<compile_context>
chip_gen: v6e
topology: v6e:2x2x1
jax: 0.10.0
libtpu: 0.0.40
codegen_flags: <defaults>
</compile_context>

<pallas_src>
import functools
import math

import jax
import jax.numpy as jnp
from jax import lax
from jax.experimental import pallas as pl
from jax.experimental.pallas import tpu as pltpu

NEG_INF = -1e30  # finite "minus infinity": avoids NaN on fully-masked rows
VMEM_LIMIT_BYTES = 32 * 1024 * 1024


def _round_up(x, m):
    return (x + m - 1) // m * m


def _tile_and_pad(dim, cap, align):
    """Pick a tile (multiple of `align`, <= max(cap, align)) and the padded dim
    it divides.  Prefers exact divisors of `dim`; otherwise zero-pads."""
    cap = max(cap, align)
    if dim <= cap:
        t = _round_up(dim, align)
        return t, t
    t = cap
    while t >= max(align, cap // 2):
        if dim % t == 0:
            return t, dim
        t -= align
    return cap, _round_up(dim, cap)


def _pick_seq_tile(dim, cap):
    """Largest power-of-two-ish divisor of dim that is <= cap."""
    if dim <= cap:
        return dim
    t = cap
    while t >= 8:
        if dim % t == 0:
            return t
        t //= 2
    # TODO(synk): pad ragged sequence lengths instead of one full-size tile.
    return dim


# ----------------------------------------------------------------------------
# Tiled linear kernel: y = x @ w + b
# ----------------------------------------------------------------------------
def _linear_kernel(x_ref, w_ref, b_ref, o_ref, acc_ref):
    @pl.when(pl.program_id(2) == 0)
    def _init():
        acc_ref[...] = jnp.zeros_like(acc_ref)

    acc_ref[...] += jnp.dot(
        x_ref[...], w_ref[...], preferred_element_type=jnp.float32
    )

    @pl.when(pl.program_id(2) == pl.num_programs(2) - 1)
    def _fin():
        o_ref[...] = (acc_ref[...] + b_ref[...].astype(jnp.float32)).astype(
            o_ref.dtype
        )


def pallas_linear(x2d, w, b, *, tm_cap=512, tn_cap=512, tk_cap=512):
    M, K = x2d.shape
    N = w.shape[1]
    tm, Mp = _tile_and_pad(M, tm_cap, 8)
    tn, Np = _tile_and_pad(N, tn_cap, 128)
    tk, Kp = _tile_and_pad(K, tk_cap, 128)
    if (Mp, Kp) != (M, K):
        x2d = jnp.pad(x2d, ((0, Mp - M), (0, Kp - K)))
    if (Kp, Np) != (K, N):
        w = jnp.pad(w, ((0, Kp - K), (0, Np - N)))
    b2 = b if Np == N else jnp.pad(b, (0, Np - N))
    b2 = b2.reshape(1, Np)

    out = pl.pallas_call(
        _linear_kernel,
        out_shape=jax.ShapeDtypeStruct((Mp, Np), x2d.dtype),
        grid_spec=pltpu.PrefetchScalarGridSpec(
            num_scalar_prefetch=0,
            grid=(Mp // tm, Np // tn, Kp // tk),
            in_specs=[
                pl.BlockSpec((tm, tk), lambda i, j, k: (i, k)),
                pl.BlockSpec((tk, tn), lambda i, j, k: (k, j)),
                pl.BlockSpec((1, tn), lambda i, j, k: (0, j)),
            ],
            out_specs=pl.BlockSpec((tm, tn), lambda i, j, k: (i, j)),
            scratch_shapes=[pltpu.VMEM((tm, tn), jnp.float32)],
        ),
        compiler_params=pltpu.CompilerParams(
            dimension_semantics=("parallel", "parallel", "arbitrary"),
            vmem_limit_bytes=VMEM_LIMIT_BYTES,
        ),
    )(x2d, w, b2)
    if (Mp, Np) != (M, N):
        out = out[:M, :N]
    return out


# ----------------------------------------------------------------------------
# RoPE pre-pass: rope(q) * (1/sqrt(D)) and rope(k), once per token.
# Lane-dense (seq_tile, E) blocks; rotate-half via an XLU roll with the sign
# folded into the sin table.
# ----------------------------------------------------------------------------
def _rope_kernel(q_ref, k_ref, cos_ref, sin_ref, oq_ref, ok_ref, *, H, D, scale):
    cos = cos_ref[...]   # (ts, D) f32
    sin = sin_ref[...]   # (ts, D) f32, rotate-half sign already folded in
    for h in range(H):
        lo, hi = h * D, (h + 1) * D           # static, 128-aligned lane slab
        q = q_ref[0, :, lo:hi].astype(jnp.float32)
        oq_ref[0, :, lo:hi] = (
            (q * cos + pltpu.roll(q, shift=D // 2, axis=1) * sin) * scale
        ).astype(oq_ref.dtype)
        k = k_ref[0, :, lo:hi].astype(jnp.float32)
        ok_ref[0, :, lo:hi] = (
            k * cos + pltpu.roll(k, shift=D // 2, axis=1) * sin
        ).astype(ok_ref.dtype)


def rope_qk(qkv3, cos, sin_signed, *, num_heads, head_dim, ts_cap=256):
    """qkv3: (B, S, 3E).  Returns (q_roped, k_roped), each (B, S, E)."""
    B, S, threeE = qkv3.shape
    E = threeE // 3
    H, D = num_heads, head_dim
    ts = _pick_seq_tile(S, ts_cap)
    kernel = functools.partial(_rope_kernel, H=H, D=D, scale=1.0 / math.sqrt(D))
    return pl.pallas_call(
        kernel,
        out_shape=(
            jax.ShapeDtypeStruct((B, S, E), qkv3.dtype),
            jax.ShapeDtypeStruct((B, S, E), qkv3.dtype),
        ),
        grid_spec=pltpu.PrefetchScalarGridSpec(
            num_scalar_prefetch=0,
            grid=(B, S // ts),
            in_specs=[
                pl.BlockSpec((1, ts, E), lambda b, i: (b, i, 0)),  # q lanes of qkv
                pl.BlockSpec((1, ts, E), lambda b, i: (b, i, 1)),  # k lanes of qkv
                pl.BlockSpec((ts, D), lambda b, i: (i, 0)),        # cos
                pl.BlockSpec((ts, D), lambda b, i: (i, 0)),        # sin (signed)
            ],
            out_specs=(
                pl.BlockSpec((1, ts, E), lambda b, i: (b, i, 0)),
                pl.BlockSpec((1, ts, E), lambda b, i: (b, i, 0)),
            ),
        ),
        compiler_params=pltpu.CompilerParams(
            dimension_semantics=("parallel", "parallel"),
            vmem_limit_bytes=VMEM_LIMIT_BYTES,
        ),
    )(qkv3, qkv3, cos, sin_signed)


# ----------------------------------------------------------------------------
# Flash attention kernel.  Grid = (B, H, S//tq, S//tk); KV axis innermost and
# "arbitrary"; running max / denom / accumulator live in VMEM scratch.
# q/k are already RoPE'd (and q pre-scaled) by the pre-pass.
# ----------------------------------------------------------------------------
def _flash_attn_kernel(q_ref, k_ref, v_ref, *rest, is_causal):
    if is_causal:
        bias_ref = None
        o_ref, m_ref, l_ref, acc_ref = rest
    else:
        bias_ref, o_ref, m_ref, l_ref, acc_ref = rest

    qi = pl.program_id(2)
    ki = pl.program_id(3)
    tq = q_ref.shape[1]
    tk = k_ref.shape[1]

    @pl.when(ki == 0)
    def _init():
        m_ref[...] = jnp.full_like(m_ref, NEG_INF)
        l_ref[...] = jnp.zeros_like(l_ref)
        acc_ref[...] = jnp.zeros_like(acc_ref)

    def _update():
        q = q_ref[0]                       # (tq, D), roped + pre-scaled
        k = k_ref[0]                       # (tk, D), roped
        # 'qd,kd->qk' contraction: no explicit k.T (no XLU transpose).
        s = lax.dot_general(
            q, k, (((1,), (1,)), ((), ())), preferred_element_type=jnp.float32
        )                                  # (tq, tk)
        if is_causal:
            row = lax.broadcasted_iota(jnp.int32, (tq, tk), 0) + qi * tq
            col = lax.broadcasted_iota(jnp.int32, (tq, tk), 1) + ki * tk
            s = jnp.where(col <= row, s, NEG_INF)
        else:
            s = s + bias_ref[0]            # (1, tk) additive key bias

        m_prev = m_ref[...]                # (tq, 1)
        m_new = jnp.maximum(m_prev, jnp.max(s, axis=-1, keepdims=True))
        alpha = jnp.exp(m_prev - m_new)
        p = jnp.exp(s - m_new)
        l_ref[...] = alpha * l_ref[...] + jnp.sum(p, axis=-1, keepdims=True)
        acc_ref[...] = alpha * acc_ref[...] + jnp.dot(
            p.astype(v_ref.dtype), v_ref[0], preferred_element_type=jnp.float32
        )
        m_ref[...] = m_new

    if is_causal:
        # Above-diagonal KV tiles: compute skipped here, and their DMA is also
        # avoided because the k/v index_maps are clamped to the diagonal block.
        @pl.when(ki * tk < (qi + 1) * tq)
        def _():
            _update()
    else:
        _update()

    @pl.when(ki == pl.num_programs(3) - 1)
    def _fin():
        # Exact divide on the O(S*D) finalize path (not the O(S^2) path).
        o_ref[0] = (acc_ref[...] / l_ref[...]).astype(o_ref.dtype)


def flash_attention(q_roped, k_roped, qkv3, bias, is_causal, *,
                    num_heads, head_dim, tq_cap=256, tk_cap=256):
    """q_roped/k_roped: (B, S, E); qkv3: (B, S, 3E) (v lanes used).
    Returns (B, S, E)."""
    B, S, E = q_roped.shape
    H, D = num_heads, head_dim
    assert E == H * D
    # TODO(synk): support head_dim < 128 by grouping heads per lane block.
    assert D % 128 == 0, "this kernel assumes a lane-aligned head_dim (mult of 128)"

    tq = _pick_seq_tile(S, tq_cap)
    tk = _pick_seq_tile(S, tk_cap)
    grid = (B, H, S // tq, S // tk)

    if is_causal:
        def kv_j(i, j):   # clamp so skipped above-diagonal steps revisit (no DMA)
            return jnp.minimum(j, (i * tq + tq - 1) // tk)
    else:
        def kv_j(i, j):
            return j

    q_spec = pl.BlockSpec((1, tq, D), lambda b, h, i, j: (b, i, h))
    k_spec = pl.BlockSpec((1, tk, D), lambda b, h, i, j: (b, kv_j(i, j), h))
    v_spec = pl.BlockSpec((1, tk, D), lambda b, h, i, j: (b, kv_j(i, j), 2 * H + h))

    in_specs = [q_spec, k_spec, v_spec]
    args = [q_roped, k_roped, qkv3]
    if not is_causal:
        in_specs.append(pl.BlockSpec((1, 1, tk), lambda b, h, i, j: (b, 0, j)))
        args.append(bias)                   # (B, 1, S) additive bias (0 / -1e30)

    kernel = functools.partial(_flash_attn_kernel, is_causal=is_causal)
    return pl.pallas_call(
        kernel,
        out_shape=jax.ShapeDtypeStruct((B, S, E), q_roped.dtype),
        grid_spec=pltpu.PrefetchScalarGridSpec(
            num_scalar_prefetch=0,
            grid=grid,
            in_specs=in_specs,
            out_specs=pl.BlockSpec((1, tq, D), lambda b, h, i, j: (b, i, h)),
            scratch_shapes=[
                pltpu.VMEM((tq, 1), jnp.float32),   # running max m
                pltpu.VMEM((tq, 1), jnp.float32),   # running denom l
                pltpu.VMEM((tq, D), jnp.float32),   # running accumulator
            ],
        ),
        compiler_params=pltpu.CompilerParams(
            dimension_semantics=("parallel", "parallel", "parallel", "arbitrary"),
            vmem_limit_bytes=VMEM_LIMIT_BYTES,
        ),
    )(*args)


# ----------------------------------------------------------------------------
# RoPE tables (rotate-half, base 10000); sign folded into sin for pltpu.roll.
# ----------------------------------------------------------------------------
def rope_tables(S, D):
    inv_freq = 1.0 / (10000.0 ** (jnp.arange(0, D, 2, dtype=jnp.float32) / D))
    t = jnp.arange(S, dtype=jnp.float32)
    freqs = t[:, None] * inv_freq[None, :]            # (S, D/2)
    emb = jnp.concatenate([freqs, freqs], axis=-1)    # (S, D)
    cos = jnp.cos(emb)
    sin = jnp.sin(emb)
    sign = jnp.concatenate(
        [-jnp.ones((D // 2,), jnp.float32), jnp.ones((D // 2,), jnp.float32)]
    )
    return cos, sin * sign[None, :]       # so rope(x) = x*cos + roll(x, D/2)*sin'


# ----------------------------------------------------------------------------
# Full module forward
# ----------------------------------------------------------------------------
@functools.partial(jax.jit, static_argnums=(2, 4))
def attention_forward(x, attn_mask, is_causal, params, num_heads):
    B, S, E = x.shape
    H = num_heads
    D = E // H

    # Fused QKV projection (tiled Pallas matmul); keep the lane-dense (B, S, 3E)
    # layout — no host-side head transposes anywhere.
    qkv = pallas_linear(x.reshape(B * S, E), params["w_qkv"], params["b_qkv"])
    qkv3 = qkv.reshape(B, S, 3 * E)                               # free reshape

    # RoPE (and the 1/sqrt(D) scale on q) applied once per token, outside the
    # O(S^2) attention loop.
    cos, sin_signed = rope_tables(S, D)
    q_roped, k_roped = rope_qk(qkv3, cos, sin_signed, num_heads=H, head_dim=D)

    if is_causal:
        bias = None
    else:
        bias = jnp.where(attn_mask[:, None, :], 0.0, NEG_INF).astype(jnp.float32)

    y = flash_attention(q_roped, k_roped, qkv3, bias, is_causal,
                        num_heads=H, head_dim=D)                  # (B, S, E)

    out = pallas_linear(y.reshape(B * S, E), params["w_out"], params["b_out"])
    return out.reshape(B, S, E)


# ----------------------------------------------------------------------------
# Pure-JAX reference (mirrors the PyTorch forward) for a correctness check
# ----------------------------------------------------------------------------
def reference_forward(x, attn_mask, is_causal, params, num_heads):
    B, S, E = x.shape
    H = num_heads
    D = E // H
    qkv = x @ params["w_qkv"] + params["b_qkv"]
    q, k, v = jnp.split(qkv, 3, axis=-1)
    q = q.reshape(B, S, H, D)
    k = k.reshape(B, S, H, D)
    v = v.reshape(B, S, H, D)

    inv_freq = 1.0 / (10000.0 ** (jnp.arange(0, D, 2, dtype=jnp.float32) / D))
    t = jnp.arange(S, dtype=jnp.float32)
    freqs = t[:, None] * inv_freq[None, :]
    emb = jnp.concatenate([freqs, freqs], axis=-1)
    cos = jnp.cos(emb)[None, :, None, :]
    sin = jnp.sin(emb)[None, :, None, :]

    def rot_half(t_):
        t1, t2 = t_[..., : D // 2], t_[..., D // 2:]
        return jnp.concatenate([-t2, t1], axis=-1)

    q = q * cos + rot_half(q) * sin
    k = k * cos + rot_half(k) * sin

    q = q.transpose(0, 2, 1, 3)
    k = k.transpose(0, 2, 1, 3)
    v = v.transpose(0, 2, 1, 3)

    s = jnp.einsum("bhqd,bhkd->bhqk", q, k) / math.sqrt(D)
    if is_causal:
        keep = jnp.tril(jnp.ones((S, S), dtype=bool))[None, None]
    else:
        keep = attn_mask[:, None, None, :]
    s = jnp.where(keep, s, -jnp.inf)
    p = jax.nn.softmax(s, axis=-1)
    y = jnp.einsum("bhqk,bhkd->bhqd", p, v)
    y = y.transpose(0, 2, 1, 3).reshape(B, S, E)
    return y @ params["w_out"] + params["b_out"]


if __name__ == "__main__":
    # Small but tiling-exercising shapes: head_dim = 128 (lane-native),
    # S = 512 -> 2x2 attention tiles at tq=tk=256, M = B*S = 1024 -> 2 row tiles.
    B, S, E, H = 2, 512, 256, 2
    key = jax.random.PRNGKey(0)
    k_x, k_wq, k_bq, k_wo, k_bo, k_m = jax.random.split(key, 6)

    x = jax.random.normal(k_x, (B, S, E), dtype=jnp.float32)

    # nn.Linear weights stored pre-transposed as (in, out): y = x @ W + b.
    params = {
        "w_qkv": 0.02 * jax.random.normal(k_wq, (E, 3 * E), dtype=jnp.float32),
        "b_qkv": 0.02 * jax.random.normal(k_bq, (3 * E,), dtype=jnp.float32),
        "w_out": 0.02 * jax.random.normal(k_wo, (E, E), dtype=jnp.float32),
        "b_out": 0.02 * jax.random.normal(k_bo, (E,), dtype=jnp.float32),
    }

    # Boolean key mask (True = attend); keep the first positions valid so the
    # pure-JAX reference (which uses -inf) does not produce NaN rows.
    attn_mask = jax.random.bernoulli(k_m, 0.7, (B, S)).at[:, :3].set(True)

    for is_causal in (False, True):
        y = attention_forward(x, attn_mask, is_causal, params, H)
        y = jax.block_until_ready(y)
        y_ref = reference_forward(x, attn_mask, is_causal, params, H)
        assert y.shape == (B, S, E)
        max_err = jnp.max(jnp.abs(y - y_ref))
        assert jnp.allclose(y, y_ref, atol=5e-3, rtol=5e-3), (
            f"mismatch (is_causal={is_causal}): max abs err = {max_err}"
        )

    print("KERNEL_OK")
</pallas_src>

<mosaic_0001>
module attributes {stable_mosaic.version = 11 : i64} {
  func.func @_linear_kernel(%arg0: i32, %arg1: i32, %arg2: i32, %arg3: memref<512x256xf32, #tpu.memory_space<vmem>>, %arg4: memref<256x384xf32, #tpu.memory_space<vmem>>, %arg5: memref<1x384xf32, #tpu.memory_space<vmem>>, %arg6: memref<512x384xf32, #tpu.memory_space<vmem>>, %arg7: memref<512x384xf32, #tpu.memory_space<vmem>>) attributes {dimension_semantics = [#tpu.dimension_semantics<parallel>, #tpu.dimension_semantics<parallel>, #tpu.dimension_semantics<arbitrary>], iteration_bounds = array<i64: 2, 2, 1>, scalar_prefetch = 0 : i64, scratch_operands = 1 : i64, tpu.core_type = #tpu.core_type<tc>, window_params = [{transform_indices = @transform_0, window_bounds = array<i64: 512, 256>}, {transform_indices = @transform_1, window_bounds = array<i64: 256, 384>}, {transform_indices = @transform_2, window_bounds = array<i64: 1, 384>}, {transform_indices = @transform_3, window_bounds = array<i64: 512, 384>}]} {
    %c0_i32 = arith.constant 0 : i32
    %0 = arith.cmpi eq, %arg2, %c0_i32 : i32
    %1 = arith.extui %0 : i1 to i32
    %c0_i32_0 = arith.constant 0 : i32
    %2 = arith.cmpi ne, %1, %c0_i32_0 : i32
    scf.if %2 {
      %cst_10 = arith.constant 0.000000e+00 : f32
      %12 = vector.broadcast %cst_10 : f32 to vector<512x384xf32>
      %c0_11 = arith.constant 0 : index
      %c0_12 = arith.constant 0 : index
      %13 = vector.load %arg7[%c0_11, %c0_12] : memref<512x384xf32, #tpu.memory_space<vmem>>, vector<512x384xf32>
      tpu.vector_store %arg7[%c0_11, %c0_12], %12 {strides = array<i32>} : memref<512x384xf32, #tpu.memory_space<vmem>>, vector<512x384xf32>,
    } else {
    }
    %c0 = arith.constant 0 : index
    %c0_1 = arith.constant 0 : index
    %3 = vector.load %arg7[%c0, %c0_1] : memref<512x384xf32, #tpu.memory_space<vmem>>, vector<512x384xf32>
    %c0_2 = arith.constant 0 : index
    %c0_3 = arith.constant 0 : index
    %4 = vector.load %arg3[%c0_2, %c0_3] : memref<512x256xf32, #tpu.memory_space<vmem>>, vector<512x256xf32>
    %c0_4 = arith.constant 0 : index
    %c0_5 = arith.constant 0 : index
    %5 = vector.load %arg4[%c0_4, %c0_5] : memref<256x384xf32, #tpu.memory_space<vmem>>, vector<256x384xf32>
    %cst = arith.constant dense<0.000000e+00> : vector<512x384xf32>
    %6 = tpu.matmul %4, %5, %cst {dimension_numbers = #tpu.dot_dimension_numbers<[1], [0], [0], [1], [0, 0, 1, 1], [], []>} : vector<512x256xf32>, vector<256x384xf32>, vector<512x384xf32> -> vector<512x384xf32>
    %7 = arith.addf %3, %6 : vector<512x384xf32>
    %c0_6 = arith.constant 0 : index
    %c0_7 = arith.constant 0 : index
    %8 = vector.load %arg7[%c0_6, %c0_7] : memref<512x384xf32, #tpu.memory_space<vmem>>, vector<512x384xf32>
    tpu.vector_store %arg7[%c0_6, %c0_7], %7 {strides = array<i32>} : memref<512x384xf32, #tpu.memory_space<vmem>>, vector<512x384xf32>,
    %c0_i32_8 = arith.constant 0 : i32
    %9 = arith.cmpi eq, %arg2, %c0_i32_8 : i32
    %10 = arith.extui %9 : i1 to i32
    %c0_i32_9 = arith.constant 0 : i32
    %11 = arith.cmpi ne, %10, %c0_i32_9 : i32
    scf.if %11 {
      %c0_10 = arith.constant 0 : index
      %c0_11 = arith.constant 0 : index
      %12 = vector.load %arg7[%c0_10, %c0_11] : memref<512x384xf32, #tpu.memory_space<vmem>>, vector<512x384xf32>
      %c0_12 = arith.constant 0 : index
      %c0_13 = arith.constant 0 : index
      %13 = vector.load %arg5[%c0_12, %c0_13] : memref<1x384xf32, #tpu.memory_space<vmem>>, vector<1x384xf32>
      %14 = vector.broadcast %13 : vector<1x384xf32> to vector<512x384xf32>
      %15 = arith.addf %12, %14 : vector<512x384xf32>
      %c0_14 = arith.constant 0 : index
      %c0_15 = arith.constant 0 : index
      %16 = vector.load %arg6[%c0_14, %c0_15] : memref<512x384xf32, #tpu.memory_space<vmem>>, vector<512x384xf32>
      tpu.vector_store %arg6[%c0_14, %c0_15], %15 {strides = array<i32>} : memref<512x384xf32, #tpu.memory_space<vmem>>, vector<512x384xf32>,
    } else {
    }
    return
  }
  func.func @transform_0(%arg0: i32, %arg1: i32, %arg2: i32) -> (i32, i32) {
    %c0_i32 = arith.constant 0 : i32
    return %arg0, %arg2 : i32, i32
  }
  func.func @transform_1(%arg0: i32, %arg1: i32, %arg2: i32) -> (i32, i32) {
    %c0_i32 = arith.constant 0 : i32
    return %arg2, %arg1 : i32, i32
  }
  func.func @transform_2(%arg0: i32, %arg1: i32, %arg2: i32) -> (i32, i32) {
    %c0_i32 = arith.constant 0 : i32
    %c0_i32_0 = arith.constant 0 : i32
    return %c0_i32, %arg1 : i32, i32
  }
  func.func @transform_3(%arg0: i32, %arg1: i32, %arg2: i32) -> (i32, i32) {
    %c0_i32 = arith.constant 0 : i32
    return %arg0, %arg1 : i32, i32
  }
}

module attributes {stable_mosaic.version = 11 : i64} {
  func.func @_rope_kernel(%arg0: i32, %arg1: i32, %arg2: memref<1x256x256xf32, #tpu.memory_space<vmem>>, %arg3: memref<1x256x256xf32, #tpu.memory_space<vmem>>, %arg4: memref<256x128xf32, #tpu.memory_space<vmem>>, %arg5: memref<256x128xf32, #tpu.memory_space<vmem>>, %arg6: memref<1x256x256xf32, #tpu.memory_space<vmem>>, %arg7: memref<1x256x256xf32, #tpu.memory_space<vmem>>) attributes {dimension_semantics = [#tpu.dimension_semantics<parallel>, #tpu.dimension_semantics<parallel>], iteration_bounds = array<i64: 2, 2>, scalar_prefetch = 0 : i64, scratch_operands = 0 : i64, tpu.core_type = #tpu.core_type<tc>, window_params = [{transform_indices = @transform_0, window_bounds = array<i64: 1, 256, 256>}, {transform_indices = @transform_1, window_bounds = array<i64: 1, 256, 256>}, {transform_indices = @transform_2, window_bounds = array<i64: 256, 128>}, {transform_indices = @transform_3, window_bounds = array<i64: 256, 128>}, {transform_indices = @transform_4, window_bounds = array<i64: 1, 256, 256>}, {transform_indices = @transform_5, window_bounds = array<i64: 1, 256, 256>}]} {
    %c0 = arith.constant 0 : index
    %c0_0 = arith.constant 0 : index
    %0 = vector.load %arg4[%c0, %c0_0] : memref<256x128xf32, #tpu.memory_space<vmem>>, vector<256x128xf32>
    %c0_1 = arith.constant 0 : index
    %c0_2 = arith.constant 0 : index
    %1 = vector.load %arg5[%c0_1, %c0_2] : memref<256x128xf32, #tpu.memory_space<vmem>>, vector<256x128xf32>
    %c0_3 = arith.constant 0 : index
    %c0_4 = arith.constant 0 : index
    %c0_5 = arith.constant 0 : index
    %2 = vector.load %arg2[%c0_3, %c0_4, %c0_5] : memref<1x256x256xf32, #tpu.memory_space<vmem>>, vector<1x256x128xf32>
    %3 = vector.shape_cast %2 : vector<1x256x128xf32> to vector<256x128xf32>
    %4 = arith.mulf %3, %0 : vector<256x128xf32>
    %c64_i32 = arith.constant 64 : i32
    %5 = tpu.dynamic_rotate %3 by %c64_i32 dim 1 : vector<256x128xf32>, i32 -> vector<256x128xf32>
    %6 = arith.mulf %5, %1 : vector<256x128xf32>
    %7 = arith.addf %4, %6 : vector<256x128xf32>
    %cst = arith.constant 0.0883883461 : f32
    %8 = vector.broadcast %cst : f32 to vector<256x128xf32>
    %9 = arith.mulf %7, %8 : vector<256x128xf32>
    %c0_6 = arith.constant 0 : index
    %c0_7 = arith.constant 0 : index
    %c0_8 = arith.constant 0 : index
    %10 = vector.load %arg6[%c0_6, %c0_7, %c0_8] : memref<1x256x256xf32, #tpu.memory_space<vmem>>, vector<1x256x128xf32>
    %11 = vector.shape_cast %10 : vector<1x256x128xf32> to vector<256x128xf32>
    %12 = vector.shape_cast %9 : vector<256x128xf32> to vector<1x256x128xf32>
    tpu.vector_store %arg6[%c0_6, %c0_7, %c0_8], %12 {strides = array<i32>} : memref<1x256x256xf32, #tpu.memory_space<vmem>>, vector<1x256x128xf32>,
    %c0_9 = arith.constant 0 : index
    %c0_10 = arith.constant 0 : index
    %c0_11 = arith.constant 0 : index
    %13 = vector.load %arg3[%c0_9, %c0_10, %c0_11] : memref<1x256x256xf32, #tpu.memory_space<vmem>>, vector<1x256x128xf32>
    %14 = vector.shape_cast %13 : vector<1x256x128xf32> to vector<256x128xf32>
    %15 = arith.mulf %14, %0 : vector<256x128xf32>
    %c64_i32_12 = arith.constant 64 : i32
    %16 = tpu.dynamic_rotate %14 by %c64_i32_12 dim 1 : vector<256x128xf32>, i32 -> vector<256x128xf32>
    %17 = arith.mulf %16, %1 : vector<256x128xf32>
    %18 = arith.addf %15, %17 : vector<256x128xf32>
    %c0_13 = arith.constant 0 : index
    %c0_14 = arith.constant 0 : index
    %c0_15 = arith.constant 0 : index
    %19 = vector.load %arg7[%c0_13, %c0_14, %c0_15] : memref<1x256x256xf32, #tpu.memory_space<vmem>>, vector<1x256x128xf32>
    %20 = vector.shape_cast %19 : vector<1x256x128xf32> to vector<256x128xf32>
    %21 = vector.shape_cast %18 : vector<256x128xf32> to vector<1x256x128xf32>
    tpu.vector_store %arg7[%c0_13, %c0_14, %c0_15], %21 {strides = array<i32>} : memref<1x256x256xf32, #tpu.memory_space<vmem>>, vector<1x256x128xf32>,
    %c0_16 = arith.constant 0 : index
    %c0_17 = arith.constant 0 : index
    %c128 = arith.constant 128 : index
    %22 = vector.load %arg2[%c0_16, %c0_17, %c128] : memref<1x256x256xf32, #tpu.memory_space<vmem>>, vector<1x256x128xf32>
    %23 = vector.shape_cast %22 : vector<1x256x128xf32> to vector<256x128xf32>
    %24 = arith.mulf %23, %0 : vector<256x128xf32>
    %c64_i32_18 = arith.constant 64 : i32
    %25 = tpu.dynamic_rotate %23 by %c64_i32_18 dim 1 : vector<256x128xf32>, i32 -> vector<256x128xf32>
    %26 = arith.mulf %25, %1 : vector<256x128xf32>
    %27 = arith.addf %24, %26 : vector<256x128xf32>
    %cst_19 = arith.constant 0.0883883461 : f32
    %28 = vector.broadcast %cst_19 : f32 to vector<256x128xf32>
    %29 = arith.mulf %27, %28 : vector<256x128xf32>
    %c0_20 = arith.constant 0 : index
    %c0_21 = arith.constant 0 : index
    %c128_22 = arith.constant 128 : index
    %30 = vector.load %arg6[%c0_20, %c0_21, %c128_22] : memref<1x256x256xf32, #tpu.memory_space<vmem>>, vector<1x256x128xf32>
    %31 = vector.shape_cast %30 : vector<1x256x128xf32> to vector<256x128xf32>
    %32 = vector.shape_cast %29 : vector<256x128xf32> to vector<1x256x128xf32>
    tpu.vector_store %arg6[%c0_20, %c0_21, %c128_22], %32 {strides = array<i32>} : memref<1x256x256xf32, #tpu.memory_space<vmem>>, vector<1x256x128xf32>,
    %c0_23 = arith.constant 0 : index
    %c0_24 = arith.constant 0 : index
    %c128_25 = arith.constant 128 : index
    %33 = vector.load %arg3[%c0_23, %c0_24, %c128_25] : memref<1x256x256xf32, #tpu.memory_space<vmem>>, vector<1x256x128xf32>
    %34 = vector.shape_cast %33 : vector<1x256x128xf32> to vector<256x128xf32>
    %35 = arith.mulf %34, %0 : vector<256x128xf32>
    %c64_i32_26 = arith.constant 64 : i32
    %36 = tpu.dynamic_rotate %34 by %c64_i32_26 dim 1 : vector<256x128xf32>, i32 -> vector<256x128xf32>
    %37 = arith.mulf %36, %1 : vector<256x128xf32>
    %38 = arith.addf %35, %37 : vector<256x128xf32>
    %c0_27 = arith.constant 0 : index
    %c0_28 = arith.constant 0 : index
    %c128_29 = arith.constant 128 : index
    %39 = vector.load %arg7[%c0_27, %c0_28, %c128_29] : memref<1x256x256xf32, #tpu.memory_space<vmem>>, vector<1x256x128xf32>
    %40 = vector.shape_cast %39 : vector<1x256x128xf32> to vector<256x128xf32>
    %41 = vector.shape_cast %38 : vector<256x128xf32> to vector<1x256x128xf32>
    tpu.vector_store %arg7[%c0_27, %c0_28, %c128_29], %41 {strides = array<i32>} : memref<1x256x256xf32, #tpu.memory_space<vmem>>, vector<1x256x128xf32>,
    return
  }
  func.func @transform_0(%arg0: i32, %arg1: i32) -> (i32, i32, i32) {
    %c0_i32 = arith.constant 0 : i32
    %c0_i32_0 = arith.constant 0 : i32
    return %arg0, %arg1, %c0_i32 : i32, i32, i32
  }
  func.func @transform_1(%arg0: i32, %arg1: i32) -> (i32, i32, i32) {
    %c1_i32 = arith.constant 1 : i32
    %c0_i32 = arith.constant 0 : i32
    return %arg0, %arg1, %c1_i32 : i32, i32, i32
  }
  func.func @transform_2(%arg0: i32, %arg1: i32) -> (i32, i32) {
    %c0_i32 = arith.constant 0 : i32
    %c0_i32_0 = arith.constant 0 : i32
    return %arg1, %c0_i32 : i32, i32
  }
  func.func @transform_3(%arg0: i32, %arg1: i32) -> (i32, i32) {
    %c0_i32 = arith.constant 0 : i32
    %c0_i32_0 = arith.constant 0 : i32
    return %arg1, %c0_i32 : i32, i32
  }
  func.func @transform_4(%arg0: i32, %arg1: i32) -> (i32, i32, i32) {
    %c0_i32 = arith.constant 0 : i32
    %c0_i32_0 = arith.constant 0 : i32
    return %arg0, %arg1, %c0_i32 : i32, i32, i32
  }
  func.func @transform_5(%arg0: i32, %arg1: i32) -> (i32, i32, i32) {
    %c0_i32 = arith.constant 0 : i32
    %c0_i32_0 = arith.constant 0 : i32
    return %arg0, %arg1, %c0_i32 : i32, i32, i32
  }
}

module attributes {stable_mosaic.version = 11 : i64} {
  func.func @_flash_attn_kernel(%arg0: i32, %arg1: i32, %arg2: i32, %arg3: i32, %arg4: memref<1x256x128xf32, #tpu.memory_space<vmem>>, %arg5: memref<1x256x128xf32, #tpu.memory_space<vmem>>, %arg6: memref<1x256x128xf32, #tpu.memory_space<vmem>>, %arg7: memref<1x1x256xf32, #tpu.memory_space<vmem>>, %arg8: memref<1x256x128xf32, #tpu.memory_space<vmem>>, %arg9: memref<256x1xf32, #tpu.memory_space<vmem>>, %arg10: memref<256x1xf32, #tpu.memory_space<vmem>>, %arg11: memref<256x128xf32, #tpu.memory_space<vmem>>) attributes {dimension_semantics = [#tpu.dimension_semantics<parallel>, #tpu.dimension_semantics<parallel>, #tpu.dimension_semantics<parallel>, #tpu.dimension_semantics<arbitrary>], iteration_bounds = array<i64: 2, 2, 2, 2>, scalar_prefetch = 0 : i64, scratch_operands = 3 : i64, tpu.core_type = #tpu.core_type<tc>, window_params = [{transform_indices = @transform_0, window_bounds = array<i64: 1, 256, 128>}, {transform_indices = @transform_1, window_bounds = array<i64: 1, 256, 128>}, {transform_indices = @transform_2, window_bounds = array<i64: 1, 256, 128>}, {transform_indices = @transform_3, window_bounds = array<i64: 1, 1, 256>}, {transform_indices = @transform_4, window_bounds = array<i64: 1, 256, 128>}]} {
    %c0_i32 = arith.constant 0 : i32
    %0 = arith.cmpi eq, %arg3, %c0_i32 : i32
    %1 = arith.extui %0 : i1 to i32
    %c0_i32_0 = arith.constant 0 : i32
    %2 = arith.cmpi ne, %1, %c0_i32_0 : i32
    scf.if %2 {
      %cst_28 = arith.constant -1.000000e+30 : f32
      %39 = vector.broadcast %cst_28 : f32 to vector<256x1xf32>
      %c0_29 = arith.constant 0 : index
      %c0_30 = arith.constant 0 : index
      %40 = vector.load %arg9[%c0_29, %c0_30] : memref<256x1xf32, #tpu.memory_space<vmem>>, vector<256x1xf32>
      tpu.vector_store %arg9[%c0_29, %c0_30], %39 {strides = array<i32>} : memref<256x1xf32, #tpu.memory_space<vmem>>, vector<256x1xf32>,
      %cst_31 = arith.constant 0.000000e+00 : f32
      %41 = vector.broadcast %cst_31 : f32 to vector<256x1xf32>
      %c0_32 = arith.constant 0 : index
      %c0_33 = arith.constant 0 : index
      %42 = vector.load %arg10[%c0_32, %c0_33] : memref<256x1xf32, #tpu.memory_space<vmem>>, vector<256x1xf32>
      tpu.vector_store %arg10[%c0_32, %c0_33], %41 {strides = array<i32>} : memref<256x1xf32, #tpu.memory_space<vmem>>, vector<256x1xf32>,
      %cst_34 = arith.constant 0.000000e+00 : f32
      %43 = vector.broadcast %cst_34 : f32 to vector<256x128xf32>
      %c0_35 = arith.constant 0 : index
      %c0_36 = arith.constant 0 : index
      %44 = vector.load %arg11[%c0_35, %c0_36] : memref<256x128xf32, #tpu.memory_space<vmem>>, vector<256x128xf32>
      tpu.vector_store %arg11[%c0_35, %c0_36], %43 {strides = array<i32>} : memref<256x128xf32, #tpu.memory_space<vmem>>, vector<256x128xf32>,
    } else {
    }
    %c0 = arith.constant 0 : index
    %c0_1 = arith.constant 0 : index
    %c0_2 = arith.constant 0 : index
    %3 = vector.load %arg4[%c0, %c0_1, %c0_2] : memref<1x256x128xf32, #tpu.memory_space<vmem>>, vector<1x256x128xf32>
    %4 = vector.shape_cast %3 : vector<1x256x128xf32> to vector<256x128xf32>
    %c0_3 = arith.constant 0 : index
    %c0_4 = arith.constant 0 : index
    %c0_5 = arith.constant 0 : index
    %5 = vector.load %arg5[%c0_3, %c0_4, %c0_5] : memref<1x256x128xf32, #tpu.memory_space<vmem>>, vector<1x256x128xf32>
    %6 = vector.shape_cast %5 : vector<1x256x128xf32> to vector<256x128xf32>
    %cst = arith.constant dense<0.000000e+00> : vector<256x256xf32>
    %7 = tpu.matmul %4, %6, %cst {dimension_numbers = #tpu.dot_dimension_numbers<[1], [1], [0], [0], [0, 0, 1, 0], [], []>} : vector<256x128xf32>, vector<256x128xf32>, vector<256x256xf32> -> vector<256x256xf32>
    %c0_6 = arith.constant 0 : index
    %c0_7 = arith.constant 0 : index
    %c0_8 = arith.constant 0 : index
    %8 = vector.load %arg7[%c0_6, %c0_7, %c0_8] : memref<1x1x256xf32, #tpu.memory_space<vmem>>, vector<1x1x256xf32>
    %9 = vector.shape_cast %8 : vector<1x1x256xf32> to vector<1x256xf32>
    %10 = vector.broadcast %9 : vector<1x256xf32> to vector<256x256xf32>
    %11 = arith.addf %7, %10 : vector<256x256xf32>
    %c0_9 = arith.constant 0 : index
    %c0_10 = arith.constant 0 : index
    %12 = vector.load %arg9[%c0_9, %c0_10] : memref<256x1xf32, #tpu.memory_space<vmem>>, vector<256x1xf32>
    %cst_11 = arith.constant dense<0xFF800000> : vector<256xf32>
    %13 = vector.multi_reduction <maximumf>, %11, %cst_11 [1] : vector<256x256xf32> to vector<256xf32>
    %14 = vector.shape_cast %13 : vector<256xf32> to vector<256x1xf32>
    %15 = arith.maximumf %12, %14 : vector<256x1xf32>
    %16 = arith.subf %12, %15 : vector<256x1xf32>
    %17 = math.exp %16 : vector<256x1xf32>
    %18 = vector.broadcast %15 : vector<256x1xf32> to vector<256x256xf32>
    %19 = arith.subf %11, %18 : vector<256x256xf32>
    %20 = math.exp %19 : vector<256x256xf32>
    %c0_12 = arith.constant 0 : index
    %c0_13 = arith.constant 0 : index
    %21 = vector.load %arg10[%c0_12, %c0_13] : memref<256x1xf32, #tpu.memory_space<vmem>>, vector<256x1xf32>
    %22 = arith.mulf %17, %21 : vector<256x1xf32>
    %cst_14 = arith.constant dense<0.000000e+00> : vector<256xf32>
    %23 = vector.multi_reduction <add>, %20, %cst_14 [1] : vector<256x256xf32> to vector<256xf32>
    %24 = vector.shape_cast %23 : vector<256xf32> to vector<256x1xf32>
    %25 = arith.addf %22, %24 : vector<256x1xf32>
    %c0_15 = arith.constant 0 : index
    %c0_16 = arith.constant 0 : index
    %26 = vector.load %arg10[%c0_15, %c0_16] : memref<256x1xf32, #tpu.memory_space<vmem>>, vector<256x1xf32>
    tpu.vector_store %arg10[%c0_15, %c0_16], %25 {strides = array<i32>} : memref<256x1xf32, #tpu.memory_space<vmem>>, vector<256x1xf32>,
    %c0_17 = arith.constant 0 : index
    %c0_18 = arith.constant 0 : index
    %27 = vector.load %arg11[%c0_17, %c0_18] : memref<256x128xf32, #tpu.memory_space<vmem>>, vector<256x128xf32>
    %28 = vector.broadcast %17 : vector<256x1xf32> to vector<256x128xf32>
    %29 = arith.mulf %28, %27 : vector<256x128xf32>
    %c0_19 = arith.constant 0 : index
    %c0_20 = arith.constant 0 : index
    %c0_21 = arith.constant 0 : index
    %30 = vector.load %arg6[%c0_19, %c0_20, %c0_21] : memref<1x256x128xf32, #tpu.memory_space<vmem>>, vector<1x256x128xf32>
    %31 = vector.shape_cast %30 : vector<1x256x128xf32> to vector<256x128xf32>
    %cst_22 = arith.constant dense<0.000000e+00> : vector<256x128xf32>
    %32 = tpu.matmul %20, %31, %cst_22 {dimension_numbers = #tpu.dot_dimension_numbers<[1], [0], [0], [1], [0, 0, 1, 1], [], []>} : vector<256x256xf32>, vector<256x128xf32>, vector<256x128xf32> -> vector<256x128xf32>
    %33 = arith.addf %29, %32 : vector<256x128xf32>
    %c0_23 = arith.constant 0 : index
    %c0_24 = arith.constant 0 : index
    %34 = vector.load %arg11[%c0_23, %c0_24] : memref<256x128xf32, #tpu.memory_space<vmem>>, vector<256x128xf32>
    tpu.vector_store %arg11[%c0_23, %c0_24], %33 {strides = array<i32>} : memref<256x128xf32, #tpu.memory_space<vmem>>, vector<256x128xf32>,
    %c0_25 = arith.constant 0 : index
    %c0_26 = arith.constant 0 : index
    %35 = vector.load %arg9[%c0_25, %c0_26] : memref<256x1xf32, #tpu.memory_space<vmem>>, vector<256x1xf32>
    tpu.vector_store %arg9[%c0_25, %c0_26], %15 {strides = array<i32>} : memref<256x1xf32, #tpu.memory_space<vmem>>, vector<256x1xf32>,
    %c1_i32 = arith.constant 1 : i32
    %36 = arith.cmpi eq, %arg3, %c1_i32 : i32
    %37 = arith.extui %36 : i1 to i32
    %c0_i32_27 = arith.constant 0 : i32
    %38 = arith.cmpi ne, %37, %c0_i32_27 : i32
    scf.if %38 {
      %c0_28 = arith.constant 0 : index
      %c0_29 = arith.constant 0 : index
      %39 = vector.load %arg11[%c0_28, %c0_29] : memref<256x128xf32, #tpu.memory_space<vmem>>, vector<256x128xf32>
      %c0_30 = arith.constant 0 : index
      %c0_31 = arith.constant 0 : index
      %40 = vector.load %arg10[%c0_30, %c0_31] : memref<256x1xf32, #tpu.memory_space<vmem>>, vector<256x1xf32>
      %41 = vector.broadcast %40 : vector<256x1xf32> to vector<256x128xf32>
      %42 = arith.divf %39, %41 : vector<256x128xf32>
      %c0_32 = arith.constant 0 : index
      %c0_33 = arith.constant 0 : index
      %c0_34 = arith.constant 0 : index
      %43 = vector.load %arg8[%c0_32, %c0_33, %c0_34] : memref<1x256x128xf32, #tpu.memory_space<vmem>>, vector<1x256x128xf32>
      %44 = vector.shape_cast %43 : vector<1x256x128xf32> to vector<256x128xf32>
      %45 = vector.shape_cast %42 : vector<256x128xf32> to vector<1x256x128xf32>
      tpu.vector_store %arg8[%c0_32, %c0_33, %c0_34], %45 {strides = array<i32>} : memref<1x256x128xf32, #tpu.memory_space<vmem>>, vector<1x256x128xf32>,
    } else {
    }
    return
  }
  func.func @transform_0(%arg0: i32, %arg1: i32, %arg2: i32, %arg3: i32) -> (i32, i32, i32) {
    %c0_i32 = arith.constant 0 : i32
    return %arg0, %arg2, %arg1 : i32, i32, i32
  }
  func.func @transform_1(%arg0: i32, %arg1: i32, %arg2: i32, %arg3: i32) -> (i32, i32, i32) {
    %c0_i32 = arith.constant 0 : i32
    return %arg0, %arg3, %arg1 : i32, i32, i32
  }
  func.func @transform_2(%arg0: i32, %arg1: i32, %arg2: i32, %arg3: i32) -> (i32, i32, i32) {
    %c4_i32 = arith.constant 4 : i32
    %0 = arith.addi %c4_i32, %arg1 : i32
    %c0_i32 = arith.constant 0 : i32
    return %arg0, %arg3, %0 : i32, i32, i32
  }
  func.func @transform_3(%arg0: i32, %arg1: i32, %arg2: i32, %arg3: i32) -> (i32, i32, i32) {
    %c0_i32 = arith.constant 0 : i32
    %c0_i32_0 = arith.constant 0 : i32
    return %arg0, %c0_i32, %arg3 : i32, i32, i32
  }
  func.func @transform_4(%arg0: i32, %arg1: i32, %arg2: i32, %arg3: i32) -> (i32, i32, i32) {
    %c0_i32 = arith.constant 0 : i32
    return %arg0, %arg2, %arg1 : i32, i32, i32
  }
}

module attributes {stable_mosaic.version = 11 : i64} {
  func.func @_linear_kernel(%arg0: i32, %arg1: i32, %arg2: i32, %arg3: memref<512x256xf32, #tpu.memory_space<vmem>>, %arg4: memref<256x256xf32, #tpu.memory_space<vmem>>, %arg5: memref<1x256xf32, #tpu.memory_space<vmem>>, %arg6: memref<512x256xf32, #tpu.memory_space<vmem>>, %arg7: memref<512x256xf32, #tpu.memory_space<vmem>>) attributes {dimension_semantics = [#tpu.dimension_semantics<parallel>, #tpu.dimension_semantics<parallel>, #tpu.dimension_semantics<arbitrary>], iteration_bounds = array<i64: 2, 1, 1>, scalar_prefetch = 0 : i64, scratch_operands = 1 : i64, tpu.core_type = #tpu.core_type<tc>, window_params = [{transform_indices = @transform_0, window_bounds = array<i64: 512, 256>}, {transform_indices = @transform_1, window_bounds = array<i64: 256, 256>}, {transform_indices = @transform_2, window_bounds = array<i64: 1, 256>}, {transform_indices = @transform_3, window_bounds = array<i64: 512, 256>}]} {
    %c0_i32 = arith.constant 0 : i32
    %0 = arith.cmpi eq, %arg2, %c0_i32 : i32
    %1 = arith.extui %0 : i1 to i32
    %c0_i32_0 = arith.constant 0 : i32
    %2 = arith.cmpi ne, %1, %c0_i32_0 : i32
    scf.if %2 {
      %cst_10 = arith.constant 0.000000e+00 : f32
      %12 = vector.broadcast %cst_10 : f32 to vector<512x256xf32>
      %c0_11 = arith.constant 0 : index
      %c0_12 = arith.constant 0 : index
      %13 = vector.load %arg7[%c0_11, %c0_12] : memref<512x256xf32, #tpu.memory_space<vmem>>, vector<512x256xf32>
      tpu.vector_store %arg7[%c0_11, %c0_12], %12 {strides = array<i32>} : memref<512x256xf32, #tpu.memory_space<vmem>>, vector<512x256xf32>,
    } else {
    }
    %c0 = arith.constant 0 : index
    %c0_1 = arith.constant 0 : index
    %3 = vector.load %arg7[%c0, %c0_1] : memref<512x256xf32, #tpu.memory_space<vmem>>, vector<512x256xf32>
    %c0_2 = arith.constant 0 : index
    %c0_3 = arith.constant 0 : index
    %4 = vector.load %arg3[%c0_2, %c0_3] : memref<512x256xf32, #tpu.memory_space<vmem>>, vector<512x256xf32>
    %c0_4 = arith.constant 0 : index
    %c0_5 = arith.constant 0 : index
    %5 = vector.load %arg4[%c0_4, %c0_5] : memref<256x256xf32, #tpu.memory_space<vmem>>, vector<256x256xf32>
    %cst = arith.constant dense<0.000000e+00> : vector<512x256xf32>
    %6 = tpu.matmul %4, %5, %cst {dimension_numbers = #tpu.dot_dimension_numbers<[1], [0], [0], [1], [0, 0, 1, 1], [], []>} : vector<512x256xf32>, vector<256x256xf32>, vector<512x256xf32> -> vector<512x256xf32>
    %7 = arith.addf %3, %6 : vector<512x256xf32>
    %c0_6 = arith.constant 0 : index
    %c0_7 = arith.constant 0 : index
    %8 = vector.load %arg7[%c0_6, %c0_7] : memref<512x256xf32, #tpu.memory_space<vmem>>, vector<512x256xf32>
    tpu.vector_store %arg7[%c0_6, %c0_7], %7 {strides = array<i32>} : memref<512x256xf32, #tpu.memory_space<vmem>>, vector<512x256xf32>,
    %c0_i32_8 = arith.constant 0 : i32
    %9 = arith.cmpi eq, %arg2, %c0_i32_8 : i32
    %10 = arith.extui %9 : i1 to i32
    %c0_i32_9 = arith.constant 0 : i32
    %11 = arith.cmpi ne, %10, %c0_i32_9 : i32
    scf.if %11 {
      %c0_10 = arith.constant 0 : index
      %c0_11 = arith.constant 0 : index
      %12 = vector.load %arg7[%c0_10, %c0_11] : memref<512x256xf32, #tpu.memory_space<vmem>>, vector<512x256xf32>
      %c0_12 = arith.constant 0 : index
      %c0_13 = arith.constant 0 : index
      %13 = vector.load %arg5[%c0_12, %c0_13] : memref<1x256xf32, #tpu.memory_space<vmem>>, vector<1x256xf32>
      %14 = vector.broadcast %13 : vector<1x256xf32> to vector<512x256xf32>
      %15 = arith.addf %12, %14 : vector<512x256xf32>
      %c0_14 = arith.constant 0 : index
      %c0_15 = arith.constant 0 : index
      %16 = vector.load %arg6[%c0_14, %c0_15] : memref<512x256xf32, #tpu.memory_space<vmem>>, vector<512x256xf32>
      tpu.vector_store %arg6[%c0_14, %c0_15], %15 {strides = array<i32>} : memref<512x256xf32, #tpu.memory_space<vmem>>, vector<512x256xf32>,
    } else {
    }
    return
  }
  func.func @transform_0(%arg0: i32, %arg1: i32, %arg2: i32) -> (i32, i32) {
    %c0_i32 = arith.constant 0 : i32
    return %arg0, %arg2 : i32, i32
  }
  func.func @transform_1(%arg0: i32, %arg1: i32, %arg2: i32) -> (i32, i32) {
    %c0_i32 = arith.constant 0 : i32
    return %arg2, %arg1 : i32, i32
  }
  func.func @transform_2(%arg0: i32, %arg1: i32, %arg2: i32) -> (i32, i32) {
    %c0_i32 = arith.constant 0 : i32
    %c0_i32_0 = arith.constant 0 : i32
    return %c0_i32, %arg1 : i32, i32
  }
  func.func @transform_3(%arg0: i32, %arg1: i32, %arg2: i32) -> (i32, i32) {
    %c0_i32 = arith.constant 0 : i32
    return %arg0, %arg1 : i32, i32
  }
}

</mosaic_0001>

<bundles_post_ra>
// kernel: attention_forward.5
= control target key start
LH: loop header
LB: loop body
LE: loop exit
PB: predicated region body
PF: predicated region fallthrough
CT: control target
= control target key end

     0   :  { %s2171_s18 = smov 0   ;;  %s2173_s19 = smov 0   ;;  %s4006_s0 = inlined_call_operand.vmem [shape: f32[2,512,768], index: 0, kind: input, shape index: {}, may-alias: {0,1}]   ;;  %s4007_s1 = inlined_call_operand.vmem [shape: f32[2,512,768], index: 1, kind: input, shape index: {}, may-alias: {0,1}]   ;;  %s4008_s2 = inlined_call_operand.vmem [shape: f32[512,128], index: 2, kind: input, shape index: {}]   ;;  %s4009_s3 = inlined_call_operand.vmem [shape: f32[512,128], index: 3, kind: input, shape index: {}]   ;;  %s4010_s4 = inlined_call_operand.vmem [shape: f32[2,512,256], index: 4, kind: output, shape index: {0}]   ;;  %s4011_s5 = inlined_call_operand.vmem [shape: f32[2,512,256], index: 5, kind: output, shape index: {1}]  }
   0x1   :  { %s2175_s20 = smov 0   ;;  %s2177_s21 = smov 0  }
   0x2   :  { %s2179_s22 = smov 0   ;;  %s2181_s23 = smov 0  }
   0x3   :  { %s2183_s24 = smov 0  }
   0x4 LB: > { %s25_s25 = sadd.s32 1, %s2130_s22  ;;  %s28_s26 = sadd.s32 1, %s2134_s23  ;;  %s2138_s24 = sphi %s2183_s24, %s16_s24   ;;  %s2134_s23 = sphi %s2181_s23, %s4432_s23   ;;  %s2130_s22 = sphi %s2179_s22, %s4431_s22   ;;  %s2126_s21 = sphi %s2177_s21, %s4430_s21   ;;  %s2122_s20 = sphi %s2175_s20, %s4429_s20   ;;  %s2118_s19 = sphi %s2173_s19, %s4428_s19   ;;  %s2114_s18 = sphi %s2171_s18, %s4427_s18  }
   0x5   : > { %p26_p0 = scmp.ge.s32.totalorder %s25_s25, 2  ;;  %p44_p1 = scmp.ne.s32.totalorder %s2118_s19, %s2114_s18 }
   0x6   : > { %p45_p2 = scmp.eq.s32.totalorder %s2138_s24, 0  ;;  %s37_s6 = sadd.s32 1, %s2118_s19 }
   0x7   : > { %s4434_s25 = smov (%p26_p0, %s25_s25), 0  ;;  %s4436_s26 = smov (!%p26_p0, %s28_s26), %s2134_s23 }
   0x8   : > { %p2214_p3 = por %p45_p2, %p44_p1  ;;  %p30_p4 = scmp.ge.s32.totalorder %s4436_s26, 2 }
   0x9   : > { %s33_s28 = ssub.s32 %s2130_s22, %s4434_s25  ;;  %p1873_p6 = scmp.ge.s32.totalorder %s2138_s24, 4 }
   0xa   : > { %s4438_s26 = smov (%p30_p4, %s4436_s26), 0 }
   0xb   : > { %s32_s29 = ssub.s32 %s2134_s23, %s4438_s26  ;;  %206 = sbr.rel (%p1873_p6) target bundleno = 96 (0x60), region = 16 }
   0xc   : > { %s34_s30 = sor.u32 %s33_s28, %s32_s29 }
   0xd   : > { %p35_p5 = scmp.eq.s32.totalorder %s34_s30, 0 }
   0xf   : > { %s2226_s7 = scalar_select %p35_p5, %s2118_s19, %s37_s6  }
  0x10   : > { %209 = sbr.rel (!%p2214_p3) target bundleno = 56 (0x38), region = 20  ;;  %s211_s8 = sand.u32 (%p2214_p3), 1, %s2118_s19  }
  0x11   : > { %s1961_s9 = smul.u32 (%p2214_p3), 192, %s2130_s22  ;;  %s1874_s10 = sshll.u32 (%p2214_p3), %s211_s8, 9 }
  0x12   : > { %s1962_s11 = smul.u32 (%p2214_p3), 384, %s2134_s23  ;;  %s2242_s17 = scalar_lea.vmem (%p2214_p3), [#allocation2], %s1874_s10 }
  0x14   : > { %s217_s12 = sadd.s32 (%p2214_p3), %s1962_s11, %s1961_s9 }
  0x15   : > { %s1877_s13 = sshll.u32 %s217_s12, 3 }
  0x16   : > { %s2237_s16 = scalar_lea.vmem %s4006_s0, %s1877_s13 }
  0x17   : > { %v232_v0 = vld [vmem:[%s2237_s16] sm:$0xff]  ;;  %v234_v1 = vld [vmem:[%s2237_s16 + $0x8] sm:$0xff]  ;;  %v236_v2 = vld [vmem:[%s2237_s16 + $0x30] sm:$0xff] }
  0x18   : > { %233 = vst [vmem:[%s2242_s17] sm:$0xff] %v232_v0  ;;  %235 = vst [vmem:[%s2242_s17 + $0x8] sm:$0xff] %v234_v1  ;;  %v238_v3 = vld [vmem:[%s2237_s16 + $0x38] sm:$0xff]  ;;  %v240_v4 = vld [vmem:[%s2237_s16 + $0x60] sm:$0xff] }
  0x19   : > { %237 = vst [vmem:[%s2242_s17 + $0x10] sm:$0xff] %v236_v2  ;;  %v242_v5 = vld [vmem:[%s2237_s16 + $0x68] sm:$0xff]  ;;  %239 = vst [vmem:[%s2242_s17 + $0x18] sm:$0xff] %v238_v3  ;;  %v244_v6 = vld [vmem:[%s2237_s16 + $0x90] sm:$0xff] }
  0x1a   : > { %241 = vst [vmem:[%s2242_s17 + $0x20] sm:$0xff] %v240_v4  ;;  %243 = vst [vmem:[%s2242_s17 + $0x28] sm:$0xff] %v242_v5  ;;  %v246_v7 = vld [vmem:[%s2237_s16 + $0x98] sm:$0xff]  ;;  %v248_v8 = vld [vmem:[%s2237_s16 + $0xc0] sm:$0xff] }
  0x1b   : > { %245 = vst [vmem:[%s2242_s17 + $0x30] sm:$0xff] %v244_v6  ;;  %247 = vst [vmem:[%s2242_s17 + $0x38] sm:$0xff] %v246_v7  ;;  %v250_v9 = vld [vmem:[%s2237_s16 + $0xc8] sm:$0xff]  ;;  %v252_v10 = vld [vmem:[%s2237_s16 + $0xf0] sm:$0xff] }
  0x1c   : > { %249 = vst [vmem:[%s2242_s17 + $0x40] sm:$0xff] %v248_v8  ;;  %v254_v11 = vld [vmem:[%s2237_s16 + $0xf8] sm:$0xff]  ;;  %251 = vst [vmem:[%s2242_s17 + $0x48] sm:$0xff] %v250_v9  ;;  %v256_v12 = vld [vmem:[%s2237_s16 + $0x120] sm:$0xff] }
  0x1d   : > { %253 = vst [vmem:[%s2242_s17 + $0x50] sm:$0xff] %v252_v10  ;;  %255 = vst [vmem:[%s2242_s17 + $0x58] sm:$0xff] %v254_v11  ;;  %v258_v13 = vld [vmem:[%s2237_s16 + $0x128] sm:$0xff]  ;;  %v260_v14 = vld [vmem:[%s2237_s16 + $0x150] sm:$0xff] }
  0x1e   : > { %257 = vst [vmem:[%s2242_s17 + $0x60] sm:$0xff] %v256_v12  ;;  %259 = vst [vmem:[%s2242_s17 + $0x68] sm:$0xff] %v258_v13  ;;  %v262_v15 = vld [vmem:[%s2237_s16 + $0x158] sm:$0xff]  ;;  %v264_v16 = vld [vmem:[%s2237_s16 + $0x180] sm:$0xff] }
  0x1f   : > { %261 = vst [vmem:[%s2242_s17 + $0x70] sm:$0xff] %v260_v14  ;;  %v266_v17 = vld [vmem:[%s2237_s16 + $0x188] sm:$0xff]  ;;  %263 = vst [vmem:[%s2242_s17 + $0x78] sm:$0xff] %v262_v15  ;;  %v268_v18 = vld [vmem:[%s2237_s16 + $0x1b0] sm:$0xff] }
  0x20   : > { %265 = vst [vmem:[%s2242_s17 + $0x80] sm:$0xff] %v264_v16  ;;  %267 = vst [vmem:[%s2242_s17 + $0x88] sm:$0xff] %v266_v17  ;;  %v270_v19 = vld [vmem:[%s2237_s16 + $0x1b8] sm:$0xff]  ;;  %v272_v20 = vld [vmem:[%s2237_s16 + $0x1e0] sm:$0xff] }
  0x21   : > { %269 = vst [vmem:[%s2242_s17 + $0x90] sm:$0xff] %v268_v18  ;;  %271 = vst [vmem:[%s2242_s17 + $0x98] sm:$0xff] %v270_v19  ;;  %v274_v21 = vld [vmem:[%s2237_s16 + $0x1e8] sm:$0xff]  ;;  %v276_v22 = vld [vmem:[%s2237_s16 + $0x210] sm:$0xff] }
  0x22   : > { %273 = vst [vmem:[%s2242_s17 + $0xa0] sm:$0xff] %v272_v20  ;;  %v278_v23 = vld [vmem:[%s2237_s16 + $0x218] sm:$0xff]  ;;  %275 = vst [vmem:[%s2242_s17 + $0xa8] sm:$0xff] %v274_v21  ;;  %v280_v24 = vld [vmem:[%s2237_s16 + $0x240] sm:$0xff] }
  0x23   : > { %277 = vst [vmem:[%s2242_s17 + $0xb0] sm:$0xff] %v276_v22  ;;  %279 = vst [vmem:[%s2242_s17 + $0xb8] sm:$0xff] %v278_v23  ;;  %v282_v25 = vld [vmem:[%s2237_s16 + $0x248] sm:$0xff]  ;;  %v284_v26 = vld [vmem:[%s2237_s16 + $0x270] sm:$0xff] }
  0x24   : > { %281 = vst [vmem:[%s2242_s17 + $0xc0] sm:$0xff] %v280_v24  ;;  %283 = vst [vmem:[%s2242_s17 + $0xc8] sm:$0xff] %v282_v25  ;;  %v286_v27 = vld [vmem:[%s2237_s16 + $0x278] sm:$0xff]  ;;  %v288_v28 = vld [vmem:[%s2237_s16 + $0x2a0] sm:$0xff] }
  0x25   : > { %285 = vst [vmem:[%s2242_s17 + $0xd0] sm:$0xff] %v284_v26  ;;  %v290_v29 = vld [vmem:[%s2237_s16 + $0x2a8] sm:$0xff]  ;;  %287 = vst [vmem:[%s2242_s17 + $0xd8] sm:$0xff] %v286_v27  ;;  %v292_v30 = vld [vmem:[%s2237_s16 + $0x2d0] sm:$0xff] }
  0x26   : > { %289 = vst [vmem:[%s2242_s17 + $0xe0] sm:$0xff] %v288_v28  ;;  %291 = vst [vmem:[%s2242_s17 + $0xe8] sm:$0xff] %v290_v29  ;;  %v294_v31 = vld [vmem:[%s2237_s16 + $0x2d8] sm:$0xff]  ;;  %v296_v32 = vld [vmem:[%s2237_s16 + $0x300] sm:$0xff] }
  0x27   : > { %293 = vst [vmem:[%s2242_s17 + $0xf0] sm:$0xff] %v292_v30  ;;  %295 = vst [vmem:[%s2242_s17 + $0xf8] sm:$0xff] %v294_v31  ;;  %v298_v33 = vld [vmem:[%s2237_s16 + $0x308] sm:$0xff]  ;;  %v300_v34 = vld [vmem:[%s2237_s16 + $0x330] sm:$0xff] }
  0x28   : > { %297 = vst [vmem:[%s2242_s17 + $0x100] sm:$0xff] %v296_v32  ;;  %v302_v35 = vld [vmem:[%s2237_s16 + $0x338] sm:$0xff]  ;;  %299 = vst [vmem:[%s2242_s17 + $0x108] sm:$0xff] %v298_v33  ;;  %v304_v36 = vld [vmem:[%s2237_s16 + $0x360] sm:$0xff] }
  0x29   : > { %301 = vst [vmem:[%s2242_s17 + $0x110] sm:$0xff] %v300_v34  ;;  %303 = vst [vmem:[%s2242_s17 + $0x118] sm:$0xff] %v302_v35  ;;  %v306_v37 = vld [vmem:[%s2237_s16 + $0x368] sm:$0xff]  ;;  %v308_v38 = vld [vmem:[%s2237_s16 + $0x390] sm:$0xff] }
  0x2a   : > { %305 = vst [vmem:[%s2242_s17 + $0x120] sm:$0xff] %v304_v36  ;;  %307 = vst [vmem:[%s2242_s17 + $0x128] sm:$0xff] %v306_v37  ;;  %v310_v39 = vld [vmem:[%s2237_s16 + $0x398] sm:$0xff]  ;;  %v312_v40 = vld [vmem:[%s2237_s16 + $0x3c0] sm:$0xff] }
  0x2b   : > { %309 = vst [vmem:[%s2242_s17 + $0x130] sm:$0xff] %v308_v38  ;;  %v314_v41 = vld [vmem:[%s2237_s16 + $0x3c8] sm:$0xff]  ;;  %311 = vst [vmem:[%s2242_s17 + $0x138] sm:$0xff] %v310_v39  ;;  %v316_v42 = vld [vmem:[%s2237_s16 + $0x3f0] sm:$0xff] }
  0x2c   : > { %313 = vst [vmem:[%s2242_s17 + $0x140] sm:$0xff] %v312_v40  ;;  %315 = vst [vmem:[%s2242_s17 + $0x148] sm:$0xff] %v314_v41  ;;  %v318_v43 = vld [vmem:[%s2237_s16 + $0x3f8] sm:$0xff]  ;;  %v320_v44 = vld [vmem:[%s2237_s16 + $0x420] sm:$0xff] }
  0x2d   : > { %317 = vst [vmem:[%s2242_s17 + $0x150] sm:$0xff] %v316_v42  ;;  %319 = vst [vmem:[%s2242_s17 + $0x158] sm:$0xff] %v318_v43  ;;  %v322_v45 = vld [vmem:[%s2237_s16 + $0x428] sm:$0xff]  ;;  %v324_v46 = vld [vmem:[%s2237_s16 + $0x450] sm:$0xff] }
  0x2e   : > { %321 = vst [vmem:[%s2242_s17 + $0x160] sm:$0xff] %v320_v44  ;;  %v326_v47 = vld [vmem:[%s2237_s16 + $0x458] sm:$0xff]  ;;  %323 = vst [vmem:[%s2242_s17 + $0x168] sm:$0xff] %v322_v45  ;;  %v328_v48 = vld [vmem:[%s2237_s16 + $0x480] sm:$0xff] }
  0x2f   : > { %325 = vst [vmem:[%s2242_s17 + $0x170] sm:$0xff] %v324_v46  ;;  %327 = vst [vmem:[%s2242_s17 + $0x178] sm:$0xff] %v326_v47  ;;  %v330_v49 = vld [vmem:[%s2237_s16 + $0x488] sm:$0xff]  ;;  %v332_v50 = vld [vmem:[%s2237_s16 + $0x4b0] sm:$0xff] }
  0x30   : > { %329 = vst [vmem:[%s2242_s17 + $0x180] sm:$0xff] %v328_v48  ;;  %331 = vst [vmem:[%s2242_s17 + $0x188] sm:$0xff] %v330_v49  ;;  %v334_v51 = vld [vmem:[%s2237_s16 + $0x4b8] sm:$0xff]  ;;  %v336_v52 = vld [vmem:[%s2237_s16 + $0x4e0] sm:$0xff] }
  0x31   : > { %333 = vst [vmem:[%s2242_s17 + $0x190] sm:$0xff] %v332_v50  ;;  %v338_v53 = vld [vmem:[%s2237_s16 + $0x4e8] sm:$0xff]  ;;  %335 = vst [vmem:[%s2242_s17 + $0x198] sm:$0xff] %v334_v51  ;;  %v340_v54 = vld [vmem:[%s2237_s16 + $0x510] sm:$0xff] }
  0x32   : > { %337 = vst [vmem:[%s2242_s17 + $0x1a0] sm:$0xff] %v336_v52  ;;  %339 = vst [vmem:[%s2242_s17 + $0x1a8] sm:$0xff] %v338_v53  ;;  %v342_v55 = vld [vmem:[%s2237_s16 + $0x518] sm:$0xff]  ;;  %v344_v56 = vld [vmem:[%s2237_s16 + $0x540] sm:$0xff] }
  0x33   : > { %341 = vst [vmem:[%s2242_s17 + $0x1b0] sm:$0xff] %v340_v54  ;;  %343 = vst [vmem:[%s2242_s17 + $0x1b8] sm:$0xff] %v342_v55  ;;  %v346_v57 = vld [vmem:[%s2237_s16 + $0x548] sm:$0xff]  ;;  %v348_v58 = vld [vmem:[%s2237_s16 + $0x570] sm:$0xff] }
  0x34   : > { %345 = vst [vmem:[%s2242_s17 + $0x1c0] sm:$0xff] %v344_v56  ;;  %v350_v59 = vld [vmem:[%s2237_s16 + $0x578] sm:$0xff]  ;;  %347 = vst [vmem:[%s2242_s17 + $0x1c8] sm:$0xff] %v346_v57  ;;  %v352_v60 = vld [vmem:[%s2237_s16 + $0x5a0] sm:$0xff] }
  0x35   : > { %349 = vst [vmem:[%s2242_s17 + $0x1d0] sm:$0xff] %v348_v58  ;;  %351 = vst [vmem:[%s2242_s17 + $0x1d8] sm:$0xff] %v350_v59  ;;  %v354_v61 = vld [vmem:[%s2237_s16 + $0x5a8] sm:$0xff]  ;;  %v356_v62 = vld [vmem:[%s2237_s16 + $0x5d0] sm:$0xff] }
  0x36   : > { %353 = vst [vmem:[%s2242_s17 + $0x1e0] sm:$0xff] %v352_v60  ;;  %355 = vst [vmem:[%s2242_s17 + $0x1e8] sm:$0xff] %v354_v61  ;;  %v358_v63 = vld [vmem:[%s2237_s16 + $0x5d8] sm:$0xff] }
  0x37   : > { %357 = vst [vmem:[%s2242_s17 + $0x1f0] sm:$0xff] %v356_v62  ;;  %359 = vst [vmem:[%s2242_s17 + $0x1f8] sm:$0xff] %v358_v63 }
  0x38 PF: > { %365 = sbr.rel (!%p2214_p3) target bundleno = 96 (0x60), region = 43  ;;  %s367_s28 = sand.u32 (%p2214_p3), 1, %s2118_s19  }
  0x39   : > { %s1737_s29 = smul.u32 (%p2214_p3), 192, %s2130_s22  ;;  %s1878_s30 = sshll.u32 (%p2214_p3), %s367_s28, 9 }
  0x3a   : > { %s1738_s6 = smul.u32 (%p2214_p3), 384, %s2134_s23  ;;  %s2382_s27 = scalar_lea.vmem (%p2214_p3), [#allocation3], %s1878_s30 }
  0x3c   : > { %s1739_s8 = sadd.s32 (%p2214_p3), %s1738_s6, %s1737_s29 }
  0x3d   : > { %s1879_s9 = sshll.u32 %s1739_s8, 3 }
  0x3e   : > { %s2377_s12 = scalar_lea.vmem %s4007_s1, %s1879_s9 }
  0x3f   : > { %v1880_v0 = vld [vmem:[%s2377_s12 + $0x10] sm:$0xff]  ;;  %v1881_v1 = vld [vmem:[%s2377_s12 + $0x18] sm:$0xff]  ;;  %v1882_v2 = vld [vmem:[%s2377_s12 + $0x40] sm:$0xff] }
  0x40   : > { %390 = vst [vmem:[%s2382_s27] sm:$0xff] %v1880_v0  ;;  %392 = vst [vmem:[%s2382_s27 + $0x8] sm:$0xff] %v1881_v1  ;;  %v1883_v3 = vld [vmem:[%s2377_s12 + $0x48] sm:$0xff]  ;;  %v1884_v4 = vld [vmem:[%s2377_s12 + $0x70] sm:$0xff] }
  0x41   : > { %394 = vst [vmem:[%s2382_s27 + $0x10] sm:$0xff] %v1882_v2  ;;  %v1885_v5 = vld [vmem:[%s2377_s12 + $0x78] sm:$0xff]  ;;  %396 = vst [vmem:[%s2382_s27 + $0x18] sm:$0xff] %v1883_v3  ;;  %v1886_v6 = vld [vmem:[%s2377_s12 + $0xa0] sm:$0xff] }
  0x42   : > { %398 = vst [vmem:[%s2382_s27 + $0x20] sm:$0xff] %v1884_v4  ;;  %400 = vst [vmem:[%s2382_s27 + $0x28] sm:$0xff] %v1885_v5  ;;  %v1887_v7 = vld [vmem:[%s2377_s12 + $0xa8] sm:$0xff]  ;;  %v1888_v8 = vld [vmem:[%s2377_s12 + $0xd0] sm:$0xff] }
  0x43   : > { %402 = vst [vmem:[%s2382_s27 + $0x30] sm:$0xff] %v1886_v6  ;;  %404 = vst [vmem:[%s2382_s27 + $0x38] sm:$0xff] %v1887_v7  ;;  %v1889_v9 = vld [vmem:[%s2377_s12 + $0xd8] sm:$0xff]  ;;  %v1890_v10 = vld [vmem:[%s2377_s12 + $0x100] sm:$0xff] }
  0x44   : > { %406 = vst [vmem:[%s2382_s27 + $0x40] sm:$0xff] %v1888_v8  ;;  %v1891_v11 = vld [vmem:[%s2377_s12 + $0x108] sm:$0xff]  ;;  %408 = vst [vmem:[%s2382_s27 + $0x48] sm:$0xff] %v1889_v9  ;;  %v1892_v12 = vld [vmem:[%s2377_s12 + $0x130] sm:$0xff] }
  0x45   : > { %410 = vst [vmem:[%s2382_s27 + $0x50] sm:$0xff] %v1890_v10  ;;  %412 = vst [vmem:[%s2382_s27 + $0x58] sm:$0xff] %v1891_v11  ;;  %v1893_v13 = vld [vmem:[%s2377_s12 + $0x138] sm:$0xff]  ;;  %v1894_v14 = vld [vmem:[%s2377_s12 + $0x160] sm:$0xff] }
  0x46   : > { %414 = vst [vmem:[%s2382_s27 + $0x60] sm:$0xff] %v1892_v12  ;;  %416 = vst [vmem:[%s2382_s27 + $0x68] sm:$0xff] %v1893_v13  ;;  %v1895_v15 = vld [vmem:[%s2377_s12 + $0x168] sm:$0xff]  ;;  %v1896_v16 = vld [vmem:[%s2377_s12 + $0x190] sm:$0xff] }
  0x47   : > { %418 = vst [vmem:[%s2382_s27 + $0x70] sm:$0xff] %v1894_v14  ;;  %v1897_v17 = vld [vmem:[%s2377_s12 + $0x198] sm:$0xff]  ;;  %420 = vst [vmem:[%s2382_s27 + $0x78] sm:$0xff] %v1895_v15  ;;  %v1898_v18 = vld [vmem:[%s2377_s12 + $0x1c0] sm:$0xff] }
  0x48   : > { %422 = vst [vmem:[%s2382_s27 + $0x80] sm:$0xff] %v1896_v16  ;;  %424 = vst [vmem:[%s2382_s27 + $0x88] sm:$0xff] %v1897_v17  ;;  %v1899_v19 = vld [vmem:[%s2377_s12 + $0x1c8] sm:$0xff]  ;;  %v1900_v20 = vld [vmem:[%s2377_s12 + $0x1f0] sm:$0xff] }
  0x49   : > { %426 = vst [vmem:[%s2382_s27 + $0x90] sm:$0xff] %v1898_v18  ;;  %428 = vst [vmem:[%s2382_s27 + $0x98] sm:$0xff] %v1899_v19  ;;  %v1901_v21 = vld [vmem:[%s2377_s12 + $0x1f8] sm:$0xff]  ;;  %v1902_v22 = vld [vmem:[%s2377_s12 + $0x220] sm:$0xff] }
  0x4a   : > { %430 = vst [vmem:[%s2382_s27 + $0xa0] sm:$0xff] %v1900_v20  ;;  %v1903_v23 = vld [vmem:[%s2377_s12 + $0x228] sm:$0xff]  ;;  %432 = vst [vmem:[%s2382_s27 + $0xa8] sm:$0xff] %v1901_v21  ;;  %v1904_v24 = vld [vmem:[%s2377_s12 + $0x250] sm:$0xff] }
  0x4b   : > { %434 = vst [vmem:[%s2382_s27 + $0xb0] sm:$0xff] %v1902_v22  ;;  %436 = vst [vmem:[%s2382_s27 + $0xb8] sm:$0xff] %v1903_v23  ;;  %v1905_v25 = vld [vmem:[%s2377_s12 + $0x258] sm:$0xff]  ;;  %v1906_v26 = vld [vmem:[%s2377_s12 + $0x280] sm:$0xff] }
  0x4c   : > { %438 = vst [vmem:[%s2382_s27 + $0xc0] sm:$0xff] %v1904_v24  ;;  %440 = vst [vmem:[%s2382_s27 + $0xc8] sm:$0xff] %v1905_v25  ;;  %v1907_v27 = vld [vmem:[%s2377_s12 + $0x288] sm:$0xff]  ;;  %v1908_v28 = vld [vmem:[%s2377_s12 + $0x2b0] sm:$0xff] }
  0x4d   : > { %442 = vst [vmem:[%s2382_s27 + $0xd0] sm:$0xff] %v1906_v26  ;;  %v1909_v29 = vld [vmem:[%s2377_s12 + $0x2b8] sm:$0xff]  ;;  %444 = vst [vmem:[%s2382_s27 + $0xd8] sm:$0xff] %v1907_v27  ;;  %v1910_v30 = vld [vmem:[%s2377_s12 + $0x2e0] sm:$0xff] }
  0x4e   : > { %446 = vst [vmem:[%s2382_s27 + $0xe0] sm:$0xff] %v1908_v28  ;;  %448 = vst [vmem:[%s2382_s27 + $0xe8] sm:$0xff] %v1909_v29  ;;  %v1911_v31 = vld [vmem:[%s2377_s12 + $0x2e8] sm:$0xff]  ;;  %v1912_v32 = vld [vmem:[%s2377_s12 + $0x310] sm:$0xff] }
  0x4f   : > { %450 = vst [vmem:[%s2382_s27 + $0xf0] sm:$0xff] %v1910_v30  ;;  %452 = vst [vmem:[%s2382_s27 + $0xf8] sm:$0xff] %v1911_v31  ;;  %v1913_v33 = vld [vmem:[%s2377_s12 + $0x318] sm:$0xff]  ;;  %v1914_v34 = vld [vmem:[%s2377_s12 + $0x340] sm:$0xff] }
  0x50   : > { %454 = vst [vmem:[%s2382_s27 + $0x100] sm:$0xff] %v1912_v32  ;;  %v1915_v35 = vld [vmem:[%s2377_s12 + $0x348] sm:$0xff]  ;;  %456 = vst [vmem:[%s2382_s27 + $0x108] sm:$0xff] %v1913_v33  ;;  %v1916_v36 = vld [vmem:[%s2377_s12 + $0x370] sm:$0xff] }
  0x51   : > { %458 = vst [vmem:[%s2382_s27 + $0x110] sm:$0xff] %v1914_v34  ;;  %460 = vst [vmem:[%s2382_s27 + $0x118] sm:$0xff] %v1915_v35  ;;  %v1917_v37 = vld [vmem:[%s2377_s12 + $0x378] sm:$0xff]  ;;  %v1918_v38 = vld [vmem:[%s2377_s12 + $0x3a0] sm:$0xff] }
  0x52   : > { %462 = vst [vmem:[%s2382_s27 + $0x120] sm:$0xff] %v1916_v36  ;;  %464 = vst [vmem:[%s2382_s27 + $0x128] sm:$0xff] %v1917_v37  ;;  %v1919_v39 = vld [vmem:[%s2377_s12 + $0x3a8] sm:$0xff]  ;;  %v1920_v40 = vld [vmem:[%s2377_s12 + $0x3d0] sm:$0xff] }
  0x53   : > { %466 = vst [vmem:[%s2382_s27 + $0x130] sm:$0xff] %v1918_v38  ;;  %v1921_v41 = vld [vmem:[%s2377_s12 + $0x3d8] sm:$0xff]  ;;  %468 = vst [vmem:[%s2382_s27 + $0x138] sm:$0xff] %v1919_v39  ;;  %v1922_v42 = vld [vmem:[%s2377_s12 + $0x400] sm:$0xff] }
  0x54   : > { %470 = vst [vmem:[%s2382_s27 + $0x140] sm:$0xff] %v1920_v40  ;;  %472 = vst [vmem:[%s2382_s27 + $0x148] sm:$0xff] %v1921_v41  ;;  %v1923_v43 = vld [vmem:[%s2377_s12 + $0x408] sm:$0xff]  ;;  %v1924_v44 = vld [vmem:[%s2377_s12 + $0x430] sm:$0xff] }
  0x55   : > { %474 = vst [vmem:[%s2382_s27 + $0x150] sm:$0xff] %v1922_v42  ;;  %476 = vst [vmem:[%s2382_s27 + $0x158] sm:$0xff] %v1923_v43  ;;  %v1925_v45 = vld [vmem:[%s2377_s12 + $0x438] sm:$0xff]  ;;  %v1926_v46 = vld [vmem:[%s2377_s12 + $0x460] sm:$0xff] }
  0x56   : > { %478 = vst [vmem:[%s2382_s27 + $0x160] sm:$0xff] %v1924_v44  ;;  %v1927_v47 = vld [vmem:[%s2377_s12 + $0x468] sm:$0xff]  ;;  %480 = vst [vmem:[%s2382_s27 + $0x168] sm:$0xff] %v1925_v45  ;;  %v1928_v48 = vld [vmem:[%s2377_s12 + $0x490] sm:$0xff] }
  0x57   : > { %482 = vst [vmem:[%s2382_s27 + $0x170] sm:$0xff] %v1926_v46  ;;  %484 = vst [vmem:[%s2382_s27 + $0x178] sm:$0xff] %v1927_v47  ;;  %v1929_v49 = vld [vmem:[%s2377_s12 + $0x498] sm:$0xff]  ;;  %v1930_v50 = vld [vmem:[%s2377_s12 + $0x4c0] sm:$0xff] }
  0x58   : > { %486 = vst [vmem:[%s2382_s27 + $0x180] sm:$0xff] %v1928_v48  ;;  %488 = vst [vmem:[%s2382_s27 + $0x188] sm:$0xff] %v1929_v49  ;;  %v1931_v51 = vld [vmem:[%s2377_s12 + $0x4c8] sm:$0xff]  ;;  %v1932_v52 = vld [vmem:[%s2377_s12 + $0x4f0] sm:$0xff] }
  0x59   : > { %490 = vst [vmem:[%s2382_s27 + $0x190] sm:$0xff] %v1930_v50  ;;  %v1933_v53 = vld [vmem:[%s2377_s12 + $0x4f8] sm:$0xff]  ;;  %492 = vst [vmem:[%s2382_s27 + $0x198] sm:$0xff] %v1931_v51  ;;  %v1934_v54 = vld [vmem:[%s2377_s12 + $0x520] sm:$0xff] }
  0x5a   : > { %494 = vst [vmem:[%s2382_s27 + $0x1a0] sm:$0xff] %v1932_v52  ;;  %496 = vst [vmem:[%s2382_s27 + $0x1a8] sm:$0xff] %v1933_v53  ;;  %v1935_v55 = vld [vmem:[%s2377_s12 + $0x528] sm:$0xff]  ;;  %v1936_v56 = vld [vmem:[%s2377_s12 + $0x550] sm:$0xff] }
  0x5b   : > { %498 = vst [vmem:[%s2382_s27 + $0x1b0] sm:$0xff] %v1934_v54  ;;  %500 = vst [vmem:[%s2382_s27 + $0x1b8] sm:$0xff] %v1935_v55  ;;  %v1937_v57 = vld [vmem:[%s2377_s12 + $0x558] sm:$0xff]  ;;  %v1938_v58 = vld [vmem:[%s2377_s12 + $0x580] sm:$0xff] }
  0x5c   : > { %502 = vst [vmem:[%s2382_s27 + $0x1c0] sm:$0xff] %v1936_v56  ;;  %v1939_v59 = vld [vmem:[%s2377_s12 + $0x588] sm:$0xff]  ;;  %504 = vst [vmem:[%s2382_s27 + $0x1c8] sm:$0xff] %v1937_v57  ;;  %v1940_v60 = vld [vmem:[%s2377_s12 + $0x5b0] sm:$0xff] }
  0x5d   : > { %506 = vst [vmem:[%s2382_s27 + $0x1d0] sm:$0xff] %v1938_v58  ;;  %508 = vst [vmem:[%s2382_s27 + $0x1d8] sm:$0xff] %v1939_v59  ;;  %v1941_v61 = vld [vmem:[%s2377_s12 + $0x5b8] sm:$0xff]  ;;  %v1942_v62 = vld [vmem:[%s2377_s12 + $0x5e0] sm:$0xff] }
  0x5e   : > { %510 = vst [vmem:[%s2382_s27 + $0x1e0] sm:$0xff] %v1940_v60  ;;  %512 = vst [vmem:[%s2382_s27 + $0x1e8] sm:$0xff] %v1941_v61  ;;  %v1943_v63 = vld [vmem:[%s2377_s12 + $0x5e8] sm:$0xff] }
  0x5f   : > { %514 = vst [vmem:[%s2382_s27 + $0x1f0] sm:$0xff] %v1942_v62  ;;  %516 = vst [vmem:[%s2382_s27 + $0x1f8] sm:$0xff] %v1943_v63 }
  0x60 PF: > { %p1944_p7 = scmp.ge.s32.totalorder %s2138_s24, 1  ;;  %p539_p8 = scmp.lt.s32.totalorder %s2138_s24, 5 }
  0x62   : > { %p540_p9 = pnand %p1944_p7, %p539_p8 }
  0x64   : > { %543 = sbr.rel (%p540_p9) target bundleno = 482 (0x1e2), region = 74 }
  0x69   : > { %s546_s13 = sand.u32 1, %s2114_s18   ;;  %s2140_s16 = smov 64  }
  0x6a   : > { %s2512_s14 = sshll.u32 %s546_s13, 9  ;;  %s1947_s18 = sshll.u32 %s2122_s20, 5 }
  0x6b   : > { %s2515_s15 = scalar_lea.vmem [#allocation2], %s2512_s14  ;;  %p612_p10 = scmp.lt.s32.totalorder %s1947_s18, 63 }
  0x6c   : > { %v2518_v0 = vld [vmem:[%s2515_s15 + $0x20] sm:$0xff]  ;;  %v2528_v2 = vld [vmem:[%s2515_s15 + $0x30] sm:$0xff]  ;;  %s2598_s30 = scalar_lea.vmem [#allocation3], %s2512_s14  ;;  %p624_p11 = scmp.lt.s32.totalorder %s2126_s21, 1 }
  0x6d   : > { %v2521_v1 = vld [vmem:[%s2515_s15] sm:$0xff]  ;;  %777 = vrot.lane.b32.xlu1 %v2518_v0, %s2140_s16  ;;  %v2531_v3 = vld [vmem:[%s2515_s15 + $0x10] sm:$0xff]  ;;  %s4440_s18 = smov (!%p612_p10, %s1947_s18), 63 }
  0x6e   : > { %773 = vrot.lane.b32.xlu0 %v2521_v1, %s2140_s16  ;;  %v2539_v4 = vld [vmem:[%s2515_s15 + $0x50] sm:$0xff]  ;;  %v2542_v5 = vld [vmem:[%s2515_s15 + $0x40] sm:$0xff]  ;;  %s1948_s20 = sshll.u32 %s4440_s18, 3  ;;  %s4442_s21 = smov (!%p624_p11, %s2126_s21), 1 }
  0x6f   : > { %v2549_v6 = vld [vmem:[%s2515_s15 + $0x70] sm:$0xff]  ;;  %v2552_v7 = vld [vmem:[%s2515_s15 + $0x60] sm:$0xff]  ;;  %s2582_s29 = scalar_lea.vmem %s4008_s2, %s1948_s20  ;;  %s1952_s6 = sshll.u32 %s4440_s18, 1 }
  0x70   : > { %v2561_v8 = vld [vmem:[%s2515_s15 + $0x90] sm:$0xff]  ;;  %v2564_v9 = vld [vmem:[%s2515_s15 + $0x80] sm:$0xff]  ;;  %s2828_s10 = scalar_lea.vmem %s4009_s3, %s1948_s20  ;;  %s1953_s11 = sshll.u32 %s4442_s21, 7 }
  0x71   : > { %779 = vrot.lane.b32.xlu1 %v2528_v2, %s2140_s16  ;;  %v2572_v10 = vld [vmem:[%s2515_s15 + $0xb0] sm:$0xff]  ;;  %v2575_v11 = vld [vmem:[%s2515_s15 + $0xa0] sm:$0xff]  ;;  %s2837_s12 = sadd.s32 %s1953_s11, %s1952_s6 }
  0x72   : > { %775 = vrot.lane.b32.xlu0 %v2531_v3, %s2140_s16  ;;  %v2589_v12 = vld [vmem:[%s2515_s15 + $0xd0] sm:$0xff]  ;;  %v2592_v13 = vld [vmem:[%s2515_s15 + $0xc0] sm:$0xff]  ;;  %s1954_s21 = sshll.u32 %s2837_s12, 3 }
  0x73   : > { %v2595_v14 = vld [vmem:[%s2582_s29] sm:$0xff]  ;;  %v2609_v17 = vld [vmem:[%s2515_s15 + $0xf0] sm:$0xff]  ;;  %s2895_s14 = scalar_lea.vmem %s4010_s4, %s1954_s21  ;;  %s3334_s17 = scalar_lea.vmem %s4011_s5, %s1954_s21 }
  0x74   : > { %v965_v15 = vld [vmem:[%s2598_s30] sm:$0xff]  ;;  %v2619_v19 = vld [vmem:[%s2515_s15 + $0x110] sm:$0xff] }
  0x75   : > { %783 = vrot.lane.b32.xlu1 %v2539_v4, %s2140_s16  ;;  %v2602_v16 = vmul.f32 %v965_v15, %v2595_v14  ;;  %v2612_v18 = vld [vmem:[%s2515_s15 + $0xe0] sm:$0xff]  ;;  %v2629_v21 = vld [vmem:[%s2515_s15 + $0x130] sm:$0xff] }
  0x76   : > { %781 = vrot.lane.b32.xlu0 %v2542_v5, %s2140_s16  ;;  %v2622_v20 = vld [vmem:[%s2515_s15 + $0x100] sm:$0xff]  ;;  %v2639_v23 = vld [vmem:[%s2515_s15 + $0x150] sm:$0xff] }
  0x77   : > { %v2632_v22 = vld [vmem:[%s2515_s15 + $0x120] sm:$0xff]  ;;  %v2649_v25 = vld [vmem:[%s2515_s15 + $0x170] sm:$0xff] }
  0x78   : > { %v2642_v24 = vld [vmem:[%s2515_s15 + $0x140] sm:$0xff]  ;;  %v2659_v27 = vld [vmem:[%s2515_s15 + $0x190] sm:$0xff] }
  0x79   : > { %787 = vrot.lane.b32.xlu1 %v2549_v6, %s2140_s16  ;;  %v2652_v26 = vld [vmem:[%s2515_s15 + $0x160] sm:$0xff]  ;;  %v2669_v29 = vld [vmem:[%s2515_s15 + $0x1b0] sm:$0xff] }
  0x7a   : > { %785 = vrot.lane.b32.xlu0 %v2552_v7, %s2140_s16  ;;  %v2662_v28 = vld [vmem:[%s2515_s15 + $0x180] sm:$0xff]  ;;  %v2679_v31 = vld [vmem:[%s2515_s15 + $0x1d0] sm:$0xff] }
  0x7b   : > { %v2672_v30 = vld [vmem:[%s2515_s15 + $0x1a0] sm:$0xff]  ;;  %v2689_v33 = vld [vmem:[%s2515_s15 + $0x1f0] sm:$0xff] }
  0x7c   : > { %v2682_v32 = vld [vmem:[%s2515_s15 + $0x1c0] sm:$0xff]  ;;  %v2699_v35 = vld [vmem:[%s2598_s30 + $0x10] sm:$0xff] }
  0x7d   : > { %791 = vrot.lane.b32.xlu1 %v2561_v8, %s2140_s16  ;;  %v2692_v34 = vld [vmem:[%s2515_s15 + $0x1e0] sm:$0xff]  ;;  %v2705_v36 = vld [vmem:[%s2598_s30 + $0x30] sm:$0xff] }
  0x7e   : > { %789 = vrot.lane.b32.xlu0 %v2564_v9, %s2140_s16  ;;  %v2708_v37 = vld [vmem:[%s2598_s30 + $0x20] sm:$0xff]  ;;  %v2715_v38 = vld [vmem:[%s2598_s30 + $0x50] sm:$0xff] }
  0x7f   : > { %v2718_v39 = vld [vmem:[%s2598_s30 + $0x40] sm:$0xff]  ;;  %v2725_v40 = vld [vmem:[%s2598_s30 + $0x70] sm:$0xff] }
  0x80   : > { %v2728_v41 = vld [vmem:[%s2598_s30 + $0x60] sm:$0xff]  ;;  %v2735_v42 = vld [vmem:[%s2598_s30 + $0x90] sm:$0xff] }
  0x81   : > { %795 = vrot.lane.b32.xlu1 %v2572_v10, %s2140_s16  ;;  %4163 = vst [vmem:[#allocation4_spill] sm:$0xff] %v2735_v42  ;;  %v2738_v43 = vld [vmem:[%s2598_s30 + $0x80] sm:$0xff]  ;;  %v2745_v44 = vld [vmem:[%s2598_s30 + $0xb0] sm:$0xff] }
  0x82   : > { %793 = vrot.lane.b32.xlu0 %v2575_v11, %s2140_s16  ;;  %4164 = vst [vmem:[#allocation5_spill] sm:$0xff] %v2738_v43  ;;  %4165 = vst [vmem:[#allocation6_spill] sm:$0xff] %v2745_v44  ;;  %v2748_v45 = vld [vmem:[%s2598_s30 + $0xa0] sm:$0xff]  ;;  %v2755_v46 = vld [vmem:[%s2598_s30 + $0xd0] sm:$0xff] }
  0x83   : > { %4166 = vst [vmem:[#allocation7_spill] sm:$0xff] %v2748_v45  ;;  %4167 = vst [vmem:[#allocation8_spill] sm:$0xff] %v2755_v46  ;;  %v2758_v47 = vld [vmem:[%s2598_s30 + $0xc0] sm:$0xff]  ;;  %v2765_v48 = vld [vmem:[%s2598_s30 + $0xf0] sm:$0xff] }
  0x84   : > { %4168 = vst [vmem:[#allocation9_spill] sm:$0xff] %v2758_v47  ;;  %4169 = vst [vmem:[#allocation10_spill] sm:$0xff] %v2765_v48  ;;  %v2768_v49 = vld [vmem:[%s2598_s30 + $0xe0] sm:$0xff]  ;;  %v2775_v50 = vld [vmem:[%s2598_s30 + $0x110] sm:$0xff] }
  0x85   : > { %799 = vrot.lane.b32.xlu1 %v2589_v12, %s2140_s16  ;;  %4170 = vst [vmem:[#allocation11_spill] sm:$0xff] %v2768_v49  ;;  %4171 = vst [vmem:[#allocation12_spill] sm:$0xff] %v2775_v50  ;;  %v2778_v51 = vld [vmem:[%s2598_s30 + $0x100] sm:$0xff]  ;;  %v2785_v52 = vld [vmem:[%s2598_s30 + $0x130] sm:$0xff] }
  0x86   : > { %797 = vrot.lane.b32.xlu0 %v2592_v13, %s2140_s16  ;;  %4172 = vst [vmem:[#allocation13_spill] sm:$0xff] %v2778_v51  ;;  %4173 = vst [vmem:[#allocation14_spill] sm:$0xff] %v2785_v52  ;;  %v2788_v53 = vld [vmem:[%s2598_s30 + $0x120] sm:$0xff]  ;;  %v2795_v54 = vld [vmem:[%s2598_s30 + $0x150] sm:$0xff] }
  0x87   : > { %4174 = vst [vmem:[#allocation15_spill] sm:$0xff] %v2788_v53  ;;  %4175 = vst [vmem:[#allocation16_spill] sm:$0xff] %v2795_v54  ;;  %v2798_v55 = vld [vmem:[%s2598_s30 + $0x140] sm:$0xff]  ;;  %v2806_v56 = vld [vmem:[%s2598_s30 + $0x170] sm:$0xff] }
  0x88   : > { %4176 = vst [vmem:[#allocation17_spill] sm:$0xff] %v2798_v55  ;;  %4177 = vst [vmem:[#allocation18_spill] sm:$0xff] %v2806_v56  ;;  %v2809_v57 = vld [vmem:[%s2598_s30 + $0x160] sm:$0xff]  ;;  %v2818_v58 = vld [vmem:[%s2598_s30 + $0x190] sm:$0xff] }
  0x89   : > { %803 = vrot.lane.b32.xlu1 %v2609_v17, %s2140_s16  ;;  %4178 = vst [vmem:[#allocation19_spill] sm:$0xff] %v2809_v57  ;;  %4179 = vst [vmem:[#allocation20_spill] sm:$0xff] %v2818_v58  ;;  %v2821_v59 = vld [vmem:[%s2598_s30 + $0x180] sm:$0xff]  ;;  %v2831_v60 = vld [vmem:[%s2582_s29 + $0x10] sm:$0xff] }
  0x8a   : > { %801 = vrot.lane.b32.xlu0 %v2612_v18, %s2140_s16  ;;  %4180 = vst [vmem:[#allocation21_spill] sm:$0xff] %v2821_v59  ;;  %v2840_v61 = vld [vmem:[%s2828_s10 + $0x10] sm:$0xff]  ;;  %v2843_v62 = vld [vmem:[%s2828_s10] sm:$0xff]  ;;  %v743_v63 = vmul.f32 %v2518_v0, %v2831_v60 }
  0x8d   : > { %807 = vrot.lane.b32.xlu1 %v2619_v19, %s2140_s16 }
  0x8e   : > { %805 = vrot.lane.b32.xlu0 %v2622_v20, %s2140_s16 }
  0x91   : > { %811 = vrot.lane.b32.xlu1 %v2629_v21, %s2140_s16 }
  0x92   : > { %809 = vrot.lane.b32.xlu0 %v2632_v22, %s2140_s16 }
  0x95   : > { %815 = vrot.lane.b32.xlu1 %v2639_v23, %s2140_s16 }
  0x96   : > { %813 = vrot.lane.b32.xlu0 %v2642_v24, %s2140_s16 }
  0x99   : > { %819 = vrot.lane.b32.xlu1 %v2649_v25, %s2140_s16 }
  0x9a   : > { %817 = vrot.lane.b32.xlu0 %v2652_v26, %s2140_s16 }
  0x9d   : > { %823 = vrot.lane.b32.xlu1 %v2659_v27, %s2140_s16 }
  0x9e   : > { %821 = vrot.lane.b32.xlu0 %v2662_v28, %s2140_s16 }
  0xa1   : > { %827 = vrot.lane.b32.xlu1 %v2669_v29, %s2140_s16 }
  0xa2   : > { %825 = vrot.lane.b32.xlu0 %v2672_v30, %s2140_s16 }
  0xa5   : > { %831 = vrot.lane.b32.xlu1 %v2679_v31, %s2140_s16 }
  0xa6   : > { %829 = vrot.lane.b32.xlu0 %v2682_v32, %s2140_s16 }
  0xa9   : > { %835 = vrot.lane.b32.xlu1 %v2689_v33, %s2140_s16 }
  0xaa   : > { %833 = vrot.lane.b32.xlu0 %v2692_v34, %s2140_s16 }
  0xad   : > { %1031 = vrot.lane.b32.xlu1 %v2699_v35, %s2140_s16 }
  0xae   : > { %1029 = vrot.lane.b32.xlu0 %v965_v15, %s2140_s16  ;;  %v741_v15 = vmul.f32 %v2521_v1, %v2595_v14  ;;  %v2869_v14 = vld [vmem:[%s2828_s10 + $0x18] sm:$0xff] }
  0xb1   : > { %1035 = vrot.lane.b32.xlu1 %v2705_v36, %s2140_s16 }
  0xb2   : > { %1033 = vrot.lane.b32.xlu0 %v2708_v37, %s2140_s16 }
  0xb5   : > { %1039 = vrot.lane.b32.xlu1 %v2715_v38, %s2140_s16 }
  0xb6   : > { %1037 = vrot.lane.b32.xlu0 %v2718_v39, %s2140_s16 }
  0xb9   : > { %1043 = vrot.lane.b32.xlu1 %v2725_v40, %s2140_s16 }
  0xba   : > { %1041 = vrot.lane.b32.xlu0 %v2728_v41, %s2140_s16 }
  0xbd   : > { %1047 = vrot.lane.b32.xlu1 %v2735_v42, %s2140_s16 }
  0xbe   : > { %1045 = vrot.lane.b32.xlu0 %v2738_v43, %s2140_s16  ;;  %v2955_v43 = vld [vmem:[%s2582_s29 + $0x40] sm:$0xff] }
  0xc1   : > { %1051 = vrot.lane.b32.xlu1 %v2745_v44, %s2140_s16 }
  0xc2   : > { %1049 = vrot.lane.b32.xlu0 %v2748_v45, %s2140_s16  ;;  %v2925_v45 = vld [vmem:[%s2582_s29 + $0x30] sm:$0xff] }
  0xc5   : > { %1055 = vrot.lane.b32.xlu1 %v2755_v46, %s2140_s16  ;;  %v2922_v46 = vld [vmem:[%s2582_s29 + $0x38] sm:$0xff] }
  0xc6   : > { %1053 = vrot.lane.b32.xlu0 %v2758_v47, %s2140_s16  ;;  %v2907_v47 = vld [vmem:[%s2828_s10 + $0x20] sm:$0xff] }
  0xc9   : > { %1059 = vrot.lane.b32.xlu1 %v2765_v48, %s2140_s16  ;;  %v2904_v48 = vld [vmem:[%s2828_s10 + $0x28] sm:$0xff] }
  0xca   : > { %1057 = vrot.lane.b32.xlu0 %v2768_v49, %s2140_s16  ;;  %v2885_v49 = vld [vmem:[%s2582_s29 + $0x28] sm:$0xff] }
  0xcd   : > { %1063 = vrot.lane.b32.xlu1 %v2775_v50, %s2140_s16  ;;  %v2879_v50 = vld [vmem:[%s2598_s30 + $0x1d0] sm:$0xff] }
  0xce   : > { %1061 = vrot.lane.b32.xlu0 %v2778_v51, %s2140_s16  ;;  %4183 = vst [vmem:[#allocation24_spill] sm:$0xff] %v2879_v50 }
  0xd1   : > { %1067 = vrot.lane.b32.xlu1 %v2785_v52, %s2140_s16 }
  0xd2   : > { %1065 = vrot.lane.b32.xlu0 %v2788_v53, %s2140_s16  ;;  %v2872_v53 = vld [vmem:[%s2828_s10 + $0x8] sm:$0xff] }
  0xd5   : > { %1071 = vrot.lane.b32.xlu1 %v2795_v54, %s2140_s16 }
  0xd6   : > { %1069 = vrot.lane.b32.xlu0 %v2798_v55, %s2140_s16 }
  0xd9   : > { %1075 = vrot.lane.b32.xlu1 %v2806_v56, %s2140_s16  ;;  %v2859_v56 = vld [vmem:[%s2582_s29 + $0x8] sm:$0xff] }
  0xda   : > { %1073 = vrot.lane.b32.xlu0 %v2809_v57, %s2140_s16  ;;  %v2850_v57 = vld [vmem:[%s2598_s30 + $0x1b0] sm:$0xff]  ;;  %v742_v51 = vmul.f32 %v2531_v3, %v2859_v56 }
  0xdb   : > { %4181 = vst [vmem:[#allocation22_spill] sm:$0xff] %v2850_v57 }
  0xdd   : > { %1079 = vrot.lane.b32.xlu1 %v2818_v58, %s2140_s16  ;;  %v2853_v58 = vld [vmem:[%s2598_s30 + $0x1a0] sm:$0xff] }
  0xde   : > { %1077 = vrot.lane.b32.xlu0 %v2821_v59, %s2140_s16  ;;  %4182 = vst [vmem:[#allocation23_spill] sm:$0xff] %v2853_v58  ;;  %v2856_v59 = vld [vmem:[%s2582_s29 + $0x18] sm:$0xff] }
  0xdf   : > { %v778_v55 = vpop.permute.xlu1 %777  ;;  %v744_v52 = vmul.f32 %v2528_v2, %v2856_v59 }
  0xe0   : > { %v774_v54 = vpop.permute.xlu0 %773  ;;  %v839_v0 = vmul.f32 %v778_v55, %v2840_v61 }
  0xe1   : > { %v837_v1 = vmul.f32 %v774_v54, %v2843_v62  ;;  %1083 = vrot.lane.b32.xlu1 %v2850_v57, %s2140_s16  ;;  %v2882_v57 = vld [vmem:[%s2598_s30 + $0x1c0] sm:$0xff] }
  0xe2   : > { %1081 = vrot.lane.b32.xlu0 %v2853_v58, %s2140_s16  ;;  %v871_v55 = vadd.f32 %v839_v0, %v743_v63  ;;  %4184 = vst [vmem:[#allocation25_spill] sm:$0xff] %v2882_v57  ;;  %v2888_v58 = vld [vmem:[%s2582_s29 + $0x20] sm:$0xff] }
  0xe3   : > { %v869_v54 = vadd.f32 %v837_v1, %v741_v15  ;;  %v780_v2 = vpop.permute.xlu1 %779 }
  0xe4   : > { %v776_v3 = vpop.permute.xlu0 %775  ;;  %v903_v63 = vmul.f32 0.088388346, %v871_v55  ;;  %v840_v0 = vmul.f32 %v780_v2, %v2869_v14  ;;  %v746_v55 = vmul.f32 %v2539_v4, %v2885_v49 }
  0xe5   : > { %v901_v15 = vmul.f32 0.088388346, %v869_v54  ;;  %v838_v1 = vmul.f32 %v776_v3, %v2872_v53  ;;  %1087 = vrot.lane.b32.xlu1 %v2879_v50, %s2140_s16  ;;  %v745_v54 = vmul.f32 %v2542_v5, %v2888_v58  ;;  %v2916_v50 = vld [vmem:[%s2598_s30 + $0x1f0] sm:$0xff] }
  0xe6   : > { %1085 = vrot.lane.b32.xlu0 %v2882_v57, %s2140_s16  ;;  %935 = vst [vmem:[%s2895_s14 + $0x20] sm:$0xff] %v903_v63  ;;  %v872_v2 = vadd.f32 %v840_v0, %v744_v52  ;;  %4185 = vst [vmem:[#allocation26_spill] sm:$0xff] %v2916_v50  ;;  %v2919_v57 = vld [vmem:[%s2598_s30 + $0x1e0] sm:$0xff]  ;;  %v2937_v0 = vld [vmem:[%s2828_s10 + $0x30] sm:$0xff] }
  0xe7   : > { %933 = vst [vmem:[%s2895_s14] sm:$0xff] %v901_v15  ;;  %v870_v3 = vadd.f32 %v838_v1, %v742_v51  ;;  %4186 = vst [vmem:[#allocation27_spill] sm:$0xff] %v2919_v57  ;;  %v784_v4 = vpop.permute.xlu1 %783  ;;  %v2934_v15 = vld [vmem:[%s2828_s10 + $0x38] sm:$0xff]  ;;  %v748_v1 = vmul.f32 %v2549_v6, %v2922_v46 }
  0xe8   : > { %v782_v44 = vpop.permute.xlu0 %781  ;;  %v904_v5 = vmul.f32 0.088388346, %v872_v2  ;;  %v842_v51 = vmul.f32 %v784_v4, %v2904_v48  ;;  %4187 = vst [vmem:[#allocation28_spill] sm:$0xff] %v2937_v0  ;;  %v747_v2 = vmul.f32 %v2552_v7, %v2925_v45  ;;  %v2946_v4 = vld [vmem:[%s2515_s15 + $0x18] sm:$0xff] }
  0xe9   : > { %v902_v63 = vmul.f32 0.088388346, %v870_v3  ;;  %v841_v52 = vmul.f32 %v782_v44, %v2907_v47  ;;  %1091 = vrot.lane.b32.xlu1 %v2916_v50, %s2140_s16  ;;  %4188 = vst [vmem:[#allocation29_spill] sm:$0xff] %v2946_v4  ;;  %v2952_v50 = vld [vmem:[%s2582_s29 + $0x48] sm:$0xff] }
  0xea   : > { %1089 = vrot.lane.b32.xlu0 %v2919_v57, %s2140_s16  ;;  %936 = vst [vmem:[%s2895_s14 + $0x30] sm:$0xff] %v904_v5  ;;  %v874_v44 = vadd.f32 %v842_v51, %v746_v55  ;;  %v2949_v57 = vld [vmem:[%s2515_s15 + $0x8] sm:$0xff]  ;;  %4190 = vst [vmem:[#allocation31_spill] sm:$0xff] %v2952_v50  ;;  %v2967_v51 = vld [vmem:[%s2828_s10 + $0x40] sm:$0xff] }
  0xeb   : > { %934 = vst [vmem:[%s2895_s14 + $0x10] sm:$0xff] %v902_v63  ;;  %v873_v3 = vadd.f32 %v841_v52, %v745_v54  ;;  %4189 = vst [vmem:[#allocation30_spill] sm:$0xff] %v2949_v57  ;;  %v788_v6 = vpop.permute.xlu1 %787  ;;  %v2964_v63 = vld [vmem:[%s2828_s10 + $0x48] sm:$0xff]  ;;  %v750_v52 = vmul.f32 %v2561_v8, %v2952_v50 }
  0xec   : > { %v786_v42 = vpop.permute.xlu0 %785  ;;  %v906_v7 = vmul.f32 0.088388346, %v874_v44  ;;  %v844_v55 = vmul.f32 %v788_v6, %v2934_v15  ;;  %4191 = vst [vmem:[#allocation32_spill] sm:$0xff] %v2967_v51  ;;  %v749_v44 = vmul.f32 %v2564_v9, %v2955_v43  ;;  %v2976_v6 = vld [vmem:[%s2515_s15 + $0x38] sm:$0xff] }
  0xed   : > { %v905_v5 = vmul.f32 0.088388346, %v873_v3  ;;  %v843_v54 = vmul.f32 %v786_v42, %v2937_v0  ;;  %1255 = vrot.lane.b32.xlu1 %v2946_v4, %s2140_s16  ;;  %4192 = vst [vmem:[#allocation33_spill] sm:$0xff] %v2976_v6  ;;  %v2982_v4 = vld [vmem:[%s2582_s29 + $0x58] sm:$0xff]  ;;  %v2985_v0 = vld [vmem:[%s2582_s29 + $0x50] sm:$0xff] }
  0xee   : > { %1253 = vrot.lane.b32.xlu0 %v2949_v57, %s2140_s16  ;;  %938 = vst [vmem:[%s2895_s14 + $0x50] sm:$0xff] %v906_v7  ;;  %v876_v42 = vadd.f32 %v844_v55, %v748_v1  ;;  %v2979_v57 = vld [vmem:[%s2515_s15 + $0x28] sm:$0xff]  ;;  %4194 = vst [vmem:[#allocation35_spill] sm:$0xff] %v2982_v4  ;;  %v2997_v55 = vld [vmem:[%s2828_s10 + $0x50] sm:$0xff] }
  0xef   : > { %937 = vst [vmem:[%s2895_s14 + $0x40] sm:$0xff] %v905_v5  ;;  %v875_v3 = vadd.f32 %v843_v54, %v747_v2  ;;  %4193 = vst [vmem:[#allocation34_spill] sm:$0xff] %v2979_v57  ;;  %v792_v8 = vpop.permute.xlu1 %791  ;;  %v2994_v5 = vld [vmem:[%s2828_s10 + $0x58] sm:$0xff]  ;;  %v752_v54 = vmul.f32 %v2572_v10, %v2982_v4 }
  0xf0   : > { %v790_v50 = vpop.permute.xlu0 %789  ;;  %v908_v9 = vmul.f32 0.088388346, %v876_v42  ;;  %v846_v1 = vmul.f32 %v792_v8, %v2964_v63  ;;  %4195 = vst [vmem:[#allocation36_spill] sm:$0xff] %v2997_v55  ;;  %v751_v42 = vmul.f32 %v2575_v11, %v2985_v0  ;;  %v3006_v8 = vld [vmem:[%s2515_s15 + $0x58] sm:$0xff] }
  0xf1   : > { %v907_v7 = vmul.f32 0.088388346, %v875_v3  ;;  %v845_v2 = vmul.f32 %v790_v50, %v2967_v51  ;;  %1259 = vrot.lane.b32.xlu1 %v2976_v6, %s2140_s16  ;;  %4196 = vst [vmem:[#allocation37_spill] sm:$0xff] %v3006_v8  ;;  %v3012_v6 = vld [vmem:[%s2582_s29 + $0x68] sm:$0xff]  ;;  %v3015_v51 = vld [vmem:[%s2582_s29 + $0x60] sm:$0xff] }
  0xf2   : > { %1257 = vrot.lane.b32.xlu0 %v2979_v57, %s2140_s16  ;;  %940 = vst [vmem:[%s2895_s14 + $0x70] sm:$0xff] %v908_v9  ;;  %v878_v50 = vadd.f32 %v846_v1, %v750_v52  ;;  %v3009_v57 = vld [vmem:[%s2515_s15 + $0x48] sm:$0xff]  ;;  %4198 = vst [vmem:[#allocation39_spill] sm:$0xff] %v3012_v6  ;;  %v3027_v1 = vld [vmem:[%s2828_s10 + $0x60] sm:$0xff] }
  0xf3   : > { %939 = vst [vmem:[%s2895_s14 + $0x60] sm:$0xff] %v907_v7  ;;  %v877_v3 = vadd.f32 %v845_v2, %v749_v44  ;;  %4197 = vst [vmem:[#allocation38_spill] sm:$0xff] %v3009_v57  ;;  %v796_v10 = vpop.permute.xlu1 %795  ;;  %v3024_v7 = vld [vmem:[%s2828_s10 + $0x68] sm:$0xff]  ;;  %v754_v2 = vmul.f32 %v2589_v12, %v3012_v6 }
  0xf4   : > { %v794_v4 = vpop.permute.xlu0 %793  ;;  %v910_v11 = vmul.f32 0.088388346, %v878_v50  ;;  %v848_v52 = vmul.f32 %v796_v10, %v2994_v5  ;;  %4199 = vst [vmem:[#allocation40_spill] sm:$0xff] %v3027_v1  ;;  %v753_v50 = vmul.f32 %v2592_v13, %v3015_v51  ;;  %v3036_v10 = vld [vmem:[%s2515_s15 + $0x78] sm:$0xff] }
  0xf5   : > { %v909_v9 = vmul.f32 0.088388346, %v877_v3  ;;  %v847_v44 = vmul.f32 %v794_v4, %v2997_v55  ;;  %1263 = vrot.lane.b32.xlu1 %v3006_v8, %s2140_s16  ;;  %4200 = vst [vmem:[#allocation41_spill] sm:$0xff] %v3036_v10  ;;  %v3042_v8 = vld [vmem:[%s2582_s29 + $0x78] sm:$0xff]  ;;  %v3045_v55 = vld [vmem:[%s2582_s29 + $0x70] sm:$0xff] }
  0xf6   : > { %1261 = vrot.lane.b32.xlu0 %v3009_v57, %s2140_s16  ;;  %942 = vst [vmem:[%s2895_s14 + $0x90] sm:$0xff] %v910_v11  ;;  %v880_v4 = vadd.f32 %v848_v52, %v752_v54  ;;  %v3039_v57 = vld [vmem:[%s2515_s15 + $0x68] sm:$0xff]  ;;  %4202 = vst [vmem:[#allocation43_spill] sm:$0xff] %v3042_v8  ;;  %v3057_v52 = vld [vmem:[%s2828_s10 + $0x70] sm:$0xff] }
  0xf7   : > { %941 = vst [vmem:[%s2895_s14 + $0x80] sm:$0xff] %v909_v9  ;;  %v879_v3 = vadd.f32 %v847_v44, %v751_v42  ;;  %4201 = vst [vmem:[#allocation42_spill] sm:$0xff] %v3039_v57  ;;  %v800_v12 = vpop.permute.xlu1 %799  ;;  %v3054_v9 = vld [vmem:[%s2828_s10 + $0x78] sm:$0xff]  ;;  %v756_v44 = vmul.f32 %v2609_v17, %v3042_v8 }
  0xf8   : > { %v798_v6 = vpop.permute.xlu0 %797  ;;  %v912_v13 = vmul.f32 0.088388346, %v880_v4  ;;  %v850_v54 = vmul.f32 %v800_v12, %v3024_v7  ;;  %4203 = vst [vmem:[#allocation44_spill] sm:$0xff] %v3057_v52  ;;  %v755_v4 = vmul.f32 %v2612_v18, %v3045_v55  ;;  %v3066_v12 = vld [vmem:[%s2515_s15 + $0x98] sm:$0xff] }
  0xf9   : > { %v911_v11 = vmul.f32 0.088388346, %v879_v3  ;;  %v849_v42 = vmul.f32 %v798_v6, %v3027_v1  ;;  %1267 = vrot.lane.b32.xlu1 %v3036_v10, %s2140_s16  ;;  %4204 = vst [vmem:[#allocation45_spill] sm:$0xff] %v3066_v12  ;;  %v3072_v10 = vld [vmem:[%s2582_s29 + $0x88] sm:$0xff]  ;;  %v3075_v1 = vld [vmem:[%s2582_s29 + $0x80] sm:$0xff] }
  0xfa   : > { %1265 = vrot.lane.b32.xlu0 %v3039_v57, %s2140_s16  ;;  %944 = vst [vmem:[%s2895_s14 + $0xb0] sm:$0xff] %v912_v13  ;;  %v882_v6 = vadd.f32 %v850_v54, %v754_v2  ;;  %v3069_v57 = vld [vmem:[%s2515_s15 + $0x88] sm:$0xff]  ;;  %4206 = vst [vmem:[#allocation47_spill] sm:$0xff] %v3072_v10  ;;  %v3087_v54 = vld [vmem:[%s2828_s10 + $0x80] sm:$0xff] }
  0xfb   : > { %943 = vst [vmem:[%s2895_s14 + $0xa0] sm:$0xff] %v911_v11  ;;  %v881_v3 = vadd.f32 %v849_v42, %v753_v50  ;;  %4205 = vst [vmem:[#allocation46_spill] sm:$0xff] %v3069_v57  ;;  %v804_v17 = vpop.permute.xlu1 %803  ;;  %v3084_v11 = vld [vmem:[%s2828_s10 + $0x88] sm:$0xff]  ;;  %v758_v42 = vmul.f32 %v2619_v19, %v3072_v10 }
  0xfc   : > { %v802_v8 = vpop.permute.xlu0 %801  ;;  %v914_v18 = vmul.f32 0.088388346, %v882_v6  ;;  %v852_v2 = vmul.f32 %v804_v17, %v3054_v9  ;;  %4207 = vst [vmem:[#allocation48_spill] sm:$0xff] %v3087_v54  ;;  %v757_v6 = vmul.f32 %v2622_v20, %v3075_v1  ;;  %v3096_v17 = vld [vmem:[%s2515_s15 + $0xb8] sm:$0xff] }
  0xfd   : > { %v913_v13 = vmul.f32 0.088388346, %v881_v3  ;;  %v851_v50 = vmul.f32 %v802_v8, %v3057_v52  ;;  %1271 = vrot.lane.b32.xlu1 %v3066_v12, %s2140_s16  ;;  %4208 = vst [vmem:[#allocation49_spill] sm:$0xff] %v3096_v17  ;;  %v3102_v12 = vld [vmem:[%s2582_s29 + $0x98] sm:$0xff]  ;;  %v3105_v52 = vld [vmem:[%s2582_s29 + $0x90] sm:$0xff] }
  0xfe   : > { %1269 = vrot.lane.b32.xlu0 %v3069_v57, %s2140_s16  ;;  %946 = vst [vmem:[%s2895_s14 + $0xd0] sm:$0xff] %v914_v18  ;;  %v884_v8 = vadd.f32 %v852_v2, %v756_v44  ;;  %v3099_v57 = vld [vmem:[%s2515_s15 + $0xa8] sm:$0xff]  ;;  %4210 = vst [vmem:[#allocation51_spill] sm:$0xff] %v3102_v12  ;;  %v3117_v2 = vld [vmem:[%s2828_s10 + $0x90] sm:$0xff] }
  0xff   : > { %945 = vst [vmem:[%s2895_s14 + $0xc0] sm:$0xff] %v913_v13  ;;  %v883_v3 = vadd.f32 %v851_v50, %v755_v4  ;;  %4209 = vst [vmem:[#allocation50_spill] sm:$0xff] %v3099_v57  ;;  %v808_v19 = vpop.permute.xlu1 %807  ;;  %v3114_v13 = vld [vmem:[%s2828_s10 + $0x98] sm:$0xff]  ;;  %v760_v50 = vmul.f32 %v2629_v21, %v3102_v12 }
 0x100   : > { %v806_v10 = vpop.permute.xlu0 %805  ;;  %v916_v20 = vmul.f32 0.088388346, %v884_v8  ;;  %v854_v44 = vmul.f32 %v808_v19, %v3084_v11  ;;  %4211 = vst [vmem:[#allocation52_spill] sm:$0xff] %v3117_v2  ;;  %v759_v8 = vmul.f32 %v2632_v22, %v3105_v52  ;;  %v3126_v19 = vld [vmem:[%s2515_s15 + $0xd8] sm:$0xff] }
 0x101   : > { %v915_v18 = vmul.f32 0.088388346, %v883_v3  ;;  %v853_v4 = vmul.f32 %v806_v10, %v3087_v54  ;;  %1275 = vrot.lane.b32.xlu1 %v3096_v17, %s2140_s16  ;;  %4212 = vst [vmem:[#allocation53_spill] sm:$0xff] %v3126_v19  ;;  %v3132_v17 = vld [vmem:[%s2582_s29 + $0xa8] sm:$0xff]  ;;  %v3135_v54 = vld [vmem:[%s2582_s29 + $0xa0] sm:$0xff] }
 0x102   : > { %1273 = vrot.lane.b32.xlu0 %v3099_v57, %s2140_s16  ;;  %948 = vst [vmem:[%s2895_s14 + $0xf0] sm:$0xff] %v916_v20  ;;  %v886_v10 = vadd.f32 %v854_v44, %v758_v42  ;;  %v3129_v57 = vld [vmem:[%s2515_s15 + $0xc8] sm:$0xff]  ;;  %4214 = vst [vmem:[#allocation55_spill] sm:$0xff] %v3132_v17  ;;  %v3147_v44 = vld [vmem:[%s2828_s10 + $0xa0] sm:$0xff] }
 0x103   : > { %947 = vst [vmem:[%s2895_s14 + $0xe0] sm:$0xff] %v915_v18  ;;  %v885_v3 = vadd.f32 %v853_v4, %v757_v6  ;;  %4213 = vst [vmem:[#allocation54_spill] sm:$0xff] %v3129_v57  ;;  %v812_v21 = vpop.permute.xlu1 %811  ;;  %v3144_v18 = vld [vmem:[%s2828_s10 + $0xa8] sm:$0xff]  ;;  %v762_v4 = vmul.f32 %v2639_v23, %v3132_v17 }
 0x104   : > { %v810_v12 = vpop.permute.xlu0 %809  ;;  %v918_v22 = vmul.f32 0.088388346, %v886_v10  ;;  %v856_v42 = vmul.f32 %v812_v21, %v3114_v13  ;;  %4215 = vst [vmem:[#allocation56_spill] sm:$0xff] %v3147_v44  ;;  %v761_v10 = vmul.f32 %v2642_v24, %v3135_v54  ;;  %v3156_v21 = vld [vmem:[%s2515_s15 + $0xf8] sm:$0xff] }
 0x105   : > { %v917_v20 = vmul.f32 0.088388346, %v885_v3  ;;  %v855_v6 = vmul.f32 %v810_v12, %v3117_v2  ;;  %1279 = vrot.lane.b32.xlu1 %v3126_v19, %s2140_s16  ;;  %4216 = vst [vmem:[#allocation57_spill] sm:$0xff] %v3156_v21  ;;  %v3162_v19 = vld [vmem:[%s2582_s29 + $0xb8] sm:$0xff]  ;;  %v3165_v2 = vld [vmem:[%s2582_s29 + $0xb0] sm:$0xff] }
 0x106   : > { %1277 = vrot.lane.b32.xlu0 %v3129_v57, %s2140_s16  ;;  %950 = vst [vmem:[%s2895_s14 + $0x110] sm:$0xff] %v918_v22  ;;  %v888_v12 = vadd.f32 %v856_v42, %v760_v50  ;;  %v3159_v57 = vld [vmem:[%s2515_s15 + $0xe8] sm:$0xff]  ;;  %4218 = vst [vmem:[#allocation59_spill] sm:$0xff] %v3162_v19  ;;  %v3177_v42 = vld [vmem:[%s2828_s10 + $0xb0] sm:$0xff] }
 0x107   : > { %949 = vst [vmem:[%s2895_s14 + $0x100] sm:$0xff] %v917_v20  ;;  %v887_v3 = vadd.f32 %v855_v6, %v759_v8  ;;  %4217 = vst [vmem:[#allocation58_spill] sm:$0xff] %v3159_v57  ;;  %v816_v23 = vpop.permute.xlu1 %815  ;;  %v3174_v20 = vld [vmem:[%s2828_s10 + $0xb8] sm:$0xff]  ;;  %v764_v6 = vmul.f32 %v2649_v25, %v3162_v19 }
 0x108   : > { %v814_v17 = vpop.permute.xlu0 %813  ;;  %v920_v24 = vmul.f32 0.088388346, %v888_v12  ;;  %v858_v50 = vmul.f32 %v816_v23, %v3144_v18  ;;  %4219 = vst [vmem:[#allocation60_spill] sm:$0xff] %v3177_v42  ;;  %v763_v12 = vmul.f32 %v2652_v26, %v3165_v2  ;;  %v3186_v23 = vld [vmem:[%s2515_s15 + $0x118] sm:$0xff] }
 0x109   : > { %v919_v22 = vmul.f32 0.088388346, %v887_v3  ;;  %v857_v8 = vmul.f32 %v814_v17, %v3147_v44  ;;  %1283 = vrot.lane.b32.xlu1 %v3156_v21, %s2140_s16  ;;  %4220 = vst [vmem:[#allocation61_spill] sm:$0xff] %v3186_v23  ;;  %v3192_v21 = vld [vmem:[%s2582_s29 + $0xc8] sm:$0xff]  ;;  %v3195_v44 = vld [vmem:[%s2582_s29 + $0xc0] sm:$0xff] }
 0x10a   : > { %1281 = vrot.lane.b32.xlu0 %v3159_v57, %s2140_s16  ;;  %952 = vst [vmem:[%s2895_s14 + $0x130] sm:$0xff] %v920_v24  ;;  %v890_v17 = vadd.f32 %v858_v50, %v762_v4  ;;  %v3189_v57 = vld [vmem:[%s2515_s15 + $0x108] sm:$0xff]  ;;  %4222 = vst [vmem:[#allocation63_spill] sm:$0xff] %v3192_v21  ;;  %v3207_v50 = vld [vmem:[%s2828_s10 + $0xc0] sm:$0xff] }
 0x10b   : > { %951 = vst [vmem:[%s2895_s14 + $0x120] sm:$0xff] %v919_v22  ;;  %v889_v3 = vadd.f32 %v857_v8, %v761_v10  ;;  %4221 = vst [vmem:[#allocation62_spill] sm:$0xff] %v3189_v57  ;;  %v820_v25 = vpop.permute.xlu1 %819  ;;  %v3204_v22 = vld [vmem:[%s2828_s10 + $0xc8] sm:$0xff]  ;;  %v766_v8 = vmul.f32 %v2659_v27, %v3192_v21 }
 0x10c   : > { %v818_v19 = vpop.permute.xlu0 %817  ;;  %v922_v26 = vmul.f32 0.088388346, %v890_v17  ;;  %v860_v4 = vmul.f32 %v820_v25, %v3174_v20  ;;  %4223 = vst [vmem:[#allocation64_spill] sm:$0xff] %v3207_v50  ;;  %v765_v17 = vmul.f32 %v2662_v28, %v3195_v44  ;;  %v3216_v25 = vld [vmem:[%s2515_s15 + $0x138] sm:$0xff] }
 0x10d   : > { %v921_v24 = vmul.f32 0.088388346, %v889_v3  ;;  %v859_v10 = vmul.f32 %v818_v19, %v3177_v42  ;;  %1287 = vrot.lane.b32.xlu1 %v3186_v23, %s2140_s16  ;;  %4224 = vst [vmem:[#allocation65_spill] sm:$0xff] %v3216_v25  ;;  %v3222_v23 = vld [vmem:[%s2582_s29 + $0xd8] sm:$0xff]  ;;  %v3225_v42 = vld [vmem:[%s2582_s29 + $0xd0] sm:$0xff] }
 0x10e   : > { %1285 = vrot.lane.b32.xlu0 %v3189_v57, %s2140_s16  ;;  %954 = vst [vmem:[%s2895_s14 + $0x150] sm:$0xff] %v922_v26  ;;  %v892_v19 = vadd.f32 %v860_v4, %v764_v6  ;;  %v3219_v57 = vld [vmem:[%s2515_s15 + $0x128] sm:$0xff]  ;;  %4226 = vst [vmem:[#allocation67_spill] sm:$0xff] %v3222_v23  ;;  %v3237_v4 = vld [vmem:[%s2828_s10 + $0xd0] sm:$0xff] }
 0x10f   : > { %953 = vst [vmem:[%s2895_s14 + $0x140] sm:$0xff] %v921_v24  ;;  %v891_v3 = vadd.f32 %v859_v10, %v763_v12  ;;  %4225 = vst [vmem:[#allocation66_spill] sm:$0xff] %v3219_v57  ;;  %v824_v27 = vpop.permute.xlu1 %823  ;;  %v3234_v24 = vld [vmem:[%s2828_s10 + $0xd8] sm:$0xff]  ;;  %v768_v10 = vmul.f32 %v2669_v29, %v3222_v23 }
 0x110   : > { %v822_v21 = vpop.permute.xlu0 %821  ;;  %v924_v28 = vmul.f32 0.088388346, %v892_v19  ;;  %v862_v6 = vmul.f32 %v824_v27, %v3204_v22  ;;  %4227 = vst [vmem:[#allocation68_spill] sm:$0xff] %v3237_v4  ;;  %v767_v19 = vmul.f32 %v2672_v30, %v3225_v42  ;;  %v3246_v27 = vld [vmem:[%s2515_s15 + $0x158] sm:$0xff] }
 0x111   : > { %v923_v26 = vmul.f32 0.088388346, %v891_v3  ;;  %v861_v12 = vmul.f32 %v822_v21, %v3207_v50  ;;  %1291 = vrot.lane.b32.xlu1 %v3216_v25, %s2140_s16  ;;  %4228 = vst [vmem:[#allocation69_spill] sm:$0xff] %v3246_v27  ;;  %v3252_v25 = vld [vmem:[%s2582_s29 + $0xe8] sm:$0xff]  ;;  %v3255_v50 = vld [vmem:[%s2582_s29 + $0xe0] sm:$0xff] }
 0x112   : > { %1289 = vrot.lane.b32.xlu0 %v3219_v57, %s2140_s16  ;;  %956 = vst [vmem:[%s2895_s14 + $0x170] sm:$0xff] %v924_v28  ;;  %v894_v21 = vadd.f32 %v862_v6, %v766_v8  ;;  %v3249_v57 = vld [vmem:[%s2515_s15 + $0x148] sm:$0xff]  ;;  %4230 = vst [vmem:[#allocation71_spill] sm:$0xff] %v3252_v25  ;;  %v3267_v6 = vld [vmem:[%s2828_s10 + $0xe0] sm:$0xff] }
 0x113   : > { %955 = vst [vmem:[%s2895_s14 + $0x160] sm:$0xff] %v923_v26  ;;  %v893_v3 = vadd.f32 %v861_v12, %v765_v17  ;;  %4229 = vst [vmem:[#allocation70_spill] sm:$0xff] %v3249_v57  ;;  %v828_v29 = vpop.permute.xlu1 %827  ;;  %v3264_v26 = vld [vmem:[%s2828_s10 + $0xe8] sm:$0xff]  ;;  %v770_v12 = vmul.f32 %v2679_v31, %v3252_v25 }
 0x114   : > { %4231 = vst [vmem:[#allocation72_spill] sm:$0xff] %v3255_v50  ;;  %v826_v23 = vpop.permute.xlu0 %825  ;;  %v926_v30 = vmul.f32 0.088388346, %v894_v21  ;;  %v864_v8 = vmul.f32 %v828_v29, %v3234_v24  ;;  %4232 = vst [vmem:[#allocation73_spill] sm:$0xff] %v3264_v26  ;;  %v769_v21 = vmul.f32 %v2682_v32, %v3255_v50  ;;  %v3276_v29 = vld [vmem:[%s2515_s15 + $0x178] sm:$0xff] }
 0x115   : > { %v925_v28 = vmul.f32 0.088388346, %v893_v3  ;;  %v863_v17 = vmul.f32 %v826_v23, %v3237_v4  ;;  %1295 = vrot.lane.b32.xlu1 %v3246_v27, %s2140_s16  ;;  %4233 = vst [vmem:[#allocation74_spill] sm:$0xff] %v3267_v6  ;;  %4234 = vst [vmem:[#allocation75_spill] sm:$0xff] %v3276_v29  ;;  %v3282_v27 = vld [vmem:[%s2582_s29 + $0xf8] sm:$0xff]  ;;  %v3285_v4 = vld [vmem:[%s2582_s29 + $0xf0] sm:$0xff] }
 0x116   : > { %1293 = vrot.lane.b32.xlu0 %v3249_v57, %s2140_s16  ;;  %958 = vst [vmem:[%s2895_s14 + $0x190] sm:$0xff] %v926_v30  ;;  %v896_v23 = vadd.f32 %v864_v8, %v768_v10  ;;  %v3279_v57 = vld [vmem:[%s2515_s15 + $0x168] sm:$0xff]  ;;  %v3297_v8 = vld [vmem:[%s2828_s10 + $0xf0] sm:$0xff] }
 0x117   : > { %957 = vst [vmem:[%s2895_s14 + $0x180] sm:$0xff] %v925_v28  ;;  %v895_v3 = vadd.f32 %v863_v17, %v767_v19  ;;  %4235 = vst [vmem:[#allocation76_spill] sm:$0xff] %v3279_v57  ;;  %v832_v31 = vpop.permute.xlu1 %831  ;;  %v3294_v19 = vld [vmem:[%s2828_s10 + $0xf8] sm:$0xff]  ;;  %v772_v17 = vmul.f32 %v2689_v33, %v3282_v27 }
 0x118   : > { %v830_v25 = vpop.permute.xlu0 %829  ;;  %v928_v32 = vmul.f32 0.088388346, %v896_v23  ;;  %v866_v28 = vmul.f32 %v832_v31, %v3264_v26  ;;  %v771_v23 = vmul.f32 %v2692_v34, %v3285_v4  ;;  %v3306_v31 = vld [vmem:[%s2515_s15 + $0x198] sm:$0xff] }
 0x119   : > { %v927_v30 = vmul.f32 0.088388346, %v895_v3  ;;  %v865_v10 = vmul.f32 %v830_v25, %v3267_v6  ;;  %1299 = vrot.lane.b32.xlu1 %v3276_v29, %s2140_s16 }
 0x11a   : > { %1297 = vrot.lane.b32.xlu0 %v3279_v57, %s2140_s16  ;;  %960 = vst [vmem:[%s2895_s14 + $0x1b0] sm:$0xff] %v928_v32  ;;  %v898_v25 = vadd.f32 %v866_v28, %v770_v12  ;;  %v3309_v57 = vld [vmem:[%s2515_s15 + $0x188] sm:$0xff]  ;;  %v998_v12 = vmul.f32 %v2699_v35, %v2859_v56  ;;  %v1000_v56 = vmul.f32 %v2705_v36, %v2856_v59 }
 0x11b   : > { %959 = vst [vmem:[%s2895_s14 + $0x1a0] sm:$0xff] %v927_v30  ;;  %v897_v3 = vadd.f32 %v865_v10, %v769_v21  ;;  %v836_v29 = vpop.permute.xlu1 %835  ;;  %v3322_v30 = vld [vmem:[%s2515_s15 + $0x1b8] sm:$0xff]  ;;  %v1001_v59 = vmul.f32 %v2718_v39, %v2888_v58  ;;  %v1004_v39 = vmul.f32 %v2725_v40, %v2922_v46  ;;  %v4238_v40 = vld [vmem:[#allocation28_spill] sm:$0xff] }
 0x11c   : > { %v834_v6 = vpop.permute.xlu0 %833  ;;  %v930_v26 = vmul.f32 0.088388346, %v898_v25  ;;  %v868_v33 = vmul.f32 %v836_v29, %v3294_v19  ;;  %v3325_v29 = vld [vmem:[%s2515_s15 + $0x1a8] sm:$0xff] }
 0x11d   : > { %v929_v50 = vmul.f32 0.088388346, %v897_v3  ;;  %v867_v34 = vmul.f32 %v834_v6, %v3297_v8  ;;  %1303 = vrot.lane.b32.xlu1 %v3306_v31, %s2140_s16 }
 0x11e   : > { %1301 = vrot.lane.b32.xlu0 %v3309_v57, %s2140_s16  ;;  %962 = vst [vmem:[%s2895_s14 + $0x1d0] sm:$0xff] %v930_v26  ;;  %v900_v21 = vadd.f32 %v868_v33, %v772_v17  ;;  %v3348_v26 = vld [vmem:[%s2515_s15 + $0x1d8] sm:$0xff]  ;;  %v3351_v17 = vld [vmem:[%s2515_s15 + $0x1c8] sm:$0xff] }
 0x11f   : > { %961 = vst [vmem:[%s2895_s14 + $0x1c0] sm:$0xff] %v929_v50  ;;  %v899_v32 = vadd.f32 %v867_v34, %v771_v23  ;;  %v1032_v6 = vpop.permute.xlu1 %1031 }
 0x120   : > { %v1030_v28 = vpop.permute.xlu0 %1029  ;;  %v932_v10 = vmul.f32 0.088388346, %v900_v21  ;;  %v1094_v3 = vmul.f32 %v1032_v6, %v2872_v53  ;;  %v999_v53 = vmul.f32 %v2708_v37, %v2831_v60 }
 0x121   : > { %v931_v25 = vmul.f32 0.088388346, %v899_v32  ;;  %v1093_v35 = vmul.f32 %v1030_v28, %v2843_v62  ;;  %1307 = vrot.lane.b32.xlu1 %v3322_v30, %s2140_s16  ;;  %v3384_v28 = vld [vmem:[%s2598_s30 + $0x18] sm:$0xff] }
 0x122   : > { %1305 = vrot.lane.b32.xlu0 %v3325_v29, %s2140_s16  ;;  %964 = vst [vmem:[%s2895_s14 + $0x1f0] sm:$0xff] %v932_v10  ;;  %v1126_v62 = vadd.f32 %v1094_v3, %v998_v12  ;;  %v3366_v12 = vld [vmem:[%s2515_s15 + $0x1f8] sm:$0xff]  ;;  %4236 = vst [vmem:[#allocation77_spill] sm:$0xff] %v3384_v28 }
 0x123   : > { %963 = vst [vmem:[%s2895_s14 + $0x1e0] sm:$0xff] %v931_v25  ;;  %v1125_v50 = vadd.f32 %v1093_v35, %v2602_v16  ;;  %v1036_v23 = vpop.permute.xlu1 %1035  ;;  %v1002_v16 = vmul.f32 %v2715_v38, %v2885_v49  ;;  %v1003_v49 = vmul.f32 %v2728_v41, %v2925_v45  ;;  %v4239_v41 = vld [vmem:[#allocation31_spill] sm:$0xff]  ;;  %v4240_v45 = vld [vmem:[#allocation4_spill] sm:$0xff]  ;;  %v4241_v35 = vld [vmem:[#allocation5_spill] sm:$0xff] }
 0x124   : > { %v1034_v33 = vpop.permute.xlu0 %1033  ;;  %1158 = vst [vmem:[%s3334_s17 + $0x10] sm:$0xff] %v1126_v62  ;;  %v1096_v36 = vmul.f32 %v1036_v23, %v2869_v14  ;;  %v3369_v14 = vld [vmem:[%s2515_s15 + $0x1e8] sm:$0xff]  ;;  %v1006_v3 = vmul.f32 %v4240_v45, %v4239_v41 }
 0x125   : > { %1157 = vst [vmem:[%s3334_s17] sm:$0xff] %v1125_v50  ;;  %v1095_v37 = vmul.f32 %v1034_v33, %v2840_v61  ;;  %1311 = vrot.lane.b32.xlu1 %v3348_v26, %s2140_s16  ;;  %v3402_v50 = vld [vmem:[%s2598_s30 + $0x38] sm:$0xff] }
 0x126   : > { %1309 = vrot.lane.b32.xlu0 %v3351_v17, %s2140_s16  ;;  %v1128_v60 = vadd.f32 %v1096_v36, %v1000_v56  ;;  %v1005_v56 = vmul.f32 %v4241_v35, %v2955_v43  ;;  %4242 = vst [vmem:[#allocation28_spill] sm:$0xff] %v3402_v50  ;;  %v4245_v43 = vld [vmem:[#allocation35_spill] sm:$0xff] }
 0x127   : > { %v1127_v34 = vadd.f32 %v1095_v37, %v999_v53  ;;  %v1040_v61 = vpop.permute.xlu1 %1039  ;;  %v4244_v37 = vld [vmem:[#allocation32_spill] sm:$0xff] }
 0x128   : > { %v1038_v21 = vpop.permute.xlu0 %1037  ;;  %1160 = vst [vmem:[%s3334_s17 + $0x30] sm:$0xff] %v1128_v60  ;;  %v1098_v32 = vmul.f32 %v1040_v61, %v2904_v48  ;;  %v3387_v48 = vld [vmem:[%s2598_s30 + $0x8] sm:$0xff] }
 0x129   : > { %1159 = vst [vmem:[%s3334_s17 + $0x20] sm:$0xff] %v1127_v34  ;;  %v1097_v38 = vmul.f32 %v1038_v21, %v2907_v47  ;;  %1315 = vrot.lane.b32.xlu1 %v3366_v12, %s2140_s16  ;;  %4237 = vst [vmem:[#allocation78_spill] sm:$0xff] %v3387_v48  ;;  %v4247_v34 = vld [vmem:[#allocation7_spill] sm:$0xff] }
 0x12a   : > { %1313 = vrot.lane.b32.xlu0 %v3369_v14, %s2140_s16  ;;  %v1130_v58 = vadd.f32 %v1098_v32, %v1002_v16  ;;  %v1007_v61 = vmul.f32 %v4247_v34, %v2985_v0  ;;  %v4251_v0 = vld [vmem:[#allocation39_spill] sm:$0xff] }
 0x12b   : > { %v1129_v6 = vadd.f32 %v1097_v38, %v1001_v59  ;;  %v1044_v47 = vpop.permute.xlu1 %1043  ;;  %v4246_v59 = vld [vmem:[#allocation6_spill] sm:$0xff]  ;;  %v3420_v38 = vld [vmem:[%s2598_s30 + $0x58] sm:$0xff] }
 0x12c   : > { %v1042_v10 = vpop.permute.xlu0 %1041  ;;  %1162 = vst [vmem:[%s3334_s17 + $0x50] sm:$0xff] %v1130_v58  ;;  %v1100_v25 = vmul.f32 %v1044_v47, %v2934_v15  ;;  %v3405_v15 = vld [vmem:[%s2598_s30 + $0x28] sm:$0xff]  ;;  %v1008_v60 = vmul.f32 %v4246_v59, %v4245_v43  ;;  %4248 = vst [vmem:[#allocation4_spill] sm:$0xff] %v3420_v38 }
 0x12d   : > { %1161 = vst [vmem:[%s3334_s17 + $0x40] sm:$0xff] %v1129_v6  ;;  %v1099_v46 = vmul.f32 %v1042_v10, %v4238_v40  ;;  %1511 = vrot.lane.b32.xlu1 %v3384_v28, %s2140_s16  ;;  %4243 = vst [vmem:[#allocation31_spill] sm:$0xff] %v3405_v15  ;;  %v4250_v6 = vld [vmem:[#allocation36_spill] sm:$0xff]  ;;  %v4253_v40 = vld [vmem:[#allocation9_spill] sm:$0xff] }
 0x12e   : > { %1509 = vrot.lane.b32.xlu0 %v3387_v48, %s2140_s16  ;;  %v1132_v53 = vadd.f32 %v1100_v25, %v1004_v39  ;;  %v4252_v10 = vld [vmem:[#allocation8_spill] sm:$0xff] }
 0x12f   : > { %v1131_v62 = vadd.f32 %v1099_v46, %v1003_v49  ;;  %v1048_v23 = vpop.permute.xlu1 %1047  ;;  %v1010_v25 = vmul.f32 %v4252_v10, %v4251_v0  ;;  %v1009_v46 = vmul.f32 %v4253_v40, %v3015_v51  ;;  %v4257_v51 = vld [vmem:[#allocation43_spill] sm:$0xff] }
 0x130   : > { %v1046_v33 = vpop.permute.xlu0 %1045  ;;  %1164 = vst [vmem:[%s3334_s17 + $0x70] sm:$0xff] %v1132_v53  ;;  %v1102_v36 = vmul.f32 %v1048_v23, %v2964_v63  ;;  %v3423_v63 = vld [vmem:[%s2598_s30 + $0x48] sm:$0xff]  ;;  %v3474_v40 = vld [vmem:[%s2598_s30 + $0xb8] sm:$0xff] }
 0x131   : > { %1163 = vst [vmem:[%s3334_s17 + $0x60] sm:$0xff] %v1131_v62  ;;  %v1101_v16 = vmul.f32 %v1046_v33, %v4244_v37  ;;  %1515 = vrot.lane.b32.xlu1 %v3402_v50, %s2140_s16  ;;  %4249 = vst [vmem:[#allocation5_spill] sm:$0xff] %v3423_v63  ;;  %v4256_v62 = vld [vmem:[#allocation40_spill] sm:$0xff]  ;;  %v4258_v33 = vld [vmem:[#allocation10_spill] sm:$0xff] }
 0x132   : > { %1513 = vrot.lane.b32.xlu0 %v3405_v15, %s2140_s16  ;;  %v1134_v21 = vadd.f32 %v1102_v36, %v1006_v3  ;;  %v3438_v3 = vld [vmem:[%s2598_s30 + $0x78] sm:$0xff]  ;;  %v1012_v36 = vmul.f32 %v4258_v33, %v4257_v51  ;;  %4266 = vst [vmem:[#allocation36_spill] sm:$0xff] %v3474_v40  ;;  %v3636_v50 = vld [vmem:[%s2828_s10] sm:$0xff] }
 0x133   : > { %v1133_v32 = vadd.f32 %v1101_v16, %v1005_v56  ;;  %v1052_v39 = vpop.permute.xlu1 %1051  ;;  %4254 = vst [vmem:[#allocation32_spill] sm:$0xff] %v3438_v3  ;;  %v4259_v37 = vld [vmem:[#allocation11_spill] sm:$0xff] }
 0x134   : > { %v1050_v49 = vpop.permute.xlu0 %1049  ;;  %1166 = vst [vmem:[%s3334_s17 + $0x90] sm:$0xff] %v1134_v21  ;;  %v1104_v58 = vmul.f32 %v1052_v39, %v2994_v5  ;;  %v3441_v5 = vld [vmem:[%s2598_s30 + $0x68] sm:$0xff]  ;;  %v1011_v16 = vmul.f32 %v4259_v37, %v3045_v55 }
 0x135   : > { %1165 = vst [vmem:[%s3334_s17 + $0x80] sm:$0xff] %v1133_v32  ;;  %v1103_v47 = vmul.f32 %v1050_v49, %v4250_v6  ;;  %1519 = vrot.lane.b32.xlu1 %v3420_v38, %s2140_s16  ;;  %4255 = vst [vmem:[#allocation35_spill] sm:$0xff] %v3441_v5  ;;  %v4262_v32 = vld [vmem:[#allocation44_spill] sm:$0xff]  ;;  %v4263_v49 = vld [vmem:[#allocation47_spill] sm:$0xff] }
 0x136   : > { %1517 = vrot.lane.b32.xlu0 %v3423_v63, %s2140_s16  ;;  %v1136_v41 = vadd.f32 %v1104_v58, %v1008_v60  ;;  %v3456_v60 = vld [vmem:[%s2598_s30 + $0x98] sm:$0xff]  ;;  %v4264_v58 = vld [vmem:[#allocation12_spill] sm:$0xff] }
 0x137   : > { %v1135_v45 = vadd.f32 %v1103_v47, %v1007_v61  ;;  %v1056_v35 = vpop.permute.xlu1 %1055  ;;  %4260 = vst [vmem:[#allocation6_spill] sm:$0xff] %v3456_v60  ;;  %v1014_v6 = vmul.f32 %v4264_v58, %v4263_v49  ;;  %v4265_v47 = vld [vmem:[#allocation13_spill] sm:$0xff]  ;;  %v4274_v58 = vld [vmem:[#allocation52_spill] sm:$0xff] }
 0x138   : > { %v1054_v56 = vpop.permute.xlu0 %1053  ;;  %1168 = vst [vmem:[%s3334_s17 + $0xb0] sm:$0xff] %v1136_v41  ;;  %v1106_v53 = vmul.f32 %v1056_v35, %v3024_v7  ;;  %v3459_v7 = vld [vmem:[%s2598_s30 + $0x88] sm:$0xff]  ;;  %v1013_v0 = vmul.f32 %v4265_v47, %v3075_v1 }
 0x139   : > { %1167 = vst [vmem:[%s3334_s17 + $0xa0] sm:$0xff] %v1135_v45  ;;  %v1105_v23 = vmul.f32 %v1054_v56, %v4256_v62  ;;  %1523 = vrot.lane.b32.xlu1 %v3438_v3, %s2140_s16  ;;  %4261 = vst [vmem:[#allocation7_spill] sm:$0xff] %v3459_v7  ;;  %v4268_v56 = vld [vmem:[#allocation48_spill] sm:$0xff]  ;;  %v4269_v62 = vld [vmem:[#allocation51_spill] sm:$0xff] }
 0x13a   : > { %1521 = vrot.lane.b32.xlu0 %v3441_v5, %s2140_s16  ;;  %v1138_v43 = vadd.f32 %v1106_v53, %v1010_v25 }
 0x13b   : > { %v1137_v59 = vadd.f32 %v1105_v23, %v1009_v46  ;;  %v1060_v34 = vpop.permute.xlu1 %1059  ;;  %v3477_v46 = vld [vmem:[%s2598_s30 + $0xa8] sm:$0xff]  ;;  %v4270_v23 = vld [vmem:[#allocation14_spill] sm:$0xff] }
 0x13c   : > { %v1058_v61 = vpop.permute.xlu0 %1057  ;;  %1170 = vst [vmem:[%s3334_s17 + $0xd0] sm:$0xff] %v1138_v43  ;;  %v1108_v21 = vmul.f32 %v1060_v34, %v3054_v9  ;;  %4267 = vst [vmem:[#allocation39_spill] sm:$0xff] %v3477_v46  ;;  %v1016_v33 = vmul.f32 %v4270_v23, %v4269_v62  ;;  %v3495_v34 = vld [vmem:[%s2598_s30 + $0xc8] sm:$0xff] }
 0x13d   : > { %1169 = vst [vmem:[%s3334_s17 + $0xc0] sm:$0xff] %v1137_v59  ;;  %v1107_v39 = vmul.f32 %v1058_v61, %v4262_v32  ;;  %1527 = vrot.lane.b32.xlu1 %v3456_v60, %s2140_s16  ;;  %v3492_v59 = vld [vmem:[%s2598_s30 + $0xd8] sm:$0xff]  ;;  %4273 = vst [vmem:[#allocation9_spill] sm:$0xff] %v3495_v34  ;;  %v3513_v23 = vld [vmem:[%s2598_s30 + $0xe8] sm:$0xff] }
 0x13e   : > { %1525 = vrot.lane.b32.xlu0 %v3459_v7, %s2140_s16  ;;  %v1140_v10 = vadd.f32 %v1108_v21, %v1012_v36  ;;  %v4271_v36 = vld [vmem:[#allocation15_spill] sm:$0xff]  ;;  %4272 = vst [vmem:[#allocation8_spill] sm:$0xff] %v3492_v59  ;;  %4279 = vst [vmem:[#allocation43_spill] sm:$0xff] %v3513_v23 }
 0x13f   : > { %v1139_v25 = vadd.f32 %v1107_v39, %v1011_v16  ;;  %v1064_v41 = vpop.permute.xlu1 %1063  ;;  %v1015_v37 = vmul.f32 %v4271_v36, %v3105_v52 }
 0x140   : > { %v1062_v45 = vpop.permute.xlu0 %1061  ;;  %1172 = vst [vmem:[%s3334_s17 + $0xf0] sm:$0xff] %v1140_v10  ;;  %v1110_v35 = vmul.f32 %v1064_v41, %v3084_v11 }
 0x141   : > { %1171 = vst [vmem:[%s3334_s17 + $0xe0] sm:$0xff] %v1139_v25  ;;  %v1109_v53 = vmul.f32 %v1062_v45, %v4268_v56  ;;  %1531 = vrot.lane.b32.xlu1 %v3474_v40, %s2140_s16  ;;  %v4277_v25 = vld [vmem:[#allocation17_spill] sm:$0xff] }
 0x142   : > { %1529 = vrot.lane.b32.xlu0 %v3477_v46, %s2140_s16  ;;  %v1142_v16 = vadd.f32 %v1110_v35, %v1014_v6  ;;  %v4275_v6 = vld [vmem:[#allocation55_spill] sm:$0xff]  ;;  %v1017_v41 = vmul.f32 %v4277_v25, %v3135_v54 }
 0x143   : > { %v1141_v43 = vadd.f32 %v1109_v53, %v1013_v0  ;;  %v1068_v61 = vpop.permute.xlu1 %1067  ;;  %v4276_v0 = vld [vmem:[#allocation16_spill] sm:$0xff]  ;;  %v3510_v53 = vld [vmem:[%s2598_s30 + $0xf8] sm:$0xff] }
 0x144   : > { %v1066_v21 = vpop.permute.xlu0 %1065  ;;  %1174 = vst [vmem:[%s3334_s17 + $0x110] sm:$0xff] %v1142_v16  ;;  %v1112_v39 = vmul.f32 %v1068_v61, %v3114_v13  ;;  %v1018_v10 = vmul.f32 %v4276_v0, %v4275_v6  ;;  %4278 = vst [vmem:[#allocation40_spill] sm:$0xff] %v3510_v53  ;;  %v4280_v61 = vld [vmem:[#allocation56_spill] sm:$0xff] }
 0x145   : > { %1173 = vst [vmem:[%s3334_s17 + $0x100] sm:$0xff] %v1141_v43  ;;  %v1111_v47 = vmul.f32 %v1066_v21, %v4274_v58  ;;  %1535 = vrot.lane.b32.xlu1 %v3492_v59, %s2140_s16 }
 0x146   : > { %1533 = vrot.lane.b32.xlu0 %v3495_v34, %s2140_s16  ;;  %v1144_v45 = vadd.f32 %v1112_v39, %v1016_v33  ;;  %v4281_v33 = vld [vmem:[#allocation59_spill] sm:$0xff] }
 0x147   : > { %v1143_v35 = vadd.f32 %v1111_v47, %v1015_v37  ;;  %v1072_v36 = vpop.permute.xlu1 %1071  ;;  %v4282_v37 = vld [vmem:[#allocation18_spill] sm:$0xff]  ;;  %v4283_v47 = vld [vmem:[#allocation19_spill] sm:$0xff]  ;;  %4318 = vst [vmem:[#allocation59_spill] sm:$0xff] %v3636_v50 }
 0x148   : > { %v1070_v16 = vpop.permute.xlu0 %1069  ;;  %1176 = vst [vmem:[%s3334_s17 + $0x130] sm:$0xff] %v1144_v45  ;;  %v1114_v43 = vmul.f32 %v1072_v36, %v3144_v18  ;;  %v1020_v39 = vmul.f32 %v4282_v37, %v4281_v33  ;;  %v1019_v0 = vmul.f32 %v4283_v47, %v3165_v2  ;;  %v3531_v36 = vld [vmem:[%s2598_s30 + $0x108] sm:$0xff]  ;;  %v4286_v37 = vld [vmem:[#allocation60_spill] sm:$0xff] }
 0x149   : > { %1175 = vst [vmem:[%s3334_s17 + $0x120] sm:$0xff] %v1143_v35  ;;  %v1113_v21 = vmul.f32 %v1070_v16, %v4280_v61  ;;  %1539 = vrot.lane.b32.xlu1 %v3510_v53, %s2140_s16  ;;  %v3528_v35 = vld [vmem:[%s2598_s30 + $0x118] sm:$0xff]  ;;  %4285 = vst [vmem:[#allocation11_spill] sm:$0xff] %v3531_v36 }
 0x14a   : > { %1537 = vrot.lane.b32.xlu0 %v3513_v23, %s2140_s16  ;;  %v1146_v25 = vadd.f32 %v1114_v43, %v1018_v10  ;;  %4284 = vst [vmem:[#allocation10_spill] sm:$0xff] %v3528_v35  ;;  %v4287_v10 = vld [vmem:[#allocation63_spill] sm:$0xff] }
 0x14b   : > { %v1145_v45 = vadd.f32 %v1113_v21, %v1017_v41  ;;  %v1076_v16 = vpop.permute.xlu1 %1075  ;;  %v4288_v41 = vld [vmem:[#allocation20_spill] sm:$0xff]  ;;  %v4289_v21 = vld [vmem:[#allocation21_spill] sm:$0xff] }
 0x14c   : > { %v1074_v53 = vpop.permute.xlu0 %1073  ;;  %1178 = vst [vmem:[%s3334_s17 + $0x150] sm:$0xff] %v1146_v25  ;;  %v1116_v23 = vmul.f32 %v1076_v16, %v3174_v20  ;;  %v1022_v43 = vmul.f32 %v4288_v41, %v4287_v10  ;;  %v1021_v47 = vmul.f32 %v4289_v21, %v3195_v44  ;;  %v3549_v16 = vld [vmem:[%s2598_s30 + $0x128] sm:$0xff]  ;;  %v4292_v41 = vld [vmem:[#allocation64_spill] sm:$0xff] }
 0x14d   : > { %1177 = vst [vmem:[%s3334_s17 + $0x140] sm:$0xff] %v1145_v45  ;;  %v1115_v34 = vmul.f32 %v1074_v53, %v4286_v37  ;;  %1543 = vrot.lane.b32.xlu1 %v3528_v35, %s2140_s16  ;;  %v3546_v45 = vld [vmem:[%s2598_s30 + $0x138] sm:$0xff]  ;;  %4291 = vst [vmem:[#allocation47_spill] sm:$0xff] %v3549_v16 }
 0x14e   : > { %1541 = vrot.lane.b32.xlu0 %v3531_v36, %s2140_s16  ;;  %v1148_v59 = vadd.f32 %v1116_v23, %v1020_v39  ;;  %4290 = vst [vmem:[#allocation44_spill] sm:$0xff] %v3546_v45  ;;  %v4294_v23 = vld [vmem:[#allocation22_spill] sm:$0xff] }
 0x14f   : > { %v1147_v25 = vadd.f32 %v1115_v34, %v1019_v0  ;;  %v1080_v53 = vpop.permute.xlu1 %1079  ;;  %v4293_v34 = vld [vmem:[#allocation67_spill] sm:$0xff] }
 0x150   : > { %v1078_v35 = vpop.permute.xlu0 %1077  ;;  %1180 = vst [vmem:[%s3334_s17 + $0x170] sm:$0xff] %v1148_v59  ;;  %v1118_v36 = vmul.f32 %v1080_v53, %v3204_v22  ;;  %v1024_v39 = vmul.f32 %v4294_v23, %v4293_v34  ;;  %v4295_v0 = vld [vmem:[#allocation23_spill] sm:$0xff]  ;;  %v3567_v53 = vld [vmem:[%s2598_s30 + $0x148] sm:$0xff]  ;;  %v4298_v23 = vld [vmem:[#allocation68_spill] sm:$0xff] }
 0x151   : > { %1179 = vst [vmem:[%s3334_s17 + $0x160] sm:$0xff] %v1147_v25  ;;  %v1117_v46 = vmul.f32 %v1078_v35, %v4292_v41  ;;  %1547 = vrot.lane.b32.xlu1 %v3546_v45, %s2140_s16  ;;  %v1023_v21 = vmul.f32 %v4295_v0, %v3225_v42  ;;  %v3564_v25 = vld [vmem:[%s2598_s30 + $0x158] sm:$0xff]  ;;  %4297 = vst [vmem:[#allocation13_spill] sm:$0xff] %v3567_v53  ;;  %v4302_v0 = vld [vmem:[#allocation25_spill] sm:$0xff] }
 0x152   : > { %1545 = vrot.lane.b32.xlu0 %v3549_v16, %s2140_s16  ;;  %v1150_v40 = vadd.f32 %v1118_v36, %v1022_v43  ;;  %4296 = vst [vmem:[#allocation12_spill] sm:$0xff] %v3564_v25  ;;  %v4300_v36 = vld [vmem:[#allocation24_spill] sm:$0xff] }
 0x153   : > { %v1149_v59 = vadd.f32 %v1117_v46, %v1021_v47  ;;  %v1084_v35 = vpop.permute.xlu1 %1083  ;;  %v4299_v46 = vld [vmem:[#allocation71_spill] sm:$0xff]  ;;  %v4301_v47 = vld [vmem:[#allocation72_spill] sm:$0xff] }
 0x154   : > { %v1082_v45 = vpop.permute.xlu0 %1081  ;;  %1182 = vst [vmem:[%s3334_s17 + $0x190] sm:$0xff] %v1150_v40  ;;  %v1120_v16 = vmul.f32 %v1084_v35, %v3234_v24  ;;  %v1026_v43 = vmul.f32 %v4300_v36, %v4299_v46  ;;  %v1025_v60 = vmul.f32 %v4302_v0, %v4301_v47  ;;  %v3585_v35 = vld [vmem:[%s2598_s30 + $0x168] sm:$0xff]  ;;  %v4306_v36 = vld [vmem:[#allocation74_spill] sm:$0xff] }
 0x155   : > { %1181 = vst [vmem:[%s3334_s17 + $0x180] sm:$0xff] %v1149_v59  ;;  %v1119_v7 = vmul.f32 %v1082_v45, %v4298_v23  ;;  %1551 = vrot.lane.b32.xlu1 %v3564_v25, %s2140_s16  ;;  %v3582_v59 = vld [vmem:[%s2598_s30 + $0x178] sm:$0xff]  ;;  %4304 = vst [vmem:[#allocation51_spill] sm:$0xff] %v3585_v35 }
 0x156   : > { %1549 = vrot.lane.b32.xlu0 %v3567_v53, %s2140_s16  ;;  %v1152_v5 = vadd.f32 %v1120_v16, %v1024_v39  ;;  %4303 = vst [vmem:[#allocation48_spill] sm:$0xff] %v3582_v59  ;;  %v4305_v53 = vld [vmem:[#allocation73_spill] sm:$0xff]  ;;  %v4308_v39 = vld [vmem:[#allocation27_spill] sm:$0xff] }
 0x157   : > { %v1151_v40 = vadd.f32 %v1119_v7, %v1023_v21  ;;  %v1088_v45 = vpop.permute.xlu1 %1087  ;;  %v4307_v7 = vld [vmem:[#allocation26_spill] sm:$0xff]  ;;  %v1027_v21 = vmul.f32 %v4308_v39, %v3285_v4 }
 0x158   : > { %v1086_v25 = vpop.permute.xlu0 %1085  ;;  %1184 = vst [vmem:[%s3334_s17 + $0x1b0] sm:$0xff] %v1152_v5  ;;  %v1122_v3 = vmul.f32 %v1088_v45, %v4305_v53  ;;  %v1028_v16 = vmul.f32 %v4307_v7, %v3282_v27  ;;  %v4314_v39 = vld [vmem:[#allocation30_spill] sm:$0xff] }
 0x159   : > { %1183 = vst [vmem:[%s3334_s17 + $0x1a0] sm:$0xff] %v1151_v40  ;;  %v1121_v63 = vmul.f32 %v1086_v25, %v4306_v36  ;;  %1555 = vrot.lane.b32.xlu1 %v3582_v59, %s2140_s16  ;;  %v3600_v40 = vld [vmem:[%s2598_s30 + $0x198] sm:$0xff]  ;;  %v3603_v25 = vld [vmem:[%s2598_s30 + $0x188] sm:$0xff] }
 0x15a   : > { %1553 = vrot.lane.b32.xlu0 %v3585_v35, %s2140_s16  ;;  %v1154_v5 = vadd.f32 %v1122_v3, %v1026_v43  ;;  %4309 = vst [vmem:[#allocation14_spill] sm:$0xff] %v3600_v40  ;;  %4310 = vst [vmem:[#allocation15_spill] sm:$0xff] %v3603_v25  ;;  %v4312_v3 = vld [vmem:[#allocation29_spill] sm:$0xff]  ;;  %v3619_v43 = vld [vmem:[%s2582_s29] sm:$0xff] }
 0x15b   : > { %v1153_v0 = vadd.f32 %v1121_v63, %v1025_v60  ;;  %v1092_v45 = vpop.permute.xlu1 %1091  ;;  %v3614_v63 = vld [vmem:[%s2582_s29 + $0x8] sm:$0xff]  ;;  %4313 = vst [vmem:[#allocation55_spill] sm:$0xff] %v3619_v43 }
 0x15c   : > { %v1090_v59 = vpop.permute.xlu0 %1089  ;;  %1186 = vst [vmem:[%s3334_s17 + $0x1d0] sm:$0xff] %v1154_v5  ;;  %v1124_v7 = vmul.f32 %v1092_v45, %v3294_v19  ;;  %4311 = vst [vmem:[#allocation52_spill] sm:$0xff] %v3614_v63  ;;  %v1222_v60 = vmul.f32 %v3614_v63, %v4312_v3  ;;  %v1221_v5 = vmul.f32 %v3619_v43, %v4314_v39  ;;  %v3624_v45 = vld [vmem:[%s2598_s30 + $0x1b8] sm:$0xff]  ;;  %v3632_v3 = vld [vmem:[%s2828_s10 + $0x8] sm:$0xff] }
 0x15d   : > { %1185 = vst [vmem:[%s3334_s17 + $0x1c0] sm:$0xff] %v1153_v0  ;;  %v1123_v35 = vmul.f32 %v1090_v59, %v3297_v8  ;;  %1559 = vrot.lane.b32.xlu1 %v3600_v40, %s2140_s16  ;;  %4315 = vst [vmem:[#allocation16_spill] sm:$0xff] %v3624_v45  ;;  %v3627_v40 = vld [vmem:[%s2598_s30 + $0x1a8] sm:$0xff]  ;;  %v3649_v39 = vld [vmem:[%s2582_s29 + $0x10] sm:$0xff] }
 0x15e   : > { %1557 = vrot.lane.b32.xlu0 %v3603_v25, %s2140_s16  ;;  %v1156_v0 = vadd.f32 %v1124_v7, %v1028_v16  ;;  %4316 = vst [vmem:[#allocation17_spill] sm:$0xff] %v3627_v40  ;;  %4317 = vst [vmem:[#allocation56_spill] sm:$0xff] %v3632_v3  ;;  %v3690_v63 = vld [vmem:[%s2828_s10 + $0x28] sm:$0xff] }
 0x15f   : > { %v1155_v59 = vadd.f32 %v1123_v35, %v1027_v21  ;;  %v1256_v38 = vpop.permute.xlu1 %1255  ;;  %v3644_v35 = vld [vmem:[%s2582_s29 + $0x18] sm:$0xff]  ;;  %v4320_v21 = vld [vmem:[#allocation33_spill] sm:$0xff]  ;;  %4321 = vst [vmem:[#allocation19_spill] sm:$0xff] %v3649_v39  ;;  %4333 = vst [vmem:[#allocation68_spill] sm:$0xff] %v3690_v63 }
 0x160   : > { %v1254_v25 = vpop.permute.xlu0 %1253  ;;  %1188 = vst [vmem:[%s3334_s17 + $0x1f0] sm:$0xff] %v1156_v0  ;;  %v1318_v15 = vmul.f32 %v3632_v3, %v1256_v38  ;;  %4319 = vst [vmem:[#allocation18_spill] sm:$0xff] %v3644_v35  ;;  %v1224_v7 = vmul.f32 %v3644_v35, %v4320_v21  ;;  %v4322_v38 = vld [vmem:[#allocation34_spill] sm:$0xff]  ;;  %v3660_v35 = vld [vmem:[%s2828_s10 + $0x18] sm:$0xff] }
 0x161   : > { %1187 = vst [vmem:[%s3334_s17 + $0x1e0] sm:$0xff] %v1155_v59  ;;  %v1317_v16 = vmul.f32 %v3636_v50, %v1254_v25  ;;  %1563 = vrot.lane.b32.xlu1 %v3624_v45, %s2140_s16  ;;  %v1223_v0 = vmul.f32 %v3649_v39, %v4322_v38  ;;  %v3654_v50 = vld [vmem:[%s2598_s30 + $0x1d8] sm:$0xff]  ;;  %v3657_v45 = vld [vmem:[%s2598_s30 + $0x1c8] sm:$0xff]  ;;  %4325 = vst [vmem:[#allocation20_spill] sm:$0xff] %v3660_v35 }
 0x162   : > { %1561 = vrot.lane.b32.xlu0 %v3627_v40, %s2140_s16  ;;  %v1350_v59 = vadd.f32 %v1318_v15, %v1222_v60  ;;  %4323 = vst [vmem:[#allocation60_spill] sm:$0xff] %v3654_v50  ;;  %4324 = vst [vmem:[#allocation63_spill] sm:$0xff] %v3657_v45  ;;  %v3664_v38 = vld [vmem:[%s2828_s10 + $0x10] sm:$0xff]  ;;  %v3672_v60 = vld [vmem:[%s2582_s29 + $0x28] sm:$0xff] }
 0x163   : > { %v1349_v25 = vadd.f32 %v1317_v16, %v1221_v5  ;;  %v1260_v40 = vpop.permute.xlu1 %1259  ;;  %4326 = vst [vmem:[#allocation21_spill] sm:$0xff] %v3664_v38  ;;  %4327 = vst [vmem:[#allocation64_spill] sm:$0xff] %v3672_v60  ;;  %v4328_v5 = vld [vmem:[#allocation37_spill] sm:$0xff] }
 0x164   : > { %v1258_v3 = vpop.permute.xlu0 %1257  ;;  %v1382_v43 = vmul.f32 0.088388346, %v1350_v59  ;;  %v1320_v48 = vmul.f32 %v3660_v35, %v1260_v40  ;;  %v1226_v16 = vmul.f32 %v3672_v60, %v4328_v5  ;;  %v3677_v59 = vld [vmem:[%s2582_s29 + $0x20] sm:$0xff]  ;;  %v4330_v40 = vld [vmem:[#allocation38_spill] sm:$0xff] }
 0x165   : > { %v1381_v21 = vmul.f32 0.088388346, %v1349_v25  ;;  %v1319_v15 = vmul.f32 %v3664_v38, %v1258_v3  ;;  %1567 = vrot.lane.b32.xlu1 %v3654_v50, %s2140_s16  ;;  %4329 = vst [vmem:[#allocation67_spill] sm:$0xff] %v3677_v59  ;;  %v1225_v25 = vmul.f32 %v3677_v59, %v4330_v40  ;;  %v3684_v38 = vld [vmem:[%s2598_s30 + $0x1f8] sm:$0xff] }
 0x166   : > { %1565 = vrot.lane.b32.xlu0 %v3657_v45, %s2140_s16  ;;  %1414 = vst [vmem:[%s2895_s14 + $0x18] sm:$0xff] %v1382_v43  ;;  %v1352_v3 = vadd.f32 %v1320_v48, %v1224_v7  ;;  %4331 = vst [vmem:[#allocation22_spill] sm:$0xff] %v3684_v38  ;;  %v3687_v45 = vld [vmem:[%s2598_s30 + $0x1e8] sm:$0xff]  ;;  %v3694_v43 = vld [vmem:[%s2828_s10 + $0x20] sm:$0xff] }
 0x167   : > { %1413 = vst [vmem:[%s2895_s14 + $0x8] sm:$0xff] %v1381_v21  ;;  %v1351_v50 = vadd.f32 %v1319_v15, %v1223_v0  ;;  %4332 = vst [vmem:[#allocation23_spill] sm:$0xff] %v3687_v45  ;;  %v1264_v35 = vpop.permute.xlu1 %1263  ;;  %v3702_v7 = vld [vmem:[%s2582_s29 + $0x38] sm:$0xff]  ;;  %v4336_v0 = vld [vmem:[#allocation41_spill] sm:$0xff] }
 0x168   : > { %v1262_v39 = vpop.permute.xlu0 %1261  ;;  %v1384_v5 = vmul.f32 0.088388346, %v1352_v3  ;;  %v1322_v40 = vmul.f32 %v3690_v63, %v1264_v35  ;;  %4334 = vst [vmem:[#allocation71_spill] sm:$0xff] %v3694_v43  ;;  %4335 = vst [vmem:[#allocation24_spill] sm:$0xff] %v3702_v7  ;;  %v3707_v21 = vld [vmem:[%s2582_s29 + $0x30] sm:$0xff]  ;;  %v3714_v59 = vld [vmem:[%s2828_s10 + $0x38] sm:$0xff] }
 0x169   : > { %v1383_v60 = vmul.f32 0.088388346, %v1351_v50  ;;  %v1321_v48 = vmul.f32 %v3694_v43, %v1262_v39  ;;  %1571 = vrot.lane.b32.xlu1 %v3684_v38, %s2140_s16  ;;  %v1228_v50 = vmul.f32 %v3702_v7, %v4336_v0  ;;  %4337 = vst [vmem:[#allocation72_spill] sm:$0xff] %v3707_v21  ;;  %v4338_v35 = vld [vmem:[#allocation42_spill] sm:$0xff]  ;;  %4339 = vst [vmem:[#allocation25_spill] sm:$0xff] %v3714_v59 }
 0x16a   : > { %1569 = vrot.lane.b32.xlu0 %v3687_v45, %s2140_s16  ;;  %v1227_v15 = vmul.f32 %v3707_v21, %v4338_v35  ;;  %1416 = vst [vmem:[%s2895_s14 + $0x38] sm:$0xff] %v1384_v5  ;;  %v1354_v39 = vadd.f32 %v1322_v40, %v1226_v16  ;;  %v3718_v7 = vld [vmem:[%s2828_s10 + $0x30] sm:$0xff]  ;;  %v3722_v5 = vld [vmem:[%s2582_s29 + $0x48] sm:$0xff] }
 0x16b   : > { %1415 = vst [vmem:[%s2895_s14 + $0x28] sm:$0xff] %v1383_v60  ;;  %v1353_v3 = vadd.f32 %v1321_v48, %v1225_v25  ;;  %v1268_v38 = vpop.permute.xlu1 %1267  ;;  %4340 = vst [vmem:[#allocation73_spill] sm:$0xff] %v3718_v7  ;;  %v4342_v60 = vld [vmem:[#allocation45_spill] sm:$0xff]  ;;  %v3727_v25 = vld [vmem:[%s2582_s29 + $0x40] sm:$0xff] }
 0x16c   : > { %v1266_v45 = vpop.permute.xlu0 %1265  ;;  %v1386_v43 = vmul.f32 0.088388346, %v1354_v39  ;;  %v1324_v0 = vmul.f32 %v3714_v59, %v1268_v38  ;;  %4341 = vst [vmem:[#allocation74_spill] sm:$0xff] %v3722_v5  ;;  %v1230_v16 = vmul.f32 %v3722_v5, %v4342_v60  ;;  %4343 = vst [vmem:[#allocation26_spill] sm:$0xff] %v3727_v25  ;;  %v4344_v40 = vld [vmem:[#allocation46_spill] sm:$0xff]  ;;  %v3734_v21 = vld [vmem:[%s2828_s10 + $0x48] sm:$0xff] }
 0x16d   : > { %v1385_v63 = vmul.f32 0.088388346, %v1353_v3  ;;  %v1323_v35 = vmul.f32 %v3718_v7, %v1266_v45  ;;  %v1229_v48 = vmul.f32 %v3727_v25, %v4344_v40  ;;  %4345 = vst [vmem:[#allocation27_spill] sm:$0xff] %v3734_v21  ;;  %v3738_v5 = vld [vmem:[%s2828_s10 + $0x40] sm:$0xff]  ;;  %v3754_v25 = vld [vmem:[%s2828_s10 + $0x58] sm:$0xff] }
 0x16e   : > { %1418 = vst [vmem:[%s2895_s14 + $0x58] sm:$0xff] %v1386_v43  ;;  %v1356_v38 = vadd.f32 %v1324_v0, %v1228_v50  ;;  %4346 = vst [vmem:[#allocation29_spill] sm:$0xff] %v3738_v5  ;;  %v3742_v43 = vld [vmem:[%s2582_s29 + $0x58] sm:$0xff]  ;;  %v4350_v0 = vld [vmem:[#allocation50_spill] sm:$0xff] }
 0x16f   : > { %1417 = vst [vmem:[%s2895_s14 + $0x48] sm:$0xff] %v1385_v63  ;;  %v1355_v39 = vadd.f32 %v1323_v35, %v1227_v15  ;;  %v1272_v3 = vpop.permute.xlu1 %1271  ;;  %4347 = vst [vmem:[#allocation30_spill] sm:$0xff] %v3742_v43  ;;  %v4348_v63 = vld [vmem:[#allocation49_spill] sm:$0xff]  ;;  %v3747_v15 = vld [vmem:[%s2582_s29 + $0x50] sm:$0xff] }
 0x170   : > { %v1270_v45 = vpop.permute.xlu0 %1269  ;;  %v1388_v7 = vmul.f32 0.088388346, %v1356_v38  ;;  %v1326_v60 = vmul.f32 %v3734_v21, %v1272_v3  ;;  %v1232_v50 = vmul.f32 %v3742_v43, %v4348_v63  ;;  %4349 = vst [vmem:[#allocation33_spill] sm:$0xff] %v3747_v15  ;;  %v1231_v35 = vmul.f32 %v3747_v15, %v4350_v0  ;;  %4351 = vst [vmem:[#allocation34_spill] sm:$0xff] %v3754_v25  ;;  %v3758_v43 = vld [vmem:[%s2828_s10 + $0x50] sm:$0xff] }
 0x171   : > { %v1387_v59 = vmul.f32 0.088388346, %v1355_v39  ;;  %v1325_v40 = vmul.f32 %v3738_v5, %v1270_v45  ;;  %4352 = vst [vmem:[#allocation37_spill] sm:$0xff] %v3758_v43 }
 0x172   : > { %1420 = vst [vmem:[%s2895_s14 + $0x78] sm:$0xff] %v1388_v7  ;;  %v1358_v38 = vadd.f32 %v1326_v60, %v1230_v16  ;;  %v3762_v7 = vld [vmem:[%s2582_s29 + $0x68] sm:$0xff]  ;;  %v4355_v60 = vld [vmem:[#allocation54_spill] sm:$0xff] }
 0x173   : > { %1419 = vst [vmem:[%s2895_s14 + $0x68] sm:$0xff] %v1387_v59  ;;  %v1357_v39 = vadd.f32 %v1325_v40, %v1229_v48  ;;  %v1276_v3 = vpop.permute.xlu1 %1275  ;;  %4353 = vst [vmem:[#allocation38_spill] sm:$0xff] %v3762_v7  ;;  %v4354_v59 = vld [vmem:[#allocation53_spill] sm:$0xff]  ;;  %v3767_v48 = vld [vmem:[%s2582_s29 + $0x60] sm:$0xff] }
 0x174   : > { %v1274_v45 = vpop.permute.xlu0 %1273  ;;  %v1390_v5 = vmul.f32 0.088388346, %v1358_v38  ;;  %v1328_v63 = vmul.f32 %v3754_v25, %v1276_v3  ;;  %v1234_v16 = vmul.f32 %v3762_v7, %v4354_v59  ;;  %v1233_v40 = vmul.f32 %v3767_v48, %v4355_v60  ;;  %v3778_v59 = vld [vmem:[%s2828_s10 + $0x60] sm:$0xff]  ;;  %v4358_v60 = vld [vmem:[#allocation57_spill] sm:$0xff] }
 0x175   : > { %v1389_v21 = vmul.f32 0.088388346, %v1357_v39  ;;  %v1327_v0 = vmul.f32 %v3758_v43, %v1274_v45  ;;  %v3774_v43 = vld [vmem:[%s2828_s10 + $0x68] sm:$0xff]  ;;  %4357 = vst [vmem:[#allocation42_spill] sm:$0xff] %v3778_v59 }
 0x176   : > { %1422 = vst [vmem:[%s2895_s14 + $0x98] sm:$0xff] %v1390_v5  ;;  %v1360_v38 = vadd.f32 %v1328_v63, %v1232_v50  ;;  %4356 = vst [vmem:[#allocation41_spill] sm:$0xff] %v3774_v43  ;;  %v1236_v5 = vmul.f32 %v4358_v60, %v4257_v51  ;;  %v4361_v60 = vld [vmem:[#allocation62_spill] sm:$0xff] }
 0x177   : > { %1421 = vst [vmem:[%s2895_s14 + $0x88] sm:$0xff] %v1389_v21  ;;  %v1359_v39 = vadd.f32 %v1327_v0, %v1231_v35  ;;  %v1280_v3 = vpop.permute.xlu1 %1279  ;;  %v4359_v21 = vld [vmem:[#allocation58_spill] sm:$0xff] }
 0x178   : > { %v1278_v25 = vpop.permute.xlu0 %1277  ;;  %v1392_v15 = vmul.f32 0.088388346, %v1360_v38  ;;  %v1330_v28 = vmul.f32 %v3774_v43, %v1280_v3  ;;  %v1235_v50 = vmul.f32 %v4359_v21, %v3045_v55  ;;  %v1237_v55 = vmul.f32 %v4361_v60, %v3075_v1  ;;  %v4362_v21 = vld [vmem:[#allocation65_spill] sm:$0xff] }
 0x179   : > { %v1391_v45 = vmul.f32 0.088388346, %v1359_v39  ;;  %v1329_v7 = vmul.f32 %v3778_v59, %v1278_v25  ;;  %v4360_v59 = vld [vmem:[#allocation61_spill] sm:$0xff] }
 0x17a   : > { %1424 = vst [vmem:[%s2895_s14 + $0xb8] sm:$0xff] %v1392_v15  ;;  %v1362_v35 = vadd.f32 %v1330_v28, %v1234_v16  ;;  %v1238_v51 = vmul.f32 %v4360_v59, %v4263_v49  ;;  %v1240_v49 = vmul.f32 %v4362_v21, %v4269_v62  ;;  %v4363_v59 = vld [vmem:[#allocation66_spill] sm:$0xff] }
 0x17b   : > { %1423 = vst [vmem:[%s2895_s14 + $0xa8] sm:$0xff] %v1391_v45  ;;  %v1361_v63 = vadd.f32 %v1329_v7, %v1233_v40  ;;  %v1284_v0 = vpop.permute.xlu1 %1283  ;;  %v1239_v1 = vmul.f32 %v4363_v59, %v3105_v52 }
 0x17c   : > { %v1282_v38 = vpop.permute.xlu0 %1281  ;;  %v1394_v39 = vmul.f32 0.088388346, %v1362_v35  ;;  %v1332_v43 = vmul.f32 %v1284_v0, %v3054_v9 }
 0x17d   : > { %v1393_v3 = vmul.f32 0.088388346, %v1361_v63  ;;  %v1331_v25 = vmul.f32 %v1282_v38, %v4262_v32  ;;  %v4364_v38 = vld [vmem:[#allocation69_spill] sm:$0xff] }
 0x17e   : > { %1426 = vst [vmem:[%s2895_s14 + $0xd8] sm:$0xff] %v1394_v39  ;;  %v1364_v28 = vadd.f32 %v1332_v43, %v1236_v5  ;;  %v1242_v62 = vmul.f32 %v4364_v38, %v4275_v6  ;;  %v4365_v39 = vld [vmem:[#allocation70_spill] sm:$0xff] }
 0x17f   : > { %1425 = vst [vmem:[%s2895_s14 + $0xc8] sm:$0xff] %v1393_v3  ;;  %v1363_v15 = vadd.f32 %v1331_v25, %v1235_v50  ;;  %v1288_v7 = vpop.permute.xlu1 %1287  ;;  %v1241_v52 = vmul.f32 %v4365_v39, %v3135_v54 }
 0x180   : > { %v1286_v16 = vpop.permute.xlu0 %1285  ;;  %v1396_v40 = vmul.f32 0.088388346, %v1364_v28  ;;  %v1334_v9 = vmul.f32 %v1288_v7, %v3084_v11  ;;  %v4367_v7 = vld [vmem:[#allocation76_spill] sm:$0xff] }
 0x181   : > { %v1395_v45 = vmul.f32 0.088388346, %v1363_v15  ;;  %v1333_v32 = vmul.f32 %v1286_v16, %v4268_v56  ;;  %v4366_v15 = vld [vmem:[#allocation75_spill] sm:$0xff]  ;;  %v1243_v54 = vmul.f32 %v4367_v7, %v3165_v2  ;;  %v1245_v2 = vmul.f32 %v3309_v57, %v3195_v44 }
 0x182   : > { %1428 = vst [vmem:[%s2895_s14 + $0xf8] sm:$0xff] %v1396_v40  ;;  %v1366_v43 = vadd.f32 %v1334_v9, %v1238_v51  ;;  %v1244_v6 = vmul.f32 %v4366_v15, %v4281_v33  ;;  %v1246_v33 = vmul.f32 %v3306_v31, %v4287_v10  ;;  %v1248_v31 = vmul.f32 %v3322_v30, %v4293_v34 }
 0x183   : > { %1427 = vst [vmem:[%s2895_s14 + $0xe8] sm:$0xff] %v1395_v45  ;;  %v1365_v5 = vadd.f32 %v1333_v32, %v1237_v55  ;;  %v1292_v50 = vpop.permute.xlu1 %1291  ;;  %v1247_v57 = vmul.f32 %v3325_v29, %v3225_v42  ;;  %v1250_v30 = vmul.f32 %v3348_v26, %v4299_v46  ;;  %v1249_v42 = vmul.f32 %v3351_v17, %v4301_v47 }
 0x184   : > { %v1290_v35 = vpop.permute.xlu0 %1289  ;;  %v1398_v63 = vmul.f32 0.088388346, %v1366_v43  ;;  %v1336_v11 = vmul.f32 %v1292_v50, %v3114_v13  ;;  %v1252_v26 = vmul.f32 %v3366_v12, %v3282_v27  ;;  %v1251_v17 = vmul.f32 %v3369_v14, %v3285_v4  ;;  %v4370_v12 = vld [vmem:[#allocation78_spill] sm:$0xff] }
 0x185   : > { %v1397_v0 = vmul.f32 0.088388346, %v1365_v5  ;;  %v1335_v56 = vmul.f32 %v1290_v35, %v4274_v58 }
 0x186   : > { %1430 = vst [vmem:[%s2895_s14 + $0x118] sm:$0xff] %v1398_v63  ;;  %v1368_v3 = vadd.f32 %v1336_v11, %v1240_v49 }
 0x187   : > { %1429 = vst [vmem:[%s2895_s14 + $0x108] sm:$0xff] %v1397_v0  ;;  %v1367_v25 = vadd.f32 %v1335_v56, %v1239_v1  ;;  %v1296_v51 = vpop.permute.xlu1 %1295 }
 0x188   : > { %v1294_v60 = vpop.permute.xlu0 %1293  ;;  %v1400_v55 = vmul.f32 0.088388346, %v1368_v3  ;;  %v1338_v13 = vmul.f32 %v1296_v51, %v3144_v18 }
 0x189   : > { %v1399_v28 = vmul.f32 0.088388346, %v1367_v25  ;;  %v1337_v58 = vmul.f32 %v1294_v60, %v4280_v61  ;;  %v4368_v60 = vld [vmem:[#allocation77_spill] sm:$0xff] }
 0x18a   : > { %1432 = vst [vmem:[%s2895_s14 + $0x138] sm:$0xff] %v1400_v55  ;;  %v1370_v16 = vadd.f32 %v1338_v13, %v1242_v62  ;;  %v4369_v55 = vld [vmem:[#allocation52_spill] sm:$0xff] }
 0x18b   : > { %1431 = vst [vmem:[%s2895_s14 + $0x128] sm:$0xff] %v1399_v28  ;;  %v1369_v40 = vadd.f32 %v1337_v58, %v1241_v52  ;;  %v1300_v45 = vpop.permute.xlu1 %1299  ;;  %v1478_v27 = vmul.f32 %v4369_v55, %v4368_v60  ;;  %v4371_v28 = vld [vmem:[#allocation55_spill] sm:$0xff]  ;;  %v4395_v55 = vld [vmem:[#allocation26_spill] sm:$0xff] }
 0x18c   : > { %v1298_v9 = vpop.permute.xlu0 %1297  ;;  %v1402_v32 = vmul.f32 0.088388346, %v1370_v16  ;;  %v1340_v18 = vmul.f32 %v1300_v45, %v3174_v20  ;;  %v1477_v4 = vmul.f32 %v4371_v28, %v4370_v12  ;;  %v4373_v16 = vld [vmem:[#allocation59_spill] sm:$0xff] }
 0x18d   : > { %v1401_v21 = vmul.f32 0.088388346, %v1369_v40  ;;  %v1339_v61 = vmul.f32 %v1298_v9, %v4286_v37  ;;  %v4374_v9 = vld [vmem:[#allocation28_spill] sm:$0xff]  ;;  %v4394_v60 = vld [vmem:[#allocation7_spill] sm:$0xff] }
 0x18e   : > { %1434 = vst [vmem:[%s2895_s14 + $0x158] sm:$0xff] %v1402_v32  ;;  %v1372_v49 = vadd.f32 %v1340_v18, %v1244_v6  ;;  %v4375_v32 = vld [vmem:[#allocation18_spill] sm:$0xff]  ;;  %v4376_v18 = vld [vmem:[#allocation31_spill] sm:$0xff] }
 0x18f   : > { %1433 = vst [vmem:[%s2895_s14 + $0x148] sm:$0xff] %v1401_v21  ;;  %v1371_v59 = vadd.f32 %v1339_v61, %v1243_v54  ;;  %v1304_v1 = vpop.permute.xlu1 %1303  ;;  %v4372_v54 = vld [vmem:[#allocation56_spill] sm:$0xff]  ;;  %v1480_v21 = vmul.f32 %v4375_v32, %v4374_v9  ;;  %v4377_v61 = vld [vmem:[#allocation19_spill] sm:$0xff]  ;;  %v4402_v32 = vld [vmem:[#allocation34_spill] sm:$0xff] }
 0x190   : > { %v1302_v43 = vpop.permute.xlu0 %1301  ;;  %v1404_v5 = vmul.f32 0.088388346, %v1372_v49  ;;  %v1342_v20 = vmul.f32 %v1304_v1, %v3204_v22 }
 0x191   : > { %v1403_v50 = vmul.f32 0.088388346, %v1371_v59  ;;  %v1341_v37 = vmul.f32 %v1302_v43, %v4292_v41  ;;  %v4378_v59 = vld [vmem:[#allocation20_spill] sm:$0xff]  ;;  %v4379_v43 = vld [vmem:[#allocation21_spill] sm:$0xff] }
 0x192   : > { %1436 = vst [vmem:[%s2895_s14 + $0x178] sm:$0xff] %v1404_v5  ;;  %v1374_v44 = vadd.f32 %v1342_v20, %v1246_v33  ;;  %v1479_v33 = vmul.f32 %v4377_v61, %v4376_v18  ;;  %v4403_v18 = vld [vmem:[#allocation37_spill] sm:$0xff] }
 0x193   : > { %1435 = vst [vmem:[%s2895_s14 + $0x168] sm:$0xff] %v1403_v50  ;;  %v1373_v10 = vadd.f32 %v1341_v37, %v1245_v2  ;;  %v1308_v35 = vpop.permute.xlu1 %1307  ;;  %v4380_v37 = vld [vmem:[#allocation4_spill] sm:$0xff] }
 0x194   : > { %v1306_v63 = vpop.permute.xlu0 %1305  ;;  %v1406_v0 = vmul.f32 0.088388346, %v1374_v44  ;;  %v1344_v22 = vmul.f32 %v1308_v35, %v3234_v24  ;;  %v4382_v44 = vld [vmem:[#allocation5_spill] sm:$0xff] }
 0x195   : > { %v1405_v11 = vmul.f32 0.088388346, %v1373_v10  ;;  %v1343_v41 = vmul.f32 %v1306_v63, %v4298_v23  ;;  %v4383_v10 = vld [vmem:[#allocation67_spill] sm:$0xff] }
 0x196   : > { %1438 = vst [vmem:[%s2895_s14 + $0x198] sm:$0xff] %v1406_v0  ;;  %v1376_v29 = vadd.f32 %v1344_v22, %v1248_v31  ;;  %v4381_v31 = vld [vmem:[#allocation64_spill] sm:$0xff]  ;;  %v1481_v35 = vmul.f32 %v4383_v10, %v4382_v44 }
 0x197   : > { %1437 = vst [vmem:[%s2895_s14 + $0x188] sm:$0xff] %v1405_v11  ;;  %v1375_v34 = vadd.f32 %v1343_v41, %v1247_v57  ;;  %v1312_v56 = vpop.permute.xlu1 %1311  ;;  %v1482_v57 = vmul.f32 %v4381_v31, %v4380_v37  ;;  %v4384_v11 = vld [vmem:[#allocation68_spill] sm:$0xff]  ;;  %v4385_v41 = vld [vmem:[#allocation71_spill] sm:$0xff]  ;;  %v4407_v37 = vld [vmem:[#allocation41_spill] sm:$0xff] }
 0x198   : > { %v1310_v38 = vpop.permute.xlu0 %1309  ;;  %v1408_v62 = vmul.f32 0.088388346, %v1376_v29  ;;  %v1346_v24 = vmul.f32 %v1312_v56, %v4305_v53  ;;  %v4387_v56 = vld [vmem:[#allocation24_spill] sm:$0xff] }
 0x199   : > { %v1407_v39 = vmul.f32 0.088388346, %v1375_v34  ;;  %v1345_v23 = vmul.f32 %v1310_v38, %v4306_v36  ;;  %v4386_v34 = vld [vmem:[#allocation32_spill] sm:$0xff] }
 0x19a   : > { %1440 = vst [vmem:[%s2895_s14 + $0x1b8] sm:$0xff] %v1408_v62  ;;  %v1378_v46 = vadd.f32 %v1346_v24, %v1250_v30  ;;  %v1484_v38 = vmul.f32 %v4387_v56, %v4386_v34  ;;  %v4388_v62 = vld [vmem:[#allocation35_spill] sm:$0xff]  ;;  %v2051_v56 = vld [vmem:[%s2828_s10 + $0x70] sm:$0xff] }
 0x19b   : > { %1439 = vst [vmem:[%s2895_s14 + $0x1a8] sm:$0xff] %v1407_v39  ;;  %v1377_v47 = vadd.f32 %v1345_v23, %v1249_v42  ;;  %v1316_v52 = vpop.permute.xlu1 %1315  ;;  %v4389_v39 = vld [vmem:[#allocation72_spill] sm:$0xff] }
 0x19c   : > { %v1314_v3 = vpop.permute.xlu0 %1313  ;;  %v1410_v25 = vmul.f32 0.088388346, %v1378_v46  ;;  %v1348_v53 = vmul.f32 %v1316_v52, %v3294_v19  ;;  %v1483_v24 = vmul.f32 %v4389_v39, %v4388_v62 }
 0x19d   : > { %v1409_v51 = vmul.f32 0.088388346, %v1377_v47  ;;  %v1347_v36 = vmul.f32 %v1314_v3, %v3297_v8  ;;  %v4391_v47 = vld [vmem:[#allocation73_spill] sm:$0xff] }
 0x19e   : > { %1442 = vst [vmem:[%s2895_s14 + $0x1d8] sm:$0xff] %v1410_v25  ;;  %v1380_v14 = vadd.f32 %v1348_v53, %v1252_v26  ;;  %v4393_v53 = vld [vmem:[#allocation74_spill] sm:$0xff] }
 0x19f   : > { %1441 = vst [vmem:[%s2895_s14 + $0x1c8] sm:$0xff] %v1409_v51  ;;  %v1379_v13 = vadd.f32 %v1347_v36, %v1251_v17  ;;  %v1512_v58 = vpop.permute.xlu1 %1511  ;;  %v4390_v17 = vld [vmem:[#allocation25_spill] sm:$0xff]  ;;  %v4392_v51 = vld [vmem:[#allocation6_spill] sm:$0xff] }
 0x1a0   : > { %v1510_v15 = vpop.permute.xlu0 %1509  ;;  %v1412_v6 = vmul.f32 0.088388346, %v1380_v14  ;;  %v1574_v19 = vmul.f32 %v4372_v54, %v1512_v58  ;;  %v1486_v36 = vmul.f32 %v4393_v53, %v4392_v51  ;;  %v4399_v54 = vld [vmem:[#allocation30_spill] sm:$0xff]  ;;  %v2055_v53 = vld [vmem:[%s2828_s10 + $0x80] sm:$0xff] }
 0x1a1   : > { %v1411_v7 = vmul.f32 0.088388346, %v1379_v13  ;;  %v1573_v8 = vmul.f32 %v4373_v16, %v1510_v15  ;;  %v4397_v13 = vld [vmem:[#allocation29_spill] sm:$0xff]  ;;  %v4400_v16 = vld [vmem:[#allocation39_spill] sm:$0xff] }
 0x1a2   : > { %1444 = vst [vmem:[%s2895_s14 + $0x1f8] sm:$0xff] %v1412_v6  ;;  %v1606_v40 = vadd.f32 %v1574_v19, %v1478_v27  ;;  %v1485_v27 = vmul.f32 %v4395_v55, %v4394_v60 }
 0x1a3   : > { %1443 = vst [vmem:[%s2895_s14 + $0x1e8] sm:$0xff] %v1411_v7  ;;  %v1605_v45 = vadd.f32 %v1573_v8, %v1477_v4  ;;  %v1516_v2 = vpop.permute.xlu1 %1515  ;;  %v4396_v4 = vld [vmem:[#allocation27_spill] sm:$0xff]  ;;  %v4398_v7 = vld [vmem:[#allocation36_spill] sm:$0xff]  ;;  %v4401_v8 = vld [vmem:[#allocation33_spill] sm:$0xff] }
 0x1a4   : > { %v1514_v49 = vpop.permute.xlu0 %1513  ;;  %1638 = vst [vmem:[%s3334_s17 + $0x18] sm:$0xff] %v1606_v40  ;;  %v1576_v1 = vmul.f32 %v4378_v59, %v1516_v2  ;;  %v1488_v19 = vmul.f32 %v4399_v54, %v4398_v7  ;;  %v1487_v40 = vmul.f32 %v4401_v8, %v4400_v16  ;;  %v4405_v59 = vld [vmem:[#allocation38_spill] sm:$0xff] }
 0x1a5   : > { %1637 = vst [vmem:[%s3334_s17 + $0x8] sm:$0xff] %v1605_v45  ;;  %v1575_v5 = vmul.f32 %v4379_v43, %v1514_v49  ;;  %v4404_v49 = vld [vmem:[#allocation8_spill] sm:$0xff]  ;;  %v4406_v43 = vld [vmem:[#allocation9_spill] sm:$0xff]  ;;  %v2059_v54 = vld [vmem:[%s2828_s10 + $0x90] sm:$0xff] }
 0x1a6   : > { %v1608_v50 = vadd.f32 %v1576_v1, %v1480_v21  ;;  %v1490_v1 = vmul.f32 %v4405_v59, %v4404_v49  ;;  %v2063_v59 = vld [vmem:[%s2828_s10 + $0xa0] sm:$0xff] }
 0x1a7   : > { %v1607_v20 = vadd.f32 %v1575_v5, %v1479_v33  ;;  %v1520_v63 = vpop.permute.xlu1 %1519  ;;  %v1489_v5 = vmul.f32 %v3767_v48, %v4406_v43  ;;  %v4410_v48 = vld [vmem:[#allocation43_spill] sm:$0xff] }
 0x1a8   : > { %v1518_v0 = vpop.permute.xlu0 %1517  ;;  %1640 = vst [vmem:[%s3334_s17 + $0x38] sm:$0xff] %v1608_v50  ;;  %v1578_v22 = vmul.f32 %v4384_v11, %v1520_v63  ;;  %v2048_v63 = vld [vmem:[%s2582_s29 + $0x78] sm:$0xff] }
 0x1a9   : > { %1639 = vst [vmem:[%s3334_s17 + $0x28] sm:$0xff] %v1607_v20  ;;  %v1577_v30 = vmul.f32 %v4385_v41, %v1518_v0  ;;  %v4409_v0 = vld [vmem:[#allocation40_spill] sm:$0xff] }
 0x1aa   : > { %v1610_v42 = vadd.f32 %v1578_v22, %v1482_v57  ;;  %v4408_v57 = vld [vmem:[#allocation42_spill] sm:$0xff]  ;;  %v1492_v11 = vmul.f32 %v2048_v63, %v4409_v0  ;;  %v2066_v63 = vld [vmem:[%s2828_s10 + $0xb8] sm:$0xff] }
 0x1ab   : > { %v1609_v29 = vadd.f32 %v1577_v30, %v1481_v35  ;;  %v1524_v23 = vpop.permute.xlu1 %1523  ;;  %v2049_v22 = vld [vmem:[%s2582_s29 + $0x70] sm:$0xff] }
 0x1ac   : > { %v1522_v26 = vpop.permute.xlu0 %1521  ;;  %1642 = vst [vmem:[%s3334_s17 + $0x58] sm:$0xff] %v1610_v42  ;;  %v1580_v46 = vmul.f32 %v4390_v17, %v1524_v23  ;;  %v1491_v41 = vmul.f32 %v2049_v22, %v4410_v48  ;;  %v4411_v23 = vld [vmem:[#allocation10_spill] sm:$0xff]  ;;  %v2053_v17 = vld [vmem:[%s2582_s29 + $0x80] sm:$0xff] }
 0x1ad   : > { %1641 = vst [vmem:[%s3334_s17 + $0x48] sm:$0xff] %v1609_v29  ;;  %v1579_v52 = vmul.f32 %v4391_v47, %v1522_v26  ;;  %v2050_v29 = vld [vmem:[%s2828_s10 + $0x78] sm:$0xff] }
 0x1ae   : > { %v1612_v3 = vadd.f32 %v1580_v46, %v1484_v38  ;;  %v4412_v46 = vld [vmem:[#allocation11_spill] sm:$0xff] }
 0x1af   : > { %v1611_v25 = vadd.f32 %v1579_v52, %v1483_v24  ;;  %v1528_v12 = vpop.permute.xlu1 %1527  ;;  %v2052_v24 = vld [vmem:[%s2582_s29 + $0x88] sm:$0xff]  ;;  %v1493_v47 = vmul.f32 %v2053_v17, %v4412_v46 }
 0x1b0   : > { %v1526_v28 = vpop.permute.xlu0 %1525  ;;  %1644 = vst [vmem:[%s3334_s17 + $0x78] sm:$0xff] %v1612_v3  ;;  %v1582_v14 = vmul.f32 %v4396_v4, %v1528_v12  ;;  %v1494_v26 = vmul.f32 %v2052_v24, %v4411_v23  ;;  %v4413_v12 = vld [vmem:[#allocation44_spill] sm:$0xff]  ;;  %v2057_v4 = vld [vmem:[%s2582_s29 + $0x90] sm:$0xff]  ;;  %v2070_v24 = vld [vmem:[%s2828_s10 + $0xc8] sm:$0xff] }
 0x1b1   : > { %1643 = vst [vmem:[%s3334_s17 + $0x68] sm:$0xff] %v1611_v25  ;;  %v1581_v58 = vmul.f32 %v4397_v13, %v1526_v28  ;;  %v2054_v25 = vld [vmem:[%s2828_s10 + $0x88] sm:$0xff] }
 0x1b2   : > { %v1614_v15 = vadd.f32 %v1582_v14, %v1486_v36  ;;  %v4414_v14 = vld [vmem:[#allocation47_spill] sm:$0xff] }
 0x1b3   : > { %v1613_v6 = vadd.f32 %v1581_v58, %v1485_v27  ;;  %v1532_v45 = vpop.permute.xlu1 %1531  ;;  %v2056_v27 = vld [vmem:[%s2582_s29 + $0x98] sm:$0xff]  ;;  %v1495_v13 = vmul.f32 %v2057_v4, %v4414_v14 }
 0x1b4   : > { %v1530_v9 = vpop.permute.xlu0 %1529  ;;  %1646 = vst [vmem:[%s3334_s17 + $0x98] sm:$0xff] %v1614_v15  ;;  %v1584_v21 = vmul.f32 %v4402_v32, %v1532_v45  ;;  %v1496_v28 = vmul.f32 %v2056_v27, %v4413_v12  ;;  %v4415_v45 = vld [vmem:[#allocation12_spill] sm:$0xff]  ;;  %v2074_v27 = vld [vmem:[%s2828_s10 + $0xd8] sm:$0xff] }
 0x1b5   : > { %1645 = vst [vmem:[%s3334_s17 + $0x88] sm:$0xff] %v1613_v6  ;;  %v1583_v61 = vmul.f32 %v4403_v18, %v1530_v9  ;;  %v2058_v6 = vld [vmem:[%s2828_s10 + $0x98] sm:$0xff]  ;;  %v2061_v32 = vld [vmem:[%s2582_s29 + $0xa0] sm:$0xff] }
 0x1b6   : > { %v1616_v33 = vadd.f32 %v1584_v21, %v1488_v19  ;;  %v4416_v21 = vld [vmem:[#allocation13_spill] sm:$0xff] }
 0x1b7   : > { %v1615_v2 = vadd.f32 %v1583_v61, %v1487_v40  ;;  %v1536_v50 = vpop.permute.xlu1 %1535  ;;  %v2060_v40 = vld [vmem:[%s2582_s29 + $0xa8] sm:$0xff]  ;;  %v1497_v18 = vmul.f32 %v2061_v32, %v4416_v21 }
 0x1b8   : > { %v1534_v20 = vpop.permute.xlu0 %1533  ;;  %1648 = vst [vmem:[%s3334_s17 + $0xb8] sm:$0xff] %v1616_v33  ;;  %v1586_v31 = vmul.f32 %v4407_v37, %v1536_v50  ;;  %v1498_v9 = vmul.f32 %v2060_v40, %v4415_v45  ;;  %v2064_v50 = vld [vmem:[%s2582_s29 + $0xb8] sm:$0xff]  ;;  %v2078_v40 = vld [vmem:[%s2828_s10 + $0xe8] sm:$0xff] }
 0x1b9   : > { %1647 = vst [vmem:[%s3334_s17 + $0xa8] sm:$0xff] %v1615_v2  ;;  %v1585_v44 = vmul.f32 %v4408_v57, %v1534_v20  ;;  %v2062_v2 = vld [vmem:[%s2828_s10 + $0xa8] sm:$0xff]  ;;  %v4417_v20 = vld [vmem:[#allocation48_spill] sm:$0xff]  ;;  %v4418_v57 = vld [vmem:[#allocation51_spill] sm:$0xff] }
 0x1ba   : > { %v1618_v10 = vadd.f32 %v1586_v31, %v1490_v1  ;;  %v1500_v37 = vmul.f32 %v2064_v50, %v4417_v20  ;;  %v2065_v31 = vld [vmem:[%s2582_s29 + $0xb0] sm:$0xff]  ;;  %v2082_v50 = vld [vmem:[%s2828_s10 + $0xf8] sm:$0xff] }
 0x1bb   : > { %v1617_v35 = vadd.f32 %v1585_v44, %v1489_v5  ;;  %v1540_v30 = vpop.permute.xlu1 %1539  ;;  %v1499_v44 = vmul.f32 %v2065_v31, %v4418_v57 }
 0x1bc   : > { %v1538_v42 = vpop.permute.xlu0 %1537  ;;  %1650 = vst [vmem:[%s3334_s17 + $0xd8] sm:$0xff] %v1618_v10  ;;  %v1588_v34 = vmul.f32 %v2050_v29, %v1540_v30  ;;  %v2068_v30 = vld [vmem:[%s2582_s29 + $0xc8] sm:$0xff] }
 0x1bd   : > { %1649 = vst [vmem:[%s3334_s17 + $0xc8] sm:$0xff] %v1617_v35  ;;  %v1587_v38 = vmul.f32 %v2051_v56, %v1538_v42  ;;  %v4419_v42 = vld [vmem:[#allocation14_spill] sm:$0xff]  ;;  %v4420_v56 = vld [vmem:[#allocation15_spill] sm:$0xff] }
 0x1be   : > { %v1620_v62 = vadd.f32 %v1588_v34, %v1492_v11  ;;  %v2067_v11 = vld [vmem:[%s2828_s10 + $0xb0] sm:$0xff]  ;;  %v1502_v29 = vmul.f32 %v2068_v30, %v4419_v42  ;;  %v2069_v34 = vld [vmem:[%s2582_s29 + $0xc0] sm:$0xff] }
 0x1bf   : > { %v1619_v39 = vadd.f32 %v1587_v38, %v1491_v41  ;;  %v1544_v52 = vpop.permute.xlu1 %1543  ;;  %v1501_v38 = vmul.f32 %v2069_v34, %v4420_v56 }
 0x1c0   : > { %v1542_v3 = vpop.permute.xlu0 %1541  ;;  %1652 = vst [vmem:[%s3334_s17 + $0xf8] sm:$0xff] %v1620_v62  ;;  %v1590_v51 = vmul.f32 %v2054_v25, %v1544_v52  ;;  %v2072_v52 = vld [vmem:[%s2582_s29 + $0xd8] sm:$0xff] }
 0x1c1   : > { %1651 = vst [vmem:[%s3334_s17 + $0xe8] sm:$0xff] %v1619_v39  ;;  %v1589_v36 = vmul.f32 %v2055_v53, %v1542_v3  ;;  %v4421_v3 = vld [vmem:[#allocation16_spill] sm:$0xff]  ;;  %v4422_v53 = vld [vmem:[#allocation17_spill] sm:$0xff] }
 0x1c2   : > { %v1622_v60 = vadd.f32 %v1590_v51, %v1494_v26  ;;  %v2071_v26 = vld [vmem:[%s2828_s10 + $0xc0] sm:$0xff]  ;;  %v1504_v25 = vmul.f32 %v2072_v52, %v4421_v3  ;;  %v2073_v51 = vld [vmem:[%s2582_s29 + $0xd0] sm:$0xff] }
 0x1c3   : > { %v1621_v55 = vadd.f32 %v1589_v36, %v1493_v47  ;;  %v1548_v58 = vpop.permute.xlu1 %1547  ;;  %v1503_v36 = vmul.f32 %v2073_v51, %v4422_v53 }
 0x1c4   : > { %v1546_v15 = vpop.permute.xlu0 %1545  ;;  %1654 = vst [vmem:[%s3334_s17 + $0x118] sm:$0xff] %v1622_v60  ;;  %v1592_v7 = vmul.f32 %v2058_v6, %v1548_v58  ;;  %v2076_v58 = vld [vmem:[%s2582_s29 + $0xe8] sm:$0xff] }
 0x1c5   : > { %1653 = vst [vmem:[%s3334_s17 + $0x108] sm:$0xff] %v1621_v55  ;;  %v1591_v19 = vmul.f32 %v2059_v54, %v1546_v15  ;;  %v4423_v15 = vld [vmem:[#allocation60_spill] sm:$0xff]  ;;  %v4424_v54 = vld [vmem:[#allocation63_spill] sm:$0xff] }
 0x1c6   : > { %v1624_v16 = vadd.f32 %v1592_v7, %v1496_v28  ;;  %v2075_v28 = vld [vmem:[%s2828_s10 + $0xd0] sm:$0xff]  ;;  %v1506_v6 = vmul.f32 %v2076_v58, %v4423_v15  ;;  %v2077_v7 = vld [vmem:[%s2582_s29 + $0xe0] sm:$0xff] }
 0x1c7   : > { %v1623_v8 = vadd.f32 %v1591_v19, %v1495_v13  ;;  %v1552_v61 = vpop.permute.xlu1 %1551  ;;  %v1505_v19 = vmul.f32 %v2077_v7, %v4424_v54 }
 0x1c8   : > { %v1550_v33 = vpop.permute.xlu0 %1549  ;;  %1656 = vst [vmem:[%s3334_s17 + $0x138] sm:$0xff] %v1624_v16  ;;  %v1594_v49 = vmul.f32 %v2062_v2, %v1552_v61  ;;  %v2080_v61 = vld [vmem:[%s2582_s29 + $0xf8] sm:$0xff] }
 0x1c9   : > { %1655 = vst [vmem:[%s3334_s17 + $0x128] sm:$0xff] %v1623_v8  ;;  %v1593_v1 = vmul.f32 %v2063_v59, %v1550_v33  ;;  %v4425_v33 = vld [vmem:[#allocation22_spill] sm:$0xff]  ;;  %v4426_v59 = vld [vmem:[#allocation23_spill] sm:$0xff] }
 0x1ca   : > { %v1626_v43 = vadd.f32 %v1594_v49, %v1498_v9  ;;  %v2079_v9 = vld [vmem:[%s2828_s10 + $0xe0] sm:$0xff]  ;;  %v1508_v2 = vmul.f32 %v2080_v61, %v4425_v33  ;;  %v2081_v49 = vld [vmem:[%s2582_s29 + $0xf0] sm:$0xff] }
 0x1cb   : > { %v1625_v5 = vadd.f32 %v1593_v1, %v1497_v18  ;;  %v1556_v10 = vpop.permute.xlu1 %1555  ;;  %v1507_v1 = vmul.f32 %v2081_v49, %v4426_v59 }
 0x1cc   : > { %v1554_v35 = vpop.permute.xlu0 %1553  ;;  %1658 = vst [vmem:[%s3334_s17 + $0x158] sm:$0xff] %v1626_v43  ;;  %v1596_v0 = vmul.f32 %v2066_v63, %v1556_v10 }
 0x1cd   : > { %1657 = vst [vmem:[%s3334_s17 + $0x148] sm:$0xff] %v1625_v5  ;;  %v1595_v22 = vmul.f32 %v2067_v11, %v1554_v35 }
 0x1ce   : > { %v1628_v48 = vadd.f32 %v1596_v0, %v1500_v37  ;;  %v2083_v37 = vld [vmem:[%s2828_s10 + $0xf0] sm:$0xff] }
 0x1cf   : > { %v1627_v41 = vadd.f32 %v1595_v22, %v1499_v44  ;;  %v1560_v62 = vpop.permute.xlu1 %1559 }
 0x1d0   : > { %v1558_v39 = vpop.permute.xlu0 %1557  ;;  %1660 = vst [vmem:[%s3334_s17 + $0x178] sm:$0xff] %v1628_v48  ;;  %v1598_v23 = vmul.f32 %v2070_v24, %v1560_v62 }
 0x1d1   : > { %1659 = vst [vmem:[%s3334_s17 + $0x168] sm:$0xff] %v1627_v41  ;;  %v1597_v17 = vmul.f32 %v2071_v26, %v1558_v39 }
 0x1d2   : > { %v1630_v46 = vadd.f32 %v1598_v23, %v1502_v29 }
 0x1d3   : > { %v1629_v47 = vadd.f32 %v1597_v17, %v1501_v38  ;;  %v1564_v60 = vpop.permute.xlu1 %1563 }
 0x1d4   : > { %v1562_v55 = vpop.permute.xlu0 %1561  ;;  %1662 = vst [vmem:[%s3334_s17 + $0x198] sm:$0xff] %v1630_v46  ;;  %v1600_v12 = vmul.f32 %v2074_v27, %v1564_v60 }
 0x1d5   : > { %1661 = vst [vmem:[%s3334_s17 + $0x188] sm:$0xff] %v1629_v47  ;;  %v1599_v4 = vmul.f32 %v2075_v28, %v1562_v55 }
 0x1d6   : > { %v1632_v14 = vadd.f32 %v1600_v12, %v1504_v25 }
 0x1d7   : > { %v1631_v13 = vadd.f32 %v1599_v4, %v1503_v36  ;;  %v1568_v16 = vpop.permute.xlu1 %1567 }
 0x1d8   : > { %v1566_v8 = vpop.permute.xlu0 %1565  ;;  %1664 = vst [vmem:[%s3334_s17 + $0x1b8] sm:$0xff] %v1632_v14  ;;  %v1602_v45 = vmul.f32 %v2078_v40, %v1568_v16 }
 0x1d9   : > { %1663 = vst [vmem:[%s3334_s17 + $0x1a8] sm:$0xff] %v1631_v13  ;;  %v1601_v32 = vmul.f32 %v2079_v9, %v1566_v8 }
 0x1da   : > { %v1634_v21 = vadd.f32 %v1602_v45, %v1506_v6 }
 0x1db   : > { %v1633_v18 = vadd.f32 %v1601_v32, %v1505_v19  ;;  %v1572_v43 = vpop.permute.xlu1 %1571 }
 0x1dc   : > { %v1570_v5 = vpop.permute.xlu0 %1569  ;;  %1666 = vst [vmem:[%s3334_s17 + $0x1d8] sm:$0xff] %v1634_v21  ;;  %v1604_v20 = vmul.f32 %v2082_v50, %v1572_v43 }
 0x1dd   : > { %1665 = vst [vmem:[%s3334_s17 + $0x1c8] sm:$0xff] %v1633_v18  ;;  %v1603_v31 = vmul.f32 %v2083_v37, %v1570_v5 }
 0x1de   : > { %v1636_v57 = vadd.f32 %v1604_v20, %v1508_v2 }
 0x1df   : > { %v1635_v44 = vadd.f32 %v1603_v31, %v1507_v1 }
 0x1e0   : > { %1668 = vst [vmem:[%s3334_s17 + $0x1f8] sm:$0xff] %v1636_v57 }
 0x1e1   : > { %1667 = vst [vmem:[%s3334_s17 + $0x1e8] sm:$0xff] %v1635_v44 }
 0x1e2 PF: > { %s16_s24 = sadd.s32 1, %s2138_s24   ;;  %s4427_s18 = smov %s2118_s19 }
 0x1e3   : > { %p13_p12 = scmp.ge.s32.totalorder %s16_s24, 6   ;;  %s4428_s19 = smov %s2226_s7 }
 0x1e4   : > { %s4429_s20 = smov %s2130_s22  ;;  %s4430_s21 = smov %s2134_s23 }
 0x1e5   : > { %s4431_s22 = smov %s4434_s25  ;;  %s4432_s23 = smov %s4438_s26 }
 0x1e6   :  { %15 = sbr.rel (!%p13_p12) target bundleno = 4 (0x4), region = 143 }

// kernel: attention_forward.6
= control target key start
LH: loop header
LB: loop body
LE: loop exit
PB: predicated region body
PF: predicated region fallthrough
CT: control target
= control target key end

     0   :  { %s5847_s0 = inlined_call_operand.vmem [shape: f32[2,512,256], index: 0, kind: input, shape index: {}]   ;;  %s5848_s1 = inlined_call_operand.vmem [shape: f32[2,512,256], index: 1, kind: input, shape index: {}]   ;;  %s5849_s2 = inlined_call_operand.vmem [shape: f32[2,512,768], index: 2, kind: input, shape index: {}]   ;;  %s5850_s3 = inlined_call_operand.vmem [shape: f32[2,1,512], index: 3, kind: input, shape index: {}]   ;;  %s5851_s4 = inlined_call_operand.vmem [shape: f32[2,512,256], index: 4, kind: output, shape index: {}]  }
   0x1   :  { %5942 = sst [smem:[#allocation92_spill]] %s5847_s0 }
   0x2   :  { %5943 = sst [smem:[#allocation93_spill]] %s5848_s1 }
   0x3   :  { %5944 = sst [smem:[#allocation94_spill]] %s5849_s2 }
   0x4   :  { %5945 = sst [smem:[#allocation95_spill]] %s5850_s3 }
   0x5   :  { %5946 = sst [smem:[#allocation96_spill]] %s5851_s4 }
   0x6   :  { %s3992_s15 = smov 0   ;;  %s3994_s16 = smov 0  }
   0x7   :  { %s3996_s17 = smov 0   ;;  %s3998_s18 = smov 0  }
   0x8   :  { %s4000_s19 = smov 0   ;;  %s4002_s20 = smov 0  }
   0x9   :  { %s4004_s21 = smov 0   ;;  %s4006_s22 = smov 0  }
   0xa   :  { %s4008_s23 = smov 0   ;;  %s4010_s24 = smov 0  }
   0xb   :  { %s4012_s25 = smov 0   ;;  %s4014_s26 = smov 0  }
   0xc   :  { %s4016_s27 = smov 0   ;;  %s4018_s28 = smov 0  }
   0xd   :  { %s4020_s29 = smov 0  }
   0xe LB: > { %5947 = sst [smem:[#allocation9_spill]] %s3904_s15  ;;  %s29_s30 = sadd.s32 1, %s3944_s25  ;;  %s3960_s29 = sphi %s4020_s29, %s14_s29   ;;  %s3956_s28 = sphi %s4018_s28, %s6192_s28   ;;  %s3952_s27 = sphi %s4016_s27, %s6191_s27   ;;  %s3948_s26 = sphi %s4014_s26, %s6190_s26   ;;  %s3944_s25 = sphi %s4012_s25, %s6189_s25   ;;  %s3940_s24 = sphi %s4010_s24, %s6188_s24   ;;  %s3936_s23 = sphi %s4008_s23, %s6187_s23   ;;  %s3932_s22 = sphi %s4006_s22, %s6186_s22   ;;  %s3928_s21 = sphi %s4004_s21, %s6185_s21   ;;  %s3924_s20 = sphi %s4002_s20, %s6184_s20   ;;  %s3920_s19 = sphi %s4000_s19, %s6183_s19   ;;  %s3916_s18 = sphi %s3998_s18, %s6182_s18   ;;  %s3912_s17 = sphi %s3996_s17, %s6181_s17   ;;  %s3908_s16 = sphi %s3994_s16, %s6180_s16   ;;  %s3904_s15 = sphi %s3992_s15, %s6179_s15  }
   0xf   : > { %5948 = sst [smem:[#allocation10_spill]] %s3912_s17  ;;  %p30_p0 = scmp.ge.s32.totalorder %s29_s30, 2 }
  0x10   : > { %5949 = sst [smem:[#allocation11_spill]] %s3928_s21  ;;  %s32_s5 = sadd.s32 1, %s3948_s26 }
  0x11   : > { %5950 = sst [smem:[#allocation12_spill]] %s3932_s22  ;;  %s36_s7 = sadd.s32 1, %s3952_s27 }
  0x12   : > { %5951 = sst [smem:[#allocation13_spill]] %s3936_s23  ;;  %s6194_s30 = smov (%p30_p0, %s29_s30), 0 }
  0x13   : > { %5952 = sst [smem:[#allocation14_spill]] %s3940_s24  ;;  %s6196_s5 = smov (!%p30_p0, %s32_s5), %s3948_s26 }
  0x14   : > { %5953 = sst [smem:[#allocation15_spill]] %s6194_s30  ;;  %s40_s8 = sadd.s32 1, %s3956_s28 }
  0x15   : > { %p58_p1 = scmp.ne.s32.totalorder %s3924_s20, %s3920_s19  ;;  %p34_p2 = scmp.ge.s32.totalorder %s6196_s5, 2 }
  0x16   : > { %p59_p3 = scmp.eq.s32.totalorder %s3960_s29, 0  ;;  %s75_s10 = ssub.s32 %s3944_s25, %s6194_s30 }
  0x17   : > { %s6198_s5 = smov (%p34_p2, %s6196_s5), 0  ;;  %s6200_s7 = smov (!%p34_p2, %s36_s7), %s3952_s27 }
  0x18   : > { %5954 = sst [smem:[#allocation16_spill]] %s6198_s5  ;;  %p4089_p4 = por %p59_p3, %p58_p1 }
  0x19   : > { %s81_s12 = sadd.s32 1, %s3916_s18  ;;  %p38_p5 = scmp.ge.s32.totalorder %s6200_s7, 2 }
  0x1a   : > { %p88_p6 = scmp.ne.s32.totalorder %s3916_s18, %s3912_s17  ;;  %s45_s13 = ssub.s32 %s3948_s26, %s6198_s5 }
  0x1b   : > { %s104_s14 = sadd.s32 4, %s3952_s27  ;;  %s6202_s7 = smov (%p38_p5, %s6200_s7), 0 }
  0x1c   : > { %5956 = sst [smem:[#allocation17_spill]] %s6202_s7  ;;  %s6204_s8 = smov (!%p38_p5, %s40_s8), %s3956_s28 }
  0x1d   : > { %p4104_p7 = por %p88_p6, %p59_p3  ;;  %s113_s6 = sadd.s32 1, %s3908_s16 }
  0x1e   : > { %p42_p8 = scmp.ge.s32.totalorder %s6204_s8, 2  ;;  %s105_s30 = sadd.s32 4, %s6202_s7 }
  0x1f   : > { %s47_s4 = ssub.s32 %s3952_s27, %s6202_s7  ;;  %p120_p9 = scmp.ne.s32.totalorder %s3908_s16, %s3904_s15 }
  0x20   : > { %s6206_s8 = smov (%p42_p8, %s6204_s8), 0  ;;  %s109_s5 = ssub.s32 %s104_s14, %s105_s30 }
  0x21   : > { %5958 = sst [smem:[#allocation18_spill]] %s6206_s8  ;;  %p4118_p10 = por %p120_p9, %p59_p3 }
  0x22   : > { %s44_s22 = ssub.s32 %s3956_s28, %s6206_s8  ;;  %s5960_s3 = sadd.s32 4294967295, %s3960_s29  }
  0x23   : > { %p182_p11 = scmp.eq.s32.totalorder %s5960_s3, 15  ;;  %s46_s24 = sor.u32 %s45_s13, %s44_s22 }
  0x24   : > { %s76_s21 = sor.u32 %s75_s10, %s44_s22  ;;  %s48_s17 = sor.u32 %s47_s4, %s46_s24 }
  0x25   : > { %s78_s2 = sor.u32 %s76_s21, %s47_s4  ;;  %p49_p12 = scmp.eq.s32.totalorder %s48_s17, 0 }
  0x26   : > { %p79_p13 = scmp.eq.s32.totalorder %s78_s2, 0  ;;  %s110_s7 = sor.u32 %s109_s5, %s76_s21 }
  0x27   : > { %p4129_p0 = por %p182_p11, %p58_p1  ;;  %s5962_s30 = sadd.s32 1, %s3924_s20 }
  0x28   : > { %s4136_s14 = scalar_select %p49_p12, %s3924_s20, %s5962_s30  }
  0x29   : > { %s4139_s1 = scalar_select %p79_p13, %s3916_s18, %s81_s12  }
  0x2a   : > { %p111_p2 = scmp.eq.s32.totalorder %s110_s7, 0  ;;  %p3297_p3 = scmp.ge.s32.totalorder %s3960_s29, 16 }
  0x2c   : > { %s4142_s8 = scalar_select %p111_p2, %s3908_s16, %s113_s6  }
  0x2d   : > { %204 = sbr.rel (%p3297_p3) target bundleno = 130 (0x82), region = 16 }
  0x32   : > { %207 = sbr.rel (!%p4089_p4) target bundleno = 77 (0x4d), region = 20  ;;  %s209_s2 = sand.u32 (%p4089_p4), 1, %s3924_s20  }
  0x33   : > { %s3358_s3 = sshll.u32 (%p4089_p4), %s3948_s26, 6  ;;  %s3298_s4 = sshll.u32 (%p4089_p4), %s209_s2, 8 }
  0x34   : > { %s214_s17 = sadd.s32 (%p4089_p4), %s3952_s27, %s3358_s3  ;;  %s3301_s21 = sshll.u32 (%p4089_p4), %s3956_s28, 7 }
  0x35   : > { %s216_s22 = sadd.s32 (%p4089_p4), %s3301_s21, %s214_s17  ;;  %s5963_s0 = sld [smem:[#allocation92_spill]] (%p4089_p4) }
  0x36   : > { %s3302_s24 = sshll.u32 (%p4089_p4), %s216_s22, 3  ;;  %s4159_s10 = scalar_lea.vmem (%p4089_p4), [#allocation5], %s3298_s4 }
  0x3b   : > { %s4154_s7 = scalar_lea.vmem %s5963_s0, %s3302_s24 }
  0x3c   : > { %v309_v0 = vld [vmem:[%s4154_s7] sm:$0xff]  ;;  %v311_v1 = vld [vmem:[%s4154_s7 + $0x10] sm:$0xff] }
  0x3d   : > { %v313_v2 = vld [vmem:[%s4154_s7 + $0x20] sm:$0xff]  ;;  %310 = vst [vmem:[%s4159_s10] sm:$0xff] %v309_v0  ;;  %312 = vst [vmem:[%s4159_s10 + $0x8] sm:$0xff] %v311_v1  ;;  %v315_v3 = vld [vmem:[%s4154_s7 + $0x30] sm:$0xff] }
  0x3e   : > { %314 = vst [vmem:[%s4159_s10 + $0x10] sm:$0xff] %v313_v2  ;;  %v317_v4 = vld [vmem:[%s4154_s7 + $0x40] sm:$0xff]  ;;  %v319_v5 = vld [vmem:[%s4154_s7 + $0x50] sm:$0xff]  ;;  %316 = vst [vmem:[%s4159_s10 + $0x18] sm:$0xff] %v315_v3 }
  0x3f   : > { %318 = vst [vmem:[%s4159_s10 + $0x20] sm:$0xff] %v317_v4  ;;  %320 = vst [vmem:[%s4159_s10 + $0x28] sm:$0xff] %v319_v5  ;;  %v321_v6 = vld [vmem:[%s4154_s7 + $0x60] sm:$0xff]  ;;  %v323_v7 = vld [vmem:[%s4154_s7 + $0x70] sm:$0xff] }
  0x40   : > { %v325_v8 = vld [vmem:[%s4154_s7 + $0x80] sm:$0xff]  ;;  %322 = vst [vmem:[%s4159_s10 + $0x30] sm:$0xff] %v321_v6  ;;  %324 = vst [vmem:[%s4159_s10 + $0x38] sm:$0xff] %v323_v7  ;;  %v327_v9 = vld [vmem:[%s4154_s7 + $0x90] sm:$0xff] }
  0x41   : > { %326 = vst [vmem:[%s4159_s10 + $0x40] sm:$0xff] %v325_v8  ;;  %v329_v10 = vld [vmem:[%s4154_s7 + $0xa0] sm:$0xff]  ;;  %v331_v11 = vld [vmem:[%s4154_s7 + $0xb0] sm:$0xff]  ;;  %328 = vst [vmem:[%s4159_s10 + $0x48] sm:$0xff] %v327_v9 }
  0x42   : > { %330 = vst [vmem:[%s4159_s10 + $0x50] sm:$0xff] %v329_v10  ;;  %332 = vst [vmem:[%s4159_s10 + $0x58] sm:$0xff] %v331_v11  ;;  %v333_v12 = vld [vmem:[%s4154_s7 + $0xc0] sm:$0xff]  ;;  %v335_v13 = vld [vmem:[%s4154_s7 + $0xd0] sm:$0xff] }
  0x43   : > { %v337_v14 = vld [vmem:[%s4154_s7 + $0xe0] sm:$0xff]  ;;  %334 = vst [vmem:[%s4159_s10 + $0x60] sm:$0xff] %v333_v12  ;;  %336 = vst [vmem:[%s4159_s10 + $0x68] sm:$0xff] %v335_v13  ;;  %v339_v15 = vld [vmem:[%s4154_s7 + $0xf0] sm:$0xff] }
  0x44   : > { %338 = vst [vmem:[%s4159_s10 + $0x70] sm:$0xff] %v337_v14  ;;  %v341_v16 = vld [vmem:[%s4154_s7 + $0x100] sm:$0xff]  ;;  %v343_v17 = vld [vmem:[%s4154_s7 + $0x110] sm:$0xff]  ;;  %340 = vst [vmem:[%s4159_s10 + $0x78] sm:$0xff] %v339_v15 }
  0x45   : > { %342 = vst [vmem:[%s4159_s10 + $0x80] sm:$0xff] %v341_v16  ;;  %344 = vst [vmem:[%s4159_s10 + $0x88] sm:$0xff] %v343_v17  ;;  %v345_v18 = vld [vmem:[%s4154_s7 + $0x120] sm:$0xff]  ;;  %v347_v19 = vld [vmem:[%s4154_s7 + $0x130] sm:$0xff] }
  0x46   : > { %v349_v20 = vld [vmem:[%s4154_s7 + $0x140] sm:$0xff]  ;;  %346 = vst [vmem:[%s4159_s10 + $0x90] sm:$0xff] %v345_v18  ;;  %348 = vst [vmem:[%s4159_s10 + $0x98] sm:$0xff] %v347_v19  ;;  %v351_v21 = vld [vmem:[%s4154_s7 + $0x150] sm:$0xff] }
  0x47   : > { %350 = vst [vmem:[%s4159_s10 + $0xa0] sm:$0xff] %v349_v20  ;;  %v353_v22 = vld [vmem:[%s4154_s7 + $0x160] sm:$0xff]  ;;  %v355_v23 = vld [vmem:[%s4154_s7 + $0x170] sm:$0xff]  ;;  %352 = vst [vmem:[%s4159_s10 + $0xa8] sm:$0xff] %v351_v21 }
  0x48   : > { %354 = vst [vmem:[%s4159_s10 + $0xb0] sm:$0xff] %v353_v22  ;;  %356 = vst [vmem:[%s4159_s10 + $0xb8] sm:$0xff] %v355_v23  ;;  %v357_v24 = vld [vmem:[%s4154_s7 + $0x180] sm:$0xff]  ;;  %v359_v25 = vld [vmem:[%s4154_s7 + $0x190] sm:$0xff] }
  0x49   : > { %v361_v26 = vld [vmem:[%s4154_s7 + $0x1a0] sm:$0xff]  ;;  %358 = vst [vmem:[%s4159_s10 + $0xc0] sm:$0xff] %v357_v24  ;;  %360 = vst [vmem:[%s4159_s10 + $0xc8] sm:$0xff] %v359_v25  ;;  %v363_v27 = vld [vmem:[%s4154_s7 + $0x1b0] sm:$0xff] }
  0x4a   : > { %362 = vst [vmem:[%s4159_s10 + $0xd0] sm:$0xff] %v361_v26  ;;  %v365_v28 = vld [vmem:[%s4154_s7 + $0x1c0] sm:$0xff]  ;;  %v367_v29 = vld [vmem:[%s4154_s7 + $0x1d0] sm:$0xff]  ;;  %364 = vst [vmem:[%s4159_s10 + $0xd8] sm:$0xff] %v363_v27 }
  0x4b   : > { %366 = vst [vmem:[%s4159_s10 + $0xe0] sm:$0xff] %v365_v28  ;;  %368 = vst [vmem:[%s4159_s10 + $0xe8] sm:$0xff] %v367_v29  ;;  %v369_v30 = vld [vmem:[%s4154_s7 + $0x1e0] sm:$0xff]  ;;  %v371_v31 = vld [vmem:[%s4154_s7 + $0x1f0] sm:$0xff] }
  0x4c   : > { %370 = vst [vmem:[%s4159_s10 + $0xf0] sm:$0xff] %v369_v30  ;;  %372 = vst [vmem:[%s4159_s10 + $0xf8] sm:$0xff] %v371_v31 }
  0x4d PF: > { %378 = sbr.rel (!%p4104_p7) target bundleno = 104 (0x68), region = 58  ;;  %s380_s11 = sand.u32 (%p4104_p7), 1, %s3916_s18  }
  0x4e   : > { %s3359_s12 = sshll.u32 (%p4104_p7), %s3944_s25, 6  ;;  %s3303_s13 = sshll.u32 (%p4104_p7), %s380_s11, 8 }
  0x4f   : > { %s385_s30 = sadd.s32 (%p4104_p7), %s3952_s27, %s3359_s12  ;;  %s3306_s2 = sshll.u32 (%p4104_p7), %s3956_s28, 7 }
  0x50   : > { %s387_s3 = sadd.s32 (%p4104_p7), %s3306_s2, %s385_s30  ;;  %s5964_s22 = sld [smem:[#allocation93_spill]] (%p4104_p7) }
  0x51   : > { %s3307_s4 = sshll.u32 (%p4104_p7), %s387_s3, 3  ;;  %s4236_s9 = scalar_lea.vmem (%p4104_p7), [#allocation6], %s3303_s13 }
  0x56   : > { %s4231_s24 = scalar_lea.vmem %s5964_s22, %s3307_s4 }
  0x57   : > { %v480_v32 = vld [vmem:[%s4231_s24] sm:$0xff]  ;;  %v482_v33 = vld [vmem:[%s4231_s24 + $0x10] sm:$0xff] }
  0x58   : > { %v484_v34 = vld [vmem:[%s4231_s24 + $0x20] sm:$0xff]  ;;  %481 = vst [vmem:[%s4236_s9] sm:$0xff] %v480_v32  ;;  %483 = vst [vmem:[%s4236_s9 + $0x8] sm:$0xff] %v482_v33  ;;  %v486_v35 = vld [vmem:[%s4231_s24 + $0x30] sm:$0xff] }
  0x59   : > { %485 = vst [vmem:[%s4236_s9 + $0x10] sm:$0xff] %v484_v34  ;;  %v488_v36 = vld [vmem:[%s4231_s24 + $0x40] sm:$0xff]  ;;  %v490_v37 = vld [vmem:[%s4231_s24 + $0x50] sm:$0xff]  ;;  %487 = vst [vmem:[%s4236_s9 + $0x18] sm:$0xff] %v486_v35 }
  0x5a   : > { %489 = vst [vmem:[%s4236_s9 + $0x20] sm:$0xff] %v488_v36  ;;  %491 = vst [vmem:[%s4236_s9 + $0x28] sm:$0xff] %v490_v37  ;;  %v492_v38 = vld [vmem:[%s4231_s24 + $0x60] sm:$0xff]  ;;  %v494_v39 = vld [vmem:[%s4231_s24 + $0x70] sm:$0xff] }
  0x5b   : > { %v496_v40 = vld [vmem:[%s4231_s24 + $0x80] sm:$0xff]  ;;  %493 = vst [vmem:[%s4236_s9 + $0x30] sm:$0xff] %v492_v38  ;;  %495 = vst [vmem:[%s4236_s9 + $0x38] sm:$0xff] %v494_v39  ;;  %v498_v41 = vld [vmem:[%s4231_s24 + $0x90] sm:$0xff] }
  0x5c   : > { %497 = vst [vmem:[%s4236_s9 + $0x40] sm:$0xff] %v496_v40  ;;  %v500_v42 = vld [vmem:[%s4231_s24 + $0xa0] sm:$0xff]  ;;  %v502_v43 = vld [vmem:[%s4231_s24 + $0xb0] sm:$0xff]  ;;  %499 = vst [vmem:[%s4236_s9 + $0x48] sm:$0xff] %v498_v41 }
  0x5d   : > { %501 = vst [vmem:[%s4236_s9 + $0x50] sm:$0xff] %v500_v42  ;;  %503 = vst [vmem:[%s4236_s9 + $0x58] sm:$0xff] %v502_v43  ;;  %v504_v44 = vld [vmem:[%s4231_s24 + $0xc0] sm:$0xff]  ;;  %v506_v45 = vld [vmem:[%s4231_s24 + $0xd0] sm:$0xff] }
  0x5e   : > { %v508_v46 = vld [vmem:[%s4231_s24 + $0xe0] sm:$0xff]  ;;  %505 = vst [vmem:[%s4236_s9 + $0x60] sm:$0xff] %v504_v44  ;;  %507 = vst [vmem:[%s4236_s9 + $0x68] sm:$0xff] %v506_v45  ;;  %v510_v47 = vld [vmem:[%s4231_s24 + $0xf0] sm:$0xff] }
  0x5f   : > { %509 = vst [vmem:[%s4236_s9 + $0x70] sm:$0xff] %v508_v46  ;;  %v512_v48 = vld [vmem:[%s4231_s24 + $0x100] sm:$0xff]  ;;  %v514_v49 = vld [vmem:[%s4231_s24 + $0x110] sm:$0xff]  ;;  %511 = vst [vmem:[%s4236_s9 + $0x78] sm:$0xff] %v510_v47 }
  0x60   : > { %513 = vst [vmem:[%s4236_s9 + $0x80] sm:$0xff] %v512_v48  ;;  %515 = vst [vmem:[%s4236_s9 + $0x88] sm:$0xff] %v514_v49  ;;  %v516_v50 = vld [vmem:[%s4231_s24 + $0x120] sm:$0xff]  ;;  %v518_v51 = vld [vmem:[%s4231_s24 + $0x130] sm:$0xff] }
  0x61   : > { %v520_v52 = vld [vmem:[%s4231_s24 + $0x140] sm:$0xff]  ;;  %517 = vst [vmem:[%s4236_s9 + $0x90] sm:$0xff] %v516_v50  ;;  %519 = vst [vmem:[%s4236_s9 + $0x98] sm:$0xff] %v518_v51  ;;  %v522_v53 = vld [vmem:[%s4231_s24 + $0x150] sm:$0xff] }
  0x62   : > { %521 = vst [vmem:[%s4236_s9 + $0xa0] sm:$0xff] %v520_v52  ;;  %v524_v54 = vld [vmem:[%s4231_s24 + $0x160] sm:$0xff]  ;;  %v526_v55 = vld [vmem:[%s4231_s24 + $0x170] sm:$0xff]  ;;  %523 = vst [vmem:[%s4236_s9 + $0xa8] sm:$0xff] %v522_v53 }
  0x63   : > { %525 = vst [vmem:[%s4236_s9 + $0xb0] sm:$0xff] %v524_v54  ;;  %527 = vst [vmem:[%s4236_s9 + $0xb8] sm:$0xff] %v526_v55  ;;  %v528_v56 = vld [vmem:[%s4231_s24 + $0x180] sm:$0xff]  ;;  %v530_v57 = vld [vmem:[%s4231_s24 + $0x190] sm:$0xff] }
  0x64   : > { %v532_v58 = vld [vmem:[%s4231_s24 + $0x1a0] sm:$0xff]  ;;  %529 = vst [vmem:[%s4236_s9 + $0xc0] sm:$0xff] %v528_v56  ;;  %531 = vst [vmem:[%s4236_s9 + $0xc8] sm:$0xff] %v530_v57  ;;  %v534_v59 = vld [vmem:[%s4231_s24 + $0x1b0] sm:$0xff] }
  0x65   : > { %533 = vst [vmem:[%s4236_s9 + $0xd0] sm:$0xff] %v532_v58  ;;  %v536_v60 = vld [vmem:[%s4231_s24 + $0x1c0] sm:$0xff]  ;;  %v538_v61 = vld [vmem:[%s4231_s24 + $0x1d0] sm:$0xff]  ;;  %535 = vst [vmem:[%s4236_s9 + $0xd8] sm:$0xff] %v534_v59 }
  0x66   : > { %537 = vst [vmem:[%s4236_s9 + $0xe0] sm:$0xff] %v536_v60  ;;  %539 = vst [vmem:[%s4236_s9 + $0xe8] sm:$0xff] %v538_v61  ;;  %v540_v62 = vld [vmem:[%s4231_s24 + $0x1e0] sm:$0xff]  ;;  %v542_v63 = vld [vmem:[%s4231_s24 + $0x1f0] sm:$0xff] }
  0x67   : > { %541 = vst [vmem:[%s4236_s9 + $0xf0] sm:$0xff] %v540_v62  ;;  %543 = vst [vmem:[%s4236_s9 + $0xf8] sm:$0xff] %v542_v63 }
  0x68 PF: > { %549 = sbr.rel (!%p4118_p10) target bundleno = 130 (0x82), region = 96  ;;  %s551_s5 = sand.u32 (%p4118_p10), 1, %s3908_s16  }
  0x69   : > { %s3176_s6 = smul.u32 (%p4118_p10), 192, %s3944_s25  ;;  %s3308_s7 = sshll.u32 (%p4118_p10), %s551_s5, 8 }
  0x6a   : > { %s3178_s10 = smul.u32 (%p4118_p10), 384, %s3956_s28  ;;  %s5965_s3 = sld [smem:[#allocation94_spill]] (%p4118_p10) }
  0x6b   : > { %s3177_s11 = sadd.s32 (%p4118_p10), %s3952_s27, %s3176_s6  ;;  %s4313_s23 = scalar_lea.vmem (%p4118_p10), [#allocation7], %s3308_s7 }
  0x6c   : > { %s3179_s12 = sadd.s32 (%p4118_p10), %s3178_s10, %s3177_s11 }
  0x6d   : > { %s3309_s13 = sshll.u32 %s3179_s12, 3 }
  0x70   : > { %s4308_s4 = scalar_lea.vmem %s5965_s3, %s3309_s13 }
  0x71   : > { %v3310_v0 = vld [vmem:[%s4308_s4 + $0x20] sm:$0xff]  ;;  %v3311_v1 = vld [vmem:[%s4308_s4 + $0x50] sm:$0xff] }
  0x72   : > { %v3312_v2 = vld [vmem:[%s4308_s4 + $0x80] sm:$0xff]  ;;  %653 = vst [vmem:[%s4313_s23] sm:$0xff] %v3310_v0  ;;  %655 = vst [vmem:[%s4313_s23 + $0x8] sm:$0xff] %v3311_v1  ;;  %v3313_v3 = vld [vmem:[%s4308_s4 + $0xb0] sm:$0xff] }
  0x73   : > { %657 = vst [vmem:[%s4313_s23 + $0x10] sm:$0xff] %v3312_v2  ;;  %v3314_v4 = vld [vmem:[%s4308_s4 + $0xe0] sm:$0xff]  ;;  %v3315_v5 = vld [vmem:[%s4308_s4 + $0x110] sm:$0xff]  ;;  %659 = vst [vmem:[%s4313_s23 + $0x18] sm:$0xff] %v3313_v3 }
  0x74   : > { %661 = vst [vmem:[%s4313_s23 + $0x20] sm:$0xff] %v3314_v4  ;;  %663 = vst [vmem:[%s4313_s23 + $0x28] sm:$0xff] %v3315_v5  ;;  %v3316_v6 = vld [vmem:[%s4308_s4 + $0x140] sm:$0xff]  ;;  %v3317_v7 = vld [vmem:[%s4308_s4 + $0x170] sm:$0xff] }
  0x75   : > { %v3318_v8 = vld [vmem:[%s4308_s4 + $0x1a0] sm:$0xff]  ;;  %665 = vst [vmem:[%s4313_s23 + $0x30] sm:$0xff] %v3316_v6  ;;  %667 = vst [vmem:[%s4313_s23 + $0x38] sm:$0xff] %v3317_v7  ;;  %v3319_v9 = vld [vmem:[%s4308_s4 + $0x1d0] sm:$0xff] }
  0x76   : > { %669 = vst [vmem:[%s4313_s23 + $0x40] sm:$0xff] %v3318_v8  ;;  %v3320_v10 = vld [vmem:[%s4308_s4 + $0x200] sm:$0xff]  ;;  %v3321_v11 = vld [vmem:[%s4308_s4 + $0x230] sm:$0xff]  ;;  %671 = vst [vmem:[%s4313_s23 + $0x48] sm:$0xff] %v3319_v9 }
  0x77   : > { %673 = vst [vmem:[%s4313_s23 + $0x50] sm:$0xff] %v3320_v10  ;;  %675 = vst [vmem:[%s4313_s23 + $0x58] sm:$0xff] %v3321_v11  ;;  %v3322_v12 = vld [vmem:[%s4308_s4 + $0x260] sm:$0xff]  ;;  %v3323_v13 = vld [vmem:[%s4308_s4 + $0x290] sm:$0xff] }
  0x78   : > { %v3324_v14 = vld [vmem:[%s4308_s4 + $0x2c0] sm:$0xff]  ;;  %677 = vst [vmem:[%s4313_s23 + $0x60] sm:$0xff] %v3322_v12  ;;  %679 = vst [vmem:[%s4313_s23 + $0x68] sm:$0xff] %v3323_v13  ;;  %v3325_v15 = vld [vmem:[%s4308_s4 + $0x2f0] sm:$0xff] }
  0x79   : > { %681 = vst [vmem:[%s4313_s23 + $0x70] sm:$0xff] %v3324_v14  ;;  %v3326_v16 = vld [vmem:[%s4308_s4 + $0x320] sm:$0xff]  ;;  %v3327_v17 = vld [vmem:[%s4308_s4 + $0x350] sm:$0xff]  ;;  %683 = vst [vmem:[%s4313_s23 + $0x78] sm:$0xff] %v3325_v15 }
  0x7a   : > { %685 = vst [vmem:[%s4313_s23 + $0x80] sm:$0xff] %v3326_v16  ;;  %687 = vst [vmem:[%s4313_s23 + $0x88] sm:$0xff] %v3327_v17  ;;  %v3328_v18 = vld [vmem:[%s4308_s4 + $0x380] sm:$0xff]  ;;  %v3329_v19 = vld [vmem:[%s4308_s4 + $0x3b0] sm:$0xff] }
  0x7b   : > { %v3330_v20 = vld [vmem:[%s4308_s4 + $0x3e0] sm:$0xff]  ;;  %689 = vst [vmem:[%s4313_s23 + $0x90] sm:$0xff] %v3328_v18  ;;  %691 = vst [vmem:[%s4313_s23 + $0x98] sm:$0xff] %v3329_v19  ;;  %v3331_v21 = vld [vmem:[%s4308_s4 + $0x410] sm:$0xff] }
  0x7c   : > { %693 = vst [vmem:[%s4313_s23 + $0xa0] sm:$0xff] %v3330_v20  ;;  %v3332_v22 = vld [vmem:[%s4308_s4 + $0x440] sm:$0xff]  ;;  %v3333_v23 = vld [vmem:[%s4308_s4 + $0x470] sm:$0xff]  ;;  %695 = vst [vmem:[%s4313_s23 + $0xa8] sm:$0xff] %v3331_v21 }
  0x7d   : > { %697 = vst [vmem:[%s4313_s23 + $0xb0] sm:$0xff] %v3332_v22  ;;  %699 = vst [vmem:[%s4313_s23 + $0xb8] sm:$0xff] %v3333_v23  ;;  %v3334_v24 = vld [vmem:[%s4308_s4 + $0x4a0] sm:$0xff]  ;;  %v3335_v25 = vld [vmem:[%s4308_s4 + $0x4d0] sm:$0xff] }
  0x7e   : > { %v3336_v26 = vld [vmem:[%s4308_s4 + $0x500] sm:$0xff]  ;;  %701 = vst [vmem:[%s4313_s23 + $0xc0] sm:$0xff] %v3334_v24  ;;  %703 = vst [vmem:[%s4313_s23 + $0xc8] sm:$0xff] %v3335_v25  ;;  %v3337_v27 = vld [vmem:[%s4308_s4 + $0x530] sm:$0xff] }
  0x7f   : > { %705 = vst [vmem:[%s4313_s23 + $0xd0] sm:$0xff] %v3336_v26  ;;  %v3338_v28 = vld [vmem:[%s4308_s4 + $0x560] sm:$0xff]  ;;  %v3339_v29 = vld [vmem:[%s4308_s4 + $0x590] sm:$0xff]  ;;  %707 = vst [vmem:[%s4313_s23 + $0xd8] sm:$0xff] %v3337_v27 }
  0x80   : > { %709 = vst [vmem:[%s4313_s23 + $0xe0] sm:$0xff] %v3338_v28  ;;  %711 = vst [vmem:[%s4313_s23 + $0xe8] sm:$0xff] %v3339_v29  ;;  %v3340_v30 = vld [vmem:[%s4308_s4 + $0x5c0] sm:$0xff]  ;;  %v3341_v31 = vld [vmem:[%s4308_s4 + $0x5f0] sm:$0xff] }
  0x81   : > { %713 = vst [vmem:[%s4313_s23 + $0xf0] sm:$0xff] %v3340_v30  ;;  %715 = vst [vmem:[%s4313_s23 + $0xf8] sm:$0xff] %v3341_v31 }
  0x82 PF: > { %p3342_p1 = scmp.ge.s32.totalorder %s3960_s29, 1  ;;  %p732_p4 = scmp.lt.s32.totalorder %s3960_s29, 17 }
  0x84   : > { %p733_p5 = pnand %p3342_p1, %p732_p4 }
  0x86   : > { %736 = sbr.rel (%p733_p5) target bundleno = 1365 (0x555), region = 138 }
  0x8b   : > { %s5966_s17 = sld [smem:[#allocation10_spill]]  ;;  %s739_s9 = sand.u32 1, %s3920_s19  }
  0x8c   : > { %s5967_s21 = sld [smem:[#allocation9_spill]]  ;;  %s3343_s6 = sshll.u32 %s739_s9, 8 }
  0x8d   : > { %s5968_s22 = sld [smem:[#allocation11_spill]]  ;;  %s4390_s0 = scalar_lea.vmem [#allocation5], %s3343_s6 }
  0x8e   : > { %s5969_s24 = sld [smem:[#allocation14_spill]] }
  0x8f   : > { %s5970_s4 = sld [smem:[#allocation95_spill]] }
  0x91   : > { %s746_s5 = sand.u32 1, %s5966_s17  }
  0x92   : > { %s3344_s7 = sshll.u32 %s746_s5, 8  ;;  %s753_s10 = sand.u32 1, %s5967_s21  }
  0x93   : > { %s3345_s11 = sshll.u32 %s753_s10, 8  ;;  %s3347_s12 = sshll.u32 %s5968_s22, 1 }
  0x94   : > { %p798_p6 = scmp.lt.s32.totalorder %s5969_s24, 1  ;;  %p800_p7 = scmp.lt.s32.totalorder %s3347_s12, 3 }
  0x95   : > { %s4392_s19 = scalar_lea.vmem [#allocation6], %s3344_s7  ;;  %s4394_s17 = scalar_lea.vmem [#allocation7], %s3345_s11 }
  0x96   : > { %s6208_s24 = smov (!%p798_p6, %s5969_s24), 1  ;;  %s6210_s12 = smov (!%p800_p7, %s3347_s12), 3 }
  0x97   : > { %s3348_s13 = sshll.u32 %s6208_s24, 2  ;;  %s4396_s21 = scalar_lea.vmem [#allocation8], %s3343_s6 }
  0x98   : > { %s4384_s30 = sadd.s32 %s3348_s13, %s6210_s12  ;;  %p3349_p8 = scmp.ne.s32.totalorder %s5968_s22, 0 }
  0x99   : > { %s804_s23 = scalar_lea.vmem %s5970_s4, %s4384_s30 }
  0x9a   : > { %810 = sbr.rel (%p3349_p8) target bundleno = 208 (0xd0), region = 154 }
  0x9f   : > { %vm811_vm0 = vcmask 7168   ;;  %v3962_v32 = vmov -1e+30   ;;  %v3963_v33 = vmov 0.0  }
  0xa0   : > { %812 = vst.msk [vmem:[#allocation2] sm:$0xff] %vm811_vm0, %v3962_v32  ;;  %813 = vst.msk [vmem:[#allocation2 + $0x8] sm:$0xff] %vm811_vm0, %v3962_v32 }
  0xa1   : > { %814 = vst.msk [vmem:[#allocation2 + $0x10] sm:$0xff] %vm811_vm0, %v3962_v32  ;;  %815 = vst.msk [vmem:[#allocation2 + $0x18] sm:$0xff] %vm811_vm0, %v3962_v32 }
  0xa2   : > { %816 = vst.msk [vmem:[#allocation2 + $0x20] sm:$0xff] %vm811_vm0, %v3962_v32  ;;  %817 = vst.msk [vmem:[#allocation2 + $0x28] sm:$0xff] %vm811_vm0, %v3962_v32 }
  0xa3   : > { %818 = vst.msk [vmem:[#allocation2 + $0x30] sm:$0xff] %vm811_vm0, %v3962_v32  ;;  %819 = vst.msk [vmem:[#allocation2 + $0x38] sm:$0xff] %vm811_vm0, %v3962_v32 }
  0xa4   : > { %820 = vst.msk [vmem:[#allocation2 + $0x40] sm:$0xff] %vm811_vm0, %v3962_v32  ;;  %821 = vst.msk [vmem:[#allocation2 + $0x48] sm:$0xff] %vm811_vm0, %v3962_v32 }
  0xa5   : > { %822 = vst.msk [vmem:[#allocation2 + $0x50] sm:$0xff] %vm811_vm0, %v3962_v32  ;;  %823 = vst.msk [vmem:[#allocation2 + $0x58] sm:$0xff] %vm811_vm0, %v3962_v32 }
  0xa6   : > { %824 = vst.msk [vmem:[#allocation2 + $0x60] sm:$0xff] %vm811_vm0, %v3962_v32  ;;  %825 = vst.msk [vmem:[#allocation2 + $0x68] sm:$0xff] %vm811_vm0, %v3962_v32 }
  0xa7   : > { %826 = vst.msk [vmem:[#allocation2 + $0x70] sm:$0xff] %vm811_vm0, %v3962_v32  ;;  %827 = vst.msk [vmem:[#allocation2 + $0x78] sm:$0xff] %vm811_vm0, %v3962_v32 }
  0xa8   : > { %828 = vst.msk [vmem:[#allocation2 + $0x80] sm:$0xff] %vm811_vm0, %v3962_v32  ;;  %829 = vst.msk [vmem:[#allocation2 + $0x88] sm:$0xff] %vm811_vm0, %v3962_v32 }
  0xa9   : > { %830 = vst.msk [vmem:[#allocation2 + $0x90] sm:$0xff] %vm811_vm0, %v3962_v32  ;;  %831 = vst.msk [vmem:[#allocation2 + $0x98] sm:$0xff] %vm811_vm0, %v3962_v32 }
  0xaa   : > { %832 = vst.msk [vmem:[#allocation2 + $0xa0] sm:$0xff] %vm811_vm0, %v3962_v32  ;;  %833 = vst.msk [vmem:[#allocation2 + $0xa8] sm:$0xff] %vm811_vm0, %v3962_v32 }
  0xab   : > { %834 = vst.msk [vmem:[#allocation2 + $0xb0] sm:$0xff] %vm811_vm0, %v3962_v32  ;;  %835 = vst.msk [vmem:[#allocation2 + $0xb8] sm:$0xff] %vm811_vm0, %v3962_v32 }
  0xac   : > { %836 = vst.msk [vmem:[#allocation2 + $0xc0] sm:$0xff] %vm811_vm0, %v3962_v32  ;;  %837 = vst.msk [vmem:[#allocation2 + $0xc8] sm:$0xff] %vm811_vm0, %v3962_v32 }
  0xad   : > { %838 = vst.msk [vmem:[#allocation2 + $0xd0] sm:$0xff] %vm811_vm0, %v3962_v32  ;;  %839 = vst.msk [vmem:[#allocation2 + $0xd8] sm:$0xff] %vm811_vm0, %v3962_v32 }
  0xae   : > { %840 = vst.msk [vmem:[#allocation2 + $0xe0] sm:$0xff] %vm811_vm0, %v3962_v32  ;;  %841 = vst.msk [vmem:[#allocation2 + $0xe8] sm:$0xff] %vm811_vm0, %v3962_v32 }
  0xaf   : > { %842 = vst.msk [vmem:[#allocation2 + $0xf0] sm:$0xff] %vm811_vm0, %v3962_v32  ;;  %843 = vst.msk [vmem:[#allocation2 + $0xf8] sm:$0xff] %vm811_vm0, %v3962_v32 }
  0xb0   : > { %844 = vst.msk [vmem:[#allocation3] sm:$0xff] %vm811_vm0, %v3963_v33  ;;  %845 = vst.msk [vmem:[#allocation3 + $0x8] sm:$0xff] %vm811_vm0, %v3963_v33 }
  0xb1   : > { %846 = vst.msk [vmem:[#allocation3 + $0x10] sm:$0xff] %vm811_vm0, %v3963_v33  ;;  %847 = vst.msk [vmem:[#allocation3 + $0x18] sm:$0xff] %vm811_vm0, %v3963_v33 }
  0xb2   : > { %848 = vst.msk [vmem:[#allocation3 + $0x20] sm:$0xff] %vm811_vm0, %v3963_v33  ;;  %849 = vst.msk [vmem:[#allocation3 + $0x28] sm:$0xff] %vm811_vm0, %v3963_v33 }
  0xb3   : > { %850 = vst.msk [vmem:[#allocation3 + $0x30] sm:$0xff] %vm811_vm0, %v3963_v33  ;;  %851 = vst.msk [vmem:[#allocation3 + $0x38] sm:$0xff] %vm811_vm0, %v3963_v33 }
  0xb4   : > { %852 = vst.msk [vmem:[#allocation3 + $0x40] sm:$0xff] %vm811_vm0, %v3963_v33  ;;  %853 = vst.msk [vmem:[#allocation3 + $0x48] sm:$0xff] %vm811_vm0, %v3963_v33 }
  0xb5   : > { %854 = vst.msk [vmem:[#allocation3 + $0x50] sm:$0xff] %vm811_vm0, %v3963_v33  ;;  %855 = vst.msk [vmem:[#allocation3 + $0x58] sm:$0xff] %vm811_vm0, %v3963_v33 }
  0xb6   : > { %856 = vst.msk [vmem:[#allocation3 + $0x60] sm:$0xff] %vm811_vm0, %v3963_v33  ;;  %857 = vst.msk [vmem:[#allocation3 + $0x68] sm:$0xff] %vm811_vm0, %v3963_v33 }
  0xb7   : > { %858 = vst.msk [vmem:[#allocation3 + $0x70] sm:$0xff] %vm811_vm0, %v3963_v33  ;;  %859 = vst.msk [vmem:[#allocation3 + $0x78] sm:$0xff] %vm811_vm0, %v3963_v33 }
  0xb8   : > { %860 = vst.msk [vmem:[#allocation3 + $0x80] sm:$0xff] %vm811_vm0, %v3963_v33  ;;  %861 = vst.msk [vmem:[#allocation3 + $0x88] sm:$0xff] %vm811_vm0, %v3963_v33 }
  0xb9   : > { %862 = vst.msk [vmem:[#allocation3 + $0x90] sm:$0xff] %vm811_vm0, %v3963_v33  ;;  %863 = vst.msk [vmem:[#allocation3 + $0x98] sm:$0xff] %vm811_vm0, %v3963_v33 }
  0xba   : > { %864 = vst.msk [vmem:[#allocation3 + $0xa0] sm:$0xff] %vm811_vm0, %v3963_v33  ;;  %865 = vst.msk [vmem:[#allocation3 + $0xa8] sm:$0xff] %vm811_vm0, %v3963_v33 }
  0xbb   : > { %866 = vst.msk [vmem:[#allocation3 + $0xb0] sm:$0xff] %vm811_vm0, %v3963_v33  ;;  %867 = vst.msk [vmem:[#allocation3 + $0xb8] sm:$0xff] %vm811_vm0, %v3963_v33 }
  0xbc   : > { %868 = vst.msk [vmem:[#allocation3 + $0xc0] sm:$0xff] %vm811_vm0, %v3963_v33  ;;  %869 = vst.msk [vmem:[#allocation3 + $0xc8] sm:$0xff] %vm811_vm0, %v3963_v33 }
  0xbd   : > { %870 = vst.msk [vmem:[#allocation3 + $0xd0] sm:$0xff] %vm811_vm0, %v3963_v33  ;;  %871 = vst.msk [vmem:[#allocation3 + $0xd8] sm:$0xff] %vm811_vm0, %v3963_v33 }
  0xbe   : > { %872 = vst.msk [vmem:[#allocation3 + $0xe0] sm:$0xff] %vm811_vm0, %v3963_v33  ;;  %873 = vst.msk [vmem:[#allocation3 + $0xe8] sm:$0xff] %vm811_vm0, %v3963_v33 }
  0xbf   : > { %874 = vst.msk [vmem:[#allocation3 + $0xf0] sm:$0xff] %vm811_vm0, %v3963_v33  ;;  %875 = vst.msk [vmem:[#allocation3 + $0xf8] sm:$0xff] %vm811_vm0, %v3963_v33 }
  0xc0   : > { %876 = vst [vmem:[#allocation4 + $0xb0] sm:$0xff] %v3963_v33  ;;  %877 = vst [vmem:[#allocation4] sm:$0xff] %v3963_v33 }
  0xc1   : > { %878 = vst [vmem:[#allocation4 + $0xd8] sm:$0xff] %v3963_v33  ;;  %879 = vst [vmem:[#allocation4 + $0x18] sm:$0xff] %v3963_v33 }
  0xc2   : > { %880 = vst [vmem:[#allocation4 + $0x50] sm:$0xff] %v3963_v33  ;;  %881 = vst [vmem:[#allocation4 + $0x68] sm:$0xff] %v3963_v33 }
  0xc3   : > { %882 = vst [vmem:[#allocation4 + $0x30] sm:$0xff] %v3963_v33  ;;  %883 = vst [vmem:[#allocation4 + $0x48] sm:$0xff] %v3963_v33 }
  0xc4   : > { %884 = vst [vmem:[#allocation4 + $0x80] sm:$0xff] %v3963_v33  ;;  %885 = vst [vmem:[#allocation4 + $0x88] sm:$0xff] %v3963_v33 }
  0xc5   : > { %886 = vst [vmem:[#allocation4 + $0xe8] sm:$0xff] %v3963_v33  ;;  %887 = vst [vmem:[#allocation4 + $0xb8] sm:$0xff] %v3963_v33 }
  0xc6   : > { %888 = vst [vmem:[#allocation4 + $0x60] sm:$0xff] %v3963_v33  ;;  %889 = vst [vmem:[#allocation4 + $0xf0] sm:$0xff] %v3963_v33 }
  0xc7   : > { %890 = vst [vmem:[#allocation4 + $0x8] sm:$0xff] %v3963_v33  ;;  %891 = vst [vmem:[#allocation4 + $0x78] sm:$0xff] %v3963_v33 }
  0xc8   : > { %892 = vst [vmem:[#allocation4 + $0x38] sm:$0xff] %v3963_v33  ;;  %893 = vst [vmem:[#allocation4 + $0x58] sm:$0xff] %v3963_v33 }
  0xc9   : > { %894 = vst [vmem:[#allocation4 + $0x40] sm:$0xff] %v3963_v33  ;;  %895 = vst [vmem:[#allocation4 + $0xc8] sm:$0xff] %v3963_v33 }
  0xca   : > { %896 = vst [vmem:[#allocation4 + $0xe0] sm:$0xff] %v3963_v33  ;;  %897 = vst [vmem:[#allocation4 + $0x90] sm:$0xff] %v3963_v33 }
  0xcb   : > { %898 = vst [vmem:[#allocation4 + $0x70] sm:$0xff] %v3963_v33  ;;  %899 = vst [vmem:[#allocation4 + $0xc0] sm:$0xff] %v3963_v33 }
  0xcc   : > { %900 = vst [vmem:[#allocation4 + $0xa8] sm:$0xff] %v3963_v33  ;;  %901 = vst [vmem:[#allocation4 + $0xd0] sm:$0xff] %v3963_v33 }
  0xcd   : > { %902 = vst [vmem:[#allocation4 + $0x10] sm:$0xff] %v3963_v33  ;;  %903 = vst [vmem:[#allocation4 + $0x28] sm:$0xff] %v3963_v33 }
  0xce   : > { %904 = vst [vmem:[#allocation4 + $0xa0] sm:$0xff] %v3963_v33  ;;  %905 = vst [vmem:[#allocation4 + $0xf8] sm:$0xff] %v3963_v33 }
  0xcf   : > { %906 = vst [vmem:[#allocation4 + $0x20] sm:$0xff] %v3963_v33  ;;  %907 = vst [vmem:[#allocation4 + $0x98] sm:$0xff] %v3963_v33 }
  0xd0 PF: > { %v971_v34 = vld [vmem:[%s4392_s19 + $0xf8] sm:$0xff]  ;;  %v970_v36 = vld [vmem:[%s4392_s19 + $0xf0] sm:$0xff]  ;;  %v969_v38 = vld [vmem:[%s4392_s19 + $0xe8] sm:$0xff]  ;;  %vm2041_vm1 = vcmask 7168  }
  0xd1   : > { %v955_v35 = vld [vmem:[%s4392_s19 + $0x78] sm:$0xff]  ;;  %3361 = vmatprep.subr.mxu0 %v971_v34  ;;  %v954_v37 = vld [vmem:[%s4392_s19 + $0x70] sm:$0xff]  ;;  %v953_v39 = vld [vmem:[%s4392_s19 + $0x68] sm:$0xff]  ;;  %v974_v34 = vlaneseq }
  0xd2   : > { %3362 = vmatpush3.xpose.msra.mxu0 %v955_v35  ;;  %v968_v40 = vld [vmem:[%s4392_s19 + $0xe0] sm:$0xff]  ;;  %v967_v43 = vld [vmem:[%s4392_s19 + $0xd8] sm:$0xff]  ;;  %v966_v45 = vld [vmem:[%s4392_s19 + $0xd0] sm:$0xff] }
  0xd3   : > { %3363 = vmatprep.subr.mxu0 %v970_v36  ;;  %v908_v41 = vld [vmem:[%s4390_s0] sm:$0xff]  ;;  %v951_v44 = vld [vmem:[%s4392_s19 + $0x58] sm:$0xff]  ;;  %v950_v46 = vld [vmem:[%s4392_s19 + $0x50] sm:$0xff]  ;;  %v975_v35 = vshrl.u32 %v974_v34, 7 }
  0xd4   : > { %v952_v42 = vld [vmem:[%s4392_s19 + $0x60] sm:$0xff]  ;;  %3393 = vmatprep.mubr.f32.mxu0 %v908_v41  ;;  %v965_v47 = vld [vmem:[%s4392_s19 + $0xc8] sm:$0xff]  ;;  %v963_v51 = vld [vmem:[%s4392_s19 + $0xb8] sm:$0xff] }
  0xd5   : > { %v949_v48 = vld [vmem:[%s4392_s19 + $0x48] sm:$0xff]  ;;  %v964_v49 = vld [vmem:[%s4392_s19 + $0xc0] sm:$0xff]  ;;  %v947_v52 = vld [vmem:[%s4392_s19 + $0x38] sm:$0xff]  ;;  %v976_v36 = vsub.s32 0, %v975_v35 }
  0xd6   : > { %3364 = vmatpush3.xpose.msra.mxu0 %v954_v37  ;;  %v948_v50 = vld [vmem:[%s4392_s19 + $0x40] sm:$0xff]  ;;  %v962_v53 = vld [vmem:[%s4392_s19 + $0xb0] sm:$0xff]  ;;  %v961_v55 = vld [vmem:[%s4392_s19 + $0xa8] sm:$0xff]  ;;  %v980_v37 = vsub.s32 1, %v975_v35 }
  0xd7   : > { %3365 = vmatprep.subr.mxu0 %v969_v38  ;;  %v946_v54 = vld [vmem:[%s4392_s19 + $0x30] sm:$0xff]  ;;  %v945_v56 = vld [vmem:[%s4392_s19 + $0x28] sm:$0xff]  ;;  %v960_v57 = vld [vmem:[%s4392_s19 + $0xa0] sm:$0xff] }
  0xd8   : > { %v944_v58 = vld [vmem:[%s4392_s19 + $0x20] sm:$0xff]  ;;  %v959_v59 = vld [vmem:[%s4392_s19 + $0x98] sm:$0xff]  ;;  %v958_v61 = vld [vmem:[%s4392_s19 + $0x90] sm:$0xff] }
  0xd9   : > { %v943_v60 = vld [vmem:[%s4392_s19 + $0x18] sm:$0xff]  ;;  %v942_v62 = vld [vmem:[%s4392_s19 + $0x10] sm:$0xff]  ;;  %v957_v63 = vld [vmem:[%s4392_s19 + $0x88] sm:$0xff] }
  0xda   : > { %3366 = vmatpush3.xpose.msra.mxu0 %v953_v39  ;;  %v941_v0 = vld [vmem:[%s4392_s19 + $0x8] sm:$0xff]  ;;  %v956_v1 = vld [vmem:[%s4392_s19 + $0x80] sm:$0xff]  ;;  %v910_v4 = vld [vmem:[%s4390_s0 + $0x10] sm:$0xff] }
  0xdb   : > { %3367 = vmatprep.subr.mxu0 %v968_v40  ;;  %v940_v2 = vld [vmem:[%s4392_s19] sm:$0xff]  ;;  %v909_v3 = vld [vmem:[%s4390_s0 + $0x8] sm:$0xff]  ;;  %v911_v5 = vld [vmem:[%s4390_s0 + $0x18] sm:$0xff] }
  0xdc   : > { %v912_v6 = vld [vmem:[%s4390_s0 + $0x20] sm:$0xff]  ;;  %v913_v7 = vld [vmem:[%s4390_s0 + $0x28] sm:$0xff]  ;;  %v914_v8 = vld [vmem:[%s4390_s0 + $0x30] sm:$0xff] }
  0xdd   : > { %v915_v9 = vld [vmem:[%s4390_s0 + $0x38] sm:$0xff]  ;;  %v916_v10 = vld [vmem:[%s4390_s0 + $0x40] sm:$0xff]  ;;  %v917_v11 = vld [vmem:[%s4390_s0 + $0x48] sm:$0xff] }
  0xde   : > { %3368 = vmatpush3.xpose.msra.mxu0 %v952_v42  ;;  %v918_v12 = vld [vmem:[%s4390_s0 + $0x50] sm:$0xff]  ;;  %v919_v13 = vld [vmem:[%s4390_s0 + $0x58] sm:$0xff]  ;;  %v920_v14 = vld [vmem:[%s4390_s0 + $0x60] sm:$0xff] }
  0xdf   : > { %3369 = vmatprep.subr.mxu0 %v967_v43  ;;  %v921_v15 = vld [vmem:[%s4390_s0 + $0x68] sm:$0xff]  ;;  %v922_v16 = vld [vmem:[%s4390_s0 + $0x70] sm:$0xff]  ;;  %v923_v17 = vld [vmem:[%s4390_s0 + $0x78] sm:$0xff] }
  0xe0   : > { %v924_v18 = vld [vmem:[%s4390_s0 + $0x80] sm:$0xff]  ;;  %v925_v19 = vld [vmem:[%s4390_s0 + $0x88] sm:$0xff]  ;;  %v926_v20 = vld [vmem:[%s4390_s0 + $0x90] sm:$0xff] }
  0xe1   : > { %v927_v21 = vld [vmem:[%s4390_s0 + $0x98] sm:$0xff]  ;;  %v928_v22 = vld [vmem:[%s4390_s0 + $0xa0] sm:$0xff]  ;;  %v929_v23 = vld [vmem:[%s4390_s0 + $0xa8] sm:$0xff] }
  0xe2   : > { %3370 = vmatpush3.xpose.msra.mxu0 %v951_v44  ;;  %v930_v24 = vld [vmem:[%s4390_s0 + $0xb0] sm:$0xff]  ;;  %v931_v25 = vld [vmem:[%s4390_s0 + $0xb8] sm:$0xff]  ;;  %v932_v26 = vld [vmem:[%s4390_s0 + $0xc0] sm:$0xff] }
  0xe3   : > { %3371 = vmatprep.subr.mxu0 %v966_v45  ;;  %v933_v27 = vld [vmem:[%s4390_s0 + $0xc8] sm:$0xff]  ;;  %v934_v28 = vld [vmem:[%s4390_s0 + $0xd0] sm:$0xff]  ;;  %v935_v29 = vld [vmem:[%s4390_s0 + $0xd8] sm:$0xff] }
  0xe4   : > { %v936_v30 = vld [vmem:[%s4390_s0 + $0xe0] sm:$0xff]  ;;  %v937_v31 = vld [vmem:[%s4390_s0 + $0xe8] sm:$0xff]  ;;  %v938_v32 = vld [vmem:[%s4390_s0 + $0xf0] sm:$0xff] }
  0xe5   : > { %v939_v33 = vld [vmem:[%s4390_s0 + $0xf8] sm:$0xff]  ;;  %v972_v38 = vld [vmem:[%s804_s23] sm:$0x3]  ;;  %s6168_s0 = sld [smem:[#allocation11_spill]] }
  0xe6   : > { %3372 = vmatpush3.xpose.msra.mxu0 %v950_v46  ;;  %v4596_v39 = vrot.slane %v972_v38, %v976_v36  ;;  %v4598_v40 = vrot.slane %v972_v38, %v980_v37 }
  0xe7   : > { %3373 = vmatprep.subr.mxu0 %v965_v47 }
  0xea   : > { %3374 = vmatpush3.xpose.msra.mxu0 %v949_v48 }
  0xeb   : > { %3375 = vmatprep.subr.mxu0 %v964_v49  ;;  %p3350_p9 = scmp.ne.s32.totalorder %s6168_s0, 1 }
  0xee   : > { %3376 = vmatpush3.xpose.msra.mxu0 %v948_v50 }
  0xef   : > { %3377 = vmatprep.subr.mxu0 %v963_v51 }
  0xf2   : > { %3378 = vmatpush3.xpose.msra.mxu0 %v947_v52 }
  0xf3   : > { %3379 = vmatprep.subr.mxu0 %v962_v53 }
  0xf6   : > { %3380 = vmatpush3.xpose.msra.mxu0 %v946_v54 }
  0xf7   : > { %3381 = vmatprep.subr.mxu0 %v961_v55 }
  0xfa   : > { %3382 = vmatpush3.xpose.msra.mxu0 %v945_v56 }
  0xfb   : > { %3383 = vmatprep.subr.mxu0 %v960_v57 }
  0xfe   : > { %3384 = vmatpush3.xpose.msra.mxu0 %v944_v58 }
  0xff   : > { %3385 = vmatprep.subr.mxu0 %v959_v59 }
 0x102   : > { %3386 = vmatpush3.xpose.msra.mxu0 %v943_v60 }
 0x103   : > { %3387 = vmatprep.subr.mxu0 %v958_v61 }
 0x106   : > { %3388 = vmatpush3.xpose.msra.mxu0 %v942_v62 }
 0x107   : > { %3389 = vmatprep.subr.mxu0 %v957_v63 }
 0x10a   : > { %3390 = vmatpush3.xpose.msra.mxu0 %v941_v0  ;;  %v3964_v0 = vmov 0  }
 0x10b   : > { %3391 = vmatprep.subr.mxu0 %v956_v1  ;;  %3582 = vset.pattern.permute.xlu1 %v3964_v0 }
 0x10c   : > { %3583 = vset.pattern.permute.xlu0 %v3964_v0 }
 0x10e   : > { %3392 = vmatpush3.xpose.msra.mxu0 %v940_v2 }
 0x111   : > { %3394 = vmatmul.mubr.f32.vlgmr.msra.gmra.mxu0 %v908_v41 }
 0x112   : > { %3395 = vmatprep.mubr.f32.mxu0 %v909_v3 }
 0x115   : > { %3396 = vmatmul.mubr.f32.gmra.mxu0 %v909_v3 }
 0x116   : > { %3397 = vmatprep.mubr.f32.mxu0 %v910_v4 }
 0x119   : > { %3398 = vmatmul.mubr.f32.gmra.mxu0 %v910_v4 }
 0x11a   : > { %3399 = vmatprep.mubr.f32.mxu0 %v911_v5 }
 0x11d   : > { %3400 = vmatmul.mubr.f32.gmra.mxu0 %v911_v5 }
 0x11e   : > { %3401 = vmatprep.mubr.f32.mxu0 %v912_v6 }
 0x121   : > { %3402 = vmatmul.mubr.f32.gmra.mxu0 %v912_v6 }
 0x122   : > { %3403 = vmatprep.mubr.f32.mxu0 %v913_v7 }
 0x125   : > { %3404 = vmatmul.mubr.f32.gmra.mxu0 %v913_v7 }
 0x126   : > { %3405 = vmatprep.mubr.f32.mxu0 %v914_v8 }
 0x129   : > { %3406 = vmatmul.mubr.f32.gmra.mxu0 %v914_v8 }
 0x12a   : > { %3407 = vmatprep.mubr.f32.mxu0 %v915_v9 }
 0x12d   : > { %3408 = vmatmul.mubr.f32.gmra.mxu0 %v915_v9 }
 0x12e   : > { %3409 = vmatprep.mubr.f32.mxu0 %v916_v10 }
 0x131   : > { %3410 = vmatmul.mubr.f32.gmra.mxu0 %v916_v10 }
 0x132   : > { %3411 = vmatprep.mubr.f32.mxu0 %v917_v11 }
 0x135   : > { %3412 = vmatmul.mubr.f32.gmra.mxu0 %v917_v11 }
 0x136   : > { %3413 = vmatprep.mubr.f32.mxu0 %v918_v12 }
 0x139   : > { %3414 = vmatmul.mubr.f32.gmra.mxu0 %v918_v12 }
 0x13a   : > { %3415 = vmatprep.mubr.f32.mxu0 %v919_v13 }
 0x13d   : > { %3416 = vmatmul.mubr.f32.gmra.mxu0 %v919_v13 }
 0x13e   : > { %3417 = vmatprep.mubr.f32.mxu0 %v920_v14 }
 0x141   : > { %3418 = vmatmul.mubr.f32.gmra.mxu0 %v920_v14 }
 0x142   : > { %3419 = vmatprep.mubr.f32.mxu0 %v921_v15 }
 0x145   : > { %3420 = vmatmul.mubr.f32.gmra.mxu0 %v921_v15 }
 0x146   : > { %3421 = vmatprep.mubr.f32.mxu0 %v922_v16 }
 0x149   : > { %3422 = vmatmul.mubr.f32.gmra.mxu0 %v922_v16 }
 0x14a   : > { %3423 = vmatprep.mubr.f32.mxu0 %v923_v17 }
 0x14d   : > { %3424 = vmatmul.mubr.f32.gmra.mxu0 %v923_v17 }
 0x14e   : > { %3425 = vmatprep.mubr.f32.mxu0 %v924_v18 }
 0x151   : > { %3426 = vmatmul.mubr.f32.gmra.mxu0 %v924_v18 }
 0x152   : > { %3427 = vmatprep.mubr.f32.mxu0 %v925_v19 }
 0x155   : > { %3428 = vmatmul.mubr.f32.gmra.mxu0 %v925_v19 }
 0x156   : > { %3429 = vmatprep.mubr.f32.mxu0 %v926_v20 }
 0x159   : > { %3430 = vmatmul.mubr.f32.gmra.mxu0 %v926_v20 }
 0x15a   : > { %3431 = vmatprep.mubr.f32.mxu0 %v927_v21 }
 0x15d   : > { %3432 = vmatmul.mubr.f32.gmra.mxu0 %v927_v21 }
 0x15e   : > { %3433 = vmatprep.mubr.f32.mxu0 %v928_v22 }
 0x161   : > { %3434 = vmatmul.mubr.f32.gmra.mxu0 %v928_v22 }
 0x162   : > { %3435 = vmatprep.mubr.f32.mxu0 %v929_v23 }
 0x165   : > { %3436 = vmatmul.mubr.f32.gmra.mxu0 %v929_v23 }
 0x166   : > { %3437 = vmatprep.mubr.f32.mxu0 %v930_v24 }
 0x169   : > { %3438 = vmatmul.mubr.f32.gmra.mxu0 %v930_v24 }
 0x16a   : > { %3439 = vmatprep.mubr.f32.mxu0 %v931_v25 }
 0x16d   : > { %3440 = vmatmul.mubr.f32.gmra.mxu0 %v931_v25 }
 0x16e   : > { %3441 = vmatprep.mubr.f32.mxu0 %v932_v26 }
 0x171   : > { %3442 = vmatmul.mubr.f32.gmra.mxu0 %v932_v26 }
 0x172   : > { %3443 = vmatprep.mubr.f32.mxu0 %v933_v27 }
 0x175   : > { %3444 = vmatmul.mubr.f32.gmra.mxu0 %v933_v27 }
 0x176   : > { %3445 = vmatprep.mubr.f32.mxu0 %v934_v28 }
 0x179   : > { %3446 = vmatmul.mubr.f32.gmra.mxu0 %v934_v28 }
 0x17a   : > { %3447 = vmatprep.mubr.f32.mxu0 %v935_v29 }
 0x17d   : > { %3448 = vmatmul.mubr.f32.gmra.mxu0 %v935_v29 }
 0x17e   : > { %3449 = vmatprep.mubr.f32.mxu0 %v936_v30 }
 0x181   : > { %3450 = vmatmul.mubr.f32.gmra.mxu0 %v936_v30 }
 0x182   : > { %3451 = vmatprep.mubr.f32.mxu0 %v937_v31 }
 0x185   : > { %3452 = vmatmul.mubr.f32.gmra.mxu0 %v937_v31 }
 0x186   : > { %3453 = vmatprep.mubr.f32.mxu0 %v938_v32 }
 0x189   : > { %3454 = vmatmul.mubr.f32.gmra.mxu0 %v938_v32 }
 0x18a   : > { %3455 = vmatprep.mubr.f32.mxu0 %v939_v33 }
 0x18d   : > { %3456 = vmatmul.mubr.f32.gmra.mxu0 %v939_v33 }
 0x1d1   : > { %v1050_v41 = vpop.f32.mrf.mxu0 }
 0x1d2   : > { %v4601_v43 = vadd.f32 %v1050_v41, %v4596_v39 }
 0x1d3   : > { %v1052_v42 = vpop.f32.mrf.mxu0 }
 0x1d4   : > { %v4604_v44 = vadd.f32 %v1052_v42, %v4598_v40 }
 0x1d5   : > { %v1056_v45 = vpop.f32.mrf.mxu0 }
 0x1d6   : > { %v4607_v46 = vadd.f32 %v1056_v45, %v4596_v39  ;;  %v1273_v47 = vmax.f32 %v4601_v43, %v4604_v44 }
 0x1d7   : > { %v1058_v48 = vpop.f32.mrf.mxu0 }
 0x1d8   : > { %v4612_v49 = vadd.f32 %v1058_v48, %v4598_v40  ;;  %1274 = vmax.xlane.f32.xlu0 %v1273_v47 }
 0x1d9   : > { %v1062_v50 = vpop.f32.mrf.mxu0 }
 0x1da   : > { %v4615_v51 = vadd.f32 %v1062_v50, %v4596_v39  ;;  %v1276_v52 = vmax.f32 %v4607_v46, %v4612_v49 }
 0x1db   : > { %v1064_v53 = vpop.f32.mrf.mxu0 }
 0x1dc   : > { %v4620_v54 = vadd.f32 %v1064_v53, %v4598_v40  ;;  %1277 = vmax.xlane.f32.xlu0 %v1276_v52 }
 0x1dd   : > { %v1068_v55 = vpop.f32.mrf.mxu0 }
 0x1de   : > { %v4623_v56 = vadd.f32 %v1068_v55, %v4596_v39  ;;  %v1279_v57 = vmax.f32 %v4615_v51, %v4620_v54 }
 0x1df   : > { %v1070_v58 = vpop.f32.mrf.mxu0 }
 0x1e0   : > { %v4628_v59 = vadd.f32 %v1070_v58, %v4598_v40  ;;  %1280 = vmax.xlane.f32.xlu1 %v1279_v57 }
 0x1e1   : > { %v1074_v60 = vpop.f32.mrf.mxu0 }
 0x1e2   : > { %v4631_v61 = vadd.f32 %v1074_v60, %v4596_v39  ;;  %v1282_v62 = vmax.f32 %v4623_v56, %v4628_v59 }
 0x1e3   : > { %v1076_v63 = vpop.f32.mrf.mxu0 }
 0x1e4   : > { %v4636_v1 = vadd.f32 %v1076_v63, %v4598_v40  ;;  %1283 = vmax.xlane.f32.xlu1 %v1282_v62 }
 0x1e5   : > { %v1080_v2 = vpop.f32.mrf.mxu0 }
 0x1e6   : > { %v4639_v3 = vadd.f32 %v1080_v2, %v4596_v39  ;;  %v1285_v4 = vmax.f32 %v4631_v61, %v4636_v1 }
 0x1e7   : > { %v1082_v5 = vpop.f32.mrf.mxu0 }
 0x1e8   : > { %v4644_v6 = vadd.f32 %v1082_v5, %v4598_v40  ;;  %1286 = vmax.xlane.f32.xlu0 %v1285_v4 }
 0x1e9   : > { %v1086_v7 = vpop.f32.mrf.mxu0 }
 0x1ea   : > { %v4647_v8 = vadd.f32 %v1086_v7, %v4596_v39  ;;  %v1288_v9 = vmax.f32 %v4639_v3, %v4644_v6 }
 0x1eb   : > { %v1088_v10 = vpop.f32.mrf.mxu0 }
 0x1ec   : > { %v4652_v11 = vadd.f32 %v1088_v10, %v4598_v40  ;;  %1289 = vmax.xlane.f32.xlu1 %v1288_v9 }
 0x1ed   : > { %v1092_v12 = vpop.f32.mrf.mxu0 }
 0x1ee   : > { %v4655_v13 = vadd.f32 %v1092_v12, %v4596_v39  ;;  %v1291_v14 = vmax.f32 %v4647_v8, %v4652_v11 }
 0x1ef   : > { %v1094_v15 = vpop.f32.mrf.mxu0 }
 0x1f0   : > { %v4660_v16 = vadd.f32 %v1094_v15, %v4598_v40  ;;  %1292 = vmax.xlane.f32.xlu0 %v1291_v14 }
 0x1f1   : > { %v1098_v17 = vpop.f32.mrf.mxu0 }
 0x1f2   : > { %v4663_v18 = vadd.f32 %v1098_v17, %v4596_v39  ;;  %v1294_v19 = vmax.f32 %v4655_v13, %v4660_v16 }
 0x1f3   : > { %v1100_v20 = vpop.f32.mrf.mxu0 }
 0x1f4   : > { %v4668_v21 = vadd.f32 %v1100_v20, %v4598_v40  ;;  %1295 = vmax.xlane.f32.xlu1 %v1294_v19 }
 0x1f5   : > { %v1104_v22 = vpop.f32.mrf.mxu0 }
 0x1f6   : > { %v4671_v23 = vadd.f32 %v1104_v22, %v4596_v39  ;;  %v1297_v24 = vmax.f32 %v4663_v18, %v4668_v21 }
 0x1f7   : > { %v1106_v25 = vpop.f32.mrf.mxu0 }
 0x1f8   : > { %v4676_v26 = vadd.f32 %v1106_v25, %v4598_v40  ;;  %1298 = vmax.xlane.f32.xlu0 %v1297_v24 }
 0x1f9   : > { %v1110_v27 = vpop.f32.mrf.mxu0 }
 0x1fa   : > { %v4679_v28 = vadd.f32 %v1110_v27, %v4596_v39  ;;  %v1300_v29 = vmax.f32 %v4671_v23, %v4676_v26 }
 0x1fb   : > { %v1112_v30 = vpop.f32.mrf.mxu0 }
 0x1fc   : > { %v4684_v31 = vadd.f32 %v1112_v30, %v4598_v40  ;;  %1301 = vmax.xlane.f32.xlu1 %v1300_v29 }
 0x1fd   : > { %v1116_v32 = vpop.f32.mrf.mxu0 }
 0x1fe   : > { %v4687_v33 = vadd.f32 %v1116_v32, %v4596_v39  ;;  %v1303_v34 = vmax.f32 %v4679_v28, %v4684_v31 }
 0x1ff   : > { %v1118_v35 = vpop.f32.mrf.mxu0 }
 0x200   : > { %v4692_v36 = vadd.f32 %v1118_v35, %v4598_v40  ;;  %1304 = vmax.xlane.f32.xlu0 %v1303_v34 }
 0x201   : > { %v1122_v37 = vpop.f32.mrf.mxu0 }
 0x202   : > { %v4695_v38 = vadd.f32 %v1122_v37, %v4596_v39  ;;  %v1306_v41 = vmax.f32 %v4687_v33, %v4692_v36 }
 0x203   : > { %v1124_v42 = vpop.f32.mrf.mxu0 }
 0x204   : > { %v4700_v45 = vadd.f32 %v1124_v42, %v4598_v40  ;;  %1307 = vmax.xlane.f32.xlu1 %v1306_v41 }
 0x205   : > { %v1128_v47 = vpop.f32.mrf.mxu0 }
 0x206   : > { %v4703_v48 = vadd.f32 %v1128_v47, %v4596_v39  ;;  %v1309_v50 = vmax.f32 %v4695_v38, %v4700_v45 }
 0x207   : > { %v1130_v52 = vpop.f32.mrf.mxu0 }
 0x208   : > { %v4708_v53 = vadd.f32 %v1130_v52, %v4598_v40  ;;  %1310 = vmax.xlane.f32.xlu0 %v1309_v50 }
 0x209   : > { %v1134_v55 = vpop.f32.mrf.mxu0 }
 0x20a   : > { %v4711_v57 = vadd.f32 %v1134_v55, %v4596_v39  ;;  %v1312_v58 = vmax.f32 %v4703_v48, %v4708_v53 }
 0x20b   : > { %v1136_v60 = vpop.f32.mrf.mxu0 }
 0x20c   : > { %v4716_v62 = vadd.f32 %v1136_v60, %v4598_v40  ;;  %1313 = vmax.xlane.f32.xlu1 %v1312_v58 }
 0x20d   : > { %v1140_v63 = vpop.f32.mrf.mxu0 }
 0x20e   : > { %5972 = vst [vmem:[#allocation19_spill] sm:$0xff] %v4716_v62  ;;  %v4719_v0 = vadd.f32 %v1140_v63, %v4596_v39  ;;  %v1315_v2 = vmax.f32 %v4711_v57, %v4716_v62 }
 0x20f   : > { %v1142_v4 = vpop.f32.mrf.mxu0 }
 0x210   : > { %5973 = vst [vmem:[#allocation20_spill] sm:$0xff] %v4719_v0  ;;  %v4724_v5 = vadd.f32 %v1142_v4, %v4598_v40  ;;  %1316 = vmax.xlane.f32.xlu0 %v1315_v2 }
 0x211   : > { %v1146_v7 = vpop.f32.mrf.mxu0 }
 0x212   : > { %5974 = vst [vmem:[#allocation21_spill] sm:$0xff] %v4724_v5  ;;  %v4727_v9 = vadd.f32 %v1146_v7, %v4596_v39  ;;  %v1318_v10 = vmax.f32 %v4719_v0, %v4724_v5 }
 0x213   : > { %v1148_v12 = vpop.f32.mrf.mxu0 }
 0x214   : > { %5975 = vst [vmem:[#allocation22_spill] sm:$0xff] %v4727_v9  ;;  %v4732_v14 = vadd.f32 %v1148_v12, %v4598_v40  ;;  %1319 = vmax.xlane.f32.xlu1 %v1318_v10 }
 0x215   : > { %v1152_v15 = vpop.f32.mrf.mxu0 }
 0x216   : > { %5976 = vst [vmem:[#allocation23_spill] sm:$0xff] %v4732_v14  ;;  %v4735_v17 = vadd.f32 %v1152_v15, %v4596_v39  ;;  %v1321_v19 = vmax.f32 %v4727_v9, %v4732_v14  ;;  %v5013_v9 = vld [vmem:[#allocation2 + $0x50] sm:$0xff] }
 0x217   : > { %v1154_v20 = vpop.f32.mrf.mxu0 }
 0x218   : > { %5977 = vst [vmem:[#allocation24_spill] sm:$0xff] %v4735_v17  ;;  %v4740_v22 = vadd.f32 %v1154_v20, %v4598_v40  ;;  %1322 = vmax.xlane.f32.xlu0 %v1321_v19 }
 0x219   : > { %v1158_v24 = vpop.f32.mrf.mxu0 }
 0x21a   : > { %5978 = vst [vmem:[#allocation25_spill] sm:$0xff] %v4740_v22  ;;  %v4743_v25 = vadd.f32 %v1158_v24, %v4596_v39  ;;  %v1324_v27 = vmax.f32 %v4735_v17, %v4740_v22  ;;  %v4995_v22 = vld [vmem:[#allocation2 + $0x48] sm:$0xff] }
 0x21b   : > { %v1160_v29 = vpop.f32.mrf.mxu0  ;;  %6005 = vst [vmem:[#allocation52_spill] sm:$0xff] %v4995_v22 }
 0x21c   : > { %5979 = vst [vmem:[#allocation26_spill] sm:$0xff] %v4743_v25  ;;  %v4748_v30 = vadd.f32 %v1160_v29, %v4598_v40  ;;  %1325 = vmax.xlane.f32.xlu1 %v1324_v27 }
 0x21d   : > { %v1164_v32 = vpop.f32.mrf.mxu0 }
 0x21e   : > { %5980 = vst [vmem:[#allocation27_spill] sm:$0xff] %v4748_v30  ;;  %v4751_v34 = vadd.f32 %v1164_v32, %v4596_v39  ;;  %v1327_v35 = vmax.f32 %v4743_v25, %v4748_v30 }
 0x21f   : > { %v1166_v37 = vpop.f32.mrf.mxu0 }
 0x220   : > { %5981 = vst [vmem:[#allocation28_spill] sm:$0xff] %v4751_v34  ;;  %v4756_v41 = vadd.f32 %v1166_v37, %v4598_v40  ;;  %1328 = vmax.xlane.f32.xlu0 %v1327_v35 }
 0x221   : > { %v1170_v42 = vpop.f32.mrf.mxu0 }
 0x222   : > { %5982 = vst [vmem:[#allocation29_spill] sm:$0xff] %v4756_v41  ;;  %v4759_v47 = vadd.f32 %v1170_v42, %v4596_v39  ;;  %v1330_v50 = vmax.f32 %v4751_v34, %v4756_v41 }
 0x223   : > { %v1172_v52 = vpop.f32.mrf.mxu0 }
 0x224   : > { %5983 = vst [vmem:[#allocation30_spill] sm:$0xff] %v4759_v47  ;;  %v4764_v55 = vadd.f32 %v1172_v52, %v4598_v40  ;;  %1331 = vmax.xlane.f32.xlu0 %v1330_v50  ;;  %v3965_v52 = vmov 0.0  }
 0x225   : > { %v1176_v58 = vpop.f32.mrf.mxu0  ;;  %2330 = vmatprep.subr.mxu1 %v3965_v52 }
 0x226   : > { %5984 = vst [vmem:[#allocation31_spill] sm:$0xff] %v4764_v55  ;;  %v4767_v60 = vadd.f32 %v1176_v58, %v4596_v39  ;;  %v1333_v63 = vmax.f32 %v4759_v47, %v4764_v55  ;;  %v2313_v58 = vld [vmem:[%s4394_s17 + $0x78] sm:$0xff]  ;;  %v4979_v47 = vld [vmem:[#allocation2 + $0x40] sm:$0xff] }
 0x227   : > { %v1178_v2 = vpop.f32.mrf.mxu0  ;;  %2331 = vmatpush1.msra.mxu1 %v2313_v58 }
 0x228   : > { %5985 = vst [vmem:[#allocation32_spill] sm:$0xff] %v4767_v60  ;;  %v4772_v4 = vadd.f32 %v1178_v2, %v4598_v40  ;;  %1334 = vmax.xlane.f32.xlu1 %v1333_v63  ;;  %2332 = vmatprep.subr.mxu1 %v3965_v52 }
 0x229   : > { %v1182_v7 = vpop.f32.mrf.mxu0 }
 0x22a   : > { %5986 = vst [vmem:[#allocation33_spill] sm:$0xff] %v4772_v4  ;;  %v4775_v10 = vadd.f32 %v1182_v7, %v4596_v39  ;;  %v1336_v12 = vmax.f32 %v4767_v60, %v4772_v4  ;;  %v2312_v7 = vld [vmem:[%s4394_s17 + $0x70] sm:$0xff]  ;;  %v4969_v4 = vld [vmem:[#allocation2 + $0x38] sm:$0xff] }
 0x22b   : > { %v1184_v15 = vpop.f32.mrf.mxu0  ;;  %2333 = vmatpush1.msra.mxu1 %v2312_v7  ;;  %v2309_v7 = vld [vmem:[%s4394_s17 + $0x58] sm:$0xff] }
 0x22c   : > { %5987 = vst [vmem:[#allocation34_spill] sm:$0xff] %v4775_v10  ;;  %v4780_v19 = vadd.f32 %v1184_v15, %v4598_v40  ;;  %1337 = vmax.xlane.f32.xlu1 %v1336_v12  ;;  %2334 = vmatprep.subr.mxu1 %v3965_v52 }
 0x22d   : > { %v1188_v20 = vpop.f32.mrf.mxu0 }
 0x22e   : > { %5988 = vst [vmem:[#allocation35_spill] sm:$0xff] %v4780_v19  ;;  %v4783_v24 = vadd.f32 %v1188_v20, %v4596_v39  ;;  %v1339_v27 = vmax.f32 %v4775_v10, %v4780_v19 }
 0x22f   : > { %v1190_v29 = vpop.f32.mrf.mxu0 }
 0x230   : > { %5989 = vst [vmem:[#allocation36_spill] sm:$0xff] %v4783_v24  ;;  %v4788_v32 = vadd.f32 %v1190_v29, %v4598_v40  ;;  %1340 = vmax.xlane.f32.xlu1 %v1339_v27  ;;  %v2311_v27 = vld [vmem:[%s4394_s17 + $0x68] sm:$0xff] }
 0x231   : > { %v1194_v35 = vpop.f32.mrf.mxu0  ;;  %2335 = vmatpush1.msra.mxu1 %v2311_v27  ;;  %v2308_v27 = vld [vmem:[%s4394_s17 + $0x50] sm:$0xff] }
 0x232   : > { %5990 = vst [vmem:[#allocation37_spill] sm:$0xff] %v4788_v32  ;;  %v4791_v37 = vadd.f32 %v1194_v35, %v4596_v39  ;;  %v1342_v42 = vmax.f32 %v4783_v24, %v4788_v32  ;;  %2336 = vmatprep.subr.mxu1 %v3965_v52  ;;  %v2314_v24 = vld [vmem:[%s4394_s17 + $0x80] sm:$0xff] }
 0x233   : > { %v1196_v50 = vpop.f32.mrf.mxu0 }
 0x234   : > { %5991 = vst [vmem:[#allocation38_spill] sm:$0xff] %v4791_v37  ;;  %v4798_v63 = vadd.f32 %v1196_v50, %v4598_v40  ;;  %1343 = vmax.xlane.f32.xlu1 %v1342_v42  ;;  %v2310_v42 = vld [vmem:[%s4394_s17 + $0x60] sm:$0xff] }
 0x235   : > { %v1200_v2 = vpop.f32.mrf.mxu0  ;;  %2337 = vmatpush1.msra.mxu1 %v2310_v42 }
 0x236   : > { %5992 = vst [vmem:[#allocation39_spill] sm:$0xff] %v4798_v63  ;;  %v4803_v12 = vadd.f32 %v1200_v2, %v4596_v39  ;;  %v1345_v15 = vmax.f32 %v4791_v37, %v4798_v63  ;;  %2338 = vmatprep.subr.mxu1 %v3965_v52  ;;  %v4935_v37 = vld [vmem:[#allocation2 + $0x20] sm:$0xff] }
 0x237   : > { %v1202_v20 = vpop.f32.mrf.mxu0  ;;  %2339 = vmatpush1.msra.mxu1 %v2309_v7 }
 0x238   : > { %5993 = vst [vmem:[#allocation40_spill] sm:$0xff] %v4803_v12  ;;  %v4810_v29 = vadd.f32 %v1202_v20, %v4598_v40  ;;  %1346 = vmax.xlane.f32.xlu1 %v1345_v15  ;;  %2340 = vmatprep.subr.mxu1 %v3965_v52 }
 0x239   : > { %v1206_v35 = vpop.f32.mrf.mxu0  ;;  %2341 = vmatpush1.msra.mxu1 %v2308_v27 }
 0x23a   : > { %5994 = vst [vmem:[#allocation41_spill] sm:$0xff] %v4810_v29  ;;  %v4815_v50 = vadd.f32 %v1206_v35, %v4596_v39  ;;  %v1348_v58 = vmax.f32 %v4803_v12, %v4810_v29  ;;  %2342 = vmatprep.subr.mxu1 %v3965_v52 }
 0x23b   : > { %v1208_v2 = vpop.f32.mrf.mxu0 }
 0x23c   : > { %5995 = vst [vmem:[#allocation42_spill] sm:$0xff] %v4815_v50  ;;  %v4822_v15 = vadd.f32 %v1208_v2, %v4598_v40  ;;  %1349 = vmax.xlane.f32.xlu1 %v1348_v58  ;;  %v2307_v2 = vld [vmem:[%s4394_s17 + $0x48] sm:$0xff] }
 0x23d   : > { %v1212_v20 = vpop.f32.mrf.mxu0  ;;  %2343 = vmatpush1.msra.mxu1 %v2307_v2 }
 0x23e   : > { %5996 = vst [vmem:[#allocation43_spill] sm:$0xff] %v4822_v15  ;;  %v4827_v35 = vadd.f32 %v1212_v20, %v4596_v39  ;;  %v1351_v42 = vmax.f32 %v4815_v50, %v4822_v15  ;;  %2344 = vmatprep.subr.mxu1 %v3965_v52  ;;  %v2306_v20 = vld [vmem:[%s4394_s17 + $0x40] sm:$0xff] }
 0x23f   : > { %v1214_v29 = vpop.f32.mrf.mxu0  ;;  %2345 = vmatpush1.msra.mxu1 %v2306_v20 }
 0x240   : > { %5997 = vst [vmem:[#allocation44_spill] sm:$0xff] %v4827_v35  ;;  %v4834_v58 = vadd.f32 %v1214_v29, %v4598_v40  ;;  %1352 = vmax.xlane.f32.xlu1 %v1351_v42  ;;  %2346 = vmatprep.subr.mxu1 %v3965_v52  ;;  %v2305_v29 = vld [vmem:[%s4394_s17 + $0x38] sm:$0xff] }
 0x241   : > { %v1218_v7 = vpop.f32.mrf.mxu0  ;;  %2347 = vmatpush1.msra.mxu1 %v2305_v29  ;;  %v2302_v29 = vld [vmem:[%s4394_s17 + $0x20] sm:$0xff] }
 0x242   : > { %5998 = vst [vmem:[#allocation45_spill] sm:$0xff] %v4834_v58  ;;  %v4839_v12 = vadd.f32 %v1218_v7, %v4596_v39  ;;  %v1354_v27 = vmax.f32 %v4827_v35, %v4834_v58  ;;  %2348 = vmatprep.subr.mxu1 %v3965_v52  ;;  %v2304_v7 = vld [vmem:[%s4394_s17 + $0x30] sm:$0xff]  ;;  %v4921_v35 = vld [vmem:[#allocation2 + $0x18] sm:$0xff] }
 0x243   : > { %v1220_v15 = vpop.f32.mrf.mxu0  ;;  %2349 = vmatpush1.msra.mxu1 %v2304_v7  ;;  %v2301_v7 = vld [vmem:[%s4394_s17 + $0x18] sm:$0xff] }
 0x244   : > { %5999 = vst [vmem:[#allocation46_spill] sm:$0xff] %v4839_v12  ;;  %v4846_v42 = vadd.f32 %v1220_v15, %v4598_v40  ;;  %1355 = vmax.xlane.f32.xlu1 %v1354_v27  ;;  %2350 = vmatprep.subr.mxu1 %v3965_v52  ;;  %v2303_v15 = vld [vmem:[%s4394_s17 + $0x28] sm:$0xff] }
 0x245   : > { %v1224_v2 = vpop.f32.mrf.mxu0  ;;  %2351 = vmatpush1.msra.mxu1 %v2303_v15  ;;  %v2298_v15 = vld [vmem:[%s4394_s17] sm:$0xff] }
 0x246   : > { %6000 = vst [vmem:[#allocation47_spill] sm:$0xff] %v4846_v42  ;;  %v4851_v50 = vadd.f32 %v1224_v2, %v4596_v39  ;;  %v1357_v20 = vmax.f32 %v4839_v12, %v4846_v42  ;;  %2352 = vmatprep.subr.mxu1 %v3965_v52  ;;  %v4907_v42 = vld [vmem:[#allocation2 + $0x10] sm:$0xff] }
 0x247   : > { %v1226_v58 = vpop.f32.mrf.mxu0  ;;  %2353 = vmatpush1.msra.mxu1 %v2302_v29  ;;  %v2329_v29 = vld [vmem:[%s4394_s17 + $0xf8] sm:$0xff] }
 0x248   : > { %6001 = vst [vmem:[#allocation48_spill] sm:$0xff] %v4851_v50  ;;  %v4858_v27 = vadd.f32 %v1226_v58, %v4598_v40  ;;  %1358 = vmax.xlane.f32.xlu1 %v1357_v20  ;;  %2354 = vmatprep.subr.mxu1 %v3965_v52  ;;  %v2300_v58 = vld [vmem:[%s4394_s17 + $0x10] sm:$0xff]  ;;  %v2299_v20 = vld [vmem:[%s4394_s17 + $0x8] sm:$0xff] }
 0x249   : > { %2355 = vmatpush1.msra.mxu1 %v2301_v7  ;;  %v2327_v7 = vld [vmem:[%s4394_s17 + $0xe8] sm:$0xff]  ;;  %v1230_v10 = vpop.f32.mrf.mxu0 }
 0x24a   : > { %6002 = vst [vmem:[#allocation49_spill] sm:$0xff] %v4858_v27  ;;  %v1360_v2 = vmax.f32 %v4851_v50, %v4858_v27  ;;  %2356 = vmatprep.subr.mxu1 %v3965_v52  ;;  %v4893_v27 = vld [vmem:[#allocation2 + $0x8] sm:$0xff]  ;;  %v4987_v34 = vadd.f32 %v1230_v10, %v4596_v39 }
 0x24b   : > { %2357 = vmatpush1.msra.mxu1 %v2300_v58  ;;  %v2326_v58 = vld [vmem:[%s4394_s17 + $0xe0] sm:$0xff]  ;;  %v1232_v60 = vpop.f32.mrf.mxu0 }
 0x24c   : > { %1361 = vmax.xlane.f32.xlu1 %v1360_v2  ;;  %2358 = vmatprep.subr.mxu1 %v3965_v52  ;;  %v2328_v2 = vld [vmem:[%s4394_s17 + $0xf0] sm:$0xff]  ;;  %6003 = vst [vmem:[#allocation50_spill] sm:$0xff] %v4987_v34  ;;  %v4990_v30 = vadd.f32 %v1232_v60, %v4598_v40 }
 0x24d   : > { %2359 = vmatpush1.msra.mxu1 %v2299_v20  ;;  %v2325_v20 = vld [vmem:[%s4394_s17 + $0xd8] sm:$0xff]  ;;  %v1236_v41 = vpop.f32.mrf.mxu0 }
 0x24e   : > { %2360 = vmatprep.subr.mxu1 %v3965_v52  ;;  %6004 = vst [vmem:[#allocation51_spill] sm:$0xff] %v4990_v30  ;;  %v5003_v10 = vadd.f32 %v1236_v41, %v4596_v39  ;;  %v1363_v14 = vmax.f32 %v4987_v34, %v4990_v30  ;;  %v5055_v34 = vld [vmem:[#allocation2 + $0x70] sm:$0xff] }
 0x24f   : > { %2361 = vmatpush1.msra.mxu1 %v2298_v15  ;;  %v2324_v15 = vld [vmem:[%s4394_s17 + $0xd0] sm:$0xff]  ;;  %v1238_v25 = vpop.f32.mrf.mxu0  ;;  %6013 = vst [vmem:[#allocation60_spill] sm:$0xff] %v5055_v34 }
 0x250   : > { %2362 = vmatprep.subr.mxu1 %v3965_v52  ;;  %6006 = vst [vmem:[#allocation53_spill] sm:$0xff] %v5003_v10  ;;  %v5006_v60 = vadd.f32 %v1238_v25, %v4598_v40  ;;  %v5025_v25 = vld [vmem:[#allocation2 + $0x58] sm:$0xff] }
 0x251   : > { %2363 = vmatpush2.msra.mxu1 %v2329_v29  ;;  %v4884_v29 = vld [vmem:[#allocation2] sm:$0xff]  ;;  %6009 = vst [vmem:[#allocation56_spill] sm:$0xff] %v5025_v25 }
 0x252   : > { %2364 = vmatprep.subr.mxu1 %v3965_v52  ;;  %6007 = vst [vmem:[#allocation54_spill] sm:$0xff] %v5006_v60 }
 0x253   : > { %2365 = vmatpush2.msra.mxu1 %v2328_v2  ;;  %v2323_v2 = vld [vmem:[%s4394_s17 + $0xc8] sm:$0xff] }
 0x254   : > { %2366 = vmatprep.subr.mxu1 %v3965_v52 }
 0x255   : > { %2367 = vmatpush2.msra.mxu1 %v2327_v7 }
 0x256   : > { %2368 = vmatprep.subr.mxu1 %v3965_v52 }
 0x257   : > { %2369 = vmatpush2.msra.mxu1 %v2326_v58 }
 0x258   : > { %2370 = vmatprep.subr.mxu1 %v3965_v52 }
 0x259   : > { %2371 = vmatpush2.msra.mxu1 %v2325_v20  ;;  %v2322_v20 = vld [vmem:[%s4394_s17 + $0xc0] sm:$0xff] }
 0x25a   : > { %2372 = vmatprep.subr.mxu1 %v3965_v52 }
 0x25b   : > { %2373 = vmatpush2.msra.mxu1 %v2324_v15 }
 0x25c   : > { %2374 = vmatprep.subr.mxu1 %v3965_v52 }
 0x25d   : > { %2375 = vmatpush2.msra.mxu1 %v2323_v2  ;;  %v2321_v2 = vld [vmem:[%s4394_s17 + $0xb8] sm:$0xff] }
 0x25e   : > { %2376 = vmatprep.subr.mxu1 %v3965_v52 }
 0x25f   : > { %2377 = vmatpush2.msra.mxu1 %v2322_v20  ;;  %v2320_v20 = vld [vmem:[%s4394_s17 + $0xb0] sm:$0xff] }
 0x260   : > { %2378 = vmatprep.subr.mxu1 %v3965_v52 }
 0x261   : > { %v1275_v7 = vpop.xlane.xlu0 %1274  ;;  %2379 = vmatpush2.msra.mxu1 %v2321_v2  ;;  %v2319_v2 = vld [vmem:[%s4394_s17 + $0xa8] sm:$0xff] }
 0x262   : > { %v4889_v58 = vmax.f32 %v4884_v29, %v1275_v7  ;;  %2380 = vmatprep.subr.mxu1 %v3965_v52 }
 0x263   : > { %2381 = vmatpush2.msra.mxu1 %v2320_v20  ;;  %v2318_v20 = vld [vmem:[%s4394_s17 + $0xa0] sm:$0xff] }
 0x264   : > { %2619 = vst.msk [vmem:[#allocation2] sm:$0xff] %vm2041_vm1, %v4889_v58  ;;  %1499 = vperm.xlu1 %3582, %v4889_v58   ;;  %2382 = vmatprep.subr.mxu1 %v3965_v52 }
 0x265   : > { %v1278_v7 = vpop.xlane.xlu0 %1277  ;;  %2383 = vmatpush2.msra.mxu1 %v2319_v2  ;;  %v2317_v2 = vld [vmem:[%s4394_s17 + $0x98] sm:$0xff] }
 0x266   : > { %v4903_v50 = vmax.f32 %v4893_v27, %v1278_v7  ;;  %2384 = vmatprep.subr.mxu1 %v3965_v52 }
 0x267   : > { %2385 = vmatpush2.msra.mxu1 %v2318_v20  ;;  %v2316_v20 = vld [vmem:[%s4394_s17 + $0x90] sm:$0xff] }
 0x268   : > { %2620 = vst.msk [vmem:[#allocation2 + $0x8] sm:$0xff] %vm2041_vm1, %v4903_v50  ;;  %1504 = vperm.xlu0 %3583, %v4903_v50   ;;  %2386 = vmatprep.subr.mxu1 %v3965_v52 }
 0x269   : > { %v1281_v7 = vpop.xlane.xlu1 %1280  ;;  %2387 = vmatpush2.msra.mxu1 %v2317_v2  ;;  %v2315_v2 = vld [vmem:[%s4394_s17 + $0x88] sm:$0xff] }
 0x26a   : > { %v4917_v12 = vmax.f32 %v4907_v42, %v1281_v7  ;;  %2388 = vmatprep.subr.mxu1 %v3965_v52 }
 0x26b   : > { %2389 = vmatpush2.msra.mxu1 %v2316_v20  ;;  %v4949_v20 = vld [vmem:[#allocation2 + $0x28] sm:$0xff] }
 0x26c   : > { %2621 = vst.msk [vmem:[#allocation2 + $0x10] sm:$0xff] %vm2041_vm1, %v4917_v12  ;;  %1509 = vperm.xlu0 %3583, %v4917_v12   ;;  %2390 = vmatprep.subr.mxu1 %v3965_v52 }
 0x26d   : > { %v1284_v7 = vpop.xlane.xlu1 %1283  ;;  %2391 = vmatpush2.msra.mxu1 %v2315_v2 }
 0x26e   : > { %v4931_v63 = vmax.f32 %v4921_v35, %v1284_v7  ;;  %2392 = vmatprep.subr.mxu1 %v3965_v52 }
 0x26f   : > { %2393 = vmatpush2.msra.mxu1 %v2314_v24 }
 0x270   : > { %2622 = vst.msk [vmem:[#allocation2 + $0x18] sm:$0xff] %vm2041_vm1, %v4931_v63  ;;  %1514 = vperm.xlu0 %3583, %v4931_v63  }
 0x271   : > { %v1287_v32 = vpop.xlane.xlu0 %1286 }
 0x272   : > { %v4945_v7 = vmax.f32 %v4935_v37, %v1287_v32  ;;  %v4959_v32 = vld [vmem:[#allocation2 + $0x30] sm:$0xff] }
 0x274   : > { %2623 = vst.msk [vmem:[#allocation2 + $0x20] sm:$0xff] %vm2041_vm1, %v4945_v7  ;;  %1519 = vperm.xlu0 %3583, %v4945_v7  }
 0x275   : > { %v1290_v19 = vpop.xlane.xlu1 %1289 }
 0x276   : > { %v4957_v2 = vmax.f32 %v4949_v20, %v1290_v19 }
 0x278   : > { %2624 = vst.msk [vmem:[#allocation2 + $0x28] sm:$0xff] %vm2041_vm1, %v4957_v2  ;;  %1524 = vperm.xlu0 %3583, %v4957_v2  }
 0x279   : > { %v1293_v24 = vpop.xlane.xlu0 %1292 }
 0x27a   : > { %v4967_v15 = vmax.f32 %v4959_v32, %v1293_v24 }
 0x27c   : > { %2625 = vst.msk [vmem:[#allocation2 + $0x30] sm:$0xff] %vm2041_vm1, %v4967_v15  ;;  %1529 = vperm.xlu0 %3583, %v4967_v15  }
 0x27d   : > { %v1296_v52 = vpop.xlane.xlu1 %1295 }
 0x27e   : > { %v4977_v55 = vmax.f32 %v4969_v4, %v1296_v52 }
 0x280   : > { %2626 = vst.msk [vmem:[#allocation2 + $0x38] sm:$0xff] %vm2041_vm1, %v4977_v55  ;;  %1534 = vperm.xlu0 %3583, %v4977_v55  }
 0x281   : > { %v1299_v19 = vpop.xlane.xlu0 %1298 }
 0x282   : > { %v4993_v52 = vmax.f32 %v4979_v47, %v1299_v19 }
 0x284   : > { %2627 = vst.msk [vmem:[#allocation2 + $0x40] sm:$0xff] %vm2041_vm1, %v4993_v52  ;;  %1539 = vperm.xlu0 %3583, %v4993_v52  }
 0x285   : > { %v1302_v17 = vpop.xlane.xlu1 %1301 }
 0x286   : > { %v5009_v19 = vmax.f32 %v4995_v22, %v1302_v17  ;;  %v1366_v17 = vmax.f32 %v5003_v10, %v5006_v60  ;;  %v5085_v22 = vld [vmem:[#allocation2 + $0x88] sm:$0xff] }
 0x287   : > { %6019 = vst [vmem:[#allocation66_spill] sm:$0xff] %v5085_v22 }
 0x288   : > { %6008 = vst [vmem:[#allocation55_spill] sm:$0xff] %v5009_v19  ;;  %2628 = vst.msk [vmem:[#allocation2 + $0x48] sm:$0xff] %vm2041_vm1, %v5009_v19  ;;  %1364 = vmax.xlane.f32.xlu1 %v1363_v14  ;;  %1544 = vperm.xlu0 %3583, %v5009_v19  }
 0x289   : > { %v1305_v39 = vpop.xlane.xlu0 %1304 }
 0x28a   : > { %v5021_v40 = vmax.f32 %v5013_v9, %v1305_v39  ;;  %v5035_v39 = vld [vmem:[#allocation2 + $0x60] sm:$0xff] }
 0x28c   : > { %2629 = vst.msk [vmem:[#allocation2 + $0x50] sm:$0xff] %vm2041_vm1, %v5021_v40  ;;  %1367 = vmax.xlane.f32.xlu1 %v1366_v17  ;;  %1549 = vperm.xlu0 %3583, %v5021_v40   ;;  %v5045_v17 = vld [vmem:[#allocation2 + $0x68] sm:$0xff] }
 0x28d   : > { %v1308_v14 = vpop.xlane.xlu1 %1307  ;;  %6011 = vst [vmem:[#allocation58_spill] sm:$0xff] %v5045_v17 }
 0x28e   : > { %v5033_v24 = vmax.f32 %v5025_v25, %v1308_v14  ;;  %v5065_v25 = vld [vmem:[#allocation2 + $0x78] sm:$0xff] }
 0x28f   : > { %6015 = vst [vmem:[#allocation62_spill] sm:$0xff] %v5065_v25 }
 0x290   : > { %6010 = vst [vmem:[#allocation57_spill] sm:$0xff] %v5033_v24  ;;  %2630 = vst.msk [vmem:[#allocation2 + $0x58] sm:$0xff] %vm2041_vm1, %v5033_v24  ;;  %1554 = vperm.xlu0 %3583, %v5033_v24  }
 0x291   : > { %v1311_v41 = vpop.xlane.xlu0 %1310 }
 0x292   : > { %v5043_v10 = vmax.f32 %v5035_v39, %v1311_v41 }
 0x294   : > { %2631 = vst.msk [vmem:[#allocation2 + $0x60] sm:$0xff] %vm2041_vm1, %v5043_v10  ;;  %1559 = vperm.xlu0 %3583, %v5043_v10  }
 0x295   : > { %v1314_v60 = vpop.xlane.xlu1 %1313 }
 0x296   : > { %v5053_v30 = vmax.f32 %v5045_v17, %v1314_v60  ;;  %v5075_v17 = vld [vmem:[#allocation2 + $0x80] sm:$0xff] }
 0x297   : > { %6017 = vst [vmem:[#allocation64_spill] sm:$0xff] %v5075_v17 }
 0x298   : > { %6012 = vst [vmem:[#allocation59_spill] sm:$0xff] %v5053_v30  ;;  %2632 = vst.msk [vmem:[#allocation2 + $0x68] sm:$0xff] %vm2041_vm1, %v5053_v30  ;;  %1564 = vperm.xlu0 %3583, %v5053_v30  }
 0x299   : > { %v1317_v14 = vpop.xlane.xlu0 %1316 }
 0x29a   : > { %v5063_v24 = vmax.f32 %v5055_v34, %v1317_v14 }
 0x29c   : > { %6014 = vst [vmem:[#allocation61_spill] sm:$0xff] %v5063_v24  ;;  %2633 = vst.msk [vmem:[#allocation2 + $0x70] sm:$0xff] %vm2041_vm1, %v5063_v24 }
 0x29d   : > { %v1320_v19 = vpop.xlane.xlu1 %1319  ;;  %1569 = vperm.xlu1 %3582, %v5063_v24   ;;  %v5095_v24 = vld [vmem:[#allocation2 + $0x90] sm:$0xff] }
 0x29e   : > { %v5073_v41 = vmax.f32 %v5065_v25, %v1320_v19  ;;  %6021 = vst [vmem:[#allocation68_spill] sm:$0xff] %v5095_v24 }
 0x2a0   : > { %6016 = vst [vmem:[#allocation63_spill] sm:$0xff] %v5073_v41  ;;  %2634 = vst.msk [vmem:[#allocation2 + $0x78] sm:$0xff] %vm2041_vm1, %v5073_v41  ;;  %1574 = vperm.xlu0 %3583, %v5073_v41  }
 0x2a1   : > { %v1323_v60 = vpop.xlane.xlu0 %1322 }
 0x2a2   : > { %v5083_v30 = vmax.f32 %v5075_v17, %v1323_v60  ;;  %v5105_v17 = vld [vmem:[#allocation2 + $0x98] sm:$0xff] }
 0x2a3   : > { %6023 = vst [vmem:[#allocation70_spill] sm:$0xff] %v5105_v17 }
 0x2a4   : > { %6018 = vst [vmem:[#allocation65_spill] sm:$0xff] %v5083_v30  ;;  %2635 = vst.msk [vmem:[#allocation2 + $0x80] sm:$0xff] %vm2041_vm1, %v5083_v30  ;;  %1579 = vperm.xlu0 %3583, %v5083_v30   ;;  %v5115_v30 = vld [vmem:[#allocation2 + $0xa0] sm:$0xff] }
 0x2a5   : > { %v1326_v14 = vpop.xlane.xlu1 %1325  ;;  %6025 = vst [vmem:[#allocation72_spill] sm:$0xff] %v5115_v30 }
 0x2a6   : > { %v5093_v25 = vmax.f32 %v5085_v22, %v1326_v14 }
 0x2a8   : > { %6020 = vst [vmem:[#allocation67_spill] sm:$0xff] %v5093_v25  ;;  %2636 = vst.msk [vmem:[#allocation2 + $0x88] sm:$0xff] %vm2041_vm1, %v5093_v25  ;;  %1584 = vperm.xlu0 %3583, %v5093_v25  }
 0x2a9   : > { %v1329_v19 = vpop.xlane.xlu0 %1328 }
 0x2aa   : > { %v5103_v41 = vmax.f32 %v5095_v24, %v1329_v19  ;;  %v5125_v24 = vld [vmem:[#allocation2 + $0xa8] sm:$0xff] }
 0x2ab   : > { %6027 = vst [vmem:[#allocation74_spill] sm:$0xff] %v5125_v24 }
 0x2ac   : > { %6022 = vst [vmem:[#allocation69_spill] sm:$0xff] %v5103_v41  ;;  %2637 = vst.msk [vmem:[#allocation2 + $0x90] sm:$0xff] %vm2041_vm1, %v5103_v41  ;;  %1589 = vperm.xlu0 %3583, %v5103_v41   ;;  %v5135_v41 = vld [vmem:[#allocation2 + $0xb0] sm:$0xff] }
 0x2ad   : > { %v1332_v60 = vpop.xlane.xlu0 %1331  ;;  %6029 = vst [vmem:[#allocation76_spill] sm:$0xff] %v5135_v41 }
 0x2ae   : > { %v5113_v22 = vmax.f32 %v5105_v17, %v1332_v60 }
 0x2b0   : > { %6024 = vst [vmem:[#allocation71_spill] sm:$0xff] %v5113_v22  ;;  %2638 = vst.msk [vmem:[#allocation2 + $0x98] sm:$0xff] %vm2041_vm1, %v5113_v22  ;;  %1594 = vperm.xlu1 %3582, %v5113_v22  }
 0x2b1   : > { %v1335_v14 = vpop.xlane.xlu1 %1334 }
 0x2b2   : > { %v5123_v25 = vmax.f32 %v5115_v30, %v1335_v14  ;;  %v5145_v30 = vld [vmem:[#allocation2 + $0xb8] sm:$0xff] }
 0x2b3   : > { %6031 = vst [vmem:[#allocation78_spill] sm:$0xff] %v5145_v30 }
 0x2b4   : > { %6026 = vst [vmem:[#allocation73_spill] sm:$0xff] %v5123_v25  ;;  %2639 = vst.msk [vmem:[#allocation2 + $0xa0] sm:$0xff] %vm2041_vm1, %v5123_v25  ;;  %1599 = vperm.xlu0 %3583, %v5123_v25   ;;  %v5155_v25 = vld [vmem:[#allocation2 + $0xc0] sm:$0xff] }
 0x2b5   : > { %v1338_v19 = vpop.xlane.xlu1 %1337  ;;  %6033 = vst [vmem:[#allocation80_spill] sm:$0xff] %v5155_v25 }
 0x2b6   : > { %v5133_v17 = vmax.f32 %v5125_v24, %v1338_v19 }
 0x2b8   : > { %6028 = vst [vmem:[#allocation75_spill] sm:$0xff] %v5133_v17  ;;  %2640 = vst.msk [vmem:[#allocation2 + $0xa8] sm:$0xff] %vm2041_vm1, %v5133_v17  ;;  %1604 = vperm.xlu1 %3582, %v5133_v17  }
 0x2b9   : > { %v1341_v60 = vpop.xlane.xlu1 %1340 }
 0x2ba   : > { %v5143_v22 = vmax.f32 %v5135_v41, %v1341_v60  ;;  %v5165_v41 = vld [vmem:[#allocation2 + $0xc8] sm:$0xff] }
 0x2bb   : > { %6035 = vst [vmem:[#allocation82_spill] sm:$0xff] %v5165_v41 }
 0x2bc   : > { %6030 = vst [vmem:[#allocation77_spill] sm:$0xff] %v5143_v22  ;;  %2641 = vst.msk [vmem:[#allocation2 + $0xb0] sm:$0xff] %vm2041_vm1, %v5143_v22  ;;  %1609 = vperm.xlu0 %3583, %v5143_v22   ;;  %v5175_v22 = vld [vmem:[#allocation2 + $0xd0] sm:$0xff] }
 0x2bd   : > { %v1344_v14 = vpop.xlane.xlu1 %1343  ;;  %6037 = vst [vmem:[#allocation84_spill] sm:$0xff] %v5175_v22 }
 0x2be   : > { %v5153_v24 = vmax.f32 %v5145_v30, %v1344_v14 }
 0x2c0   : > { %6032 = vst [vmem:[#allocation79_spill] sm:$0xff] %v5153_v24  ;;  %2642 = vst.msk [vmem:[#allocation2 + $0xb8] sm:$0xff] %vm2041_vm1, %v5153_v24  ;;  %1614 = vperm.xlu1 %3582, %v5153_v24  }
 0x2c1   : > { %v1347_v19 = vpop.xlane.xlu1 %1346 }
 0x2c2   : > { %v5163_v17 = vmax.f32 %v5155_v25, %v1347_v19  ;;  %v5185_v25 = vld [vmem:[#allocation2 + $0xd8] sm:$0xff] }
 0x2c3   : > { %6039 = vst [vmem:[#allocation86_spill] sm:$0xff] %v5185_v25 }
 0x2c4   : > { %6034 = vst [vmem:[#allocation81_spill] sm:$0xff] %v5163_v17  ;;  %2643 = vst.msk [vmem:[#allocation2 + $0xc0] sm:$0xff] %vm2041_vm1, %v5163_v17  ;;  %1619 = vperm.xlu0 %3583, %v5163_v17   ;;  %v5195_v17 = vld [vmem:[#allocation2 + $0xe0] sm:$0xff] }
 0x2c5   : > { %v1350_v60 = vpop.xlane.xlu1 %1349  ;;  %6041 = vst [vmem:[#allocation88_spill] sm:$0xff] %v5195_v17 }
 0x2c6   : > { %v5173_v30 = vmax.f32 %v5165_v41, %v1350_v60 }
 0x2c8   : > { %6036 = vst [vmem:[#allocation83_spill] sm:$0xff] %v5173_v30  ;;  %2644 = vst.msk [vmem:[#allocation2 + $0xc8] sm:$0xff] %vm2041_vm1, %v5173_v30  ;;  %1624 = vperm.xlu1 %3582, %v5173_v30  }
 0x2c9   : > { %v1353_v14 = vpop.xlane.xlu1 %1352 }
 0x2ca   : > { %v5183_v24 = vmax.f32 %v5175_v22, %v1353_v14  ;;  %v5205_v22 = vld [vmem:[#allocation2 + $0xe8] sm:$0xff] }
 0x2cb   : > { %6043 = vst [vmem:[#allocation90_spill] sm:$0xff] %v5205_v22 }
 0x2cc   : > { %6038 = vst [vmem:[#allocation85_spill] sm:$0xff] %v5183_v24  ;;  %2645 = vst.msk [vmem:[#allocation2 + $0xd0] sm:$0xff] %vm2041_vm1, %v5183_v24  ;;  %1629 = vperm.xlu0 %3583, %v5183_v24  }
 0x2cd   : > { %v1356_v19 = vpop.xlane.xlu1 %1355 }
 0x2ce   : > { %v5193_v41 = vmax.f32 %v5185_v25, %v1356_v19 }
 0x2d0   : > { %6040 = vst [vmem:[#allocation87_spill] sm:$0xff] %v5193_v41  ;;  %2646 = vst.msk [vmem:[#allocation2 + $0xd8] sm:$0xff] %vm2041_vm1, %v5193_v41  ;;  %1634 = vperm.xlu1 %3582, %v5193_v41  }
 0x2d1   : > { %v1359_v60 = vpop.xlane.xlu1 %1358 }
 0x2d2   : > { %v5203_v30 = vmax.f32 %v5195_v17, %v1359_v60 }
 0x2d4   : > { %6042 = vst [vmem:[#allocation89_spill] sm:$0xff] %v5203_v30  ;;  %2647 = vst.msk [vmem:[#allocation2 + $0xe0] sm:$0xff] %vm2041_vm1, %v5203_v30  ;;  %1639 = vperm.xlu0 %3583, %v5203_v30  }
 0x2d5   : > { %v1362_v14 = vpop.xlane.xlu1 %1361 }
 0x2d6   : > { %v5213_v25 = vmax.f32 %v5205_v22, %v1362_v14 }
 0x2d8   : > { %6044 = vst [vmem:[#allocation91_spill] sm:$0xff] %v5213_v25  ;;  %2648 = vst.msk [vmem:[#allocation2 + $0xe8] sm:$0xff] %vm2041_vm1, %v5213_v25  ;;  %1644 = vperm.xlu1 %3582, %v5213_v25  }
 0x2df   : > { %v1500_v60 = vpop.permute.xlu1 %1499 }
 0x2e0   : > { %v1657_v19 = vsub.f32 %v4601_v43, %v1500_v60  ;;  %v1658_v17 = vsub.f32 %v4604_v44, %v1500_v60 }
 0x2e2   : > { %v1721_v24 = vmul.f32 1.442695, %v1657_v19  ;;  %v1723_v34 = vmul.f32 1.442695, %v1658_v17 }
 0x2e3   : > { %v1505_v30 = vpop.permute.xlu0 %1504 }
 0x2e4   : > { %3584 = vpow2.f32 %v1721_v24  ;;  %v1659_v14 = vsub.f32 %v4607_v46, %v1505_v30  ;;  %v1660_v5 = vsub.f32 %v4612_v49, %v1505_v30 }
 0x2e5   : > { %3586 = vpow2.f32 %v1723_v34 }
 0x2e6   : > { %v1725_v41 = vmul.f32 1.442695, %v1659_v14  ;;  %v1727_v22 = vmul.f32 1.442695, %v1660_v5 }
 0x2e7   : > { %v1510_v0 = vpop.permute.xlu0 %1509 }
 0x2e8   : > { %3588 = vpow2.f32 %v1725_v41  ;;  %v1661_v25 = vsub.f32 %v4615_v51, %v1510_v0  ;;  %v1662_v62 = vsub.f32 %v4620_v54, %v1510_v0 }
 0x2e9   : > { %3590 = vpow2.f32 %v1727_v22 }
 0x2ea   : > { %v1729_v43 = vmul.f32 1.442695, %v1661_v25  ;;  %v1731_v44 = vmul.f32 1.442695, %v1662_v62 }
 0x2eb   : > { %v1515_v19 = vpop.permute.xlu0 %1514 }
 0x2ec   : > { %3592 = vpow2.f32 %v1729_v43  ;;  %v1663_v24 = vsub.f32 %v4623_v56, %v1515_v19  ;;  %v1664_v46 = vsub.f32 %v4628_v59, %v1515_v19 }
 0x2ed   : > { %3594 = vpow2.f32 %v1731_v44 }
 0x2ee   : > { %v1733_v49 = vmul.f32 1.442695, %v1663_v24  ;;  %v1735_v30 = vmul.f32 1.442695, %v1664_v46 }
 0x2ef   : > { %v1520_v34 = vpop.permute.xlu0 %1519 }
 0x2f0   : > { %3596 = vpow2.f32 %v1733_v49  ;;  %v1665_v5 = vsub.f32 %v4631_v61, %v1520_v34  ;;  %v1666_v51 = vsub.f32 %v4636_v1, %v1520_v34 }
 0x2f1   : > { %v3585_v17 = vpop.eup %3584  ;;  %3598 = vpow2.f32 %v1735_v30 }
 0x2f2   : > { %v3587_v54 = vpop.eup %3586  ;;  %v1737_v0 = vmul.f32 1.442695, %v1665_v5  ;;  %v1739_v62 = vmul.f32 1.442695, %v1666_v51 }
 0x2f3   : > { %2394 = vmatprep.mubr.f32.mxu1 %v3587_v54  ;;  %v1525_v22 = vpop.permute.xlu0 %1524  ;;  %v5230_v25 = vadd.f32 %v3587_v54, %v3585_v17 }
 0x2f4   : > { %3600 = vpow2.f32 %v1737_v0  ;;  %2395 = vmatmul.mubr.f32.vlgmr.msra.gmra.mxu1 %v3585_v17  ;;  %v1667_v56 = vsub.f32 %v4639_v3, %v1525_v22  ;;  %v1668_v59 = vsub.f32 %v4644_v6, %v1525_v22 }
 0x2f5   : > { %v3589_v41 = vpop.eup %3588  ;;  %3602 = vpow2.f32 %v1739_v62 }
 0x2f6   : > { %v3591_v61 = vpop.eup %3590  ;;  %v1741_v60 = vmul.f32 1.442695, %v1667_v56  ;;  %v1743_v1 = vmul.f32 1.442695, %v1668_v59 }
 0x2f7   : > { %2399 = vmatprep.mubr.f32.mxu1 %v3591_v61  ;;  %v1530_v14 = vpop.permute.xlu0 %1529  ;;  %v5234_v43 = vadd.f32 %v3591_v61, %v3589_v41 }
 0x2f8   : > { %3604 = vpow2.f32 %v1741_v60  ;;  %2400 = vmatmul.mubr.f32.gmra.mxu1 %v3589_v41  ;;  %v1669_v44 = vsub.f32 %v4647_v8, %v1530_v14  ;;  %v1670_v19 = vsub.f32 %v4652_v11, %v1530_v14 }
 0x2f9   : > { %v3593_v24 = vpop.eup %3592  ;;  %3606 = vpow2.f32 %v1743_v1 }
 0x2fa   : > { %v3595_v3 = vpop.eup %3594  ;;  %v1745_v46 = vmul.f32 1.442695, %v1669_v44  ;;  %v1747_v6 = vmul.f32 1.442695, %v1670_v19 }
 0x2fb   : > { %2404 = vmatprep.mubr.f32.mxu1 %v3595_v3  ;;  %v1535_v49 = vpop.permute.xlu0 %1534  ;;  %v5238_v30 = vadd.f32 %v3595_v3, %v3593_v24  ;;  %v6046_v3 = vsub.f32 %v4884_v29, %v4889_v58 }
 0x2fc   : > { %3608 = vpow2.f32 %v1745_v46  ;;  %2405 = vmatmul.mubr.f32.gmra.mxu1 %v3593_v24  ;;  %v1671_v34 = vsub.f32 %v4655_v13, %v1535_v49  ;;  %v1672_v5 = vsub.f32 %v4660_v16, %v1535_v49 }
 0x2fd   : > { %v3597_v51 = vpop.eup %3596  ;;  %3610 = vpow2.f32 %v1747_v6  ;;  %v1433_v46 = vmul.f32 1.442695, %v6046_v3 }
 0x2fe   : > { %v3599_v8 = vpop.eup %3598  ;;  %v1749_v17 = vmul.f32 1.442695, %v1671_v34  ;;  %v1751_v11 = vmul.f32 1.442695, %v1672_v5 }
 0x2ff   : > { %2409 = vmatprep.mubr.f32.mxu1 %v3599_v8  ;;  %v1540_v54 = vpop.permute.xlu0 %1539  ;;  %v5242_v0 = vadd.f32 %v3599_v8, %v3597_v51 }
 0x300   : > { %3612 = vpow2.f32 %v1749_v17  ;;  %2410 = vmatmul.mubr.f32.gmra.mxu1 %v3597_v51  ;;  %v1673_v62 = vsub.f32 %v4663_v18, %v1540_v54  ;;  %v1674_v22 = vsub.f32 %v4668_v21, %v1540_v54  ;;  %v6045_v21 = vsub.f32 %v4893_v27, %v4903_v50 }
 0x301   : > { %v3601_v56 = vpop.eup %3600  ;;  %3614 = vpow2.f32 %v1751_v11  ;;  %v6047_v27 = vsub.f32 %v4935_v37, %v4945_v7  ;;  %v6048_v51 = vsub.f32 %v4959_v32, %v4967_v15  ;;  %v6049_v15 = vsub.f32 %v4907_v42, %v4917_v12 }
 0x302   : > { %v3603_v13 = vpop.eup %3602  ;;  %v1753_v59 = vmul.f32 1.442695, %v1673_v62  ;;  %v1755_v16 = vmul.f32 1.442695, %v1674_v22  ;;  %v1435_v44 = vmul.f32 1.442695, %v6045_v21  ;;  %v6050_v12 = vsub.f32 %v4979_v47, %v4993_v52 }
 0x303   : > { %2414 = vmatprep.mubr.f32.mxu1 %v3603_v13  ;;  %v1545_v41 = vpop.permute.xlu0 %1544  ;;  %v5246_v61 = vadd.f32 %v3603_v13, %v3601_v56  ;;  %v1441_v5 = vmul.f32 1.442695, %v6047_v27  ;;  %v1445_v8 = vmul.f32 1.442695, %v6048_v51  ;;  %v1437_v32 = vmul.f32 1.442695, %v6049_v15 }
 0x304   : > { %3616 = vpow2.f32 %v1753_v59  ;;  %2415 = vmatmul.mubr.f32.gmra.mxu1 %v3601_v56  ;;  %v1675_v60 = vsub.f32 %v4671_v23, %v1545_v41  ;;  %v1676_v1 = vsub.f32 %v4676_v26, %v1545_v41  ;;  %v5273_v56 = vld [vmem:[#allocation2 + $0xf0] sm:$0xff]  ;;  %v1449_v42 = vmul.f32 1.442695, %v6050_v12  ;;  %v6056_v51 = vld [vmem:[#allocation19_spill] sm:$0xff] }
 0x305   : > { %v3605_v14 = vpop.eup %3604  ;;  %3618 = vpow2.f32 %v1755_v16  ;;  %v6063_v12 = vld [vmem:[#allocation55_spill] sm:$0xff]  ;;  %v6137_v52 = vld [vmem:[#allocation41_spill] sm:$0xff] }
 0x306   : > { %v3607_v18 = vpop.eup %3606  ;;  %v1757_v19 = vmul.f32 1.442695, %v1675_v60  ;;  %v1759_v24 = vmul.f32 1.442695, %v1676_v1 }
 0x307   : > { %2419 = vmatprep.mubr.f32.mxu1 %v3607_v18  ;;  %v1550_v6 = vpop.permute.xlu0 %1549  ;;  %v5256_v49 = vadd.f32 %v3607_v18, %v3605_v14  ;;  %v6051_v18 = vsub.f32 %v4921_v35, %v4931_v63 }
 0x308   : > { %3620 = vpow2.f32 %v1757_v19  ;;  %2420 = vmatmul.mubr.f32.gmra.mxu1 %v3605_v14  ;;  %v1677_v23 = vsub.f32 %v4679_v28, %v1550_v6  ;;  %v1678_v26 = vsub.f32 %v4684_v31, %v1550_v6  ;;  %v5291_v19 = vld [vmem:[#allocation2 + $0xf8] sm:$0xff] }
 0x309   : > { %v3609_v34 = vpop.eup %3608  ;;  %3622 = vpow2.f32 %v1759_v24 }
 0x30a   : > { %v3611_v50 = vpop.eup %3610  ;;  %3624 = vpow2.f32 %v1435_v44  ;;  %v1761_v29 = vmul.f32 1.442695, %v1677_v23  ;;  %v1763_v58 = vmul.f32 1.442695, %v1678_v26 }
 0x30b   : > { %3626 = vpow2.f32 %v1433_v46  ;;  %2424 = vmatprep.mubr.f32.mxu1 %v3611_v50  ;;  %v1555_v17 = vpop.permute.xlu0 %1554  ;;  %v5266_v28 = vadd.f32 %v3611_v50, %v3609_v34  ;;  %v6054_v50 = vsub.f32 %v4969_v4, %v4977_v55 }
 0x30c   : > { %3628 = vpow2.f32 %v1761_v29  ;;  %2425 = vmatmul.mubr.f32.gmra.mxu1 %v3609_v34  ;;  %v1679_v31 = vsub.f32 %v4687_v33, %v1555_v17  ;;  %v1680_v11 = vsub.f32 %v4692_v36, %v1555_v17 }
 0x30d   : > { %v3613_v54 = vpop.eup %3612  ;;  %3630 = vpow2.f32 %v1763_v58  ;;  %v1447_v27 = vmul.f32 1.442695, %v6054_v50 }
 0x30e   : > { %v3615_v37 = vpop.eup %3614  ;;  %3632 = vpow2.f32 %v1441_v5  ;;  %v1765_v7 = vmul.f32 1.442695, %v1679_v31  ;;  %v1767_v62 = vmul.f32 1.442695, %v1680_v11 }
 0x30f   : > { %3634 = vpow2.f32 %v1445_v8  ;;  %2429 = vmatprep.mubr.f32.mxu1 %v3615_v37  ;;  %v1560_v22 = vpop.permute.xlu0 %1559  ;;  %v5275_v13 = vadd.f32 %v3615_v37, %v3613_v54  ;;  %v6057_v37 = vld [vmem:[#allocation20_spill] sm:$0xff] }
 0x310   : > { %3636 = vpow2.f32 %v1765_v7  ;;  %2430 = vmatmul.mubr.f32.gmra.mxu1 %v3613_v54  ;;  %v1681_v33 = vsub.f32 %v4695_v38, %v1560_v22  ;;  %v1682_v36 = vsub.f32 %v4700_v45, %v1560_v22  ;;  %v1439_v38 = vmul.f32 1.442695, %v6051_v18  ;;  %v6059_v22 = vld [vmem:[#allocation60_spill] sm:$0xff] }
 0x311   : > { %v3617_v59 = vpop.eup %3616  ;;  %3638 = vpow2.f32 %v1767_v62  ;;  %v1365_v16 = vpop.xlane.xlu1 %1364  ;;  %v6052_v45 = vsub.f32 %v5013_v9, %v5021_v40  ;;  %v6058_v62 = vld [vmem:[#allocation21_spill] sm:$0xff] }
 0x312   : > { %v3619_v41 = vpop.eup %3618  ;;  %v1769_v60 = vmul.f32 1.442695, %v1681_v33  ;;  %v1771_v1 = vmul.f32 1.442695, %v1682_v36  ;;  %v5283_v14 = vmax.f32 %v5273_v56, %v1365_v16  ;;  %3640 = vpow2.f32 %v1437_v32  ;;  %v6060_v33 = vld [vmem:[#allocation61_spill] sm:$0xff] }
 0x313   : > { %v1453_v21 = vmul.f32 1.442695, %v6052_v45  ;;  %2434 = vmatprep.mubr.f32.mxu1 %v3619_v41  ;;  %v1565_v44 = vpop.permute.xlu0 %1564  ;;  %v5293_v47 = vadd.f32 %v3619_v41, %v3617_v59  ;;  %v6061_v36 = vsub.f32 %v6059_v22, %v6060_v33  ;;  %v6062_v41 = vld [vmem:[#allocation52_spill] sm:$0xff] }
 0x314   : > { %3642 = vpow2.f32 %v1769_v60  ;;  %2649 = vst.msk [vmem:[#allocation2 + $0xf0] sm:$0xff] %vm2041_vm1, %v5283_v14  ;;  %2435 = vmatmul.mubr.f32.gmra.mxu1 %v3617_v59  ;;  %v1683_v63 = vsub.f32 %v4703_v48, %v1565_v44  ;;  %v1684_v35 = vsub.f32 %v4708_v53, %v1565_v44  ;;  %1649 = vperm.xlu0 %3583, %v5283_v14  }
 0x315   : > { %v3621_v9 = vpop.eup %3620  ;;  %3644 = vpow2.f32 %v1771_v1  ;;  %v1368_v40 = vpop.xlane.xlu1 %1367  ;;  %v6053_v48 = vsub.f32 %v4949_v20, %v4957_v2  ;;  %v6055_v2 = vsub.f32 %v5035_v39, %v5043_v10  ;;  %v1461_v59 = vmul.f32 1.442695, %v6061_v36 }
 0x316   : > { %v3623_v24 = vpop.eup %3622  ;;  %3646 = vpow2.f32 %v1449_v42  ;;  %v1773_v3 = vmul.f32 1.442695, %v1683_v63  ;;  %v1775_v46 = vmul.f32 1.442695, %v1684_v35  ;;  %v5303_v6 = vmax.f32 %v5291_v19, %v1368_v40  ;;  %v6066_v63 = vld [vmem:[#allocation23_spill] sm:$0xff] }
 0x317   : > { %v5305_v23 = vpop.eup %3624  ;;  %3648 = vpow2.f32 %v1439_v38  ;;  %v1443_v26 = vmul.f32 1.442695, %v6053_v48  ;;  %2439 = vmatprep.mubr.f32.mxu1 %v3623_v24  ;;  %v5310_v53 = vadd.f32 %v3623_v24, %v3621_v9  ;;  %v1457_v29 = vmul.f32 1.442695, %v6055_v2  ;;  %v6067_v24 = vld [vmem:[#allocation64_spill] sm:$0xff]  ;;  %v6071_v2 = vld [vmem:[#allocation57_spill] sm:$0xff] }
 0x318   : > { %v5312_v34 = vpop.eup %3626  ;;  %3650 = vpow2.f32 %v1453_v21  ;;  %2650 = vst.msk [vmem:[#allocation2 + $0xf8] sm:$0xff] %vm2041_vm1, %v5303_v6  ;;  %2440 = vmatmul.mubr.f32.gmra.mxu1 %v3621_v9  ;;  %2113 = vperm.xlu0 %3583, %v5305_v23   ;;  %v6064_v42 = vsub.f32 %v6062_v41, %v6063_v12  ;;  %v6065_v21 = vld [vmem:[#allocation22_spill] sm:$0xff] }
 0x319   : > { %v3629_v20 = vpop.eup %3628  ;;  %3652 = vpow2.f32 %v1773_v3  ;;  %1654 = vperm.xlu1 %3582, %v5303_v6   ;;  %v1570_v55 = vpop.permute.xlu1 %1569  ;;  %v6068_v3 = vld [vmem:[#allocation65_spill] sm:$0xff] }
 0x31a   : > { %v3631_v4 = vpop.eup %3630  ;;  %3654 = vpow2.f32 %v1775_v46  ;;  %v1685_v58 = vsub.f32 %v4711_v57, %v1570_v55  ;;  %v1686_v8 = vsub.f32 %v6056_v51, %v1570_v55  ;;  %v1451_v60 = vmul.f32 1.442695, %v6064_v42 }
 0x31b   : > { %v5328_v17 = vpop.eup %3632  ;;  %3656 = vpow2.f32 %v1443_v26  ;;  %2444 = vmatprep.mubr.f32.mxu1 %v3631_v4  ;;  %v1575_v31 = vpop.permute.xlu0 %1574  ;;  %v5330_v11 = vadd.f32 %v3631_v4, %v3629_v20  ;;  %v6069_v46 = vsub.f32 %v6067_v24, %v6068_v3  ;;  %v6084_v24 = vld [vmem:[#allocation73_spill] sm:$0xff] }
 0x31c   : > { %v5332_v54 = vpop.eup %3634  ;;  %3658 = vpow2.f32 %v1447_v27  ;;  %v1777_v10 = vmul.f32 1.442695, %v1685_v58  ;;  %v1779_v39 = vmul.f32 1.442695, %v1686_v8  ;;  %2445 = vmatmul.mubr.f32.gmra.mxu1 %v3629_v20  ;;  %v1687_v7 = vsub.f32 %v6057_v37, %v1575_v31  ;;  %2128 = vperm.xlu0 %3583, %v5328_v17   ;;  %v6070_v20 = vld [vmem:[#allocation56_spill] sm:$0xff] }
 0x31d   : > { %v3637_v57 = vpop.eup %3636  ;;  %3660 = vpow2.f32 %v1457_v29  ;;  %v1688_v15 = vsub.f32 %v6058_v62, %v1575_v31  ;;  %2108 = vperm.xlu1 %3582, %v5312_v34   ;;  %v1465_v48 = vmul.f32 1.442695, %v6069_v46  ;;  %v6072_v29 = vsub.f32 %v6070_v20, %v6071_v2  ;;  %v6073_v8 = vld [vmem:[#allocation24_spill] sm:$0xff]  ;;  %v6076_v62 = vld [vmem:[#allocation69_spill] sm:$0xff]  ;;  %v6086_v20 = vld [vmem:[#allocation62_spill] sm:$0xff] }
 0x31e   : > { %v3639_v32 = vpop.eup %3638  ;;  %3662 = vpow2.f32 %v1777_v10  ;;  %v1781_v16 = vmul.f32 1.442695, %v1687_v7  ;;  %v6074_v10 = vld [vmem:[#allocation25_spill] sm:$0xff]  ;;  %v6087_v2 = vld [vmem:[#allocation63_spill] sm:$0xff] }
 0x31f   : > { %3664 = vpow2.f32 %v1779_v39  ;;  %v1783_v1 = vmul.f32 1.442695, %v1688_v15  ;;  %2449 = vmatprep.mubr.f32.mxu1 %v3639_v32  ;;  %v1580_v18 = vpop.permute.xlu0 %1579  ;;  %v5344_v38 = vadd.f32 %v3639_v32, %v3637_v57  ;;  %v5346_v45 = vpop.eup %3640  ;;  %v1455_v55 = vmul.f32 1.442695, %v6072_v29 }
 0x320   : > { %3666 = vpow2.f32 %v1781_v16  ;;  %2450 = vmatmul.mubr.f32.gmra.mxu1 %v3637_v57  ;;  %v1689_v44 = vsub.f32 %v6065_v21, %v1580_v18  ;;  %v1690_v35 = vsub.f32 %v6066_v63, %v1580_v18  ;;  %2138 = vperm.xlu0 %3583, %v5332_v54   ;;  %v6075_v57 = vld [vmem:[#allocation68_spill] sm:$0xff]  ;;  %v6079_v16 = vld [vmem:[#allocation59_spill] sm:$0xff]  ;;  %v6088_v29 = vsub.f32 %v6086_v20, %v6087_v2  ;;  %v6100_v2 = vld [vmem:[#allocation81_spill] sm:$0xff] }
 0x321   : > { %v3643_v9 = vpop.eup %3642  ;;  %3668 = vpow2.f32 %v1783_v1  ;;  %2118 = vperm.xlu1 %3582, %v5346_v45   ;;  %v6077_v15 = vsub.f32 %v6075_v57, %v6076_v62  ;;  %v6081_v1 = vld [vmem:[#allocation26_spill] sm:$0xff]  ;;  %v6082_v21 = vld [vmem:[#allocation27_spill] sm:$0xff]  ;;  %v6099_v20 = vld [vmem:[#allocation80_spill] sm:$0xff] }
 0x322   : > { %v3645_v40 = vpop.eup %3644  ;;  %3670 = vpow2.f32 %v1461_v59  ;;  %v1785_v26 = vmul.f32 1.442695, %v1689_v44  ;;  %v1787_v50 = vmul.f32 1.442695, %v1690_v35  ;;  %v6078_v59 = vld [vmem:[#allocation58_spill] sm:$0xff] }
 0x323   : > { %v5355_v27 = vpop.eup %3646  ;;  %3672 = vpow2.f32 %v1451_v60  ;;  %2454 = vmatprep.mubr.f32.mxu1 %v3645_v40  ;;  %v1585_v4 = vpop.permute.xlu0 %1584  ;;  %v5360_v58 = vadd.f32 %v3645_v40, %v3643_v9  ;;  %v1469_v32 = vmul.f32 1.442695, %v6077_v15  ;;  %v6080_v41 = vsub.f32 %v6078_v59, %v6079_v16  ;;  %v6083_v40 = vld [vmem:[#allocation72_spill] sm:$0xff] }
 0x324   : > { %v5362_v51 = vpop.eup %3648  ;;  %3674 = vpow2.f32 %v1785_v26  ;;  %2455 = vmatmul.mubr.f32.gmra.mxu1 %v3643_v9  ;;  %v1691_v31 = vsub.f32 %v6073_v8, %v1585_v4  ;;  %v1692_v39 = vsub.f32 %v6074_v10, %v1585_v4  ;;  %2148 = vperm.xlu0 %3583, %v5355_v27   ;;  %v6085_v3 = vsub.f32 %v6083_v40, %v6084_v24  ;;  %v6097_v24 = vld [vmem:[#allocation30_spill] sm:$0xff] }
 0x325   : > { %v5367_v37 = vpop.eup %3650  ;;  %3676 = vpow2.f32 %v1787_v50  ;;  %2123 = vperm.xlu1 %3582, %v5362_v51   ;;  %v1459_v12 = vmul.f32 1.442695, %v6080_v41 }
 0x326   : > { %v3653_v7 = vpop.eup %3652  ;;  %3678 = vpow2.f32 %v1465_v48  ;;  %v1789_v22 = vmul.f32 1.442695, %v1691_v31  ;;  %v1791_v33 = vmul.f32 1.442695, %v1692_v39  ;;  %v1473_v46 = vmul.f32 1.442695, %v6085_v3 }
 0x327   : > { %v3655_v36 = vpop.eup %3654  ;;  %3680 = vpow2.f32 %v1455_v55  ;;  %v1590_v42 = vpop.permute.xlu0 %1589  ;;  %v1463_v55 = vmul.f32 1.442695, %v6088_v29  ;;  %v6089_v31 = vld [vmem:[#allocation28_spill] sm:$0xff]  ;;  %v6090_v39 = vld [vmem:[#allocation29_spill] sm:$0xff]  ;;  %v6101_v29 = vsub.f32 %v6099_v20, %v6100_v2  ;;  %v6113_v20 = vld [vmem:[#allocation75_spill] sm:$0xff] }
 0x328   : > { %v5376_v60 = vpop.eup %3656  ;;  %3682 = vpow2.f32 %v1789_v22  ;;  %2459 = vmatprep.mubr.f32.mxu1 %v3655_v36  ;;  %v1693_v18 = vsub.f32 %v6081_v1, %v1590_v42  ;;  %v1694_v44 = vsub.f32 %v6082_v21, %v1590_v42  ;;  %2158 = vperm.xlu0 %3583, %v5367_v37   ;;  %v5381_v63 = vadd.f32 %v3655_v36, %v3653_v7  ;;  %v6092_v22 = vld [vmem:[#allocation77_spill] sm:$0xff]  ;;  %v6095_v42 = vld [vmem:[#allocation67_spill] sm:$0xff] }
 0x329   : > { %v5383_v35 = vpop.eup %3658  ;;  %3684 = vpow2.f32 %v1791_v33  ;;  %2460 = vmatmul.mubr.f32.gmra.mxu1 %v3653_v7  ;;  %2133 = vperm.xlu1 %3582, %v5376_v60  }
 0x32a   : > { %v5386_v9 = vpop.eup %3660  ;;  %3686 = vpow2.f32 %v1469_v32  ;;  %v1793_v48 = vmul.f32 1.442695, %v1693_v18  ;;  %v1795_v26 = vmul.f32 1.442695, %v1694_v44  ;;  %v6091_v32 = vld [vmem:[#allocation76_spill] sm:$0xff] }
 0x32b   : > { %v3663_v50 = vpop.eup %3662  ;;  %3688 = vpow2.f32 %v1459_v12  ;;  %v1595_v4 = vpop.permute.xlu1 %1594  ;;  %v6093_v33 = vsub.f32 %v6091_v32, %v6092_v22  ;;  %v6094_v12 = vld [vmem:[#allocation66_spill] sm:$0xff] }
 0x32c   : > { %v3665_v8 = vpop.eup %3664  ;;  %3690 = vpow2.f32 %v1793_v48  ;;  %v1695_v10 = vsub.f32 %v6089_v31, %v1595_v4  ;;  %v1696_v7 = vsub.f32 %v6090_v39, %v1595_v4  ;;  %2168 = vperm.xlu0 %3583, %v5386_v9   ;;  %v6096_v1 = vsub.f32 %v6094_v12, %v6095_v42  ;;  %v6104_v39 = vld [vmem:[#allocation71_spill] sm:$0xff] }
 0x32d   : > { %v3667_v57 = vpop.eup %3666  ;;  %3692 = vpow2.f32 %v1795_v26  ;;  %2143 = vperm.xlu1 %3582, %v5383_v35   ;;  %2464 = vmatprep.mubr.f32.mxu1 %v3665_v8  ;;  %v5398_v62 = vadd.f32 %v3665_v8, %v3663_v50  ;;  %v1477_v36 = vmul.f32 1.442695, %v6093_v33 }
 0x32e   : > { %v3669_v15 = vpop.eup %3668  ;;  %3694 = vpow2.f32 %v1473_v46  ;;  %v1797_v59 = vmul.f32 1.442695, %v1695_v10  ;;  %v1799_v16 = vmul.f32 1.442695, %v1696_v7  ;;  %2465 = vmatmul.mubr.f32.gmra.mxu1 %v3663_v50  ;;  %v1467_v18 = vmul.f32 1.442695, %v6096_v1 }
 0x32f   : > { %v5403_v41 = vpop.eup %3670  ;;  %3696 = vpow2.f32 %v1463_v55  ;;  %2469 = vmatprep.mubr.f32.mxu1 %v3669_v15  ;;  %v1600_v21 = vpop.permute.xlu0 %1599  ;;  %v5408_v44 = vadd.f32 %v3669_v15, %v3667_v57  ;;  %v6098_v46 = vld [vmem:[#allocation31_spill] sm:$0xff]  ;;  %v1481_v55 = vmul.f32 1.442695, %v6101_v29  ;;  %v6103_v10 = vld [vmem:[#allocation70_spill] sm:$0xff]  ;;  %v6108_v1 = vld [vmem:[#allocation84_spill] sm:$0xff] }
 0x330   : > { %v5410_v40 = vpop.eup %3672  ;;  %3698 = vpow2.f32 %v1797_v59  ;;  %v1697_v3 = vsub.f32 %v6097_v24, %v1600_v21  ;;  %v1698_v48 = vsub.f32 %v6098_v46, %v1600_v21  ;;  %2178 = vperm.xlu0 %3583, %v5403_v41   ;;  %v6105_v7 = vsub.f32 %v6103_v10, %v6104_v39 }
 0x331   : > { %v3675_v26 = vpop.eup %3674  ;;  %3700 = vpow2.f32 %v1799_v16  ;;  %2153 = vperm.xlu1 %3582, %v5410_v40   ;;  %v6107_v16 = vld [vmem:[#allocation33_spill] sm:$0xff] }
 0x332   : > { %v3677_v50 = vpop.eup %3676  ;;  %3702 = vpow2.f32 %v1477_v36  ;;  %v1801_v4 = vmul.f32 1.442695, %v1697_v3  ;;  %v1803_v8 = vmul.f32 1.442695, %v1698_v48  ;;  %2470 = vmatmul.mubr.f32.gmra.mxu1 %v3667_v57  ;;  %v1471_v15 = vmul.f32 1.442695, %v6105_v7 }
 0x333   : > { %v5419_v31 = vpop.eup %3678  ;;  %3704 = vpow2.f32 %v1467_v18  ;;  %2474 = vmatprep.mubr.f32.mxu1 %v3677_v50  ;;  %v1605_v32 = vpop.permute.xlu1 %1604  ;;  %v5424_v22 = vadd.f32 %v3677_v50, %v3675_v26  ;;  %v6106_v36 = vld [vmem:[#allocation32_spill] sm:$0xff]  ;;  %v6109_v18 = vld [vmem:[#allocation85_spill] sm:$0xff]  ;;  %v6112_v50 = vld [vmem:[#allocation74_spill] sm:$0xff] }
 0x334   : > { %6102 = vst [vmem:[#allocation19_spill] sm:$0xff] %v5419_v31  ;;  %v5426_v33 = vpop.eup %3680  ;;  %3706 = vpow2.f32 %v1801_v4  ;;  %v1699_v59 = vsub.f32 %v6106_v36, %v1605_v32  ;;  %v1700_v12 = vsub.f32 %v6107_v16, %v1605_v32  ;;  %2188 = vperm.xlu0 %3583, %v5419_v31   ;;  %v6110_v21 = vsub.f32 %v6108_v1, %v6109_v18  ;;  %v6116_v7 = vld [vmem:[#allocation35_spill] sm:$0xff]  ;;  %v6117_v36 = vld [vmem:[#allocation88_spill] sm:$0xff] }
 0x335   : > { %v3683_v57 = vpop.eup %3682  ;;  %3708 = vpow2.f32 %v1803_v8  ;;  %2163 = vperm.xlu1 %3582, %v5426_v33   ;;  %v6114_v2 = vsub.f32 %v6112_v50, %v6113_v20 }
 0x336   : > { %v3685_v42 = vpop.eup %3684  ;;  %3710 = vpow2.f32 %v1481_v55  ;;  %v1485_v24 = vmul.f32 1.442695, %v6110_v21  ;;  %v1805_v3 = vmul.f32 1.442695, %v1699_v59  ;;  %v1807_v46 = vmul.f32 1.442695, %v1700_v12  ;;  %2475 = vmatmul.mubr.f32.gmra.mxu1 %v3675_v26 }
 0x337   : > { %v5435_v48 = vpop.eup %3686  ;;  %3712 = vpow2.f32 %v1471_v15  ;;  %v1475_v29 = vmul.f32 1.442695, %v6114_v2  ;;  %2479 = vmatprep.mubr.f32.mxu1 %v3685_v42  ;;  %v1610_v4 = vpop.permute.xlu0 %1609  ;;  %v5440_v8 = vadd.f32 %v3685_v42, %v3683_v57  ;;  %v6115_v55 = vld [vmem:[#allocation34_spill] sm:$0xff]  ;;  %v6118_v59 = vld [vmem:[#allocation89_spill] sm:$0xff] }
 0x338   : > { %6111 = vst [vmem:[#allocation20_spill] sm:$0xff] %v5435_v48  ;;  %v5442_v10 = vpop.eup %3688  ;;  %3714 = vpow2.f32 %v1805_v3  ;;  %v1701_v39 = vsub.f32 %v6115_v55, %v1610_v4  ;;  %v1702_v32 = vsub.f32 %v6116_v7, %v1610_v4  ;;  %2198 = vperm.xlu0 %3583, %v5435_v48   ;;  %v6119_v16 = vsub.f32 %v6117_v36, %v6118_v59  ;;  %v6121_v21 = vld [vmem:[#allocation78_spill] sm:$0xff]  ;;  %v6122_v3 = vld [vmem:[#allocation79_spill] sm:$0xff]  ;;  %v6125_v7 = vld [vmem:[#allocation37_spill] sm:$0xff] }
 0x339   : > { %v3691_v26 = vpop.eup %3690  ;;  %3716 = vpow2.f32 %v1807_v46  ;;  %2173 = vperm.xlu1 %3582, %v5442_v10   ;;  %v6123_v50 = vsub.f32 %v6121_v21, %v6122_v3  ;;  %v6127_v59 = vld [vmem:[#allocation82_spill] sm:$0xff] }
 0x33a   : > { %v3693_v15 = vpop.eup %3692  ;;  %3718 = vpow2.f32 %v1485_v24  ;;  %v1489_v12 = vmul.f32 1.442695, %v6119_v16  ;;  %v1809_v42 = vmul.f32 1.442695, %v1701_v39  ;;  %v1811_v1 = vmul.f32 1.442695, %v1702_v32  ;;  %2480 = vmatmul.mubr.f32.gmra.mxu1 %v3683_v57 }
 0x33b   : > { %v5451_v18 = vpop.eup %3694  ;;  %3720 = vpow2.f32 %v1475_v29  ;;  %v1479_v20 = vmul.f32 1.442695, %v6123_v50  ;;  %2484 = vmatprep.mubr.f32.mxu1 %v3693_v15  ;;  %v1615_v46 = vpop.permute.xlu1 %1614  ;;  %v5456_v2 = vadd.f32 %v3693_v15, %v3691_v26  ;;  %v6124_v24 = vld [vmem:[#allocation36_spill] sm:$0xff]  ;;  %v6128_v16 = vld [vmem:[#allocation83_spill] sm:$0xff] }
 0x33c   : > { %6120 = vst [vmem:[#allocation21_spill] sm:$0xff] %v5451_v18  ;;  %v5458_v4 = vpop.eup %3696  ;;  %3722 = vpow2.f32 %v1809_v42  ;;  %v1703_v55 = vsub.f32 %v6124_v24, %v1615_v46  ;;  %v1704_v39 = vsub.f32 %v6125_v7, %v1615_v46  ;;  %2208 = vperm.xlu0 %3583, %v5451_v18   ;;  %v6129_v42 = vsub.f32 %v6127_v59, %v6128_v16  ;;  %v6134_v16 = vld [vmem:[#allocation87_spill] sm:$0xff] }
 0x33d   : > { %v3699_v57 = vpop.eup %3698  ;;  %3724 = vpow2.f32 %v1811_v1  ;;  %2183 = vperm.xlu1 %3582, %v5458_v4   ;;  %v6130_v1 = vld [vmem:[#allocation38_spill] sm:$0xff]  ;;  %v6144_v18 = vld [vmem:[#allocation43_spill] sm:$0xff] }
 0x33e   : > { %v3701_v29 = vpop.eup %3700  ;;  %3726 = vpow2.f32 %v1489_v12  ;;  %v1813_v32 = vmul.f32 1.442695, %v1703_v55  ;;  %v1815_v36 = vmul.f32 1.442695, %v1704_v39  ;;  %2485 = vmatmul.mubr.f32.gmra.mxu1 %v3691_v26  ;;  %v1483_v21 = vmul.f32 1.442695, %v6129_v42 }
 0x33f   : > { %v5464_v15 = vpop.eup %3702  ;;  %3728 = vpow2.f32 %v1479_v20  ;;  %2489 = vmatprep.mubr.f32.mxu1 %v3701_v29  ;;  %v1620_v3 = vpop.permute.xlu0 %1619  ;;  %v5469_v50 = vadd.f32 %v3701_v29, %v3699_v57  ;;  %v6131_v12 = vld [vmem:[#allocation39_spill] sm:$0xff]  ;;  %v6133_v29 = vld [vmem:[#allocation86_spill] sm:$0xff] }
 0x340   : > { %6126 = vst [vmem:[#allocation60_spill] sm:$0xff] %v5464_v15  ;;  %v5471_v46 = vpop.eup %3704  ;;  %3730 = vpow2.f32 %v1813_v32  ;;  %v1705_v24 = vsub.f32 %v6130_v1, %v1620_v3  ;;  %v1706_v55 = vsub.f32 %v6131_v12, %v1620_v3  ;;  %2218 = vperm.xlu0 %3583, %v5464_v15   ;;  %v6135_v32 = vsub.f32 %v6133_v29, %v6134_v16 }
 0x341   : > { %v3707_v26 = vpop.eup %3706  ;;  %3732 = vpow2.f32 %v1815_v36  ;;  %2193 = vperm.xlu1 %3582, %v5471_v46   ;;  %v6136_v36 = vld [vmem:[#allocation40_spill] sm:$0xff] }
 0x342   : > { %v3709_v20 = vpop.eup %3708  ;;  %v1817_v7 = vmul.f32 1.442695, %v1705_v24  ;;  %v1819_v39 = vmul.f32 1.442695, %v1706_v55  ;;  %2490 = vmatmul.mubr.f32.gmra.mxu1 %v3699_v57  ;;  %3734 = vpow2.f32 %v1483_v21  ;;  %v1487_v42 = vmul.f32 1.442695, %v6135_v32 }
 0x343   : > { %v5477_v59 = vpop.eup %3710  ;;  %2494 = vmatprep.mubr.f32.mxu1 %v3709_v20  ;;  %v1625_v1 = vpop.permute.xlu1 %1624  ;;  %v5482_v3 = vadd.f32 %v3709_v20, %v3707_v26  ;;  %v6139_v20 = vld [vmem:[#allocation90_spill] sm:$0xff]  ;;  %v6140_v32 = vld [vmem:[#allocation91_spill] sm:$0xff] }
 0x344   : > { %6132 = vst [vmem:[#allocation61_spill] sm:$0xff] %v5477_v59  ;;  %v5484_v12 = vpop.eup %3712  ;;  %3736 = vpow2.f32 %v1817_v7  ;;  %v1707_v5 = vsub.f32 %v6136_v36, %v1625_v1  ;;  %v1708_v24 = vsub.f32 %v6137_v52, %v1625_v1  ;;  %2228 = vperm.xlu0 %3583, %v5477_v59   ;;  %v6141_v7 = vsub.f32 %v6139_v20, %v6140_v32 }
 0x345   : > { %v3715_v57 = vpop.eup %3714  ;;  %3738 = vpow2.f32 %v1819_v39  ;;  %2203 = vperm.xlu1 %3582, %v5484_v12   ;;  %v6143_v39 = vld [vmem:[#allocation42_spill] sm:$0xff] }
 0x346   : > { %v3717_v21 = vpop.eup %3716  ;;  %v1821_v55 = vmul.f32 1.442695, %v1707_v5  ;;  %v1823_v29 = vmul.f32 1.442695, %v1708_v24  ;;  %2495 = vmatmul.mubr.f32.gmra.mxu1 %v3707_v26  ;;  %3740 = vpow2.f32 %v1487_v42  ;;  %v1491_v15 = vmul.f32 1.442695, %v6141_v7 }
 0x347   : > { %v5490_v16 = vpop.eup %3718  ;;  %2499 = vmatprep.mubr.f32.mxu1 %v3717_v21  ;;  %v1630_v36 = vpop.permute.xlu0 %1629  ;;  %v5495_v52 = vadd.f32 %v3717_v21, %v3715_v57 }
 0x348   : > { %6138 = vst [vmem:[#allocation52_spill] sm:$0xff] %v5490_v16  ;;  %v5497_v1 = vpop.eup %3720  ;;  %3742 = vpow2.f32 %v1821_v55  ;;  %v1709_v59 = vsub.f32 %v6143_v39, %v1630_v36  ;;  %v1710_v5 = vsub.f32 %v6144_v18, %v1630_v36  ;;  %2238 = vperm.xlu0 %3583, %v5490_v16   ;;  %v6147_v18 = vld [vmem:[#allocation44_spill] sm:$0xff]  ;;  %v6148_v39 = vld [vmem:[#allocation45_spill] sm:$0xff] }
 0x349   : > { %6142 = vst [vmem:[#allocation55_spill] sm:$0xff] %v5497_v1  ;;  %v3723_v26 = vpop.eup %3722  ;;  %3744 = vpow2.f32 %v1823_v29  ;;  %2213 = vperm.xlu1 %3582, %v5497_v1  }
 0x34a   : > { %v3725_v42 = vpop.eup %3724  ;;  %v1825_v24 = vmul.f32 1.442695, %v1709_v59  ;;  %v1827_v20 = vmul.f32 1.442695, %v1710_v5  ;;  %2500 = vmatmul.mubr.f32.gmra.mxu1 %v3715_v57  ;;  %3746 = vpow2.f32 %v1491_v15 }
 0x34b   : > { %v5503_v32 = vpop.eup %3726  ;;  %2504 = vmatprep.mubr.f32.mxu1 %v3725_v42  ;;  %v1635_v21 = vpop.permute.xlu1 %1634  ;;  %v5505_v55 = vadd.f32 %v3725_v42, %v3723_v26 }
 0x34c   : > { %6145 = vst [vmem:[#allocation22_spill] sm:$0xff] %v5503_v32  ;;  %v5507_v7 = vpop.eup %3728  ;;  %3748 = vpow2.f32 %v1825_v24  ;;  %v1711_v36 = vsub.f32 %v6147_v18, %v1635_v21  ;;  %v1712_v29 = vsub.f32 %v6148_v39, %v1635_v21  ;;  %2248 = vperm.xlu0 %3583, %v5503_v32   ;;  %v6149_v24 = vld [vmem:[#allocation46_spill] sm:$0xff]  ;;  %v6150_v21 = vld [vmem:[#allocation47_spill] sm:$0xff] }
 0x34d   : > { %6146 = vst [vmem:[#allocation23_spill] sm:$0xff] %v5507_v7  ;;  %v3731_v16 = vpop.eup %3730  ;;  %3750 = vpow2.f32 %v1827_v20  ;;  %2223 = vperm.xlu1 %3582, %v5507_v7  }
 0x34e   : > { %v3733_v59 = vpop.eup %3732  ;;  %v1829_v57 = vmul.f32 1.442695, %v1711_v36  ;;  %v1831_v15 = vmul.f32 1.442695, %v1712_v29  ;;  %2505 = vmatmul.mubr.f32.gmra.mxu1 %v3723_v26 }
 0x34f   : > { %2509 = vmatprep.mubr.f32.mxu1 %v3733_v59  ;;  %v1640_v5 = vpop.permute.xlu0 %1639  ;;  %v5513_v42 = vadd.f32 %v3733_v59, %v3731_v16  ;;  %v5515_v48 = vpop.eup %3734 }
 0x350   : > { %3752 = vpow2.f32 %v1829_v57  ;;  %v1713_v18 = vsub.f32 %v6149_v24, %v1640_v5  ;;  %v1714_v39 = vsub.f32 %v6150_v21, %v1640_v5  ;;  %v6151_v57 = vld [vmem:[#allocation48_spill] sm:$0xff]  ;;  %v6152_v24 = vld [vmem:[#allocation49_spill] sm:$0xff] }
 0x351   : > { %v3737_v32 = vpop.eup %3736  ;;  %3754 = vpow2.f32 %v1831_v15  ;;  %2233 = vperm.xlu1 %3582, %v5515_v48  }
 0x352   : > { %v3739_v20 = vpop.eup %3738  ;;  %v1833_v7 = vmul.f32 1.442695, %v1713_v18  ;;  %v1835_v36 = vmul.f32 1.442695, %v1714_v39  ;;  %2510 = vmatmul.mubr.f32.gmra.mxu1 %v3731_v16 }
 0x353   : > { %2514 = vmatprep.mubr.f32.mxu1 %v3739_v20  ;;  %v1645_v26 = vpop.permute.xlu1 %1644  ;;  %v5520_v29 = vadd.f32 %v3739_v20, %v3737_v32  ;;  %v5522_v59 = vpop.eup %3740 }
 0x354   : > { %3756 = vpow2.f32 %v1833_v7  ;;  %v1715_v31 = vsub.f32 %v6151_v57, %v1645_v26  ;;  %v1716_v1 = vsub.f32 %v6152_v24, %v1645_v26 }
 0x355   : > { %v3743_v5 = vpop.eup %3742  ;;  %3758 = vpow2.f32 %v1835_v36  ;;  %2243 = vperm.xlu1 %3582, %v5522_v59  }
 0x356   : > { %v3745_v15 = vpop.eup %3744  ;;  %v1837_v21 = vmul.f32 1.442695, %v1715_v31  ;;  %v1839_v18 = vmul.f32 1.442695, %v1716_v1  ;;  %2515 = vmatmul.mubr.f32.gmra.mxu1 %v3737_v32 }
 0x357   : > { %2519 = vmatprep.mubr.f32.mxu1 %v3745_v15  ;;  %v1988_v16 = vadd.f32 %v3745_v15, %v3743_v5  ;;  %v5527_v39 = vpop.eup %3746 }
 0x358   : > { %3760 = vpow2.f32 %v1837_v21 }
 0x359   : > { %v3749_v20 = vpop.eup %3748  ;;  %3762 = vpow2.f32 %v1839_v18  ;;  %2253 = vperm.xlu1 %3582, %v5527_v39  }
 0x35a   : > { %v3751_v7 = vpop.eup %3750  ;;  %2520 = vmatmul.mubr.f32.gmra.mxu1 %v3743_v5 }
 0x35b   : > { %2524 = vmatprep.mubr.f32.mxu1 %v3751_v7  ;;  %v5530_v26 = vadd.f32 %v3751_v7, %v3749_v20 }
 0x35d   : > { %v3753_v36 = vpop.eup %3752 }
 0x35e   : > { %v3755_v57 = vpop.eup %3754  ;;  %2525 = vmatmul.mubr.f32.gmra.mxu1 %v3749_v20 }
 0x35f   : > { %2529 = vmatprep.mubr.f32.mxu1 %v3755_v57  ;;  %v1994_v31 = vadd.f32 %v3755_v57, %v3753_v36 }
 0x361   : > { %v3757_v1 = vpop.eup %3756 }
 0x362   : > { %v3759_v32 = vpop.eup %3758  ;;  %2530 = vmatmul.mubr.f32.gmra.mxu1 %v3753_v36 }
 0x363   : > { %2534 = vmatprep.mubr.f32.mxu1 %v3759_v32  ;;  %v5532_v24 = vadd.f32 %v3759_v32, %v3757_v1 }
 0x365   : > { %v3761_v15 = vpop.eup %3760 }
 0x366   : > { %v3763_v21 = vpop.eup %3762  ;;  %2535 = vmatmul.mubr.f32.gmra.mxu1 %v3757_v1  ;;  %v2075_v1 = vld [vmem:[#allocation4] sm:$0xff] }
 0x367   : > { %2539 = vmatprep.mubr.f32.mxu1 %v3763_v21  ;;  %v2000_v18 = vadd.f32 %v3763_v21, %v3761_v15 }
 0x36a   : > { %2540 = vmatmul.mubr.f32.gmra.mxu1 %v3761_v15 }
 0x36b   : > { %1914 = vadd.xlane.f32.xlu0 %v5230_v25 }
 0x36f   : > { %1920 = vadd.xlane.f32.xlu0 %v5238_v30 }
 0x373   : > { %1923 = vadd.xlane.f32.xlu0 %v5242_v0  ;;  %v6154_v0 = vld [vmem:[#allocation51_spill] sm:$0xff] }
 0x377   : > { %1929 = vadd.xlane.f32.xlu0 %v5256_v49 }
 0x37b   : > { %1935 = vadd.xlane.f32.xlu0 %v5275_v13 }
 0x37d   : > { %1917 = vadd.xlane.f32.xlu1 %v5234_v43  ;;  %v6153_v43 = vld [vmem:[#allocation50_spill] sm:$0xff] }
 0x37f   : > { %1941 = vadd.xlane.f32.xlu0 %v5310_v53 }
 0x381   : > { %1926 = vadd.xlane.f32.xlu1 %v5246_v61 }
 0x383   : > { %1947 = vadd.xlane.f32.xlu0 %v5344_v38  ;;  %v6156_v38 = vld [vmem:[#allocation54_spill] sm:$0xff] }
 0x385   : > { %1932 = vadd.xlane.f32.xlu1 %v5266_v28 }
 0x387   : > { %1953 = vadd.xlane.f32.xlu0 %v5381_v63 }
 0x389   : > { %1938 = vadd.xlane.f32.xlu1 %v5293_v47  ;;  %v6155_v47 = vld [vmem:[#allocation53_spill] sm:$0xff] }
 0x38b   : > { %1959 = vadd.xlane.f32.xlu0 %v5408_v44 }
 0x38d   : > { %1944 = vadd.xlane.f32.xlu1 %v5330_v11 }
 0x38f   : > { %1965 = vadd.xlane.f32.xlu0 %v5440_v8  ;;  %v1650_v25 = vpop.permute.xlu0 %1649 }
 0x390   : > { %v1717_v30 = vsub.f32 %v6153_v43, %v1650_v25  ;;  %v1718_v49 = vsub.f32 %v6154_v0, %v1650_v25 }
 0x391   : > { %1950 = vadd.xlane.f32.xlu1 %v5360_v58 }
 0x392   : > { %v1841_v61 = vmul.f32 1.442695, %v1717_v30  ;;  %v1843_v13 = vmul.f32 1.442695, %v1718_v49 }
 0x393   : > { %1971 = vadd.xlane.f32.xlu0 %v5469_v50  ;;  %v2114_v50 = vpop.permute.xlu0 %2113 }
 0x394   : > { %3764 = vpow2.f32 %v1841_v61  ;;  %v1655_v28 = vpop.permute.xlu1 %1654 }
 0x395   : > { %3766 = vpow2.f32 %v1843_v13  ;;  %v1719_v53 = vsub.f32 %v6155_v47, %v1655_v28  ;;  %v1720_v11 = vsub.f32 %v6156_v38, %v1655_v28  ;;  %1956 = vadd.xlane.f32.xlu1 %v5398_v62 }
 0x397   : > { %v1845_v63 = vmul.f32 1.442695, %v1719_v53  ;;  %v1847_v44 = vmul.f32 1.442695, %v1720_v11  ;;  %1977 = vadd.xlane.f32.xlu0 %v5495_v52  ;;  %v2078_v53 = vld [vmem:[#allocation4 + $0x50] sm:$0xff] }
 0x398   : > { %v2109_v5 = vpop.permute.xlu1 %2108 }
 0x399   : > { %3768 = vpow2.f32 %v1845_v63  ;;  %1962 = vadd.xlane.f32.xlu1 %v5424_v22  ;;  %v2129_v22 = vpop.permute.xlu0 %2128 }
 0x39a   : > { %3770 = vpow2.f32 %v1847_v44 }
 0x39b   : > { %1983 = vadd.xlane.f32.xlu0 %v5513_v42 }
 0x39c   : > { %v2119_v42 = vpop.permute.xlu1 %2118 }
 0x39d   : > { %1968 = vadd.xlane.f32.xlu1 %v5456_v2 }
 0x39f   : > { %1989 = vadd.xlane.f32.xlu0 %v1988_v16  ;;  %v6157_v16 = vsub.f32 %v5273_v56, %v5283_v14  ;;  %v2076_v56 = vld [vmem:[#allocation4 + $0xd8] sm:$0xff] }
 0x3a0   : > { %v2124_v36 = vpop.permute.xlu1 %2123  ;;  %v2268_v0 = vmul.f32 %v2119_v42, %v2076_v56 }
 0x3a1   : > { %v3765_v58 = vpop.eup %3764  ;;  %1974 = vadd.xlane.f32.xlu1 %v5482_v3  ;;  %v2139_v3 = vpop.permute.xlu0 %2138  ;;  %v1493_v20 = vmul.f32 1.442695, %v6157_v16 }
 0x3a2   : > { %v3767_v8 = vpop.eup %3766 }
 0x3a3   : > { %2544 = vmatprep.mubr.f32.mxu1 %v3767_v8  ;;  %1995 = vadd.xlane.f32.xlu0 %v1994_v31  ;;  %3772 = vpow2.f32 %v1493_v20  ;;  %v2003_v57 = vadd.f32 %v3767_v8, %v3765_v58  ;;  %v2079_v8 = vld [vmem:[#allocation4 + $0x68] sm:$0xff]  ;;  %v2080_v20 = vld [vmem:[#allocation4 + $0x30] sm:$0xff] }
 0x3a4   : > { %2545 = vmatmul.mubr.f32.gmra.mxu1 %v3765_v58  ;;  %v2270_v58 = vmul.f32 %v2129_v22, %v2078_v53  ;;  %v2084_v53 = vld [vmem:[#allocation4 + $0xe8] sm:$0xff] }
 0x3a5   : > { %1980 = vadd.xlane.f32.xlu1 %v5505_v55  ;;  %v2074_v55 = vld [vmem:[#allocation4 + $0xb0] sm:$0xff]  ;;  %v2149_v32 = vpop.permute.xlu0 %2148 }
 0x3a6   : > { %v3769_v62 = vpop.eup %3768  ;;  %v2266_v7 = vmul.f32 %v2109_v5, %v2074_v55 }
 0x3a7   : > { %v3771_v52 = vpop.eup %3770  ;;  %2001 = vadd.xlane.f32.xlu0 %v2000_v18  ;;  %v2267_v18 = vmul.f32 %v2114_v50, %v2075_v1 }
 0x3a8   : > { %2549 = vmatprep.mubr.f32.mxu1 %v3771_v52  ;;  %v2006_v2 = vadd.f32 %v3771_v52, %v3769_v62 }
 0x3a9   : > { %2550 = vmatmul.mubr.f32.gmra.mxu1 %v3769_v62  ;;  %1986 = vadd.xlane.f32.xlu1 %v5520_v29  ;;  %v6158_v29 = vsub.f32 %v5291_v19, %v5303_v6  ;;  %v5571_v43 = vpop.permute.xlu0 %2158  ;;  %v2077_v19 = vld [vmem:[#allocation4 + $0x18] sm:$0xff] }
 0x3aa   : > { %v2269_v13 = vmul.f32 %v2124_v36, %v2077_v19 }
 0x3ab   : > { %2007 = vadd.xlane.f32.xlu0 %v2006_v2  ;;  %v1495_v31 = vmul.f32 1.442695, %v6158_v29  ;;  %v2081_v29 = vld [vmem:[#allocation4 + $0x48] sm:$0xff] }
 0x3ad   : > { %1992 = vadd.xlane.f32.xlu1 %v5530_v26  ;;  %3774 = vpow2.f32 %v1495_v31  ;;  %v5575_v38 = vpop.permute.xlu0 %2168 }
 0x3b0   : > { %v5573_v47 = vpop.eup %3772 }
 0x3b1   : > { %1998 = vadd.xlane.f32.xlu1 %v5532_v24  ;;  %v2134_v24 = vpop.permute.xlu1 %2133  ;;  %v5580_v2 = vpop.permute.xlu0 %2178 }
 0x3b2   : > { %v2271_v16 = vmul.f32 %v2134_v24, %v2079_v8  ;;  %v2085_v8 = vld [vmem:[#allocation4 + $0xb8] sm:$0xff] }
 0x3b4   : > { %v2396_v15 = vpop.f32.mrf.mxu1 }
 0x3b5   : > { %v2555_v26 = vadd.f32 %v2396_v15, %v2266_v7  ;;  %2004 = vadd.xlane.f32.xlu1 %v2003_v57  ;;  %v2144_v28 = vpop.permute.xlu1 %2143  ;;  %v2272_v57 = vmul.f32 %v2139_v3, %v2080_v20  ;;  %v5583_v31 = vpop.permute.xlu0 %2188  ;;  %v2083_v3 = vld [vmem:[#allocation4 + $0x88] sm:$0xff] }
 0x3b6   : > { %v2398_v21 = vpop.f32.mrf.mxu1 }
 0x3b7   : > { %2587 = vst [vmem:[#allocation4 + $0xb0] sm:$0xff] %v2555_v26  ;;  %v2273_v21 = vmul.f32 %v2144_v28, %v2081_v29 }
 0x3b8   : > { %v2401_v14 = vpop.f32.mrf.mxu1 }
 0x3b9   : > { %v2556_v25 = vadd.f32 %v2401_v14, %v2267_v18  ;;  %v2154_v52 = vpop.permute.xlu1 %2153  ;;  %v2082_v18 = vld [vmem:[#allocation4 + $0x80] sm:$0xff] }
 0x3ba   : > { %v2403_v30 = vpop.f32.mrf.mxu1  ;;  %v5578_v62 = vpop.eup %3774 }
 0x3bb   : > { %2588 = vst [vmem:[#allocation4] sm:$0xff] %v2556_v25  ;;  %v5585_v25 = vpop.permute.xlu0 %2198 }
 0x3bc   : > { %v2406_v6 = vpop.f32.mrf.mxu1 }
 0x3bd   : > { %v2557_v49 = vadd.f32 %v2406_v6, %v2268_v0  ;;  %v2164_v22 = vpop.permute.xlu1 %2163  ;;  %v2274_v0 = vmul.f32 %v2149_v32, %v2082_v18 }
 0x3be   : > { %v2408_v61 = vpop.f32.mrf.mxu1  ;;  %v2277_v20 = vmul.f32 %v2164_v22, %v2085_v8 }
 0x3bf   : > { %2589 = vst [vmem:[#allocation4 + $0xd8] sm:$0xff] %v2557_v49  ;;  %v2275_v61 = vmul.f32 %v2154_v52, %v2083_v3  ;;  %v2086_v52 = vld [vmem:[#allocation4 + $0x60] sm:$0xff] }
 0x3c0   : > { %v2411_v11 = vpop.f32.mrf.mxu1 }
 0x3c1   : > { %v2558_v63 = vadd.f32 %v2411_v11, %v2269_v13  ;;  %2258 = vperm.xlu0 %3583, %v5573_v47   ;;  %v2174_v14 = vpop.permute.xlu1 %2173  ;;  %v5587_v11 = vpop.permute.xlu0 %2208 }
 0x3c2   : > { %v2413_v44 = vpop.f32.mrf.mxu1 }
 0x3c3   : > { %2590 = vst [vmem:[#allocation4 + $0x18] sm:$0xff] %v2558_v63 }
 0x3c4   : > { %v2416_v50 = vpop.f32.mrf.mxu1 }
 0x3c5   : > { %v2559_v5 = vadd.f32 %v2416_v50, %v2270_v58  ;;  %v2184_v13 = vpop.permute.xlu1 %2183  ;;  %v2276_v58 = vmul.f32 %v5571_v43, %v2084_v53 }
 0x3c6   : > { %v2418_v42 = vpop.f32.mrf.mxu1  ;;  %2263 = vperm.xlu1 %3582, %v5578_v62  }
 0x3c7   : > { %2591 = vst [vmem:[#allocation4 + $0x50] sm:$0xff] %v2559_v5  ;;  %v5590_v42 = vpop.permute.xlu0 %2218 }
 0x3c8   : > { %v2421_v55 = vpop.f32.mrf.mxu1 }
 0x3c9   : > { %v2560_v7 = vadd.f32 %v2421_v55, %v2271_v16  ;;  %v2194_v32 = vpop.permute.xlu1 %2193 }
 0x3ca   : > { %v2423_v36 = vpop.f32.mrf.mxu1 }
 0x3cb   : > { %2592 = vst [vmem:[#allocation4 + $0x68] sm:$0xff] %v2560_v7  ;;  %v5595_v43 = vpop.permute.xlu0 %2228 }
 0x3cc   : > { %v2426_v1 = vpop.f32.mrf.mxu1 }
 0x3cd   : > { %v2561_v15 = vadd.f32 %v2426_v1, %v2272_v57  ;;  %v2278_v57 = vmul.f32 %v5575_v38, %v2086_v52  ;;  %v5593_v29 = vpop.permute.xlu1 %2203 }
 0x3ce   : > { %v2428_v26 = vpop.f32.mrf.mxu1 }
 0x3cf   : > { %2593 = vst [vmem:[#allocation4 + $0x30] sm:$0xff] %v2561_v15  ;;  %v2087_v15 = vld [vmem:[#allocation4 + $0xf0] sm:$0xff] }
 0x3d0   : > { %v2431_v56 = vpop.f32.mrf.mxu1  ;;  %v2279_v18 = vmul.f32 %v2174_v14, %v2087_v15  ;;  %v1849_v14 = vld [vmem:[#allocation3] sm:$0xff] }
 0x3d1   : > { %v2562_v24 = vadd.f32 %v2431_v56, %v2273_v21  ;;  %v5597_v56 = vpop.permute.xlu1 %2213 }
 0x3d2   : > { %v2433_v30 = vpop.f32.mrf.mxu1 }
 0x3d3   : > { %2594 = vst [vmem:[#allocation4 + $0x48] sm:$0xff] %v2562_v24  ;;  %v2088_v24 = vld [vmem:[#allocation4 + $0x8] sm:$0xff]  ;;  %v5599_v30 = vpop.permute.xlu0 %2238 }
 0x3d4   : > { %v2436_v19 = vpop.f32.mrf.mxu1  ;;  %v2280_v38 = vmul.f32 %v5580_v2, %v2088_v24 }
 0x3d5   : > { %v2563_v6 = vadd.f32 %v2436_v19, %v2274_v0  ;;  %v2089_v19 = vld [vmem:[#allocation4 + $0x78] sm:$0xff] }
 0x3d6   : > { %v2438_v49 = vpop.f32.mrf.mxu1 }
 0x3d7   : > { %2595 = vst [vmem:[#allocation4 + $0x80] sm:$0xff] %v2563_v6  ;;  %v5602_v49 = vpop.permute.xlu1 %2223  ;;  %v5604_v53 = vpop.permute.xlu0 %2248 }
 0x3d8   : > { %v2441_v28 = vpop.f32.mrf.mxu1 }
 0x3d9   : > { %v2564_v63 = vadd.f32 %v2441_v28, %v2275_v61 }
 0x3da   : > { %v2443_v44 = vpop.f32.mrf.mxu1 }
 0x3db   : > { %2596 = vst [vmem:[#allocation4 + $0x88] sm:$0xff] %v2564_v63  ;;  %v2281_v63 = vmul.f32 %v2184_v13, %v2089_v19  ;;  %v2090_v44 = vld [vmem:[#allocation4 + $0x38] sm:$0xff]  ;;  %v5608_v52 = vpop.permute.xlu1 %2233  ;;  %v1854_v19 = vld [vmem:[#allocation3 + $0x28] sm:$0xff] }
 0x3dc   : > { %v2446_v50 = vpop.f32.mrf.mxu1  ;;  %v2282_v2 = vmul.f32 %v5583_v31, %v2090_v44 }
 0x3dd   : > { %v2565_v5 = vadd.f32 %v2446_v50, %v2276_v58  ;;  %v1881_v50 = vmul.f32 %v5312_v34, %v1849_v14  ;;  %v1886_v14 = vmul.f32 %v5376_v60, %v1854_v19  ;;  %v1858_v60 = vld [vmem:[#allocation3 + $0x48] sm:$0xff] }
 0x3de   : > { %v2448_v16 = vpop.f32.mrf.mxu1 }
 0x3df   : > { %2597 = vst [vmem:[#allocation4 + $0xe8] sm:$0xff] %v2565_v5  ;;  %v5612_v31 = vpop.permute.xlu1 %2243 }
 0x3e0   : > { %v2451_v55 = vpop.f32.mrf.mxu1 }
 0x3e1   : > { %v2566_v7 = vadd.f32 %v2451_v55, %v2277_v20  ;;  %v1851_v20 = vld [vmem:[#allocation3 + $0x10] sm:$0xff] }
 0x3e2   : > { %v2453_v36 = vpop.f32.mrf.mxu1 }
 0x3e3   : > { %2598 = vst [vmem:[#allocation4 + $0xb8] sm:$0xff] %v2566_v7  ;;  %v2091_v7 = vld [vmem:[#allocation4 + $0x58] sm:$0xff] }
 0x3e4   : > { %v2456_v1 = vpop.f32.mrf.mxu1  ;;  %v2283_v34 = vmul.f32 %v2194_v32, %v2091_v7 }
 0x3e5   : > { %v2567_v26 = vadd.f32 %v2456_v1, %v2278_v57  ;;  %v1883_v57 = vmul.f32 %v5346_v45, %v1851_v20 }
 0x3e6   : > { %v2458_v21 = vpop.f32.mrf.mxu1 }
 0x3e7   : > { %2599 = vst [vmem:[#allocation4 + $0x60] sm:$0xff] %v2567_v26  ;;  %v1852_v26 = vld [vmem:[#allocation3 + $0x18] sm:$0xff] }
 0x3e9   : > { %v2461_v22 = vpop.f32.mrf.mxu1 }
 0x3ea   : > { %v2568_v0 = vadd.f32 %v2461_v22, %v2279_v18  ;;  %v2092_v18 = vld [vmem:[#allocation4 + $0x40] sm:$0xff] }
 0x3eb   : > { %v2463_v3 = vpop.f32.mrf.mxu1  ;;  %v2284_v45 = vmul.f32 %v5585_v25, %v2092_v18  ;;  %v1890_v18 = vmul.f32 %v5410_v40, %v1858_v60 }
 0x3ec   : > { %2600 = vst [vmem:[#allocation4 + $0xf0] sm:$0xff] %v2568_v0  ;;  %v1884_v0 = vmul.f32 %v5362_v51, %v1852_v26  ;;  %v1853_v26 = vld [vmem:[#allocation3 + $0x20] sm:$0xff] }
 0x3ee   : > { %v2466_v6 = vpop.f32.mrf.mxu1 }
 0x3ef   : > { %v2569_v61 = vadd.f32 %v2466_v6, %v2280_v38 }
 0x3f0   : > { %v2468_v28 = vpop.f32.mrf.mxu1 }
 0x3f1   : > { %2601 = vst [vmem:[#allocation4 + $0x8] sm:$0xff] %v2569_v61  ;;  %v2093_v61 = vld [vmem:[#allocation4 + $0xc8] sm:$0xff] }
 0x3f2   : > { %v2471_v58 = vpop.f32.mrf.mxu1 }
 0x3f3   : > { %v2570_v8 = vadd.f32 %v2471_v58, %v2281_v63  ;;  %v1856_v58 = vld [vmem:[#allocation3 + $0x38] sm:$0xff] }
 0x3f4   : > { %v2473_v5 = vpop.f32.mrf.mxu1  ;;  %v1915_v16 = vpop.xlane.xlu0 %1914 }
 0x3f5   : > { %2602 = vst [vmem:[#allocation4 + $0x78] sm:$0xff] %v2570_v8  ;;  %v2009_v55 = vadd.f32 %v1915_v16, %v1881_v50  ;;  %v2285_v8 = vmul.f32 %v5593_v29, %v2093_v61  ;;  %v2094_v50 = vld [vmem:[#allocation4 + $0xe0] sm:$0xff]  ;;  %v5620_v5 = vpop.permute.xlu1 %2253  ;;  %v1850_v16 = vld [vmem:[#allocation3 + $0x8] sm:$0xff] }
 0x3f6   : > { %v2476_v36 = vpop.f32.mrf.mxu1  ;;  %v1882_v29 = vmul.f32 %v5305_v23, %v1850_v16  ;;  %v1885_v23 = vmul.f32 %v5328_v17, %v1853_v26  ;;  %v1866_v26 = vld [vmem:[#allocation3 + $0x88] sm:$0xff] }
 0x3f7   : > { %2042 = vst.msk [vmem:[#allocation3] sm:$0xff] %vm2041_vm1, %v2009_v55  ;;  %v2571_v13 = vadd.f32 %v2476_v36, %v2282_v2  ;;  %v1888_v2 = vmul.f32 %v5383_v35, %v1856_v58  ;;  %v2286_v36 = vmul.f32 %v5587_v11, %v2094_v50 }
 0x3f8   : > { %v2478_v1 = vpop.f32.mrf.mxu1  ;;  %v1921_v15 = vpop.xlane.xlu0 %1920 }
 0x3f9   : > { %2603 = vst [vmem:[#allocation4 + $0x38] sm:$0xff] %v2571_v13  ;;  %v2011_v21 = vadd.f32 %v1921_v15, %v1883_v57  ;;  %v2095_v57 = vld [vmem:[#allocation4 + $0x90] sm:$0xff] }
 0x3fa   : > { %v2481_v22 = vpop.f32.mrf.mxu1 }
 0x3fb   : > { %2044 = vst.msk [vmem:[#allocation3 + $0x10] sm:$0xff] %vm2041_vm1, %v2011_v21  ;;  %v2572_v24 = vadd.f32 %v2481_v22, %v2283_v34 }
 0x3fc   : > { %v2483_v3 = vpop.f32.mrf.mxu1  ;;  %v1924_v38 = vpop.xlane.xlu0 %1923 }
 0x3fd   : > { %2604 = vst [vmem:[#allocation4 + $0x58] sm:$0xff] %v2572_v24  ;;  %v2012_v6 = vadd.f32 %v1924_v38, %v1884_v0  ;;  %v1860_v24 = vld [vmem:[#allocation3 + $0x58] sm:$0xff]  ;;  %v2287_v0 = vmul.f32 %v5597_v56, %v2095_v57  ;;  %v2096_v3 = vld [vmem:[#allocation4 + $0x70] sm:$0xff] }
 0x3fe   : > { %v2486_v32 = vpop.f32.mrf.mxu1  ;;  %v1892_v40 = vmul.f32 %v5426_v33, %v1860_v24  ;;  %v2288_v56 = vmul.f32 %v5590_v42, %v2096_v3  ;;  %v1868_v3 = vld [vmem:[#allocation3 + $0x98] sm:$0xff] }
 0x3ff   : > { %2045 = vst.msk [vmem:[#allocation3 + $0x18] sm:$0xff] %vm2041_vm1, %v2012_v6  ;;  %v2573_v28 = vadd.f32 %v2486_v32, %v2284_v45  ;;  %v1855_v45 = vld [vmem:[#allocation3 + $0x30] sm:$0xff] }
 0x400   : > { %v2488_v63 = vpop.f32.mrf.mxu1  ;;  %v1930_v44 = vpop.xlane.xlu0 %1929  ;;  %v1887_v17 = vmul.f32 %v5332_v54, %v1855_v45 }
 0x401   : > { %2605 = vst [vmem:[#allocation4 + $0x40] sm:$0xff] %v2573_v28  ;;  %v2014_v51 = vadd.f32 %v1930_v44, %v1886_v14  ;;  %v1862_v14 = vld [vmem:[#allocation3 + $0x68] sm:$0xff]  ;;  %v2097_v44 = vld [vmem:[#allocation4 + $0xc0] sm:$0xff] }
 0x402   : > { %v2491_v25 = vpop.f32.mrf.mxu1  ;;  %v1894_v33 = vmul.f32 %v5442_v10, %v1862_v14  ;;  %v2289_v42 = vmul.f32 %v5602_v49, %v2097_v44 }
 0x403   : > { %2047 = vst.msk [vmem:[#allocation3 + $0x28] sm:$0xff] %vm2041_vm1, %v2014_v51  ;;  %v2574_v20 = vadd.f32 %v2491_v25, %v2285_v8  ;;  %v1857_v51 = vld [vmem:[#allocation3 + $0x40] sm:$0xff] }
 0x404   : > { %v2493_v55 = vpop.f32.mrf.mxu1  ;;  %v1936_v7 = vpop.xlane.xlu0 %1935  ;;  %v1889_v54 = vmul.f32 %v5355_v27, %v1857_v51 }
 0x405   : > { %2606 = vst [vmem:[#allocation4 + $0xc8] sm:$0xff] %v2574_v20  ;;  %v2016_v13 = vadd.f32 %v1936_v7, %v1888_v2  ;;  %v1864_v2 = vld [vmem:[#allocation3 + $0x78] sm:$0xff]  ;;  %v2098_v7 = vld [vmem:[#allocation4 + $0xa8] sm:$0xff] }
 0x406   : > { %v1918_v1 = vpop.xlane.xlu1 %1917  ;;  %v2496_v15 = vpop.f32.mrf.mxu1  ;;  %v1896_v10 = vmul.f32 %v5458_v4, %v1864_v2  ;;  %v2290_v49 = vmul.f32 %v5595_v43, %v2098_v7  ;;  %v1898_v4 = vmul.f32 %v5471_v46, %v1866_v26  ;;  %v1900_v46 = vmul.f32 %v5484_v12, %v1868_v3  ;;  %v6159_v12 = vld [vmem:[#allocation55_spill] sm:$0xff] }
 0x407   : > { %2049 = vst.msk [vmem:[#allocation3 + $0x38] sm:$0xff] %vm2041_vm1, %v2016_v13  ;;  %v2010_v34 = vadd.f32 %v1918_v1, %v1882_v29  ;;  %v2575_v21 = vadd.f32 %v2496_v15, %v2286_v36  ;;  %v1859_v13 = vld [vmem:[#allocation3 + $0x50] sm:$0xff] }
 0x408   : > { %v2498_v35 = vpop.f32.mrf.mxu1  ;;  %v1942_v22 = vpop.xlane.xlu0 %1941  ;;  %v1891_v27 = vmul.f32 %v5367_v37, %v1859_v13 }
 0x409   : > { %2043 = vst.msk [vmem:[#allocation3 + $0x8] sm:$0xff] %vm2041_vm1, %v2010_v34  ;;  %2607 = vst [vmem:[#allocation4 + $0xe0] sm:$0xff] %v2575_v21  ;;  %v2018_v11 = vadd.f32 %v1942_v22, %v1890_v18  ;;  %v2099_v21 = vld [vmem:[#allocation4 + $0xd0] sm:$0xff]  ;;  %v1861_v22 = vld [vmem:[#allocation3 + $0x60] sm:$0xff] }
 0x40a   : > { %v1927_v38 = vpop.xlane.xlu1 %1926  ;;  %v2501_v19 = vpop.f32.mrf.mxu1  ;;  %v2291_v43 = vmul.f32 %v5608_v52, %v2099_v21  ;;  %v1893_v37 = vmul.f32 %v5386_v9, %v1861_v22 }
 0x40b   : > { %2051 = vst.msk [vmem:[#allocation3 + $0x48] sm:$0xff] %vm2041_vm1, %v2018_v11  ;;  %v2013_v6 = vadd.f32 %v1927_v38, %v1885_v23  ;;  %v2576_v61 = vadd.f32 %v2501_v19, %v2287_v0  ;;  %v2100_v19 = vld [vmem:[#allocation4 + $0x10] sm:$0xff] }
 0x40c   : > { %v2503_v32 = vpop.f32.mrf.mxu1  ;;  %v1948_v28 = vpop.xlane.xlu0 %1947  ;;  %v2292_v52 = vmul.f32 %v5599_v30, %v2100_v19 }
 0x40d   : > { %2046 = vst.msk [vmem:[#allocation3 + $0x20] sm:$0xff] %vm2041_vm1, %v2013_v6  ;;  %2608 = vst [vmem:[#allocation4 + $0x90] sm:$0xff] %v2576_v61  ;;  %v2020_v63 = vadd.f32 %v1948_v28, %v1892_v40  ;;  %v1863_v61 = vld [vmem:[#allocation3 + $0x70] sm:$0xff] }
 0x40e   : > { %v1933_v58 = vpop.xlane.xlu1 %1932  ;;  %v2506_v8 = vpop.f32.mrf.mxu1  ;;  %v1895_v9 = vmul.f32 %v5403_v41, %v1863_v61  ;;  %v6160_v41 = vld [vmem:[#allocation19_spill] sm:$0xff] }
 0x40f   : > { %2053 = vst.msk [vmem:[#allocation3 + $0x58] sm:$0xff] %vm2041_vm1, %v2020_v63  ;;  %v2015_v50 = vadd.f32 %v1933_v58, %v1887_v17  ;;  %v2577_v25 = vadd.f32 %v2506_v8, %v2288_v56  ;;  %v1870_v56 = vld [vmem:[#allocation3 + $0xa8] sm:$0xff]  ;;  %v1865_v8 = vld [vmem:[#allocation3 + $0x80] sm:$0xff] }
 0x410   : > { %v2508_v16 = vpop.f32.mrf.mxu1  ;;  %v1954_v20 = vpop.xlane.xlu0 %1953  ;;  %v2101_v17 = vld [vmem:[#allocation4 + $0x28] sm:$0xff] }
 0x411   : > { %2048 = vst.msk [vmem:[#allocation3 + $0x30] sm:$0xff] %vm2041_vm1, %v2015_v50  ;;  %2609 = vst [vmem:[#allocation4 + $0x70] sm:$0xff] %v2577_v25  ;;  %v2022_v55 = vadd.f32 %v1954_v20, %v1894_v33  ;;  %v1902_v25 = vmul.f32 %v6159_v12, %v1870_v56  ;;  %v1872_v20 = vld [vmem:[#allocation3 + $0xb8] sm:$0xff]  ;;  %v2293_v30 = vmul.f32 %v5612_v31, %v2101_v17 }
 0x412   : > { %v1939_v60 = vpop.xlane.xlu1 %1938  ;;  %v2511_v36 = vpop.f32.mrf.mxu1 }
 0x413   : > { %2055 = vst.msk [vmem:[#allocation3 + $0x68] sm:$0xff] %vm2041_vm1, %v2022_v55  ;;  %v2017_v29 = vadd.f32 %v1939_v60, %v1889_v54  ;;  %v2578_v57 = vadd.f32 %v2511_v36, %v2289_v42  ;;  %v1897_v42 = vmul.f32 %v6160_v41, %v1865_v8  ;;  %v2102_v55 = vld [vmem:[#allocation4 + $0xa0] sm:$0xff]  ;;  %v1867_v60 = vld [vmem:[#allocation3 + $0x90] sm:$0xff] }
 0x414   : > { %v2513_v1 = vpop.f32.mrf.mxu1  ;;  %v1960_v15 = vpop.xlane.xlu0 %1959  ;;  %v2294_v31 = vmul.f32 %v5604_v53, %v2102_v55 }
 0x415   : > { %2050 = vst.msk [vmem:[#allocation3 + $0x40] sm:$0xff] %vm2041_vm1, %v2017_v29  ;;  %2610 = vst [vmem:[#allocation4 + $0xc0] sm:$0xff] %v2578_v57  ;;  %v2024_v34 = vadd.f32 %v1960_v15, %v1896_v10  ;;  %v6161_v29 = vld [vmem:[#allocation23_spill] sm:$0xff]  ;;  %v1874_v15 = vld [vmem:[#allocation3 + $0xc8] sm:$0xff] }
 0x416   : > { %v1945_v18 = vpop.xlane.xlu1 %1944  ;;  %v2516_v35 = vpop.f32.mrf.mxu1  ;;  %v1904_v57 = vmul.f32 %v6161_v29, %v1872_v20  ;;  %v6166_v20 = vld [vmem:[#allocation52_spill] sm:$0xff]  ;;  %v2104_v29 = vld [vmem:[#allocation4 + $0x20] sm:$0xff] }
 0x417   : > { %2057 = vst.msk [vmem:[#allocation3 + $0x78] sm:$0xff] %vm2041_vm1, %v2024_v34  ;;  %v2019_v24 = vadd.f32 %v1945_v18, %v1891_v27  ;;  %v2579_v0 = vadd.f32 %v2516_v35, %v2290_v49  ;;  %v6162_v49 = vld [vmem:[#allocation20_spill] sm:$0xff]  ;;  %v2103_v27 = vld [vmem:[#allocation4 + $0xf8] sm:$0xff]  ;;  %v1869_v35 = vld [vmem:[#allocation3 + $0xa0] sm:$0xff] }
 0x418   : > { %v2518_v11 = vpop.f32.mrf.mxu1  ;;  %v1966_v23 = vpop.xlane.xlu0 %1965  ;;  %v1899_v34 = vmul.f32 %v6162_v49, %v1867_v60  ;;  %v2295_v53 = vmul.f32 %v5620_v5, %v2103_v27 }
 0x419   : > { %2052 = vst.msk [vmem:[#allocation3 + $0x50] sm:$0xff] %vm2041_vm1, %v2019_v24  ;;  %2611 = vst [vmem:[#allocation4 + $0xa8] sm:$0xff] %v2579_v0  ;;  %v2026_v38 = vadd.f32 %v1966_v23, %v1898_v4  ;;  %v1906_v0 = vmul.f32 %v5515_v48, %v1874_v15  ;;  %v1876_v23 = vld [vmem:[#allocation3 + $0xd8] sm:$0xff] }
 0x41a   : > { %v1951_v45 = vpop.xlane.xlu1 %1950  ;;  %v2521_v6 = vpop.f32.mrf.mxu1  ;;  %v1908_v48 = vmul.f32 %v5522_v59, %v1876_v23  ;;  %v2105_v15 = vld [vmem:[#allocation4 + $0x98] sm:$0xff] }
 0x41b   : > { %2059 = vst.msk [vmem:[#allocation3 + $0x88] sm:$0xff] %vm2041_vm1, %v2026_v38  ;;  %v2021_v40 = vadd.f32 %v1951_v45, %v1893_v37  ;;  %v2580_v32 = vadd.f32 %v2521_v6, %v2291_v43  ;;  %v6163_v43 = vld [vmem:[#allocation21_spill] sm:$0xff] }
 0x41c   : > { %v2523_v28 = vpop.f32.mrf.mxu1  ;;  %v1972_v14 = vpop.xlane.xlu0 %1971  ;;  %v1901_v38 = vmul.f32 %v6163_v43, %v1869_v35  ;;  %v1871_v45 = vld [vmem:[#allocation3 + $0xb0] sm:$0xff] }
 0x41d   : > { %2054 = vst.msk [vmem:[#allocation3 + $0x60] sm:$0xff] %vm2041_vm1, %v2021_v40  ;;  %2612 = vst [vmem:[#allocation4 + $0xd0] sm:$0xff] %v2580_v32  ;;  %v2028_v63 = vadd.f32 %v1972_v14, %v1900_v46  ;;  %v1878_v46 = vld [vmem:[#allocation3 + $0xe8] sm:$0xff] }
 0x41e   : > { %v1957_v44 = vpop.xlane.xlu1 %1956  ;;  %v2526_v58 = vpop.f32.mrf.mxu1  ;;  %v6164_v28 = vld [vmem:[#allocation60_spill] sm:$0xff] }
 0x41f   : > { %2061 = vst.msk [vmem:[#allocation3 + $0x98] sm:$0xff] %vm2041_vm1, %v2028_v63  ;;  %v2023_v51 = vadd.f32 %v1957_v44, %v1895_v9  ;;  %v2581_v50 = vadd.f32 %v2526_v58, %v2292_v52  ;;  %v1903_v14 = vmul.f32 %v6164_v28, %v1871_v45  ;;  %v1873_v52 = vld [vmem:[#allocation3 + $0xc0] sm:$0xff]  ;;  %v1910_v9 = vmul.f32 %v5527_v39, %v1878_v46  ;;  %v1880_v44 = vld [vmem:[#allocation3 + $0xf8] sm:$0xff]  ;;  %v6165_v58 = vld [vmem:[#allocation61_spill] sm:$0xff] }
 0x420   : > { %v2528_v33 = vpop.f32.mrf.mxu1  ;;  %v1978_v16 = vpop.xlane.xlu0 %1977  ;;  %v1905_v8 = vmul.f32 %v6165_v58, %v1873_v52 }
 0x421   : > { %2056 = vst.msk [vmem:[#allocation3 + $0x70] sm:$0xff] %vm2041_vm1, %v2023_v51  ;;  %2613 = vst [vmem:[#allocation4 + $0x10] sm:$0xff] %v2581_v50  ;;  %v2030_v2 = vadd.f32 %v1978_v16, %v1902_v25  ;;  %v1875_v50 = vld [vmem:[#allocation3 + $0xd0] sm:$0xff]  ;;  %v1912_v25 = vmul.f32 %v5578_v62, %v1880_v44 }
 0x422   : > { %v1963_v54 = vpop.xlane.xlu1 %1962  ;;  %v2531_v7 = vpop.f32.mrf.mxu1  ;;  %v1907_v39 = vmul.f32 %v6166_v20, %v1875_v50 }
 0x423   : > { %2063 = vst.msk [vmem:[#allocation3 + $0xa8] sm:$0xff] %vm2041_vm1, %v2030_v2  ;;  %v2025_v36 = vadd.f32 %v1963_v54, %v1897_v42  ;;  %v2582_v13 = vadd.f32 %v2531_v7, %v2293_v30  ;;  %v1877_v2 = vld [vmem:[#allocation3 + $0xe0] sm:$0xff]  ;;  %v6167_v42 = vld [vmem:[#allocation22_spill] sm:$0xff]  ;;  %v1879_v7 = vld [vmem:[#allocation3 + $0xf0] sm:$0xff] }
 0x424   : > { %v2533_v10 = vpop.f32.mrf.mxu1  ;;  %v1984_v1 = vpop.xlane.xlu0 %1983  ;;  %v1909_v55 = vmul.f32 %v6167_v42, %v1877_v2  ;;  %v1911_v62 = vmul.f32 %v5573_v47, %v1879_v7 }
 0x425   : > { %2058 = vst.msk [vmem:[#allocation3 + $0x80] sm:$0xff] %vm2041_vm1, %v2025_v36  ;;  %2614 = vst [vmem:[#allocation4 + $0x28] sm:$0xff] %v2582_v13  ;;  %v2032_v26 = vadd.f32 %v1984_v1, %v1904_v57 }
 0x426   : > { %v1969_v21 = vpop.xlane.xlu1 %1968  ;;  %v2536_v18 = vpop.f32.mrf.mxu1 }
 0x427   : > { %2065 = vst.msk [vmem:[#allocation3 + $0xb8] sm:$0xff] %vm2041_vm1, %v2032_v26  ;;  %v2027_v22 = vadd.f32 %v1969_v21, %v1899_v34  ;;  %v2583_v24 = vadd.f32 %v2536_v18, %v2294_v31 }
 0x428   : > { %v2538_v4 = vpop.f32.mrf.mxu1  ;;  %v1990_v11 = vpop.xlane.xlu0 %1989 }
 0x429   : > { %2060 = vst.msk [vmem:[#allocation3 + $0x90] sm:$0xff] %vm2041_vm1, %v2027_v22  ;;  %2615 = vst [vmem:[#allocation4 + $0xa0] sm:$0xff] %v2583_v24  ;;  %v2034_v3 = vadd.f32 %v1990_v11, %v1906_v0 }
 0x42a   : > { %v1975_v37 = vpop.xlane.xlu1 %1974  ;;  %v2541_v19 = vpop.f32.mrf.mxu1 }
 0x42b   : > { %2067 = vst.msk [vmem:[#allocation3 + $0xc8] sm:$0xff] %vm2041_vm1, %v2034_v3  ;;  %v2029_v6 = vadd.f32 %v1975_v37, %v1901_v38  ;;  %v2584_v61 = vadd.f32 %v2541_v19, %v2295_v53 }
 0x42c   : > { %v2543_v40 = vpop.f32.mrf.mxu1  ;;  %v1996_v32 = vpop.xlane.xlu0 %1995 }
 0x42d   : > { %2062 = vst.msk [vmem:[#allocation3 + $0xa0] sm:$0xff] %vm2041_vm1, %v2029_v6  ;;  %2616 = vst [vmem:[#allocation4 + $0xf8] sm:$0xff] %v2584_v61  ;;  %v2036_v5 = vadd.f32 %v1996_v32, %v1908_v48 }
 0x42e   : > { %v1981_v56 = vpop.xlane.xlu1 %1980 }
 0x42f   : > { %2069 = vst.msk [vmem:[#allocation3 + $0xd8] sm:$0xff] %vm2041_vm1, %v2036_v5  ;;  %v2031_v63 = vadd.f32 %v1981_v56, %v1903_v14 }
 0x430   : > { %v2002_v17 = vpop.xlane.xlu0 %2001 }
 0x431   : > { %2064 = vst.msk [vmem:[#allocation3 + $0xb0] sm:$0xff] %vm2041_vm1, %v2031_v63  ;;  %v2038_v59 = vadd.f32 %v2002_v17, %v1910_v9 }
 0x432   : > { %v1987_v51 = vpop.xlane.xlu1 %1986 }
 0x433   : > { %2071 = vst.msk [vmem:[#allocation3 + $0xe8] sm:$0xff] %vm2041_vm1, %v2038_v59  ;;  %v2033_v12 = vadd.f32 %v1987_v51, %v1905_v8 }
 0x434   : > { %v2008_v33 = vpop.xlane.xlu0 %2007 }
 0x435   : > { %2066 = vst.msk [vmem:[#allocation3 + $0xc0] sm:$0xff] %vm2041_vm1, %v2033_v12  ;;  %v2040_v16 = vadd.f32 %v2008_v33, %v1912_v25 }
 0x436   : > { %v1993_v30 = vpop.xlane.xlu1 %1992 }
 0x437   : > { %2073 = vst.msk [vmem:[#allocation3 + $0xf8] sm:$0xff] %vm2041_vm1, %v2040_v16  ;;  %v2035_v41 = vadd.f32 %v1993_v30, %v1907_v39 }
 0x439   : > { %2068 = vst.msk [vmem:[#allocation3 + $0xd0] sm:$0xff] %vm2041_vm1, %v2035_v41 }
 0x43a   : > { %v1999_v54 = vpop.xlane.xlu1 %1998 }
 0x43b   : > { %v2037_v60 = vadd.f32 %v1999_v54, %v1909_v55 }
 0x43c   : > { %v2259_v57 = vpop.permute.xlu0 %2258 }
 0x43d   : > { %2070 = vst.msk [vmem:[#allocation3 + $0xe0] sm:$0xff] %vm2041_vm1, %v2037_v60  ;;  %v2296_v10 = vmul.f32 %v2259_v57, %v2104_v29 }
 0x43e   : > { %v2005_v36 = vpop.xlane.xlu1 %2004 }
 0x43f   : > { %v2039_v13 = vadd.f32 %v2005_v36, %v1911_v62 }
 0x441   : > { %2072 = vst.msk [vmem:[#allocation3 + $0xf0] sm:$0xff] %vm2041_vm1, %v2039_v13 }
 0x442   : > { %v2264_v31 = vpop.permute.xlu1 %2263 }
 0x443   : > { %v2297_v34 = vmul.f32 %v2264_v31, %v2105_v15 }
 0x464   : > { %v2546_v1 = vpop.f32.mrf.mxu1 }
 0x465   : > { %v2585_v26 = vadd.f32 %v2546_v1, %v2296_v10 }
 0x466   : > { %v2548_v49 = vpop.f32.mrf.mxu1 }
 0x467   : > { %2617 = vst [vmem:[#allocation4 + $0x20] sm:$0xff] %v2585_v26 }
 0x468   : > { %2654 = sbr.rel (%p3350_p9) target bundleno = 1337 (0x539), region = 158 }
 0x469   : > { %v2551_v27 = vpop.f32.mrf.mxu1 }
 0x46a   : > { %v2586_v21 = vadd.f32 %v2551_v27, %v2297_v34 }
 0x46b   : > { %v2553_v18 = vpop.f32.mrf.mxu1 }
 0x46c   : > { %2618 = vst [vmem:[#allocation4 + $0x98] sm:$0xff] %v2586_v21 }
 0x46d   : > { %v2689_v47 = vld [vmem:[#allocation3 + $0x10] sm:$0xff]  ;;  %v2687_v35 = vld [vmem:[#allocation3] sm:$0xff]  ;;  %v3966_v22 = vmov 0   ;;  %v2690_v24 = vld [vmem:[#allocation3 + $0x18] sm:$0xff] }
 0x46e   : > { %3777 = vset.pattern.permute.xlu1 %v3966_v22  ;;  %3776 = vset.pattern.permute.xlu0 %v3966_v22  ;;  %v2688_v0 = vld [vmem:[#allocation3 + $0x8] sm:$0xff]  ;;  %v2691_v11 = vld [vmem:[#allocation3 + $0x20] sm:$0xff]  ;;  %v2694_v23 = vld [vmem:[#allocation3 + $0x38] sm:$0xff] }
 0x46f   : > { %2731 = vperm.xlu1 %3777, %v2689_v47   ;;  %2721 = vperm.xlu0 %3776, %v2687_v35   ;;  %v2692_v4 = vld [vmem:[#allocation3 + $0x28] sm:$0xff]  ;;  %v2693_v53 = vld [vmem:[#allocation3 + $0x30] sm:$0xff]  ;;  %v2695_v43 = vld [vmem:[#allocation3 + $0x40] sm:$0xff] }
 0x470   : > { %v2696_v3 = vld [vmem:[#allocation3 + $0x48] sm:$0xff]  ;;  %v2698_v38 = vld [vmem:[#allocation3 + $0x58] sm:$0xff]  ;;  %v2697_v37 = vld [vmem:[#allocation3 + $0x50] sm:$0xff] }
 0x471   : > { %v2700_v19 = vld [vmem:[#allocation3 + $0x68] sm:$0xff]  ;;  %v2699_v45 = vld [vmem:[#allocation3 + $0x60] sm:$0xff]  ;;  %v2702_v6 = vld [vmem:[#allocation3 + $0x78] sm:$0xff] }
 0x472   : > { %v2701_v61 = vld [vmem:[#allocation3 + $0x70] sm:$0xff]  ;;  %v2704_v48 = vld [vmem:[#allocation3 + $0x88] sm:$0xff]  ;;  %v2703_v40 = vld [vmem:[#allocation3 + $0x80] sm:$0xff] }
 0x473   : > { %2736 = vperm.xlu1 %3777, %v2690_v24   ;;  %2726 = vperm.xlu0 %3776, %v2688_v0   ;;  %v2706_v32 = vld [vmem:[#allocation3 + $0x98] sm:$0xff]  ;;  %v2705_v46 = vld [vmem:[#allocation3 + $0x90] sm:$0xff]  ;;  %v2708_v5 = vld [vmem:[#allocation3 + $0xa8] sm:$0xff] }
 0x474   : > { %v2707_v28 = vld [vmem:[#allocation3 + $0xa0] sm:$0xff]  ;;  %v2710_v14 = vld [vmem:[#allocation3 + $0xb8] sm:$0xff]  ;;  %v2709_v56 = vld [vmem:[#allocation3 + $0xb0] sm:$0xff] }
 0x475   : > { %v2712_v52 = vld [vmem:[#allocation3 + $0xc8] sm:$0xff]  ;;  %v2711_v63 = vld [vmem:[#allocation3 + $0xc0] sm:$0xff]  ;;  %v2714_v9 = vld [vmem:[#allocation3 + $0xd8] sm:$0xff] }
 0x476   : > { %v2713_v17 = vld [vmem:[#allocation3 + $0xd0] sm:$0xff]  ;;  %v2716_v44 = vld [vmem:[#allocation3 + $0xe8] sm:$0xff]  ;;  %v2715_v59 = vld [vmem:[#allocation3 + $0xe0] sm:$0xff] }
 0x477   : > { %2746 = vperm.xlu1 %3777, %v2692_v4   ;;  %2741 = vperm.xlu0 %3776, %v2691_v11   ;;  %v2718_v58 = vld [vmem:[#allocation3 + $0xf8] sm:$0xff]  ;;  %v2717_v8 = vld [vmem:[#allocation3 + $0xf0] sm:$0xff]  ;;  %v2656_v36 = vld [vmem:[#allocation4] sm:$0xff] }
 0x478   : > { %v2657_v20 = vld [vmem:[#allocation4 + $0xd8] sm:$0xff]  ;;  %v2655_v2 = vld [vmem:[#allocation4 + $0xb0] sm:$0xff]  ;;  %v2660_v1 = vld [vmem:[#allocation4 + $0x68] sm:$0xff] }
 0x479   : > { %v2658_v7 = vld [vmem:[#allocation4 + $0x18] sm:$0xff]  ;;  %v2659_v26 = vld [vmem:[#allocation4 + $0x50] sm:$0xff]  ;;  %v2662_v18 = vld [vmem:[#allocation4 + $0x48] sm:$0xff] }
 0x47a   : > { %v2661_v22 = vld [vmem:[#allocation4 + $0x30] sm:$0xff] }
 0x47b   : > { %2756 = vperm.xlu1 %3777, %v2694_v23   ;;  %2751 = vperm.xlu0 %3776, %v2693_v53   ;;  %v2664_v23 = vld [vmem:[#allocation4 + $0x88] sm:$0xff] }
 0x47f   : > { %2766 = vperm.xlu1 %3777, %v2696_v3   ;;  %2761 = vperm.xlu0 %3776, %v2695_v43   ;;  %v2663_v43 = vld [vmem:[#allocation4 + $0x80] sm:$0xff] }
 0x483   : > { %2776 = vperm.xlu1 %3777, %v2698_v38   ;;  %2771 = vperm.xlu0 %3776, %v2697_v37  }
 0x487   : > { %2786 = vperm.xlu1 %3777, %v2700_v19   ;;  %2781 = vperm.xlu0 %3776, %v2699_v45  }
 0x48b   : > { %2796 = vperm.xlu1 %3777, %v2702_v6   ;;  %2791 = vperm.xlu0 %3776, %v2701_v61   ;;  %v2666_v6 = vld [vmem:[#allocation4 + $0xb8] sm:$0xff] }
 0x48f   : > { %2806 = vperm.xlu1 %3777, %v2704_v48   ;;  %2801 = vperm.xlu0 %3776, %v2703_v40   ;;  %v2665_v40 = vld [vmem:[#allocation4 + $0xe8] sm:$0xff] }
 0x493   : > { %2816 = vperm.xlu1 %3777, %v2706_v32   ;;  %2811 = vperm.xlu0 %3776, %v2705_v46  }
 0x497   : > { %2826 = vperm.xlu1 %3777, %v2708_v5   ;;  %2821 = vperm.xlu0 %3776, %v2707_v28  }
 0x49b   : > { %2836 = vperm.xlu1 %3777, %v2710_v14   ;;  %2831 = vperm.xlu0 %3776, %v2709_v56   ;;  %v2668_v14 = vld [vmem:[#allocation4 + $0xf0] sm:$0xff] }
 0x49f   : > { %2846 = vperm.xlu1 %3777, %v2712_v52   ;;  %2841 = vperm.xlu0 %3776, %v2711_v63   ;;  %v2667_v63 = vld [vmem:[#allocation4 + $0x60] sm:$0xff] }
 0x4a3   : > { %2856 = vperm.xlu1 %3777, %v2714_v9   ;;  %2851 = vperm.xlu0 %3776, %v2713_v17  }
 0x4a7   : > { %2866 = vperm.xlu1 %3777, %v2716_v44   ;;  %2861 = vperm.xlu0 %3776, %v2715_v59  }
 0x4ab   : > { %2876 = vperm.xlu1 %3777, %v2718_v58   ;;  %2871 = vperm.xlu0 %3776, %v2717_v8   ;;  %v2670_v58 = vld [vmem:[#allocation4 + $0x78] sm:$0xff] }
 0x4ea   : > { %v2732_v51 = vpop.permute.xlu1 %2731  ;;  %v2722_v50 = vpop.permute.xlu0 %2721 }
 0x4eb   : > { %3778 = vrcp.f32 %v2732_v51 }
 0x4ec   : > { %3780 = vrcp.f32 %v2722_v50  ;;  %v2669_v50 = vld [vmem:[#allocation4 + $0x8] sm:$0xff] }
 0x4ee   : > { %v2737_v12 = vpop.permute.xlu1 %2736  ;;  %v2727_v25 = vpop.permute.xlu0 %2726 }
 0x4ef   : > { %3782 = vrcp.f32 %v2737_v12 }
 0x4f0   : > { %3784 = vrcp.f32 %v2727_v25 }
 0x4f2   : > { %v2747_v33 = vpop.permute.xlu1 %2746  ;;  %v2742_v16 = vpop.permute.xlu0 %2741 }
 0x4f3   : > { %3786 = vrcp.f32 %v2747_v33 }
 0x4f4   : > { %3788 = vrcp.f32 %v2742_v16 }
 0x4f6   : > { %v2757_v39 = vpop.permute.xlu1 %2756  ;;  %v2752_v30 = vpop.permute.xlu0 %2751 }
 0x4f7   : > { %3790 = vrcp.f32 %v2757_v39 }
 0x4f8   : > { %v3779_v41 = vpop.eup %3778  ;;  %3792 = vrcp.f32 %v2752_v30 }
 0x4f9   : > { %v3781_v42 = vpop.eup %3780  ;;  %v2884_v55 = vmul.f32 %v3779_v41, %v2657_v20  ;;  %v2672_v20 = vld [vmem:[#allocation4 + $0x58] sm:$0xff] }
 0x4fa   : > { %v2880_v54 = vmul.f32 %v3781_v42, %v2655_v2  ;;  %v2767_v60 = vpop.permute.xlu1 %2766  ;;  %v2762_v62 = vpop.permute.xlu0 %2761  ;;  %v2671_v2 = vld [vmem:[#allocation4 + $0x38] sm:$0xff] }
 0x4fb   : > { %2945 = vst [vmem:[%s4396_s21 + $0x10] sm:$0xff] %v2884_v55  ;;  %3794 = vrcp.f32 %v2767_v60 }
 0x4fc   : > { %v3783_v13 = vpop.eup %3782  ;;  %2943 = vst [vmem:[%s4396_s21] sm:$0xff] %v2880_v54  ;;  %3796 = vrcp.f32 %v2762_v62 }
 0x4fd   : > { %v3785_v29 = vpop.eup %3784  ;;  %v2886_v57 = vmul.f32 %v3783_v13, %v2658_v7  ;;  %v2674_v7 = vld [vmem:[#allocation4 + $0xc8] sm:$0xff] }
 0x4fe   : > { %v2882_v10 = vmul.f32 %v3785_v29, %v2656_v36  ;;  %v2777_v15 = vpop.permute.xlu1 %2776  ;;  %v2772_v31 = vpop.permute.xlu0 %2771  ;;  %v2673_v36 = vld [vmem:[#allocation4 + $0x40] sm:$0xff] }
 0x4ff   : > { %2946 = vst [vmem:[%s4396_s21 + $0x18] sm:$0xff] %v2886_v57  ;;  %3798 = vrcp.f32 %v2777_v15 }
 0x500   : > { %v3787_v49 = vpop.eup %3786  ;;  %2944 = vst [vmem:[%s4396_s21 + $0x8] sm:$0xff] %v2882_v10  ;;  %3800 = vrcp.f32 %v2772_v31 }
 0x501   : > { %v3789_v34 = vpop.eup %3788  ;;  %v2890_v27 = vmul.f32 %v3787_v49, %v2660_v1  ;;  %v2676_v1 = vld [vmem:[#allocation4 + $0x90] sm:$0xff] }
 0x502   : > { %v2888_v21 = vmul.f32 %v3789_v34, %v2659_v26  ;;  %v2787_v47 = vpop.permute.xlu1 %2786  ;;  %v2782_v35 = vpop.permute.xlu0 %2781  ;;  %v2675_v26 = vld [vmem:[#allocation4 + $0xe0] sm:$0xff] }
 0x503   : > { %2948 = vst [vmem:[%s4396_s21 + $0x28] sm:$0xff] %v2890_v27  ;;  %3802 = vrcp.f32 %v2787_v47 }
 0x504   : > { %v3791_v24 = vpop.eup %3790  ;;  %2947 = vst [vmem:[%s4396_s21 + $0x20] sm:$0xff] %v2888_v21  ;;  %3804 = vrcp.f32 %v2782_v35 }
 0x505   : > { %v3793_v0 = vpop.eup %3792  ;;  %v2894_v4 = vmul.f32 %v3791_v24, %v2662_v18  ;;  %v2678_v18 = vld [vmem:[#allocation4 + $0xc0] sm:$0xff] }
 0x506   : > { %v2892_v11 = vmul.f32 %v3793_v0, %v2661_v22  ;;  %v2797_v53 = vpop.permute.xlu1 %2796  ;;  %v2792_v3 = vpop.permute.xlu0 %2791  ;;  %v2677_v22 = vld [vmem:[#allocation4 + $0x70] sm:$0xff] }
 0x507   : > { %2950 = vst [vmem:[%s4396_s21 + $0x38] sm:$0xff] %v2894_v4  ;;  %3806 = vrcp.f32 %v2797_v53 }
 0x508   : > { %v3795_v38 = vpop.eup %3794  ;;  %2949 = vst [vmem:[%s4396_s21 + $0x30] sm:$0xff] %v2892_v11  ;;  %3808 = vrcp.f32 %v2792_v3 }
 0x509   : > { %v3797_v37 = vpop.eup %3796  ;;  %v2898_v19 = vmul.f32 %v3795_v38, %v2664_v23  ;;  %v2680_v23 = vld [vmem:[#allocation4 + $0xd0] sm:$0xff] }
 0x50a   : > { %v2896_v45 = vmul.f32 %v3797_v37, %v2663_v43  ;;  %v2807_v61 = vpop.permute.xlu1 %2806  ;;  %v2802_v48 = vpop.permute.xlu0 %2801  ;;  %v2679_v43 = vld [vmem:[#allocation4 + $0xa8] sm:$0xff] }
 0x50b   : > { %2952 = vst [vmem:[%s4396_s21 + $0x48] sm:$0xff] %v2898_v19  ;;  %3810 = vrcp.f32 %v2807_v61  ;;  %v2681_v61 = vld [vmem:[#allocation4 + $0x10] sm:$0xff] }
 0x50c   : > { %v3799_v32 = vpop.eup %3798  ;;  %2951 = vst [vmem:[%s4396_s21 + $0x40] sm:$0xff] %v2896_v45  ;;  %3812 = vrcp.f32 %v2802_v48 }
 0x50d   : > { %v3801_v46 = vpop.eup %3800  ;;  %v2902_v5 = vmul.f32 %v3799_v32, %v2666_v6  ;;  %v2682_v6 = vld [vmem:[#allocation4 + $0x28] sm:$0xff] }
 0x50e   : > { %v2900_v28 = vmul.f32 %v3801_v46, %v2665_v40  ;;  %v2817_v56 = vpop.permute.xlu1 %2816  ;;  %v2812_v52 = vpop.permute.xlu0 %2811 }
 0x50f   : > { %2954 = vst [vmem:[%s4396_s21 + $0x58] sm:$0xff] %v2902_v5  ;;  %3814 = vrcp.f32 %v2817_v56  ;;  %v2684_v5 = vld [vmem:[#allocation4 + $0xf8] sm:$0xff] }
 0x510   : > { %v3803_v9 = vpop.eup %3802  ;;  %2953 = vst [vmem:[%s4396_s21 + $0x50] sm:$0xff] %v2900_v28  ;;  %3816 = vrcp.f32 %v2812_v52  ;;  %v2683_v28 = vld [vmem:[#allocation4 + $0xa0] sm:$0xff] }
 0x511   : > { %v3805_v17 = vpop.eup %3804  ;;  %v2906_v44 = vmul.f32 %v3803_v9, %v2668_v14  ;;  %v2686_v9 = vld [vmem:[#allocation4 + $0x98] sm:$0xff] }
 0x512   : > { %v2904_v59 = vmul.f32 %v3805_v17, %v2667_v63  ;;  %v2827_v8 = vpop.permute.xlu1 %2826  ;;  %v2822_v51 = vpop.permute.xlu0 %2821  ;;  %v2685_v17 = vld [vmem:[#allocation4 + $0x20] sm:$0xff] }
 0x513   : > { %2956 = vst [vmem:[%s4396_s21 + $0x68] sm:$0xff] %v2906_v44  ;;  %3818 = vrcp.f32 %v2827_v8 }
 0x514   : > { %v3807_v12 = vpop.eup %3806  ;;  %2955 = vst [vmem:[%s4396_s21 + $0x60] sm:$0xff] %v2904_v59  ;;  %3820 = vrcp.f32 %v2822_v51 }
 0x515   : > { %v3809_v25 = vpop.eup %3808  ;;  %v2910_v33 = vmul.f32 %v3807_v12, %v2670_v58 }
 0x516   : > { %v2908_v16 = vmul.f32 %v3809_v25, %v2669_v50  ;;  %v2837_v39 = vpop.permute.xlu1 %2836  ;;  %v2832_v30 = vpop.permute.xlu0 %2831 }
 0x517   : > { %2958 = vst [vmem:[%s4396_s21 + $0x78] sm:$0xff] %v2910_v33  ;;  %3822 = vrcp.f32 %v2837_v39 }
 0x518   : > { %v3811_v41 = vpop.eup %3810  ;;  %2957 = vst [vmem:[%s4396_s21 + $0x70] sm:$0xff] %v2908_v16  ;;  %3824 = vrcp.f32 %v2832_v30 }
 0x519   : > { %v3813_v42 = vpop.eup %3812  ;;  %v2914_v55 = vmul.f32 %v3811_v41, %v2672_v20 }
 0x51a   : > { %v2912_v54 = vmul.f32 %v3813_v42, %v2671_v2  ;;  %v2847_v60 = vpop.permute.xlu1 %2846  ;;  %v2842_v62 = vpop.permute.xlu0 %2841 }
 0x51b   : > { %2960 = vst [vmem:[%s4396_s21 + $0x88] sm:$0xff] %v2914_v55  ;;  %3826 = vrcp.f32 %v2847_v60 }
 0x51c   : > { %v3815_v13 = vpop.eup %3814  ;;  %2959 = vst [vmem:[%s4396_s21 + $0x80] sm:$0xff] %v2912_v54  ;;  %3828 = vrcp.f32 %v2842_v62 }
 0x51d   : > { %v3817_v29 = vpop.eup %3816  ;;  %v2918_v57 = vmul.f32 %v3815_v13, %v2674_v7 }
 0x51e   : > { %v2916_v10 = vmul.f32 %v3817_v29, %v2673_v36  ;;  %v2857_v15 = vpop.permute.xlu1 %2856  ;;  %v2852_v31 = vpop.permute.xlu0 %2851 }
 0x51f   : > { %2962 = vst [vmem:[%s4396_s21 + $0x98] sm:$0xff] %v2918_v57  ;;  %3830 = vrcp.f32 %v2857_v15 }
 0x520   : > { %v3819_v49 = vpop.eup %3818  ;;  %2961 = vst [vmem:[%s4396_s21 + $0x90] sm:$0xff] %v2916_v10  ;;  %3832 = vrcp.f32 %v2852_v31 }
 0x521   : > { %v3821_v34 = vpop.eup %3820  ;;  %v2922_v27 = vmul.f32 %v3819_v49, %v2676_v1 }
 0x522   : > { %v2920_v21 = vmul.f32 %v3821_v34, %v2675_v26  ;;  %v2867_v47 = vpop.permute.xlu1 %2866  ;;  %v2862_v35 = vpop.permute.xlu0 %2861 }
 0x523   : > { %2964 = vst [vmem:[%s4396_s21 + $0xa8] sm:$0xff] %v2922_v27  ;;  %3834 = vrcp.f32 %v2867_v47 }
 0x524   : > { %v3823_v24 = vpop.eup %3822  ;;  %2963 = vst [vmem:[%s4396_s21 + $0xa0] sm:$0xff] %v2920_v21  ;;  %3836 = vrcp.f32 %v2862_v35 }
 0x525   : > { %v3825_v0 = vpop.eup %3824  ;;  %v2926_v4 = vmul.f32 %v3823_v24, %v2678_v18 }
 0x526   : > { %v2924_v11 = vmul.f32 %v3825_v0, %v2677_v22  ;;  %v2877_v53 = vpop.permute.xlu1 %2876  ;;  %v2872_v3 = vpop.permute.xlu0 %2871 }
 0x527   : > { %2966 = vst [vmem:[%s4396_s21 + $0xb8] sm:$0xff] %v2926_v4  ;;  %3838 = vrcp.f32 %v2877_v53 }
 0x528   : > { %v3827_v38 = vpop.eup %3826  ;;  %2965 = vst [vmem:[%s4396_s21 + $0xb0] sm:$0xff] %v2924_v11  ;;  %3840 = vrcp.f32 %v2872_v3 }
 0x529   : > { %v3829_v37 = vpop.eup %3828  ;;  %v2930_v19 = vmul.f32 %v3827_v38, %v2680_v23 }
 0x52a   : > { %v2928_v45 = vmul.f32 %v3829_v37, %v2679_v43 }
 0x52b   : > { %2968 = vst [vmem:[%s4396_s21 + $0xc8] sm:$0xff] %v2930_v19 }
 0x52c   : > { %v3831_v48 = vpop.eup %3830  ;;  %2967 = vst [vmem:[%s4396_s21 + $0xc0] sm:$0xff] %v2928_v45 }
 0x52d   : > { %v3833_v40 = vpop.eup %3832  ;;  %v2934_v32 = vmul.f32 %v3831_v48, %v2682_v6 }
 0x52e   : > { %v2932_v46 = vmul.f32 %v3833_v40, %v2681_v61 }
 0x52f   : > { %2970 = vst [vmem:[%s4396_s21 + $0xd8] sm:$0xff] %v2934_v32 }
 0x530   : > { %v3835_v14 = vpop.eup %3834  ;;  %2969 = vst [vmem:[%s4396_s21 + $0xd0] sm:$0xff] %v2932_v46 }
 0x531   : > { %v3837_v56 = vpop.eup %3836  ;;  %v2938_v52 = vmul.f32 %v3835_v14, %v2684_v5 }
 0x532   : > { %v2936_v63 = vmul.f32 %v3837_v56, %v2683_v28 }
 0x533   : > { %2972 = vst [vmem:[%s4396_s21 + $0xe8] sm:$0xff] %v2938_v52 }
 0x534   : > { %v3839_v44 = vpop.eup %3838  ;;  %2971 = vst [vmem:[%s4396_s21 + $0xe0] sm:$0xff] %v2936_v63 }
 0x535   : > { %v3841_v59 = vpop.eup %3840  ;;  %v2942_v58 = vmul.f32 %v3839_v44, %v2686_v9 }
 0x536   : > { %v2940_v8 = vmul.f32 %v3841_v59, %v2685_v17 }
 0x537   : > { %2974 = vst [vmem:[%s4396_s21 + $0xf8] sm:$0xff] %v2942_v58 }
 0x538   : > { %2973 = vst [vmem:[%s4396_s21 + $0xf0] sm:$0xff] %v2940_v8 }
 0x539 PF: > { %2981 = sbr.rel (!%p4129_p0) target bundleno = 1365 (0x555), region = 162  ;;  %s6169_s5 = sld [smem:[#allocation12_spill]] (%p4129_p0)  ;;  %v3079_v51 = vld [vmem:[%s4396_s21] sm:$0xff] (%p4129_p0)  ;;  %v3081_v50 = vld [vmem:[%s4396_s21 + $0x8] sm:$0xff] (%p4129_p0)  ;;  %v3083_v12 = vld [vmem:[%s4396_s21 + $0x10] sm:$0xff] (%p4129_p0) }
 0x53a   : > { %s6170_s6 = sld [smem:[#allocation14_spill]] (%p4129_p0)  ;;  %v3085_v25 = vld [vmem:[%s4396_s21 + $0x18] sm:$0xff] (%p4129_p0)  ;;  %v3087_v33 = vld [vmem:[%s4396_s21 + $0x20] sm:$0xff] (%p4129_p0)  ;;  %v3089_v16 = vld [vmem:[%s4396_s21 + $0x28] sm:$0xff] (%p4129_p0) }
 0x53b   : > { %s6171_s7 = sld [smem:[#allocation13_spill]] (%p4129_p0)  ;;  %v3091_v20 = vld [vmem:[%s4396_s21 + $0x30] sm:$0xff] (%p4129_p0)  ;;  %v3093_v39 = vld [vmem:[%s4396_s21 + $0x38] sm:$0xff] (%p4129_p0)  ;;  %v3095_v30 = vld [vmem:[%s4396_s21 + $0x40] sm:$0xff] (%p4129_p0) }
 0x53c   : > { %v3097_v2 = vld [vmem:[%s4396_s21 + $0x48] sm:$0xff] (%p4129_p0)  ;;  %v3099_v41 = vld [vmem:[%s4396_s21 + $0x50] sm:$0xff] (%p4129_p0)  ;;  %v3101_v42 = vld [vmem:[%s4396_s21 + $0x58] sm:$0xff] (%p4129_p0)  ;;  %s6172_s3 = sld [smem:[#allocation96_spill]] (%p4129_p0) }
 0x53d   : > { %v3103_v55 = vld [vmem:[%s4396_s21 + $0x60] sm:$0xff] (%p4129_p0)  ;;  %v3105_v54 = vld [vmem:[%s4396_s21 + $0x68] sm:$0xff] (%p4129_p0)  ;;  %v3107_v7 = vld [vmem:[%s4396_s21 + $0x70] sm:$0xff] (%p4129_p0) }
 0x53e   : > { %v3109_v60 = vld [vmem:[%s4396_s21 + $0x78] sm:$0xff]  ;;  %v3111_v62 = vld [vmem:[%s4396_s21 + $0x80] sm:$0xff]  ;;  %v3113_v36 = vld [vmem:[%s4396_s21 + $0x88] sm:$0xff] }
 0x53f   : > { %s3360_s10 = sshll.u32 %s6169_s5, 6  ;;  %v3115_v13 = vld [vmem:[%s4396_s21 + $0x90] sm:$0xff]  ;;  %v3117_v29 = vld [vmem:[%s4396_s21 + $0x98] sm:$0xff]  ;;  %v3119_v57 = vld [vmem:[%s4396_s21 + $0xa0] sm:$0xff] }
 0x540   : > { %s3354_s11 = sshll.u32 %s6170_s6, 7  ;;  %v3121_v10 = vld [vmem:[%s4396_s21 + $0xa8] sm:$0xff]  ;;  %v3123_v1 = vld [vmem:[%s4396_s21 + $0xb0] sm:$0xff]  ;;  %v3125_v15 = vld [vmem:[%s4396_s21 + $0xb8] sm:$0xff] }
 0x541   : > { %s2984_s15 = sadd.s32 %s6171_s7, %s3360_s10  ;;  %v3127_v31 = vld [vmem:[%s4396_s21 + $0xc0] sm:$0xff]  ;;  %v3129_v26 = vld [vmem:[%s4396_s21 + $0xc8] sm:$0xff]  ;;  %v3131_v49 = vld [vmem:[%s4396_s21 + $0xd0] sm:$0xff] }
 0x542   : > { %s2986_s12 = sadd.s32 %s3354_s11, %s2984_s15  ;;  %v3133_v34 = vld [vmem:[%s4396_s21 + $0xd8] sm:$0xff]  ;;  %v3135_v27 = vld [vmem:[%s4396_s21 + $0xe0] sm:$0xff]  ;;  %v3137_v21 = vld [vmem:[%s4396_s21 + $0xe8] sm:$0xff] }
 0x543   : > { %s3355_s13 = sshll.u32 %s2986_s12, 3  ;;  %v3139_v18 = vld [vmem:[%s4396_s21 + $0xf0] sm:$0xff]  ;;  %v3141_v47 = vld [vmem:[%s4396_s21 + $0xf8] sm:$0xff] }
 0x544   : > { %s5742_s4 = scalar_lea.vmem %s6172_s3, %s3355_s13 }
 0x545   : > { %3080 = vst [vmem:[%s5742_s4] sm:$0xff] %v3079_v51  ;;  %3082 = vst [vmem:[%s5742_s4 + $0x10] sm:$0xff] %v3081_v50 }
 0x546   : > { %3084 = vst [vmem:[%s5742_s4 + $0x20] sm:$0xff] %v3083_v12  ;;  %3086 = vst [vmem:[%s5742_s4 + $0x30] sm:$0xff] %v3085_v25 }
 0x547   : > { %3088 = vst [vmem:[%s5742_s4 + $0x40] sm:$0xff] %v3087_v33  ;;  %3090 = vst [vmem:[%s5742_s4 + $0x50] sm:$0xff] %v3089_v16 }
 0x548   : > { %3092 = vst [vmem:[%s5742_s4 + $0x60] sm:$0xff] %v3091_v20  ;;  %3094 = vst [vmem:[%s5742_s4 + $0x70] sm:$0xff] %v3093_v39 }
 0x549   : > { %3096 = vst [vmem:[%s5742_s4 + $0x80] sm:$0xff] %v3095_v30  ;;  %3098 = vst [vmem:[%s5742_s4 + $0x90] sm:$0xff] %v3097_v2 }
 0x54a   : > { %3100 = vst [vmem:[%s5742_s4 + $0xa0] sm:$0xff] %v3099_v41  ;;  %3102 = vst [vmem:[%s5742_s4 + $0xb0] sm:$0xff] %v3101_v42 }
 0x54b   : > { %3104 = vst [vmem:[%s5742_s4 + $0xc0] sm:$0xff] %v3103_v55  ;;  %3106 = vst [vmem:[%s5742_s4 + $0xd0] sm:$0xff] %v3105_v54 }
 0x54c   : > { %3108 = vst [vmem:[%s5742_s4 + $0xe0] sm:$0xff] %v3107_v7  ;;  %3110 = vst [vmem:[%s5742_s4 + $0xf0] sm:$0xff] %v3109_v60 }
 0x54d   : > { %3112 = vst [vmem:[%s5742_s4 + $0x100] sm:$0xff] %v3111_v62  ;;  %3114 = vst [vmem:[%s5742_s4 + $0x110] sm:$0xff] %v3113_v36 }
 0x54e   : > { %3116 = vst [vmem:[%s5742_s4 + $0x120] sm:$0xff] %v3115_v13  ;;  %3118 = vst [vmem:[%s5742_s4 + $0x130] sm:$0xff] %v3117_v29 }
 0x54f   : > { %3120 = vst [vmem:[%s5742_s4 + $0x140] sm:$0xff] %v3119_v57  ;;  %3122 = vst [vmem:[%s5742_s4 + $0x150] sm:$0xff] %v3121_v10 }
 0x550   : > { %3124 = vst [vmem:[%s5742_s4 + $0x160] sm:$0xff] %v3123_v1  ;;  %3126 = vst [vmem:[%s5742_s4 + $0x170] sm:$0xff] %v3125_v15 }
 0x551   : > { %3128 = vst [vmem:[%s5742_s4 + $0x180] sm:$0xff] %v3127_v31  ;;  %3130 = vst [vmem:[%s5742_s4 + $0x190] sm:$0xff] %v3129_v26 }
 0x552   : > { %3132 = vst [vmem:[%s5742_s4 + $0x1a0] sm:$0xff] %v3131_v49  ;;  %3134 = vst [vmem:[%s5742_s4 + $0x1b0] sm:$0xff] %v3133_v34 }
 0x553   : > { %3136 = vst [vmem:[%s5742_s4 + $0x1c0] sm:$0xff] %v3135_v27  ;;  %3138 = vst [vmem:[%s5742_s4 + $0x1d0] sm:$0xff] %v3137_v21 }
 0x554   : > { %3140 = vst [vmem:[%s5742_s4 + $0x1e0] sm:$0xff] %v3139_v18  ;;  %3142 = vst [vmem:[%s5742_s4 + $0x1f0] sm:$0xff] %v3141_v47 }
 0x555 PF: > { %s14_s29 = sadd.s32 1, %s3960_s29   ;;  %s6174_s9 = sld [smem:[#allocation15_spill]] }
 0x556   : > { %p5797_p10 = scmp.ge.s32.totalorder %s14_s29, 18   ;;  %s6175_s0 = sld [smem:[#allocation16_spill]] }
 0x557   : > { %s6176_s5 = sld [smem:[#allocation17_spill]]  ;;  %s6179_s15 = smov %s3908_s16 }
 0x558   : > { %s6177_s6 = sld [smem:[#allocation18_spill]]  ;;  %s6180_s16 = smov %s4142_s8 }
 0x559   : > { %s6181_s17 = smov %s3916_s18  ;;  %s6182_s18 = smov %s4139_s1 }
 0x55a   : > { %s6183_s19 = smov %s3924_s20  ;;  %s6184_s20 = smov %s4136_s14 }
 0x55b   : > { %s6185_s21 = smov %s3944_s25  ;;  %s6186_s22 = smov %s3948_s26 }
 0x55c   : > { %s6187_s23 = smov %s3952_s27  ;;  %s6188_s24 = smov %s3956_s28 }
 0x55d   : > { %s6189_s25 = smov %s6174_s9  ;;  %s6190_s26 = smov %s6175_s0 }
 0x55e   : > { %s6191_s27 = smov %s6176_s5  ;;  %s6192_s28 = smov %s6177_s6 }
 0x55f   :  { %13 = sbr.rel (!%p5797_p10) target bundleno = 14 (0xe), region = 250 }

// kernel: attention_forward.4
= control target key start
LH: loop header
LB: loop body
LE: loop exit
PB: predicated region body
PF: predicated region fallthrough
CT: control target
= control target key end

     0   :  { %s4862_s0 = inlined_call_operand.hbm [shape: f32[1024,256], index: 0, kind: input, shape index: {}]   ;;  %s4863_s1 = inlined_call_operand.hbm [shape: f32[256,768], index: 1, kind: input, shape index: {}]   ;;  %s4864_s2 = inlined_call_operand.vmem [shape: f32[1,768], index: 2, kind: input, shape index: {}]   ;;  %s4865_s3 = inlined_call_operand.vmem [shape: f32[1024,768], index: 3, kind: output, shape index: {}]  }
   0x1   :  { %4868 = sst [smem:[#allocation14_spill]] %s4862_s0 }
   0x2   :  { %4869 = sst [smem:[#allocation15_spill]] %s4863_s1 }
   0x3   :  { %4870 = sst [smem:[#allocation16_spill]] %s4865_s3 }
   0x4   :  { %8 = vsyncpa [#allocation4], 0 }
   0x5   :  { %10 = vsyncpa [#allocation4 + $0x1], 0 }
   0x6   :  { %11 = vsyncpa [#allocation6], 0 }
   0x7   :  { %13 = vsyncpa [#allocation6 + $0x1], 0  ;;  %s3577_s12 = smov 0   ;;  %s3579_s13 = smov 0  }
   0x8   :  { %s3581_s14 = smov 0   ;;  %s3583_s15 = smov 0  }
   0x9   :  { %s3585_s16 = smov 0   ;;  %s3587_s17 = smov 0  }
   0xa   :  { %s3589_s18 = smov 0   ;;  %s3591_s19 = smov 0  }
   0xb   :  { %s3593_s20 = smov 0   ;;  %s3595_s21 = smov 0  }
   0xc   :  { %s3597_s22 = smov 0   ;;  %s3599_s23 = smov 0  }
   0xd   :  { %s3601_s24 = smov 0  }
   0xe LB: > { %4871 = sst [smem:[#allocation10_spill]] %s3535_s21  ;;  %s3236_s25 = sadd.s32 4294967295, %s3547_s24   ;;  %s3547_s24 = sphi %s3601_s24, %s19_s24   ;;  %s3543_s23 = sphi %s3599_s23, %s4905_s23   ;;  %s3539_s22 = sphi %s3597_s22, %s4904_s22   ;;  %s3535_s21 = sphi %s3595_s21, %s4903_s21   ;;  %s3531_s20 = sphi %s3593_s20, %s4902_s20   ;;  %s3527_s19 = sphi %s3591_s19, %s4901_s19   ;;  %s3523_s18 = sphi %s3589_s18, %s4900_s18   ;;  %s3519_s17 = sphi %s3587_s17, %s4899_s17   ;;  %s3515_s16 = sphi %s3585_s16, %s4898_s16   ;;  %s3511_s15 = sphi %s3583_s15, %s4897_s15   ;;  %s3507_s14 = sphi %s3581_s14, %s4896_s14   ;;  %s3503_s13 = sphi %s3579_s13, %s4895_s13   ;;  %s3499_s12 = sphi %s3577_s12, %s4894_s12  }
   0xf   : > { %p54_p0 = scmp.ne.s32.totalorder %s3527_s19, %s3523_s18  ;;  %p55_p1 = scmp.eq.s32.totalorder %s3547_s24, 0 }
  0x10   : > { %p60_p2 = scmp.ne.s32.totalorder %s3523_s18, %s3519_s17  ;;  %p3647_p3 = scmp.eq.s32.totalorder %s3236_s25, 0 }
  0x11   : > { %p3651_p4 = scmp.eq.s32.totalorder %s3236_s25, 3  ;;  %p56_p5 = por %p55_p1, %p54_p0 }
  0x12   : > { %p3659_p6 = por %p3647_p3, %p60_p2  ;;  %p3270_p7 = scmp.lt.s32.totalorder %s3547_s24, 4 }
  0x13   : > { %s166_s4 = sand.u32 1, %s3527_s19   ;;  %s3253_s5 = sshll.u32 %s3543_s23, 14 }
  0x14   : > { %s3240_s6 = sshll.u32 %s166_s4, 10  ;;  %s4875_s0 = sld [smem:[#allocation14_spill]] }
  0x15   : > { %s170_s10 = scalar_lea.vmem [#allocation3], %s3240_s6  ;;  %p3671_p8 = pnand %p3270_p7, %p56_p5 }
  0x16   : > { %s180_s11 = sshll.u32 %s170_s10, 4  ;;  %s167_s25 = scalar_lea.sflag [#allocation4], %s166_s4  ;;  %s181_s11 = int_to_ptr.vmem [resolvable:$true] %s180_s11 }
  0x17   : > { %p3383_p9 = pneg %p3671_p8  ;;  %s3394_s27 = scalar_lea.vmem %s181_s11, 16384 }
  0x18   : > { %p3395_p10 = scmp.ne.s32.totalorder %s181_s11, %s3394_s27  ;;  %s3549_s26 = smov [#allocation3]  }
  0x19   : > { %s3399_s3 = sshll.u32 %s3549_s26, 4  ;;  %s3400_s3 = int_to_ptr.vmem [resolvable:$false] %s3399_s3 }
  0x1a   : > { %s179_s9 = scalar_lea.hbm %s4875_s0, %s3253_s5  ;;  %p3397_p11 = pnand %p3395_p10, %p3383_p9 }
  0x1b   : > { %s3401_s5 = scalar_lea.vmem %s3400_s3, 32768  ;;  %p3402_p13 = scmp.lt.s32.totalorder %s181_s11, %s3400_s3 }
  0x1c   : > { %p3398_p12 = pneg %p3397_p11  ;;  %p3403_p0 = scmp.lt.s32.totalorder %s3401_s5, %s3394_s27 }
  0x1e   : > { %p3404_p2 = por %p3403_p0, %p3402_p13 }
  0x20   : > { %p3405_p5 = pnand %p3404_p2, %p3398_p12 }
  0x22   : > { %3408 = shalt.err (!%p3405_p5)
}
  0x23   : > { %s3550_s6 = smov 256   ;;  %s3551_s26 = smov 16  }
  0x24   : > { %3266 = dma.hbm_to_vmem [thread:$0]  (!%p3671_p8), %s179_s9, 16384, %s181_s11, %s167_s25, %s3550_s6, %s3550_s6, %s3551_s26  }
  0x25   : > { %p3245_p9 = scmp.ge.s32.totalorder %s3547_s24, 1  ;;  %p220_p10 = scmp.lt.s32.totalorder %s3547_s24, 5 }
  0x26   : > { %s34_s27 = sadd.s32 1, %s3539_s22  ;;  %s75_s4 = sadd.s32 1, %s3515_s16 }
  0x27   : > { %p3681_p11 = pnand %p3245_p9, %p220_p10  ;;  %p36_p12 = scmp.ge.s32.totalorder %s34_s27, 2 }
  0x28   : > { %p82_p13 = scmp.ne.s32.totalorder %s3515_s16, %s3511_s15  ;;  %p88_p0 = scmp.ne.s32.totalorder %s3511_s15, %s3507_s14 }
  0x29   : > { %s4907_s27 = smov (%p36_p12, %s34_s27), 0  ;;  %s4879_s7 = sadd.s32 1, %s3543_s23 }
  0x2a   : > { %4878 = sst [smem:[#allocation11_spill]] %s4907_s27  ;;  %s4909_s7 = smov (!%p36_p12, %s4879_s7), %s3543_s23 }
  0x2b   : > { %s71_s8 = ssub.s32 %s3539_s22, %s4907_s27  ;;  %p3700_p8 = por %p82_p13, %p55_p1 }
  0x2c   : > { %p40_p2 = scmp.ge.s32.totalorder %s4909_s7, 2  ;;  %p73_p5 = scmp.eq.s32.totalorder %s71_s8, 0 }
  0x2d   : > { %p3706_p9 = por %p88_p0, %p3647_p3  ;;  %s129_s10 = sadd.s32 1, %s3503_s13 }
  0x2e   : > { %s4911_s7 = smov (%p40_p2, %s4909_s7), 0  ;;  %p139_p1 = scmp.ne.s32.totalorder %s3503_s13, %s3499_s12 }
  0x2f   : > { %4882 = sst [smem:[#allocation12_spill]] %s4911_s7  ;;  %s42_s17 = ssub.s32 %s3543_s23, %s4911_s7 }
  0x30   : > { %s3714_s11 = scalar_select %p73_p5, %s3515_s16, %s75_s4  }
  0x31   : > { %p45_p10 = scmp.eq.s32.totalorder %s42_s17, 0  ;;  %s126_s25 = sor.u32 %s71_s8, %s42_s17 }
  0x32   : > { %4883 = sst [smem:[#allocation13_spill]] %s3714_s11  ;;  %p127_p12 = scmp.eq.s32.totalorder %s126_s25, 0 }
  0x33   : > { %p3722_p13 = por %p3651_p4, %p139_p1  ;;  %s4885_s5 = sadd.s32 1, %s3527_s19 }
  0x34   : > { %s3729_s6 = scalar_select %p45_p10, %s3527_s19, %s4885_s5  }
  0x35   : > { %s3732_s26 = scalar_select %p127_p12, %s3503_s13, %s129_s10  }
  0x36   : > { %s190_s0 = sand.u32 1, %s3515_s16   ;;  %s3254_s27 = smul.u32 384, %s3539_s22 }
  0x37   : > { %s3255_s21 = smul.u32 768, %s190_s0  ;;  %s4886_s1 = sld [smem:[#allocation15_spill]] }
  0x38   : > { %p3743_p3 = pnand %p3270_p7, %p3700_p8  ;;  %s191_s25 = scalar_lea.sflag [#allocation6], %s190_s0 }
  0x39   : > { %s194_s8 = scalar_lea.vmem [#allocation5], %s3255_s21  ;;  %s3552_s5 = smov [#allocation5]  }
  0x3a   : > { %s204_s17 = sshll.u32 %s194_s8, 4  ;;  %p3411_p4 = pneg %p3743_p3  ;;  %s205_s17 = int_to_ptr.vmem [resolvable:$true] %s204_s17 }
  0x3b   : > { %s3422_s10 = scalar_lea.vmem %s205_s17, 12288  ;;  %s3427_s11 = sshll.u32 %s3552_s5, 4  ;;  %s3428_s11 = int_to_ptr.vmem [resolvable:$false] %s3427_s11 }
  0x3c   : > { %p3423_p0 = scmp.ne.s32.totalorder %s205_s17, %s3422_s10  ;;  %p3430_p1 = scmp.lt.s32.totalorder %s205_s17, %s3428_s11 }
  0x3d   : > { %s203_s7 = scalar_lea.hbm %s4886_s1, %s3254_s27  ;;  %s3429_s27 = scalar_lea.vmem %s3428_s11, 24576 }
  0x3e   : > { %p3425_p2 = pnand %p3423_p0, %p3411_p4  ;;  %p3431_p7 = scmp.lt.s32.totalorder %s3429_s27, %s3422_s10 }
  0x40   : > { %p3426_p5 = pneg %p3425_p2  ;;  %p3432_p8 = por %p3431_p7, %p3430_p1 }
  0x42   : > { %p3433_p10 = pnand %p3432_p8, %p3426_p5 }
  0x44   : > { %3436 = shalt.err (!%p3433_p10)
}
  0x45   : > { %s3553_s9 = smov 768   ;;  %s3554_s21 = smov 384  }
  0x46   : > { %s3555_s4 = smov 24   ;;  %224 = sbr.rel (%p3681_p11) target bundleno = 671 (0x29f), region = 32 }
  0x47   : > { %3269 = dma.hbm_to_vmem [thread:$0]  (!%p3743_p3), %s203_s7, 12288, %s205_s17, %s191_s25, %s3553_s9, %s3554_s21, %s3555_s4  }
  0x48   : > { %s226_s0 = sand.u32 (!%p3681_p11), 1, %s3523_s18  }
  0x49   : > { %s3246_s8 = sshll.u32 (!%p3681_p11), %s226_s0, 10  ;;  %s227_s5 = scalar_lea.sflag (!%p3681_p11), [#allocation4], %s226_s0 }
  0x4a   : > { %s3754_s1 = scalar_lea.vmem (!%p3681_p11), [#allocation3], %s3246_s8 }
  0x4b   : > { %3490 = dma.done.wait (%p3659_p6), %s227_s5, 16384  }
  0x4c   : > { %3492 = vsyncadd (%p3659_p6), %s227_s5, 4294950912  ;;  %s235_s10 = sand.u32 1, %s3511_s15  }
  0x4d   : > { %s3256_s29 = smul.u32 768, %s235_s10  ;;  %s236_s7 = scalar_lea.sflag [#allocation6], %s235_s10 }
  0x4f   : > { %s3761_s17 = scalar_lea.vmem [#allocation5], %s3256_s29 }
  0x50   : > { %3494 = dma.done.wait (%p3706_p9), %s236_s7, 12288  }
  0x51   : > { %3496 = vsyncadd (%p3706_p9), %s236_s7, 4294955008  ;;  %v3556_v0 = vmov 0.0   ;;  %v843_v1 = vld [vmem:[%s3761_s17 + $0x170] sm:$0xff]  ;;  %v842_v2 = vld [vmem:[%s3761_s17 + $0x168] sm:$0xff]  ;;  %s3985_s30 = smul.u32 3, %s3531_s20  ;;  %s267_s11 = sand.u32 1, %s3499_s12  }
  0x52   : > { %1342 = vmatprep.subr.mxu1 %v3556_v0  ;;  %v844_v3 = vld [vmem:[%s3761_s17 + $0x178] sm:$0xff]  ;;  %893 = vmatprep.subr.mxu0 %v843_v1  ;;  %v839_v5 = vld [vmem:[%s3761_s17 + $0x150] sm:$0xff]  ;;  %v841_v6 = vld [vmem:[%s3761_s17 + $0x160] sm:$0xff]  ;;  %s3257_s27 = smul.u32 1536, %s267_s11  ;;  %s4889_s8 = sld [smem:[#allocation16_spill]] (%p3722_p13) }
  0x53   : > { %1343 = vmatpush1.msra.mxu1 %v844_v3  ;;  %v840_v4 = vld [vmem:[%s3761_s17 + $0x158] sm:$0xff]  ;;  %894 = vmatpush1.msra.mxu0 %v842_v2  ;;  %v837_v7 = vld [vmem:[%s3761_s17 + $0x140] sm:$0xff]  ;;  %v838_v8 = vld [vmem:[%s3761_s17 + $0x148] sm:$0xff]  ;;  %p275_p6 = scmp.lt.s32.totalorder %s3985_s30, 5 }
  0x54   : > { %1344 = vmatprep.subr.mxu1 %v3556_v0  ;;  %895 = vmatprep.subr.mxu0 %v840_v4  ;;  %v836_v9 = vld [vmem:[%s3761_s17 + $0x138] sm:$0xff]  ;;  %v834_v10 = vld [vmem:[%s3761_s17 + $0x128] sm:$0xff]  ;;  %v835_v11 = vld [vmem:[%s3761_s17 + $0x130] sm:$0xff]  ;;  %s4013_s12 = scalar_lea.vmem [#allocation7], %s3257_s27 }
  0x55   : > { %1345 = vmatpush1.msra.mxu1 %v841_v6  ;;  %896 = vmatpush1.msra.mxu0 %v839_v5  ;;  %v833_v12 = vld [vmem:[%s3761_s17 + $0x120] sm:$0xff]  ;;  %v831_v13 = vld [vmem:[%s3761_s17 + $0x110] sm:$0xff]  ;;  %v832_v14 = vld [vmem:[%s3761_s17 + $0x118] sm:$0xff]  ;;  %s276_s20 = scalar_select %p275_p6, %s3985_s30, 5 }
  0x56   : > { %1346 = vmatprep.subr.mxu1 %v3556_v0  ;;  %897 = vmatprep.subr.mxu0 %v837_v7  ;;  %v830_v15 = vld [vmem:[%s3761_s17 + $0x108] sm:$0xff]  ;;  %v828_v16 = vld [vmem:[%s3761_s17 + $0xf8] sm:$0xff]  ;;  %v829_v17 = vld [vmem:[%s3761_s17 + $0x100] sm:$0xff] }
  0x57   : > { %1347 = vmatpush1.msra.mxu1 %v838_v8  ;;  %898 = vmatpush1.msra.mxu0 %v836_v9  ;;  %v827_v18 = vld [vmem:[%s3761_s17 + $0xf0] sm:$0xff]  ;;  %v825_v19 = vld [vmem:[%s3761_s17 + $0xe0] sm:$0xff]  ;;  %v826_v20 = vld [vmem:[%s3761_s17 + $0xe8] sm:$0xff]  ;;  %s277_s25 = scalar_lea.vmem %s4864_s2, %s276_s20 }
  0x58   : > { %1348 = vmatprep.subr.mxu1 %v3556_v0  ;;  %899 = vmatprep.subr.mxu0 %v834_v10  ;;  %v824_v21 = vld [vmem:[%s3761_s17 + $0xd8] sm:$0xff]  ;;  %v822_v22 = vld [vmem:[%s3761_s17 + $0xc8] sm:$0xff]  ;;  %v823_v23 = vld [vmem:[%s3761_s17 + $0xd0] sm:$0xff] }
  0x59   : > { %1349 = vmatpush1.msra.mxu1 %v835_v11  ;;  %900 = vmatpush1.msra.mxu0 %v833_v12  ;;  %v821_v24 = vld [vmem:[%s3761_s17 + $0xc0] sm:$0xff]  ;;  %v819_v25 = vld [vmem:[%s3761_s17 + $0xb0] sm:$0xff]  ;;  %v820_v26 = vld [vmem:[%s3761_s17 + $0xb8] sm:$0xff] }
  0x5a   : > { %1350 = vmatprep.subr.mxu1 %v3556_v0  ;;  %901 = vmatprep.subr.mxu0 %v831_v13  ;;  %v818_v27 = vld [vmem:[%s3761_s17 + $0xa8] sm:$0xff]  ;;  %v816_v28 = vld [vmem:[%s3761_s17 + $0x98] sm:$0xff]  ;;  %v817_v29 = vld [vmem:[%s3761_s17 + $0xa0] sm:$0xff] }
  0x5b   : > { %1351 = vmatpush1.msra.mxu1 %v832_v14  ;;  %902 = vmatpush1.msra.mxu0 %v830_v15  ;;  %v815_v30 = vld [vmem:[%s3761_s17 + $0x90] sm:$0xff]  ;;  %v813_v31 = vld [vmem:[%s3761_s17 + $0x80] sm:$0xff]  ;;  %v814_v32 = vld [vmem:[%s3761_s17 + $0x88] sm:$0xff] }
  0x5c   : > { %1352 = vmatprep.subr.mxu1 %v3556_v0  ;;  %903 = vmatprep.subr.mxu0 %v828_v16  ;;  %v812_v33 = vld [vmem:[%s3761_s17 + $0x78] sm:$0xff]  ;;  %v810_v34 = vld [vmem:[%s3761_s17 + $0x68] sm:$0xff]  ;;  %v811_v35 = vld [vmem:[%s3761_s17 + $0x70] sm:$0xff] }
  0x5d   : > { %1353 = vmatpush1.msra.mxu1 %v829_v17  ;;  %904 = vmatpush1.msra.mxu0 %v827_v18  ;;  %v809_v36 = vld [vmem:[%s3761_s17 + $0x60] sm:$0xff]  ;;  %v807_v37 = vld [vmem:[%s3761_s17 + $0x50] sm:$0xff]  ;;  %v808_v38 = vld [vmem:[%s3761_s17 + $0x58] sm:$0xff] }
  0x5e   : > { %1354 = vmatprep.subr.mxu1 %v3556_v0  ;;  %905 = vmatprep.subr.mxu0 %v825_v19  ;;  %v806_v39 = vld [vmem:[%s3761_s17 + $0x48] sm:$0xff]  ;;  %v804_v40 = vld [vmem:[%s3761_s17 + $0x38] sm:$0xff]  ;;  %v805_v41 = vld [vmem:[%s3761_s17 + $0x40] sm:$0xff] }
  0x5f   : > { %1355 = vmatpush1.msra.mxu1 %v826_v20  ;;  %906 = vmatpush1.msra.mxu0 %v824_v21  ;;  %v803_v42 = vld [vmem:[%s3761_s17 + $0x30] sm:$0xff]  ;;  %v801_v43 = vld [vmem:[%s3761_s17 + $0x20] sm:$0xff]  ;;  %v802_v44 = vld [vmem:[%s3761_s17 + $0x28] sm:$0xff] }
  0x60   : > { %1356 = vmatprep.subr.mxu1 %v3556_v0  ;;  %907 = vmatprep.subr.mxu0 %v822_v22  ;;  %v800_v45 = vld [vmem:[%s3761_s17 + $0x18] sm:$0xff]  ;;  %v798_v46 = vld [vmem:[%s3761_s17 + $0x8] sm:$0xff]  ;;  %v799_v47 = vld [vmem:[%s3761_s17 + $0x10] sm:$0xff] }
  0x61   : > { %1357 = vmatpush1.msra.mxu1 %v823_v23  ;;  %908 = vmatpush1.msra.mxu0 %v821_v24  ;;  %v797_v48 = vld [vmem:[%s3761_s17] sm:$0xff]  ;;  %v891_v49 = vld [vmem:[%s3761_s17 + $0x2f0] sm:$0xff]  ;;  %v892_v50 = vld [vmem:[%s3761_s17 + $0x2f8] sm:$0xff] }
  0x62   : > { %1358 = vmatprep.subr.mxu1 %v3556_v0  ;;  %909 = vmatprep.subr.mxu0 %v819_v25  ;;  %v890_v51 = vld [vmem:[%s3761_s17 + $0x2e8] sm:$0xff]  ;;  %v888_v52 = vld [vmem:[%s3761_s17 + $0x2d8] sm:$0xff]  ;;  %v889_v53 = vld [vmem:[%s3761_s17 + $0x2e0] sm:$0xff] }
  0x63   : > { %1359 = vmatpush1.msra.mxu1 %v820_v26  ;;  %910 = vmatpush1.msra.mxu0 %v818_v27  ;;  %v887_v54 = vld [vmem:[%s3761_s17 + $0x2d0] sm:$0xff]  ;;  %v885_v55 = vld [vmem:[%s3761_s17 + $0x2c0] sm:$0xff]  ;;  %v886_v56 = vld [vmem:[%s3761_s17 + $0x2c8] sm:$0xff] }
  0x64   : > { %1360 = vmatprep.subr.mxu1 %v3556_v0  ;;  %911 = vmatprep.subr.mxu0 %v816_v28  ;;  %v884_v57 = vld [vmem:[%s3761_s17 + $0x2b8] sm:$0xff]  ;;  %v882_v58 = vld [vmem:[%s3761_s17 + $0x2a8] sm:$0xff]  ;;  %v883_v59 = vld [vmem:[%s3761_s17 + $0x2b0] sm:$0xff] }
  0x65   : > { %1361 = vmatpush1.msra.mxu1 %v817_v29  ;;  %912 = vmatpush1.msra.mxu0 %v815_v30  ;;  %v881_v60 = vld [vmem:[%s3761_s17 + $0x2a0] sm:$0xff]  ;;  %v879_v61 = vld [vmem:[%s3761_s17 + $0x290] sm:$0xff]  ;;  %v880_v62 = vld [vmem:[%s3761_s17 + $0x298] sm:$0xff] }
  0x66   : > { %1362 = vmatprep.subr.mxu1 %v3556_v0  ;;  %913 = vmatprep.subr.mxu0 %v813_v31  ;;  %v878_v63 = vld [vmem:[%s3761_s17 + $0x288] sm:$0xff]  ;;  %v876_v1 = vld [vmem:[%s3761_s17 + $0x278] sm:$0xff]  ;;  %v877_v2 = vld [vmem:[%s3761_s17 + $0x280] sm:$0xff] }
  0x67   : > { %1363 = vmatpush1.msra.mxu1 %v814_v32  ;;  %914 = vmatpush1.msra.mxu0 %v812_v33  ;;  %v875_v3 = vld [vmem:[%s3761_s17 + $0x270] sm:$0xff]  ;;  %v873_v4 = vld [vmem:[%s3761_s17 + $0x260] sm:$0xff]  ;;  %v874_v5 = vld [vmem:[%s3761_s17 + $0x268] sm:$0xff] }
  0x68   : > { %1364 = vmatprep.subr.mxu1 %v3556_v0  ;;  %915 = vmatprep.subr.mxu0 %v810_v34  ;;  %v872_v6 = vld [vmem:[%s3761_s17 + $0x258] sm:$0xff]  ;;  %v870_v7 = vld [vmem:[%s3761_s17 + $0x248] sm:$0xff]  ;;  %v871_v8 = vld [vmem:[%s3761_s17 + $0x250] sm:$0xff] }
  0x69   : > { %1365 = vmatpush1.msra.mxu1 %v811_v35  ;;  %916 = vmatpush1.msra.mxu0 %v809_v36  ;;  %v869_v9 = vld [vmem:[%s3761_s17 + $0x240] sm:$0xff]  ;;  %v867_v10 = vld [vmem:[%s3761_s17 + $0x230] sm:$0xff]  ;;  %v868_v11 = vld [vmem:[%s3761_s17 + $0x238] sm:$0xff] }
  0x6a   : > { %1366 = vmatprep.subr.mxu1 %v3556_v0  ;;  %917 = vmatprep.subr.mxu0 %v807_v37  ;;  %v866_v12 = vld [vmem:[%s3761_s17 + $0x228] sm:$0xff]  ;;  %v864_v13 = vld [vmem:[%s3761_s17 + $0x218] sm:$0xff]  ;;  %v865_v14 = vld [vmem:[%s3761_s17 + $0x220] sm:$0xff] }
  0x6b   : > { %1367 = vmatpush1.msra.mxu1 %v808_v38  ;;  %918 = vmatpush1.msra.mxu0 %v806_v39  ;;  %v863_v15 = vld [vmem:[%s3761_s17 + $0x210] sm:$0xff]  ;;  %v861_v16 = vld [vmem:[%s3761_s17 + $0x200] sm:$0xff]  ;;  %v862_v17 = vld [vmem:[%s3761_s17 + $0x208] sm:$0xff] }
  0x6c   : > { %1368 = vmatprep.subr.mxu1 %v3556_v0  ;;  %919 = vmatprep.subr.mxu0 %v804_v40  ;;  %v860_v18 = vld [vmem:[%s3761_s17 + $0x1f8] sm:$0xff]  ;;  %v858_v19 = vld [vmem:[%s3761_s17 + $0x1e8] sm:$0xff]  ;;  %v859_v20 = vld [vmem:[%s3761_s17 + $0x1f0] sm:$0xff] }
  0x6d   : > { %1369 = vmatpush1.msra.mxu1 %v805_v41  ;;  %920 = vmatpush1.msra.mxu0 %v803_v42  ;;  %v857_v21 = vld [vmem:[%s3761_s17 + $0x1e0] sm:$0xff]  ;;  %v855_v22 = vld [vmem:[%s3761_s17 + $0x1d0] sm:$0xff]  ;;  %v856_v23 = vld [vmem:[%s3761_s17 + $0x1d8] sm:$0xff] }
  0x6e   : > { %1370 = vmatprep.subr.mxu1 %v3556_v0  ;;  %921 = vmatprep.subr.mxu0 %v801_v43  ;;  %v854_v24 = vld [vmem:[%s3761_s17 + $0x1c8] sm:$0xff]  ;;  %v852_v25 = vld [vmem:[%s3761_s17 + $0x1b8] sm:$0xff]  ;;  %v853_v26 = vld [vmem:[%s3761_s17 + $0x1c0] sm:$0xff] }
  0x6f   : > { %1371 = vmatpush1.msra.mxu1 %v802_v44  ;;  %922 = vmatpush1.msra.mxu0 %v800_v45  ;;  %v851_v27 = vld [vmem:[%s3761_s17 + $0x1b0] sm:$0xff]  ;;  %v849_v28 = vld [vmem:[%s3761_s17 + $0x1a0] sm:$0xff]  ;;  %v850_v29 = vld [vmem:[%s3761_s17 + $0x1a8] sm:$0xff] }
  0x70   : > { %1372 = vmatprep.subr.mxu1 %v3556_v0  ;;  %923 = vmatprep.subr.mxu0 %v798_v46  ;;  %v848_v30 = vld [vmem:[%s3761_s17 + $0x198] sm:$0xff]  ;;  %v846_v31 = vld [vmem:[%s3761_s17 + $0x188] sm:$0xff]  ;;  %v845_v33 = vld [vmem:[%s3761_s17 + $0x180] sm:$0xff] }
  0x71   : > { %1373 = vmatpush1.msra.mxu1 %v799_v47  ;;  %924 = vmatpush1.msra.mxu0 %v797_v48  ;;  %v670_v32 = vld [vmem:[%s3754_s1 + $0x8] sm:$0xff]  ;;  %v847_v34 = vld [vmem:[%s3761_s17 + $0x190] sm:$0xff]  ;;  %v669_v35 = vld [vmem:[%s3754_s1] sm:$0xff] }
  0x72   : > { %1374 = vmatprep.subr.mxu1 %v3556_v0  ;;  %925 = vmatprep.subr.mxu0 %v891_v49  ;;  %v672_v36 = vld [vmem:[%s3754_s1 + $0x18] sm:$0xff]  ;;  %v671_v37 = vld [vmem:[%s3754_s1 + $0x10] sm:$0xff]  ;;  %v674_v38 = vld [vmem:[%s3754_s1 + $0x28] sm:$0xff] }
  0x73   : > { %1375 = vmatpush2.msra.mxu1 %v892_v50  ;;  %926 = vmatpush2.msra.mxu0 %v890_v51  ;;  %v676_v39 = vld [vmem:[%s3754_s1 + $0x38] sm:$0xff]  ;;  %v675_v40 = vld [vmem:[%s3754_s1 + $0x30] sm:$0xff]  ;;  %v678_v41 = vld [vmem:[%s3754_s1 + $0x48] sm:$0xff] }
  0x74   : > { %1376 = vmatprep.subr.mxu1 %v3556_v0  ;;  %927 = vmatprep.subr.mxu0 %v888_v52  ;;  %v677_v42 = vld [vmem:[%s3754_s1 + $0x40] sm:$0xff]  ;;  %v680_v43 = vld [vmem:[%s3754_s1 + $0x58] sm:$0xff]  ;;  %v679_v44 = vld [vmem:[%s3754_s1 + $0x50] sm:$0xff] }
  0x75   : > { %1377 = vmatpush2.msra.mxu1 %v889_v53  ;;  %928 = vmatpush2.msra.mxu0 %v887_v54  ;;  %v682_v45 = vld [vmem:[%s3754_s1 + $0x68] sm:$0xff]  ;;  %v681_v46 = vld [vmem:[%s3754_s1 + $0x60] sm:$0xff]  ;;  %v684_v47 = vld [vmem:[%s3754_s1 + $0x78] sm:$0xff] }
  0x76   : > { %1378 = vmatprep.subr.mxu1 %v3556_v0  ;;  %929 = vmatprep.subr.mxu0 %v885_v55  ;;  %v683_v48 = vld [vmem:[%s3754_s1 + $0x70] sm:$0xff]  ;;  %v686_v49 = vld [vmem:[%s3754_s1 + $0x88] sm:$0xff]  ;;  %v685_v50 = vld [vmem:[%s3754_s1 + $0x80] sm:$0xff] }
  0x77   : > { %1379 = vmatpush2.msra.mxu1 %v886_v56  ;;  %930 = vmatpush2.msra.mxu0 %v884_v57  ;;  %v688_v51 = vld [vmem:[%s3754_s1 + $0x98] sm:$0xff]  ;;  %v687_v52 = vld [vmem:[%s3754_s1 + $0x90] sm:$0xff]  ;;  %v690_v53 = vld [vmem:[%s3754_s1 + $0xa8] sm:$0xff] }
  0x78   : > { %1380 = vmatprep.subr.mxu1 %v3556_v0  ;;  %931 = vmatprep.subr.mxu0 %v882_v58  ;;  %v689_v54 = vld [vmem:[%s3754_s1 + $0xa0] sm:$0xff]  ;;  %v692_v55 = vld [vmem:[%s3754_s1 + $0xb8] sm:$0xff]  ;;  %v691_v56 = vld [vmem:[%s3754_s1 + $0xb0] sm:$0xff] }
  0x79   : > { %1381 = vmatpush2.msra.mxu1 %v883_v59  ;;  %932 = vmatpush2.msra.mxu0 %v881_v60  ;;  %v694_v57 = vld [vmem:[%s3754_s1 + $0xc8] sm:$0xff]  ;;  %v693_v58 = vld [vmem:[%s3754_s1 + $0xc0] sm:$0xff]  ;;  %v696_v59 = vld [vmem:[%s3754_s1 + $0xd8] sm:$0xff] }
  0x7a   : > { %1382 = vmatprep.subr.mxu1 %v3556_v0  ;;  %933 = vmatprep.subr.mxu0 %v879_v61  ;;  %v695_v60 = vld [vmem:[%s3754_s1 + $0xd0] sm:$0xff]  ;;  %v698_v61 = vld [vmem:[%s3754_s1 + $0xe8] sm:$0xff] }
  0x7b   : > { %1383 = vmatpush2.msra.mxu1 %v880_v62  ;;  %934 = vmatpush2.msra.mxu0 %v878_v63  ;;  %v697_v62 = vld [vmem:[%s3754_s1 + $0xe0] sm:$0xff]  ;;  %v700_v63 = vld [vmem:[%s3754_s1 + $0xf8] sm:$0xff] }
  0x7c   : > { %1384 = vmatprep.subr.mxu1 %v3556_v0  ;;  %935 = vmatprep.subr.mxu0 %v876_v1  ;;  %v699_v1 = vld [vmem:[%s3754_s1 + $0xf0] sm:$0xff] }
  0x7d   : > { %1385 = vmatpush2.msra.mxu1 %v877_v2  ;;  %936 = vmatpush2.msra.mxu0 %v875_v3  ;;  %v702_v2 = vld [vmem:[%s3754_s1 + $0x108] sm:$0xff]  ;;  %v701_v3 = vld [vmem:[%s3754_s1 + $0x100] sm:$0xff] }
  0x7e   : > { %1386 = vmatprep.subr.mxu1 %v3556_v0  ;;  %937 = vmatprep.subr.mxu0 %v873_v4  ;;  %v704_v4 = vld [vmem:[%s3754_s1 + $0x118] sm:$0xff] }
  0x7f   : > { %1387 = vmatpush2.msra.mxu1 %v874_v5  ;;  %938 = vmatpush2.msra.mxu0 %v872_v6  ;;  %v703_v5 = vld [vmem:[%s3754_s1 + $0x110] sm:$0xff]  ;;  %v706_v6 = vld [vmem:[%s3754_s1 + $0x128] sm:$0xff] }
  0x80   : > { %1388 = vmatprep.subr.mxu1 %v3556_v0  ;;  %939 = vmatprep.subr.mxu0 %v870_v7  ;;  %v705_v7 = vld [vmem:[%s3754_s1 + $0x120] sm:$0xff] }
  0x81   : > { %1389 = vmatpush2.msra.mxu1 %v871_v8  ;;  %940 = vmatpush2.msra.mxu0 %v869_v9  ;;  %v708_v8 = vld [vmem:[%s3754_s1 + $0x138] sm:$0xff]  ;;  %v707_v9 = vld [vmem:[%s3754_s1 + $0x130] sm:$0xff] }
  0x82   : > { %1390 = vmatprep.subr.mxu1 %v3556_v0  ;;  %941 = vmatprep.subr.mxu0 %v867_v10  ;;  %v710_v10 = vld [vmem:[%s3754_s1 + $0x148] sm:$0xff] }
  0x83   : > { %1391 = vmatpush2.msra.mxu1 %v868_v11  ;;  %942 = vmatpush2.msra.mxu0 %v866_v12  ;;  %v709_v11 = vld [vmem:[%s3754_s1 + $0x140] sm:$0xff]  ;;  %v712_v12 = vld [vmem:[%s3754_s1 + $0x158] sm:$0xff] }
  0x84   : > { %1392 = vmatprep.subr.mxu1 %v3556_v0  ;;  %943 = vmatprep.subr.mxu0 %v864_v13  ;;  %v711_v13 = vld [vmem:[%s3754_s1 + $0x150] sm:$0xff] }
  0x85   : > { %1393 = vmatpush2.msra.mxu1 %v865_v14  ;;  %944 = vmatpush2.msra.mxu0 %v863_v15  ;;  %v714_v14 = vld [vmem:[%s3754_s1 + $0x168] sm:$0xff]  ;;  %v713_v15 = vld [vmem:[%s3754_s1 + $0x160] sm:$0xff] }
  0x86   : > { %1394 = vmatprep.subr.mxu1 %v3556_v0  ;;  %945 = vmatprep.subr.mxu0 %v861_v16  ;;  %v716_v16 = vld [vmem:[%s3754_s1 + $0x178] sm:$0xff] }
  0x87   : > { %1395 = vmatpush2.msra.mxu1 %v862_v17  ;;  %946 = vmatpush2.msra.mxu0 %v860_v18  ;;  %v715_v17 = vld [vmem:[%s3754_s1 + $0x170] sm:$0xff]  ;;  %v718_v18 = vld [vmem:[%s3754_s1 + $0x188] sm:$0xff] }
  0x88   : > { %1396 = vmatprep.subr.mxu1 %v3556_v0  ;;  %947 = vmatprep.subr.mxu0 %v858_v19  ;;  %v717_v19 = vld [vmem:[%s3754_s1 + $0x180] sm:$0xff] }
  0x89   : > { %1397 = vmatpush2.msra.mxu1 %v859_v20  ;;  %948 = vmatpush2.msra.mxu0 %v857_v21  ;;  %v720_v20 = vld [vmem:[%s3754_s1 + $0x198] sm:$0xff]  ;;  %v719_v21 = vld [vmem:[%s3754_s1 + $0x190] sm:$0xff] }
  0x8a   : > { %1398 = vmatprep.subr.mxu1 %v3556_v0  ;;  %949 = vmatprep.subr.mxu0 %v855_v22  ;;  %v722_v22 = vld [vmem:[%s3754_s1 + $0x1a8] sm:$0xff] }
  0x8b   : > { %1399 = vmatpush2.msra.mxu1 %v856_v23  ;;  %950 = vmatpush2.msra.mxu0 %v854_v24  ;;  %v721_v23 = vld [vmem:[%s3754_s1 + $0x1a0] sm:$0xff]  ;;  %v724_v24 = vld [vmem:[%s3754_s1 + $0x1b8] sm:$0xff] }
  0x8c   : > { %1400 = vmatprep.subr.mxu1 %v3556_v0  ;;  %951 = vmatprep.subr.mxu0 %v852_v25  ;;  %v723_v25 = vld [vmem:[%s3754_s1 + $0x1b0] sm:$0xff] }
  0x8d   : > { %1401 = vmatpush2.msra.mxu1 %v853_v26  ;;  %952 = vmatpush2.msra.mxu0 %v851_v27  ;;  %v726_v26 = vld [vmem:[%s3754_s1 + $0x1c8] sm:$0xff]  ;;  %v725_v27 = vld [vmem:[%s3754_s1 + $0x1c0] sm:$0xff] }
  0x8e   : > { %1402 = vmatprep.subr.mxu1 %v3556_v0  ;;  %953 = vmatprep.subr.mxu0 %v849_v28  ;;  %v728_v28 = vld [vmem:[%s3754_s1 + $0x1d8] sm:$0xff] }
  0x8f   : > { %1403 = vmatpush2.msra.mxu1 %v850_v29  ;;  %954 = vmatpush2.msra.mxu0 %v848_v30  ;;  %v727_v29 = vld [vmem:[%s3754_s1 + $0x1d0] sm:$0xff]  ;;  %v730_v30 = vld [vmem:[%s3754_s1 + $0x1e8] sm:$0xff] }
  0x90   : > { %1404 = vmatprep.subr.mxu1 %v3556_v0  ;;  %955 = vmatprep.subr.mxu0 %v846_v31  ;;  %v673_v0 = vld [vmem:[%s3754_s1 + $0x20] sm:$0xff] }
  0x91   : > { %957 = vmatprep.mubr.f32.mxu0 %v670_v32  ;;  %956 = vmatpush2.msra.mxu0 %v845_v33  ;;  %v729_v31 = vld [vmem:[%s3754_s1 + $0x1e0] sm:$0xff]  ;;  %v731_v33 = vld [vmem:[%s3754_s1 + $0x1f0] sm:$0xff] }
  0x92   : > { %1405 = vmatpush2.msra.mxu1 %v847_v34  ;;  %1406 = vmatprep.mubr.f32.mxu1 %v670_v32  ;;  %v732_v32 = vld [vmem:[%s3754_s1 + $0x1f8] sm:$0xff]  ;;  %v734_v34 = vld [vmem:[%s3754_s1 + $0x208] sm:$0xff] }
  0x93   : > { %958 = vmatmul.mubr.f32.vlgmr.msra.gmra.mxu0 %v669_v35  ;;  %1407 = vmatmul.mubr.f32.vlgmr.msra.gmra.mxu1 %v669_v35  ;;  %v733_v35 = vld [vmem:[%s3754_s1 + $0x200] sm:$0xff] }
  0x94   : > { %963 = vmatprep.mubr.f32.mxu0 %v672_v36  ;;  %1411 = vmatprep.mubr.f32.mxu1 %v672_v36  ;;  %v736_v36 = vld [vmem:[%s3754_s1 + $0x218] sm:$0xff] }
  0x97   : > { %964 = vmatmul.mubr.f32.gmra.mxu0 %v671_v37  ;;  %1412 = vmatmul.mubr.f32.gmra.mxu1 %v671_v37  ;;  %v735_v37 = vld [vmem:[%s3754_s1 + $0x210] sm:$0xff] }
  0x98   : > { %969 = vmatprep.mubr.f32.mxu0 %v674_v38  ;;  %1416 = vmatprep.mubr.f32.mxu1 %v674_v38  ;;  %v738_v38 = vld [vmem:[%s3754_s1 + $0x228] sm:$0xff] }
  0x9b   : > { %970 = vmatmul.mubr.f32.gmra.mxu0 %v673_v0  ;;  %1417 = vmatmul.mubr.f32.gmra.mxu1 %v673_v0  ;;  %v737_v0 = vld [vmem:[%s3754_s1 + $0x220] sm:$0xff] }
  0x9c   : > { %975 = vmatprep.mubr.f32.mxu0 %v676_v39  ;;  %1421 = vmatprep.mubr.f32.mxu1 %v676_v39  ;;  %v740_v39 = vld [vmem:[%s3754_s1 + $0x238] sm:$0xff] }
  0x9f   : > { %976 = vmatmul.mubr.f32.gmra.mxu0 %v675_v40  ;;  %1422 = vmatmul.mubr.f32.gmra.mxu1 %v675_v40  ;;  %v739_v40 = vld [vmem:[%s3754_s1 + $0x230] sm:$0xff] }
  0xa0   : > { %981 = vmatprep.mubr.f32.mxu0 %v678_v41  ;;  %1426 = vmatprep.mubr.f32.mxu1 %v678_v41  ;;  %v742_v41 = vld [vmem:[%s3754_s1 + $0x248] sm:$0xff] }
  0xa3   : > { %982 = vmatmul.mubr.f32.gmra.mxu0 %v677_v42  ;;  %1427 = vmatmul.mubr.f32.gmra.mxu1 %v677_v42  ;;  %v741_v42 = vld [vmem:[%s3754_s1 + $0x240] sm:$0xff] }
  0xa4   : > { %987 = vmatprep.mubr.f32.mxu0 %v680_v43  ;;  %1431 = vmatprep.mubr.f32.mxu1 %v680_v43  ;;  %v744_v43 = vld [vmem:[%s3754_s1 + $0x258] sm:$0xff] }
  0xa7   : > { %988 = vmatmul.mubr.f32.gmra.mxu0 %v679_v44  ;;  %1432 = vmatmul.mubr.f32.gmra.mxu1 %v679_v44  ;;  %v743_v44 = vld [vmem:[%s3754_s1 + $0x250] sm:$0xff] }
  0xa8   : > { %993 = vmatprep.mubr.f32.mxu0 %v682_v45  ;;  %1436 = vmatprep.mubr.f32.mxu1 %v682_v45  ;;  %v746_v45 = vld [vmem:[%s3754_s1 + $0x268] sm:$0xff] }
  0xab   : > { %994 = vmatmul.mubr.f32.gmra.mxu0 %v681_v46  ;;  %1437 = vmatmul.mubr.f32.gmra.mxu1 %v681_v46  ;;  %v745_v46 = vld [vmem:[%s3754_s1 + $0x260] sm:$0xff] }
  0xac   : > { %999 = vmatprep.mubr.f32.mxu0 %v684_v47  ;;  %1441 = vmatprep.mubr.f32.mxu1 %v684_v47  ;;  %v748_v47 = vld [vmem:[%s3754_s1 + $0x278] sm:$0xff] }
  0xaf   : > { %1000 = vmatmul.mubr.f32.gmra.mxu0 %v683_v48  ;;  %1442 = vmatmul.mubr.f32.gmra.mxu1 %v683_v48  ;;  %v747_v48 = vld [vmem:[%s3754_s1 + $0x270] sm:$0xff] }
  0xb0   : > { %1005 = vmatprep.mubr.f32.mxu0 %v686_v49  ;;  %1446 = vmatprep.mubr.f32.mxu1 %v686_v49  ;;  %v750_v49 = vld [vmem:[%s3754_s1 + $0x288] sm:$0xff] }
  0xb3   : > { %1006 = vmatmul.mubr.f32.gmra.mxu0 %v685_v50  ;;  %1447 = vmatmul.mubr.f32.gmra.mxu1 %v685_v50  ;;  %v749_v50 = vld [vmem:[%s3754_s1 + $0x280] sm:$0xff] }
  0xb4   : > { %1011 = vmatprep.mubr.f32.mxu0 %v688_v51  ;;  %1451 = vmatprep.mubr.f32.mxu1 %v688_v51  ;;  %v752_v51 = vld [vmem:[%s3754_s1 + $0x298] sm:$0xff] }
  0xb7   : > { %1012 = vmatmul.mubr.f32.gmra.mxu0 %v687_v52  ;;  %1452 = vmatmul.mubr.f32.gmra.mxu1 %v687_v52  ;;  %v751_v52 = vld [vmem:[%s3754_s1 + $0x290] sm:$0xff] }
  0xb8   : > { %1017 = vmatprep.mubr.f32.mxu0 %v690_v53  ;;  %1456 = vmatprep.mubr.f32.mxu1 %v690_v53  ;;  %v754_v53 = vld [vmem:[%s3754_s1 + $0x2a8] sm:$0xff] }
  0xbb   : > { %1018 = vmatmul.mubr.f32.gmra.mxu0 %v689_v54  ;;  %1457 = vmatmul.mubr.f32.gmra.mxu1 %v689_v54  ;;  %v753_v54 = vld [vmem:[%s3754_s1 + $0x2a0] sm:$0xff] }
  0xbc   : > { %1023 = vmatprep.mubr.f32.mxu0 %v692_v55  ;;  %1461 = vmatprep.mubr.f32.mxu1 %v692_v55  ;;  %v756_v55 = vld [vmem:[%s3754_s1 + $0x2b8] sm:$0xff] }
  0xbf   : > { %1024 = vmatmul.mubr.f32.gmra.mxu0 %v691_v56  ;;  %1462 = vmatmul.mubr.f32.gmra.mxu1 %v691_v56  ;;  %v755_v56 = vld [vmem:[%s3754_s1 + $0x2b0] sm:$0xff] }
  0xc0   : > { %1029 = vmatprep.mubr.f32.mxu0 %v694_v57  ;;  %1466 = vmatprep.mubr.f32.mxu1 %v694_v57  ;;  %v758_v57 = vld [vmem:[%s3754_s1 + $0x2c8] sm:$0xff] }
  0xc3   : > { %1030 = vmatmul.mubr.f32.gmra.mxu0 %v693_v58  ;;  %1467 = vmatmul.mubr.f32.gmra.mxu1 %v693_v58  ;;  %v757_v58 = vld [vmem:[%s3754_s1 + $0x2c0] sm:$0xff] }
  0xc4   : > { %1035 = vmatprep.mubr.f32.mxu0 %v696_v59  ;;  %1471 = vmatprep.mubr.f32.mxu1 %v696_v59  ;;  %v760_v59 = vld [vmem:[%s3754_s1 + $0x2d8] sm:$0xff] }
  0xc7   : > { %1036 = vmatmul.mubr.f32.gmra.mxu0 %v695_v60  ;;  %1472 = vmatmul.mubr.f32.gmra.mxu1 %v695_v60  ;;  %v759_v60 = vld [vmem:[%s3754_s1 + $0x2d0] sm:$0xff] }
  0xc8   : > { %1041 = vmatprep.mubr.f32.mxu0 %v698_v61  ;;  %1476 = vmatprep.mubr.f32.mxu1 %v698_v61  ;;  %v2308_v61 = vlaneseq }
  0xcb   : > { %1042 = vmatmul.mubr.f32.gmra.mxu0 %v697_v62  ;;  %1477 = vmatmul.mubr.f32.gmra.mxu1 %v697_v62  ;;  %v762_v62 = vld [vmem:[%s3754_s1 + $0x2e8] sm:$0xff] }
  0xcc   : > { %1047 = vmatprep.mubr.f32.mxu0 %v700_v63  ;;  %1481 = vmatprep.mubr.f32.mxu1 %v700_v63  ;;  %v761_v63 = vld [vmem:[%s3754_s1 + $0x2e0] sm:$0xff] }
  0xcf   : > { %1048 = vmatmul.mubr.f32.gmra.mxu0 %v699_v1  ;;  %1482 = vmatmul.mubr.f32.gmra.mxu1 %v699_v1  ;;  %v2309_v1 = vshrl.u32 %v2308_v61, 7  ;;  %v777_v61 = vld [vmem:[%s3754_s1 + $0x360] sm:$0xff] }
  0xd0   : > { %1053 = vmatprep.mubr.f32.mxu0 %v702_v2  ;;  %1486 = vmatprep.mubr.f32.mxu1 %v702_v2  ;;  %v764_v2 = vld [vmem:[%s3754_s1 + $0x2f8] sm:$0xff] }
  0xd3   : > { %1054 = vmatmul.mubr.f32.gmra.mxu0 %v701_v3  ;;  %1487 = vmatmul.mubr.f32.gmra.mxu1 %v701_v3  ;;  %v763_v3 = vld [vmem:[%s3754_s1 + $0x2f0] sm:$0xff] }
  0xd4   : > { %1059 = vmatprep.mubr.f32.mxu0 %v704_v4  ;;  %1491 = vmatprep.mubr.f32.mxu1 %v704_v4  ;;  %v2310_v4 = vsub.s32 0, %v2309_v1 }
  0xd7   : > { %1060 = vmatmul.mubr.f32.gmra.mxu0 %v703_v5  ;;  %1492 = vmatmul.mubr.f32.gmra.mxu1 %v703_v5  ;;  %v766_v5 = vld [vmem:[%s3754_s1 + $0x308] sm:$0xff] }
  0xd8   : > { %1065 = vmatprep.mubr.f32.mxu0 %v706_v6  ;;  %1496 = vmatprep.mubr.f32.mxu1 %v706_v6  ;;  %v2306_v6 = vld [vmem:[%s277_s25] sm:$0x7] }
  0xdb   : > { %1066 = vmatmul.mubr.f32.gmra.mxu0 %v705_v7  ;;  %1497 = vmatmul.mubr.f32.gmra.mxu1 %v705_v7  ;;  %v2318_v7 = vsub.s32 2, %v2309_v1 }
  0xdc   : > { %1071 = vmatprep.mubr.f32.mxu0 %v708_v8  ;;  %1501 = vmatprep.mubr.f32.mxu1 %v708_v8  ;;  %v2314_v8 = vsub.s32 1, %v2309_v1  ;;  %v780_v1 = vld [vmem:[%s3754_s1 + $0x378] sm:$0xff] }
  0xdf   : > { %1072 = vmatmul.mubr.f32.gmra.mxu0 %v707_v9  ;;  %1502 = vmatmul.mubr.f32.gmra.mxu1 %v707_v9  ;;  %v4001_v9 = vrot.slane %v2306_v6, %v2310_v4 }
  0xe0   : > { %1077 = vmatprep.mubr.f32.mxu0 %v710_v10  ;;  %1506 = vmatprep.mubr.f32.mxu1 %v710_v10  ;;  %v765_v10 = vld [vmem:[%s3754_s1 + $0x300] sm:$0xff] }
  0xe3   : > { %1078 = vmatmul.mubr.f32.gmra.mxu0 %v709_v11  ;;  %1507 = vmatmul.mubr.f32.gmra.mxu1 %v709_v11  ;;  %v4004_v11 = vrot.slane %v2306_v6, %v2318_v7  ;;  %v779_v7 = vld [vmem:[%s3754_s1 + $0x370] sm:$0xff] }
  0xe4   : > { %1083 = vmatprep.mubr.f32.mxu0 %v712_v12  ;;  %1511 = vmatprep.mubr.f32.mxu1 %v712_v12  ;;  %v768_v12 = vld [vmem:[%s3754_s1 + $0x318] sm:$0xff] }
  0xe7   : > { %1084 = vmatmul.mubr.f32.gmra.mxu0 %v711_v13  ;;  %1512 = vmatmul.mubr.f32.gmra.mxu1 %v711_v13  ;;  %v4007_v13 = vrot.slane %v2306_v6, %v2314_v8 }
  0xe8   : > { %1089 = vmatprep.mubr.f32.mxu0 %v714_v14  ;;  %1516 = vmatprep.mubr.f32.mxu1 %v714_v14 }
  0xeb   : > { %1090 = vmatmul.mubr.f32.gmra.mxu0 %v713_v15  ;;  %1517 = vmatmul.mubr.f32.gmra.mxu1 %v713_v15 }
  0xec   : > { %1095 = vmatprep.mubr.f32.mxu0 %v716_v16  ;;  %1521 = vmatprep.mubr.f32.mxu1 %v716_v16 }
  0xef   : > { %1096 = vmatmul.mubr.f32.gmra.mxu0 %v715_v17  ;;  %1522 = vmatmul.mubr.f32.gmra.mxu1 %v715_v17  ;;  %v767_v17 = vld [vmem:[%s3754_s1 + $0x310] sm:$0xff] }
  0xf0   : > { %1101 = vmatprep.mubr.f32.mxu0 %v718_v18  ;;  %1526 = vmatprep.mubr.f32.mxu1 %v718_v18 }
  0xf3   : > { %1102 = vmatmul.mubr.f32.gmra.mxu0 %v717_v19  ;;  %1527 = vmatmul.mubr.f32.gmra.mxu1 %v717_v19 }
  0xf4   : > { %1107 = vmatprep.mubr.f32.mxu0 %v720_v20  ;;  %1531 = vmatprep.mubr.f32.mxu1 %v720_v20  ;;  %v770_v20 = vld [vmem:[%s3754_s1 + $0x328] sm:$0xff] }
  0xf7   : > { %1108 = vmatmul.mubr.f32.gmra.mxu0 %v719_v21  ;;  %1532 = vmatmul.mubr.f32.gmra.mxu1 %v719_v21 }
  0xf8   : > { %1113 = vmatprep.mubr.f32.mxu0 %v722_v22  ;;  %1536 = vmatprep.mubr.f32.mxu1 %v722_v22 }
  0xfb   : > { %1114 = vmatmul.mubr.f32.gmra.mxu0 %v721_v23  ;;  %1537 = vmatmul.mubr.f32.gmra.mxu1 %v721_v23 }
  0xfc   : > { %1119 = vmatprep.mubr.f32.mxu0 %v724_v24  ;;  %1541 = vmatprep.mubr.f32.mxu1 %v724_v24 }
  0xff   : > { %1120 = vmatmul.mubr.f32.gmra.mxu0 %v723_v25  ;;  %1542 = vmatmul.mubr.f32.gmra.mxu1 %v723_v25 }
 0x100   : > { %1125 = vmatprep.mubr.f32.mxu0 %v726_v26  ;;  %1546 = vmatprep.mubr.f32.mxu1 %v726_v26  ;;  %v769_v26 = vld [vmem:[%s3754_s1 + $0x320] sm:$0xff] }
 0x103   : > { %1126 = vmatmul.mubr.f32.gmra.mxu0 %v725_v27  ;;  %1547 = vmatmul.mubr.f32.gmra.mxu1 %v725_v27 }
 0x104   : > { %1131 = vmatprep.mubr.f32.mxu0 %v728_v28  ;;  %1551 = vmatprep.mubr.f32.mxu1 %v728_v28 }
 0x107   : > { %1132 = vmatmul.mubr.f32.gmra.mxu0 %v727_v29  ;;  %1552 = vmatmul.mubr.f32.gmra.mxu1 %v727_v29  ;;  %v772_v29 = vld [vmem:[%s3754_s1 + $0x338] sm:$0xff] }
 0x108   : > { %1137 = vmatprep.mubr.f32.mxu0 %v730_v30  ;;  %1556 = vmatprep.mubr.f32.mxu1 %v730_v30 }
 0x10b   : > { %1138 = vmatmul.mubr.f32.gmra.mxu0 %v729_v31  ;;  %1557 = vmatmul.mubr.f32.gmra.mxu1 %v729_v31 }
 0x10c   : > { %1143 = vmatprep.mubr.f32.mxu0 %v732_v32  ;;  %1561 = vmatprep.mubr.f32.mxu1 %v732_v32 }
 0x10f   : > { %1144 = vmatmul.mubr.f32.gmra.mxu0 %v731_v33  ;;  %1562 = vmatmul.mubr.f32.gmra.mxu1 %v731_v33 }
 0x110   : > { %1149 = vmatprep.mubr.f32.mxu0 %v734_v34  ;;  %1566 = vmatprep.mubr.f32.mxu1 %v734_v34 }
 0x113   : > { %1150 = vmatmul.mubr.f32.gmra.mxu0 %v733_v35  ;;  %1567 = vmatmul.mubr.f32.gmra.mxu1 %v733_v35  ;;  %v771_v35 = vld [vmem:[%s3754_s1 + $0x330] sm:$0xff] }
 0x114   : > { %1155 = vmatprep.mubr.f32.mxu0 %v736_v36  ;;  %1571 = vmatprep.mubr.f32.mxu1 %v736_v36 }
 0x117   : > { %1156 = vmatmul.mubr.f32.gmra.mxu0 %v735_v37  ;;  %1572 = vmatmul.mubr.f32.gmra.mxu1 %v735_v37 }
 0x118   : > { %1161 = vmatprep.mubr.f32.mxu0 %v738_v38  ;;  %1576 = vmatprep.mubr.f32.mxu1 %v738_v38  ;;  %v774_v38 = vld [vmem:[%s3754_s1 + $0x348] sm:$0xff] }
 0x11b   : > { %1162 = vmatmul.mubr.f32.gmra.mxu0 %v737_v0  ;;  %1577 = vmatmul.mubr.f32.gmra.mxu1 %v737_v0 }
 0x11c   : > { %1167 = vmatprep.mubr.f32.mxu0 %v740_v39  ;;  %1581 = vmatprep.mubr.f32.mxu1 %v740_v39 }
 0x11f   : > { %1168 = vmatmul.mubr.f32.gmra.mxu0 %v739_v40  ;;  %1582 = vmatmul.mubr.f32.gmra.mxu1 %v739_v40 }
 0x120   : > { %1173 = vmatprep.mubr.f32.mxu0 %v742_v41  ;;  %1586 = vmatprep.mubr.f32.mxu1 %v742_v41 }
 0x123   : > { %1174 = vmatmul.mubr.f32.gmra.mxu0 %v741_v42  ;;  %1587 = vmatmul.mubr.f32.gmra.mxu1 %v741_v42 }
 0x124   : > { %1179 = vmatprep.mubr.f32.mxu0 %v744_v43  ;;  %1591 = vmatprep.mubr.f32.mxu1 %v744_v43  ;;  %v773_v43 = vld [vmem:[%s3754_s1 + $0x340] sm:$0xff] }
 0x127   : > { %1180 = vmatmul.mubr.f32.gmra.mxu0 %v743_v44  ;;  %1592 = vmatmul.mubr.f32.gmra.mxu1 %v743_v44 }
 0x128   : > { %1185 = vmatprep.mubr.f32.mxu0 %v746_v45  ;;  %1596 = vmatprep.mubr.f32.mxu1 %v746_v45 }
 0x12b   : > { %1186 = vmatmul.mubr.f32.gmra.mxu0 %v745_v46  ;;  %1597 = vmatmul.mubr.f32.gmra.mxu1 %v745_v46  ;;  %v776_v46 = vld [vmem:[%s3754_s1 + $0x358] sm:$0xff] }
 0x12c   : > { %1191 = vmatprep.mubr.f32.mxu0 %v748_v47  ;;  %1601 = vmatprep.mubr.f32.mxu1 %v748_v47 }
 0x12f   : > { %1192 = vmatmul.mubr.f32.gmra.mxu0 %v747_v48  ;;  %1602 = vmatmul.mubr.f32.gmra.mxu1 %v747_v48 }
 0x130   : > { %1197 = vmatprep.mubr.f32.mxu0 %v750_v49  ;;  %1606 = vmatprep.mubr.f32.mxu1 %v750_v49 }
 0x133   : > { %1198 = vmatmul.mubr.f32.gmra.mxu0 %v749_v50  ;;  %1607 = vmatmul.mubr.f32.gmra.mxu1 %v749_v50 }
 0x134   : > { %1203 = vmatprep.mubr.f32.mxu0 %v752_v51  ;;  %1611 = vmatprep.mubr.f32.mxu1 %v752_v51 }
 0x137   : > { %1204 = vmatmul.mubr.f32.gmra.mxu0 %v751_v52  ;;  %1612 = vmatmul.mubr.f32.gmra.mxu1 %v751_v52  ;;  %v775_v52 = vld [vmem:[%s3754_s1 + $0x350] sm:$0xff] }
 0x138   : > { %1209 = vmatprep.mubr.f32.mxu0 %v754_v53  ;;  %1616 = vmatprep.mubr.f32.mxu1 %v754_v53 }
 0x13b   : > { %1210 = vmatmul.mubr.f32.gmra.mxu0 %v753_v54  ;;  %1617 = vmatmul.mubr.f32.gmra.mxu1 %v753_v54 }
 0x13c   : > { %1215 = vmatprep.mubr.f32.mxu0 %v756_v55  ;;  %1621 = vmatprep.mubr.f32.mxu1 %v756_v55  ;;  %v778_v55 = vld [vmem:[%s3754_s1 + $0x368] sm:$0xff] }
 0x13f   : > { %1216 = vmatmul.mubr.f32.gmra.mxu0 %v755_v56  ;;  %1622 = vmatmul.mubr.f32.gmra.mxu1 %v755_v56 }
 0x140   : > { %1221 = vmatprep.mubr.f32.mxu0 %v758_v57  ;;  %1626 = vmatprep.mubr.f32.mxu1 %v758_v57 }
 0x143   : > { %1222 = vmatmul.mubr.f32.gmra.mxu0 %v757_v58  ;;  %1627 = vmatmul.mubr.f32.gmra.mxu1 %v757_v58 }
 0x144   : > { %1227 = vmatprep.mubr.f32.mxu0 %v760_v59  ;;  %1631 = vmatprep.mubr.f32.mxu1 %v760_v59 }
 0x147   : > { %1228 = vmatmul.mubr.f32.gmra.mxu0 %v759_v60  ;;  %1632 = vmatmul.mubr.f32.gmra.mxu1 %v759_v60 }
 0x148   : > { %1233 = vmatprep.mubr.f32.mxu0 %v762_v62  ;;  %1636 = vmatprep.mubr.f32.mxu1 %v762_v62 }
 0x14b   : > { %1234 = vmatmul.mubr.f32.gmra.mxu0 %v761_v63  ;;  %1637 = vmatmul.mubr.f32.gmra.mxu1 %v761_v63 }
 0x14c   : > { %1239 = vmatprep.mubr.f32.mxu0 %v764_v2  ;;  %1641 = vmatprep.mubr.f32.mxu1 %v764_v2 }
 0x14f   : > { %1240 = vmatmul.mubr.f32.gmra.mxu0 %v763_v3  ;;  %1642 = vmatmul.mubr.f32.gmra.mxu1 %v763_v3 }
 0x150   : > { %1245 = vmatprep.mubr.f32.mxu0 %v766_v5  ;;  %1646 = vmatprep.mubr.f32.mxu1 %v766_v5 }
 0x153   : > { %v959_v14 = vpop.f32.mrf.mxu0  ;;  %1246 = vmatmul.mubr.f32.gmra.mxu0 %v765_v10  ;;  %v1408_v16 = vpop.f32.mrf.mxu1  ;;  %1647 = vmatmul.mubr.f32.gmra.mxu1 %v765_v10 }
 0x154   : > { %v2323_v15 = vadd.f32 %v4001_v9, %v959_v14  ;;  %1251 = vmatprep.mubr.f32.mxu0 %v768_v12  ;;  %v2325_v18 = vadd.f32 %v4004_v11, %v1408_v16  ;;  %1651 = vmatprep.mubr.f32.mxu1 %v768_v12  ;;  %v782_v12 = vld [vmem:[%s3754_s1 + $0x388] sm:$0xff] }
 0x155   : > { %v961_v19 = vpop.f32.mrf.mxu0  ;;  %v1410_v22 = vpop.f32.mrf.mxu1 }
 0x156   : > { %2515 = vst [vmem:[%s4013_s12] sm:$0xff] %v2323_v15  ;;  %v2324_v21 = vadd.f32 %v4007_v13, %v961_v19  ;;  %2517 = vst [vmem:[%s4013_s12 + $0x10] sm:$0xff] %v2325_v18  ;;  %v781_v19 = vld [vmem:[%s3754_s1 + $0x380] sm:$0xff]  ;;  %v784_v22 = vld [vmem:[%s3754_s1 + $0x398] sm:$0xff] }
 0x157   : > { %v965_v23 = vpop.f32.mrf.mxu0  ;;  %1252 = vmatmul.mubr.f32.gmra.mxu0 %v767_v17  ;;  %v1413_v25 = vpop.f32.mrf.mxu1  ;;  %1652 = vmatmul.mubr.f32.gmra.mxu1 %v767_v17 }
 0x158   : > { %2516 = vst [vmem:[%s4013_s12 + $0x8] sm:$0xff] %v2324_v21  ;;  %v2326_v24 = vadd.f32 %v4001_v9, %v965_v23  ;;  %1257 = vmatprep.mubr.f32.mxu0 %v770_v20  ;;  %v2328_v27 = vadd.f32 %v4004_v11, %v1413_v25  ;;  %1656 = vmatprep.mubr.f32.mxu1 %v770_v20 }
 0x159   : > { %v967_v28 = vpop.f32.mrf.mxu0  ;;  %v1415_v31 = vpop.f32.mrf.mxu1 }
 0x15a   : > { %2518 = vst [vmem:[%s4013_s12 + $0x18] sm:$0xff] %v2326_v24  ;;  %v2327_v30 = vadd.f32 %v4007_v13, %v967_v28  ;;  %2520 = vst [vmem:[%s4013_s12 + $0x28] sm:$0xff] %v2328_v27  ;;  %v783_v28 = vld [vmem:[%s3754_s1 + $0x390] sm:$0xff]  ;;  %v786_v31 = vld [vmem:[%s3754_s1 + $0x3a8] sm:$0xff] }
 0x15b   : > { %v971_v32 = vpop.f32.mrf.mxu0  ;;  %1258 = vmatmul.mubr.f32.gmra.mxu0 %v769_v26  ;;  %v1418_v34 = vpop.f32.mrf.mxu1  ;;  %1657 = vmatmul.mubr.f32.gmra.mxu1 %v769_v26 }
 0x15c   : > { %2519 = vst [vmem:[%s4013_s12 + $0x20] sm:$0xff] %v2327_v30  ;;  %v2329_v33 = vadd.f32 %v4001_v9, %v971_v32  ;;  %1263 = vmatprep.mubr.f32.mxu0 %v772_v29  ;;  %v2331_v36 = vadd.f32 %v4004_v11, %v1418_v34  ;;  %1661 = vmatprep.mubr.f32.mxu1 %v772_v29 }
 0x15d   : > { %v973_v37 = vpop.f32.mrf.mxu0  ;;  %v1420_v39 = vpop.f32.mrf.mxu1 }
 0x15e   : > { %2521 = vst [vmem:[%s4013_s12 + $0x30] sm:$0xff] %v2329_v33  ;;  %v2330_v0 = vadd.f32 %v4007_v13, %v973_v37  ;;  %2523 = vst [vmem:[%s4013_s12 + $0x40] sm:$0xff] %v2331_v36  ;;  %v785_v37 = vld [vmem:[%s3754_s1 + $0x3a0] sm:$0xff]  ;;  %v788_v39 = vld [vmem:[%s3754_s1 + $0x3b8] sm:$0xff] }
 0x15f   : > { %v977_v40 = vpop.f32.mrf.mxu0  ;;  %1264 = vmatmul.mubr.f32.gmra.mxu0 %v771_v35  ;;  %v1423_v42 = vpop.f32.mrf.mxu1  ;;  %1662 = vmatmul.mubr.f32.gmra.mxu1 %v771_v35 }
 0x160   : > { %2522 = vst [vmem:[%s4013_s12 + $0x38] sm:$0xff] %v2330_v0  ;;  %v2332_v41 = vadd.f32 %v4001_v9, %v977_v40  ;;  %1269 = vmatprep.mubr.f32.mxu0 %v774_v38  ;;  %v2334_v44 = vadd.f32 %v4004_v11, %v1423_v42  ;;  %1666 = vmatprep.mubr.f32.mxu1 %v774_v38 }
 0x161   : > { %v979_v45 = vpop.f32.mrf.mxu0  ;;  %v1425_v48 = vpop.f32.mrf.mxu1 }
 0x162   : > { %2524 = vst [vmem:[%s4013_s12 + $0x48] sm:$0xff] %v2332_v41  ;;  %v2333_v47 = vadd.f32 %v4007_v13, %v979_v45  ;;  %2526 = vst [vmem:[%s4013_s12 + $0x58] sm:$0xff] %v2334_v44  ;;  %v787_v45 = vld [vmem:[%s3754_s1 + $0x3b0] sm:$0xff]  ;;  %v790_v48 = vld [vmem:[%s3754_s1 + $0x3c8] sm:$0xff] }
 0x163   : > { %v983_v49 = vpop.f32.mrf.mxu0  ;;  %1270 = vmatmul.mubr.f32.gmra.mxu0 %v773_v43  ;;  %v1428_v51 = vpop.f32.mrf.mxu1  ;;  %1667 = vmatmul.mubr.f32.gmra.mxu1 %v773_v43 }
 0x164   : > { %2525 = vst [vmem:[%s4013_s12 + $0x50] sm:$0xff] %v2333_v47  ;;  %v2335_v50 = vadd.f32 %v4001_v9, %v983_v49  ;;  %1275 = vmatprep.mubr.f32.mxu0 %v776_v46  ;;  %v2337_v53 = vadd.f32 %v4004_v11, %v1428_v51  ;;  %1671 = vmatprep.mubr.f32.mxu1 %v776_v46 }
 0x165   : > { %v985_v54 = vpop.f32.mrf.mxu0  ;;  %v1430_v57 = vpop.f32.mrf.mxu1 }
 0x166   : > { %2527 = vst [vmem:[%s4013_s12 + $0x60] sm:$0xff] %v2335_v50  ;;  %v2336_v56 = vadd.f32 %v4007_v13, %v985_v54  ;;  %2529 = vst [vmem:[%s4013_s12 + $0x70] sm:$0xff] %v2337_v53  ;;  %v789_v54 = vld [vmem:[%s3754_s1 + $0x3c0] sm:$0xff]  ;;  %v792_v57 = vld [vmem:[%s3754_s1 + $0x3d8] sm:$0xff] }
 0x167   : > { %v989_v58 = vpop.f32.mrf.mxu0  ;;  %1276 = vmatmul.mubr.f32.gmra.mxu0 %v775_v52  ;;  %v1433_v60 = vpop.f32.mrf.mxu1  ;;  %1672 = vmatmul.mubr.f32.gmra.mxu1 %v775_v52 }
 0x168   : > { %2528 = vst [vmem:[%s4013_s12 + $0x68] sm:$0xff] %v2336_v56  ;;  %v2338_v59 = vadd.f32 %v4001_v9, %v989_v58  ;;  %1281 = vmatprep.mubr.f32.mxu0 %v778_v55  ;;  %v2340_v62 = vadd.f32 %v4004_v11, %v1433_v60  ;;  %1676 = vmatprep.mubr.f32.mxu1 %v778_v55 }
 0x169   : > { %v991_v63 = vpop.f32.mrf.mxu0  ;;  %v1435_v3 = vpop.f32.mrf.mxu1 }
 0x16a   : > { %2530 = vst [vmem:[%s4013_s12 + $0x78] sm:$0xff] %v2338_v59  ;;  %v2339_v2 = vadd.f32 %v4007_v13, %v991_v63  ;;  %2532 = vst [vmem:[%s4013_s12 + $0x88] sm:$0xff] %v2340_v62  ;;  %v791_v63 = vld [vmem:[%s3754_s1 + $0x3d0] sm:$0xff]  ;;  %v794_v3 = vld [vmem:[%s3754_s1 + $0x3e8] sm:$0xff] }
 0x16b   : > { %v995_v4 = vpop.f32.mrf.mxu0  ;;  %1282 = vmatmul.mubr.f32.gmra.mxu0 %v777_v61  ;;  %v1438_v6 = vpop.f32.mrf.mxu1  ;;  %1677 = vmatmul.mubr.f32.gmra.mxu1 %v777_v61 }
 0x16c   : > { %2531 = vst [vmem:[%s4013_s12 + $0x80] sm:$0xff] %v2339_v2  ;;  %v2341_v5 = vadd.f32 %v4001_v9, %v995_v4  ;;  %1287 = vmatprep.mubr.f32.mxu0 %v780_v1  ;;  %v2343_v8 = vadd.f32 %v4004_v11, %v1438_v6  ;;  %1681 = vmatprep.mubr.f32.mxu1 %v780_v1 }
 0x16d   : > { %v997_v10 = vpop.f32.mrf.mxu0  ;;  %v1440_v15 = vpop.f32.mrf.mxu1 }
 0x16e   : > { %2533 = vst [vmem:[%s4013_s12 + $0x90] sm:$0xff] %v2341_v5  ;;  %v2342_v14 = vadd.f32 %v4007_v13, %v997_v10  ;;  %2535 = vst [vmem:[%s4013_s12 + $0xa0] sm:$0xff] %v2343_v8  ;;  %v793_v10 = vld [vmem:[%s3754_s1 + $0x3e0] sm:$0xff]  ;;  %v796_v15 = vld [vmem:[%s3754_s1 + $0x3f8] sm:$0xff] }
 0x16f   : > { %v1001_v16 = vpop.f32.mrf.mxu0  ;;  %1288 = vmatmul.mubr.f32.gmra.mxu0 %v779_v7  ;;  %v1443_v18 = vpop.f32.mrf.mxu1  ;;  %1682 = vmatmul.mubr.f32.gmra.mxu1 %v779_v7 }
 0x170   : > { %2534 = vst [vmem:[%s4013_s12 + $0x98] sm:$0xff] %v2342_v14  ;;  %v2344_v17 = vadd.f32 %v4001_v9, %v1001_v16  ;;  %1293 = vmatprep.mubr.f32.mxu0 %v782_v12  ;;  %v2346_v20 = vadd.f32 %v4004_v11, %v1443_v18  ;;  %1686 = vmatprep.mubr.f32.mxu1 %v782_v12 }
 0x171   : > { %v1003_v21 = vpop.f32.mrf.mxu0  ;;  %v1445_v24 = vpop.f32.mrf.mxu1 }
 0x172   : > { %2536 = vst [vmem:[%s4013_s12 + $0xa8] sm:$0xff] %v2344_v17  ;;  %v2345_v23 = vadd.f32 %v4007_v13, %v1003_v21  ;;  %2538 = vst [vmem:[%s4013_s12 + $0xb8] sm:$0xff] %v2346_v20  ;;  %v795_v21 = vld [vmem:[%s3754_s1 + $0x3f0] sm:$0xff]  ;;  %s4888_s1 = sld [smem:[#allocation10_spill]] (%p3722_p13) }
 0x173   : > { %v1007_v25 = vpop.f32.mrf.mxu0  ;;  %1294 = vmatmul.mubr.f32.gmra.mxu0 %v781_v19  ;;  %v1448_v27 = vpop.f32.mrf.mxu1  ;;  %1687 = vmatmul.mubr.f32.gmra.mxu1 %v781_v19 }
 0x174   : > { %2537 = vst [vmem:[%s4013_s12 + $0xb0] sm:$0xff] %v2345_v23  ;;  %v2347_v26 = vadd.f32 %v4001_v9, %v1007_v25  ;;  %1299 = vmatprep.mubr.f32.mxu0 %v784_v22  ;;  %v2349_v29 = vadd.f32 %v4004_v11, %v1448_v27  ;;  %1691 = vmatprep.mubr.f32.mxu1 %v784_v22 }
 0x175   : > { %v1009_v30 = vpop.f32.mrf.mxu0  ;;  %v1450_v33 = vpop.f32.mrf.mxu1 }
 0x176   : > { %2539 = vst [vmem:[%s4013_s12 + $0xc0] sm:$0xff] %v2347_v26  ;;  %v2348_v32 = vadd.f32 %v4007_v13, %v1009_v30  ;;  %2541 = vst [vmem:[%s4013_s12 + $0xd0] sm:$0xff] %v2349_v29 }
 0x177   : > { %v1013_v34 = vpop.f32.mrf.mxu0  ;;  %1300 = vmatmul.mubr.f32.gmra.mxu0 %v783_v28  ;;  %v1453_v36 = vpop.f32.mrf.mxu1  ;;  %1692 = vmatmul.mubr.f32.gmra.mxu1 %v783_v28 }
 0x178   : > { %2540 = vst [vmem:[%s4013_s12 + $0xc8] sm:$0xff] %v2348_v32  ;;  %v2350_v35 = vadd.f32 %v4001_v9, %v1013_v34  ;;  %1305 = vmatprep.mubr.f32.mxu0 %v786_v31  ;;  %v2352_v38 = vadd.f32 %v4004_v11, %v1453_v36  ;;  %1696 = vmatprep.mubr.f32.mxu1 %v786_v31  ;;  %s3258_s9 = smul.u32 (%p3722_p13), 384, %s4888_s1 }
 0x179   : > { %v1015_v0 = vpop.f32.mrf.mxu0  ;;  %v1455_v41 = vpop.f32.mrf.mxu1 }
 0x17a   : > { %2542 = vst [vmem:[%s4013_s12 + $0xd8] sm:$0xff] %v2350_v35  ;;  %v2351_v40 = vadd.f32 %v4007_v13, %v1015_v0  ;;  %2544 = vst [vmem:[%s4013_s12 + $0xe8] sm:$0xff] %v2352_v38  ;;  %s2717_s28 = sadd.s32 (%p3722_p13), %s3258_s9, %s3985_s30 }
 0x17b   : > { %v1019_v42 = vpop.f32.mrf.mxu0  ;;  %1306 = vmatmul.mubr.f32.gmra.mxu0 %v785_v37  ;;  %v1458_v44 = vpop.f32.mrf.mxu1  ;;  %1697 = vmatmul.mubr.f32.gmra.mxu1 %v785_v37  ;;  %s3249_s21 = sshll.u32 (%p3722_p13), %s2717_s28, 3 }
 0x17c   : > { %2543 = vst [vmem:[%s4013_s12 + $0xe0] sm:$0xff] %v2351_v40  ;;  %v2353_v43 = vadd.f32 %v4001_v9, %v1019_v42  ;;  %1311 = vmatprep.mubr.f32.mxu0 %v788_v39  ;;  %v2355_v46 = vadd.f32 %v4004_v11, %v1458_v44  ;;  %1701 = vmatprep.mubr.f32.mxu1 %v788_v39  ;;  %s4443_s5 = scalar_lea.vmem (%p3722_p13), %s4889_s8, %s3249_s21 }
 0x17d   : > { %v1021_v47 = vpop.f32.mrf.mxu0  ;;  %v1460_v50 = vpop.f32.mrf.mxu1 }
 0x17e   : > { %2545 = vst [vmem:[%s4013_s12 + $0xf0] sm:$0xff] %v2353_v43  ;;  %v2354_v49 = vadd.f32 %v4007_v13, %v1021_v47  ;;  %2547 = vst [vmem:[%s4013_s12 + $0x100] sm:$0xff] %v2355_v46 }
 0x17f   : > { %v1025_v51 = vpop.f32.mrf.mxu0  ;;  %1312 = vmatmul.mubr.f32.gmra.mxu0 %v787_v45  ;;  %v1463_v53 = vpop.f32.mrf.mxu1  ;;  %1702 = vmatmul.mubr.f32.gmra.mxu1 %v787_v45 }
 0x180   : > { %2546 = vst [vmem:[%s4013_s12 + $0xf8] sm:$0xff] %v2354_v49  ;;  %v2356_v52 = vadd.f32 %v4001_v9, %v1025_v51  ;;  %1317 = vmatprep.mubr.f32.mxu0 %v790_v48  ;;  %v2358_v55 = vadd.f32 %v4004_v11, %v1463_v53  ;;  %1706 = vmatprep.mubr.f32.mxu1 %v790_v48 }
 0x181   : > { %v1027_v56 = vpop.f32.mrf.mxu0  ;;  %v1465_v59 = vpop.f32.mrf.mxu1 }
 0x182   : > { %2548 = vst [vmem:[%s4013_s12 + $0x108] sm:$0xff] %v2356_v52  ;;  %v2357_v58 = vadd.f32 %v4007_v13, %v1027_v56  ;;  %2550 = vst [vmem:[%s4013_s12 + $0x118] sm:$0xff] %v2358_v55 }
 0x183   : > { %v1031_v60 = vpop.f32.mrf.mxu0  ;;  %1318 = vmatmul.mubr.f32.gmra.mxu0 %v789_v54  ;;  %v1468_v62 = vpop.f32.mrf.mxu1  ;;  %1707 = vmatmul.mubr.f32.gmra.mxu1 %v789_v54 }
 0x184   : > { %2549 = vst [vmem:[%s4013_s12 + $0x110] sm:$0xff] %v2357_v58  ;;  %v2359_v61 = vadd.f32 %v4001_v9, %v1031_v60  ;;  %1323 = vmatprep.mubr.f32.mxu0 %v792_v57  ;;  %v2361_v1 = vadd.f32 %v4004_v11, %v1468_v62  ;;  %1711 = vmatprep.mubr.f32.mxu1 %v792_v57 }
 0x185   : > { %v1033_v2 = vpop.f32.mrf.mxu0  ;;  %v1470_v5 = vpop.f32.mrf.mxu1 }
 0x186   : > { %2551 = vst [vmem:[%s4013_s12 + $0x120] sm:$0xff] %v2359_v61  ;;  %v2360_v4 = vadd.f32 %v4007_v13, %v1033_v2  ;;  %2553 = vst [vmem:[%s4013_s12 + $0x130] sm:$0xff] %v2361_v1 }
 0x187   : > { %v1037_v6 = vpop.f32.mrf.mxu0  ;;  %1324 = vmatmul.mubr.f32.gmra.mxu0 %v791_v63  ;;  %v1473_v8 = vpop.f32.mrf.mxu1  ;;  %1712 = vmatmul.mubr.f32.gmra.mxu1 %v791_v63 }
 0x188   : > { %2552 = vst [vmem:[%s4013_s12 + $0x128] sm:$0xff] %v2360_v4  ;;  %v2362_v7 = vadd.f32 %v4001_v9, %v1037_v6  ;;  %1329 = vmatprep.mubr.f32.mxu0 %v794_v3  ;;  %v2364_v12 = vadd.f32 %v4004_v11, %v1473_v8  ;;  %1716 = vmatprep.mubr.f32.mxu1 %v794_v3 }
 0x189   : > { %v1039_v14 = vpop.f32.mrf.mxu0  ;;  %v1475_v17 = vpop.f32.mrf.mxu1 }
 0x18a   : > { %2554 = vst [vmem:[%s4013_s12 + $0x138] sm:$0xff] %v2362_v7  ;;  %v2363_v16 = vadd.f32 %v4007_v13, %v1039_v14  ;;  %2556 = vst [vmem:[%s4013_s12 + $0x148] sm:$0xff] %v2364_v12 }
 0x18b   : > { %v1043_v18 = vpop.f32.mrf.mxu0  ;;  %1330 = vmatmul.mubr.f32.gmra.mxu0 %v793_v10  ;;  %v1478_v20 = vpop.f32.mrf.mxu1  ;;  %1717 = vmatmul.mubr.f32.gmra.mxu1 %v793_v10 }
 0x18c   : > { %2555 = vst [vmem:[%s4013_s12 + $0x140] sm:$0xff] %v2363_v16  ;;  %v2365_v19 = vadd.f32 %v4001_v9, %v1043_v18  ;;  %1335 = vmatprep.mubr.f32.mxu0 %v796_v15  ;;  %v2367_v22 = vadd.f32 %v4004_v11, %v1478_v20  ;;  %1721 = vmatprep.mubr.f32.mxu1 %v796_v15 }
 0x18d   : > { %v1045_v23 = vpop.f32.mrf.mxu0  ;;  %v1480_v25 = vpop.f32.mrf.mxu1 }
 0x18e   : > { %2557 = vst [vmem:[%s4013_s12 + $0x150] sm:$0xff] %v2365_v19  ;;  %v2366_v24 = vadd.f32 %v4007_v13, %v1045_v23  ;;  %2559 = vst [vmem:[%s4013_s12 + $0x160] sm:$0xff] %v2367_v22 }
 0x18f   : > { %v1049_v26 = vpop.f32.mrf.mxu0  ;;  %1336 = vmatmul.mubr.f32.gmra.mxu0 %v795_v21  ;;  %v1483_v28 = vpop.f32.mrf.mxu1  ;;  %1722 = vmatmul.mubr.f32.gmra.mxu1 %v795_v21 }
 0x190   : > { %2558 = vst [vmem:[%s4013_s12 + $0x158] sm:$0xff] %v2366_v24  ;;  %v2368_v27 = vadd.f32 %v4001_v9, %v1049_v26  ;;  %v2370_v29 = vadd.f32 %v4004_v11, %v1483_v28 }
 0x191   : > { %v1051_v30 = vpop.f32.mrf.mxu0  ;;  %v1485_v32 = vpop.f32.mrf.mxu1 }
 0x192   : > { %2560 = vst [vmem:[%s4013_s12 + $0x168] sm:$0xff] %v2368_v27  ;;  %v2369_v31 = vadd.f32 %v4007_v13, %v1051_v30  ;;  %2562 = vst [vmem:[%s4013_s12 + $0x178] sm:$0xff] %v2370_v29 }
 0x193   : > { %v1055_v33 = vpop.f32.mrf.mxu0  ;;  %v1488_v35 = vpop.f32.mrf.mxu1 }
 0x194   : > { %2561 = vst [vmem:[%s4013_s12 + $0x170] sm:$0xff] %v2369_v31  ;;  %v2371_v34 = vadd.f32 %v4001_v9, %v1055_v33  ;;  %v2373_v36 = vadd.f32 %v4004_v11, %v1488_v35 }
 0x195   : > { %v1057_v37 = vpop.f32.mrf.mxu0  ;;  %v1490_v0 = vpop.f32.mrf.mxu1 }
 0x196   : > { %2563 = vst [vmem:[%s4013_s12 + $0x180] sm:$0xff] %v2371_v34  ;;  %v2372_v38 = vadd.f32 %v4007_v13, %v1057_v37  ;;  %2565 = vst [vmem:[%s4013_s12 + $0x190] sm:$0xff] %v2373_v36 }
 0x197   : > { %v1061_v39 = vpop.f32.mrf.mxu0  ;;  %v1493_v41 = vpop.f32.mrf.mxu1 }
 0x198   : > { %2564 = vst [vmem:[%s4013_s12 + $0x188] sm:$0xff] %v2372_v38  ;;  %v2374_v40 = vadd.f32 %v4001_v9, %v1061_v39  ;;  %v2376_v42 = vadd.f32 %v4004_v11, %v1493_v41 }
 0x199   : > { %v1063_v43 = vpop.f32.mrf.mxu0  ;;  %v1495_v45 = vpop.f32.mrf.mxu1 }
 0x19a   : > { %2566 = vst [vmem:[%s4013_s12 + $0x198] sm:$0xff] %v2374_v40  ;;  %v2375_v44 = vadd.f32 %v4007_v13, %v1063_v43  ;;  %2568 = vst [vmem:[%s4013_s12 + $0x1a8] sm:$0xff] %v2376_v42 }
 0x19b   : > { %v1067_v46 = vpop.f32.mrf.mxu0  ;;  %v1498_v48 = vpop.f32.mrf.mxu1 }
 0x19c   : > { %2567 = vst [vmem:[%s4013_s12 + $0x1a0] sm:$0xff] %v2375_v44  ;;  %v2377_v47 = vadd.f32 %v4001_v9, %v1067_v46  ;;  %v2379_v49 = vadd.f32 %v4004_v11, %v1498_v48 }
 0x19d   : > { %v1069_v50 = vpop.f32.mrf.mxu0  ;;  %v1500_v52 = vpop.f32.mrf.mxu1 }
 0x19e   : > { %2569 = vst [vmem:[%s4013_s12 + $0x1b0] sm:$0xff] %v2377_v47  ;;  %v2378_v51 = vadd.f32 %v4007_v13, %v1069_v50  ;;  %2571 = vst [vmem:[%s4013_s12 + $0x1c0] sm:$0xff] %v2379_v49 }
 0x19f   : > { %v1073_v53 = vpop.f32.mrf.mxu0  ;;  %v1503_v55 = vpop.f32.mrf.mxu1 }
 0x1a0   : > { %2570 = vst [vmem:[%s4013_s12 + $0x1b8] sm:$0xff] %v2378_v51  ;;  %v2380_v54 = vadd.f32 %v4001_v9, %v1073_v53  ;;  %v2382_v56 = vadd.f32 %v4004_v11, %v1503_v55 }
 0x1a1   : > { %v1075_v57 = vpop.f32.mrf.mxu0  ;;  %v1505_v59 = vpop.f32.mrf.mxu1 }
 0x1a2   : > { %2572 = vst [vmem:[%s4013_s12 + $0x1c8] sm:$0xff] %v2380_v54  ;;  %v2381_v58 = vadd.f32 %v4007_v13, %v1075_v57  ;;  %2574 = vst [vmem:[%s4013_s12 + $0x1d8] sm:$0xff] %v2382_v56 }
 0x1a3   : > { %v1079_v60 = vpop.f32.mrf.mxu0  ;;  %v1508_v62 = vpop.f32.mrf.mxu1 }
 0x1a4   : > { %2573 = vst [vmem:[%s4013_s12 + $0x1d0] sm:$0xff] %v2381_v58  ;;  %v2383_v61 = vadd.f32 %v4001_v9, %v1079_v60  ;;  %v2385_v63 = vadd.f32 %v4004_v11, %v1508_v62 }
 0x1a5   : > { %v1081_v1 = vpop.f32.mrf.mxu0  ;;  %v1510_v3 = vpop.f32.mrf.mxu1 }
 0x1a6   : > { %2575 = vst [vmem:[%s4013_s12 + $0x1e0] sm:$0xff] %v2383_v61  ;;  %v2384_v2 = vadd.f32 %v4007_v13, %v1081_v1  ;;  %2577 = vst [vmem:[%s4013_s12 + $0x1f0] sm:$0xff] %v2385_v63 }
 0x1a7   : > { %v1085_v4 = vpop.f32.mrf.mxu0  ;;  %v1513_v6 = vpop.f32.mrf.mxu1 }
 0x1a8   : > { %2576 = vst [vmem:[%s4013_s12 + $0x1e8] sm:$0xff] %v2384_v2  ;;  %v2386_v5 = vadd.f32 %v4001_v9, %v1085_v4  ;;  %v2388_v7 = vadd.f32 %v4004_v11, %v1513_v6 }
 0x1a9   : > { %v1087_v8 = vpop.f32.mrf.mxu0  ;;  %v1515_v12 = vpop.f32.mrf.mxu1 }
 0x1aa   : > { %2578 = vst [vmem:[%s4013_s12 + $0x1f8] sm:$0xff] %v2386_v5  ;;  %v2387_v10 = vadd.f32 %v4007_v13, %v1087_v8  ;;  %2580 = vst [vmem:[%s4013_s12 + $0x208] sm:$0xff] %v2388_v7 }
 0x1ab   : > { %v1091_v14 = vpop.f32.mrf.mxu0  ;;  %v1518_v16 = vpop.f32.mrf.mxu1 }
 0x1ac   : > { %2579 = vst [vmem:[%s4013_s12 + $0x200] sm:$0xff] %v2387_v10  ;;  %v2389_v15 = vadd.f32 %v4001_v9, %v1091_v14  ;;  %v2391_v17 = vadd.f32 %v4004_v11, %v1518_v16 }
 0x1ad   : > { %v1093_v18 = vpop.f32.mrf.mxu0  ;;  %v1520_v20 = vpop.f32.mrf.mxu1 }
 0x1ae   : > { %2581 = vst [vmem:[%s4013_s12 + $0x210] sm:$0xff] %v2389_v15  ;;  %v2390_v19 = vadd.f32 %v4007_v13, %v1093_v18  ;;  %2583 = vst [vmem:[%s4013_s12 + $0x220] sm:$0xff] %v2391_v17 }
 0x1af   : > { %v1097_v21 = vpop.f32.mrf.mxu0  ;;  %v1523_v23 = vpop.f32.mrf.mxu1 }
 0x1b0   : > { %2582 = vst [vmem:[%s4013_s12 + $0x218] sm:$0xff] %v2390_v19  ;;  %v2392_v22 = vadd.f32 %v4001_v9, %v1097_v21  ;;  %v2394_v24 = vadd.f32 %v4004_v11, %v1523_v23 }
 0x1b1   : > { %v1099_v25 = vpop.f32.mrf.mxu0  ;;  %v1525_v27 = vpop.f32.mrf.mxu1 }
 0x1b2   : > { %2584 = vst [vmem:[%s4013_s12 + $0x228] sm:$0xff] %v2392_v22  ;;  %v2393_v26 = vadd.f32 %v4007_v13, %v1099_v25  ;;  %2586 = vst [vmem:[%s4013_s12 + $0x238] sm:$0xff] %v2394_v24 }
 0x1b3   : > { %v1103_v28 = vpop.f32.mrf.mxu0  ;;  %v1528_v30 = vpop.f32.mrf.mxu1 }
 0x1b4   : > { %2585 = vst [vmem:[%s4013_s12 + $0x230] sm:$0xff] %v2393_v26  ;;  %v2395_v29 = vadd.f32 %v4001_v9, %v1103_v28  ;;  %v2397_v31 = vadd.f32 %v4004_v11, %v1528_v30 }
 0x1b5   : > { %v1105_v32 = vpop.f32.mrf.mxu0  ;;  %v1530_v34 = vpop.f32.mrf.mxu1 }
 0x1b6   : > { %2587 = vst [vmem:[%s4013_s12 + $0x240] sm:$0xff] %v2395_v29  ;;  %v2396_v33 = vadd.f32 %v4007_v13, %v1105_v32  ;;  %2589 = vst [vmem:[%s4013_s12 + $0x250] sm:$0xff] %v2397_v31 }
 0x1b7   : > { %v1109_v35 = vpop.f32.mrf.mxu0  ;;  %v1533_v37 = vpop.f32.mrf.mxu1 }
 0x1b8   : > { %2588 = vst [vmem:[%s4013_s12 + $0x248] sm:$0xff] %v2396_v33  ;;  %v2398_v36 = vadd.f32 %v4001_v9, %v1109_v35  ;;  %v2400_v38 = vadd.f32 %v4004_v11, %v1533_v37 }
 0x1b9   : > { %v1111_v0 = vpop.f32.mrf.mxu0  ;;  %v1535_v40 = vpop.f32.mrf.mxu1 }
 0x1ba   : > { %2590 = vst [vmem:[%s4013_s12 + $0x258] sm:$0xff] %v2398_v36  ;;  %v2399_v39 = vadd.f32 %v4007_v13, %v1111_v0  ;;  %2592 = vst [vmem:[%s4013_s12 + $0x268] sm:$0xff] %v2400_v38 }
 0x1bb   : > { %v1115_v41 = vpop.f32.mrf.mxu0  ;;  %v1538_v43 = vpop.f32.mrf.mxu1 }
 0x1bc   : > { %2591 = vst [vmem:[%s4013_s12 + $0x260] sm:$0xff] %v2399_v39  ;;  %v2401_v42 = vadd.f32 %v4001_v9, %v1115_v41  ;;  %v2403_v44 = vadd.f32 %v4004_v11, %v1538_v43 }
 0x1bd   : > { %v1117_v45 = vpop.f32.mrf.mxu0  ;;  %v1540_v47 = vpop.f32.mrf.mxu1 }
 0x1be   : > { %2593 = vst [vmem:[%s4013_s12 + $0x270] sm:$0xff] %v2401_v42  ;;  %v2402_v46 = vadd.f32 %v4007_v13, %v1117_v45  ;;  %2595 = vst [vmem:[%s4013_s12 + $0x280] sm:$0xff] %v2403_v44 }
 0x1bf   : > { %v1121_v48 = vpop.f32.mrf.mxu0  ;;  %v1543_v50 = vpop.f32.mrf.mxu1 }
 0x1c0   : > { %2594 = vst [vmem:[%s4013_s12 + $0x278] sm:$0xff] %v2402_v46  ;;  %v2404_v49 = vadd.f32 %v4001_v9, %v1121_v48  ;;  %v2406_v51 = vadd.f32 %v4004_v11, %v1543_v50 }
 0x1c1   : > { %v1123_v52 = vpop.f32.mrf.mxu0  ;;  %v1545_v54 = vpop.f32.mrf.mxu1 }
 0x1c2   : > { %2596 = vst [vmem:[%s4013_s12 + $0x288] sm:$0xff] %v2404_v49  ;;  %v2405_v53 = vadd.f32 %v4007_v13, %v1123_v52  ;;  %2598 = vst [vmem:[%s4013_s12 + $0x298] sm:$0xff] %v2406_v51 }
 0x1c3   : > { %v1127_v55 = vpop.f32.mrf.mxu0  ;;  %v1548_v57 = vpop.f32.mrf.mxu1 }
 0x1c4   : > { %2597 = vst [vmem:[%s4013_s12 + $0x290] sm:$0xff] %v2405_v53  ;;  %v2407_v56 = vadd.f32 %v4001_v9, %v1127_v55  ;;  %v2409_v58 = vadd.f32 %v4004_v11, %v1548_v57 }
 0x1c5   : > { %v1129_v59 = vpop.f32.mrf.mxu0  ;;  %v1550_v61 = vpop.f32.mrf.mxu1 }
 0x1c6   : > { %2599 = vst [vmem:[%s4013_s12 + $0x2a0] sm:$0xff] %v2407_v56  ;;  %v2408_v60 = vadd.f32 %v4007_v13, %v1129_v59  ;;  %2601 = vst [vmem:[%s4013_s12 + $0x2b0] sm:$0xff] %v2409_v58 }
 0x1c7   : > { %v1133_v62 = vpop.f32.mrf.mxu0  ;;  %v1553_v1 = vpop.f32.mrf.mxu1 }
 0x1c8   : > { %2600 = vst [vmem:[%s4013_s12 + $0x2a8] sm:$0xff] %v2408_v60  ;;  %v2410_v63 = vadd.f32 %v4001_v9, %v1133_v62  ;;  %v2412_v2 = vadd.f32 %v4004_v11, %v1553_v1 }
 0x1c9   : > { %v1135_v3 = vpop.f32.mrf.mxu0  ;;  %v1555_v5 = vpop.f32.mrf.mxu1 }
 0x1ca   : > { %2602 = vst [vmem:[%s4013_s12 + $0x2b8] sm:$0xff] %v2410_v63  ;;  %v2411_v4 = vadd.f32 %v4007_v13, %v1135_v3  ;;  %2604 = vst [vmem:[%s4013_s12 + $0x2c8] sm:$0xff] %v2412_v2 }
 0x1cb   : > { %v1139_v6 = vpop.f32.mrf.mxu0  ;;  %v1558_v8 = vpop.f32.mrf.mxu1 }
 0x1cc   : > { %2603 = vst [vmem:[%s4013_s12 + $0x2c0] sm:$0xff] %v2411_v4  ;;  %v2413_v7 = vadd.f32 %v4001_v9, %v1139_v6  ;;  %v2415_v10 = vadd.f32 %v4004_v11, %v1558_v8 }
 0x1cd   : > { %v1141_v12 = vpop.f32.mrf.mxu0  ;;  %v1560_v15 = vpop.f32.mrf.mxu1 }
 0x1ce   : > { %2605 = vst [vmem:[%s4013_s12 + $0x2d0] sm:$0xff] %v2413_v7  ;;  %v2414_v14 = vadd.f32 %v4007_v13, %v1141_v12  ;;  %2607 = vst [vmem:[%s4013_s12 + $0x2e0] sm:$0xff] %v2415_v10 }
 0x1cf   : > { %v1145_v16 = vpop.f32.mrf.mxu0  ;;  %v1563_v18 = vpop.f32.mrf.mxu1 }
 0x1d0   : > { %2606 = vst [vmem:[%s4013_s12 + $0x2d8] sm:$0xff] %v2414_v14  ;;  %v2416_v17 = vadd.f32 %v4001_v9, %v1145_v16  ;;  %v2418_v19 = vadd.f32 %v4004_v11, %v1563_v18 }
 0x1d1   : > { %v1147_v20 = vpop.f32.mrf.mxu0  ;;  %v1565_v22 = vpop.f32.mrf.mxu1 }
 0x1d2   : > { %2608 = vst [vmem:[%s4013_s12 + $0x2e8] sm:$0xff] %v2416_v17  ;;  %v2417_v21 = vadd.f32 %v4007_v13, %v1147_v20  ;;  %2610 = vst [vmem:[%s4013_s12 + $0x2f8] sm:$0xff] %v2418_v19 }
 0x1d3   : > { %v1151_v23 = vpop.f32.mrf.mxu0  ;;  %v1568_v25 = vpop.f32.mrf.mxu1 }
 0x1d4   : > { %2609 = vst [vmem:[%s4013_s12 + $0x2f0] sm:$0xff] %v2417_v21  ;;  %v2419_v24 = vadd.f32 %v4001_v9, %v1151_v23  ;;  %v2421_v26 = vadd.f32 %v4004_v11, %v1568_v25 }
 0x1d5   : > { %v1153_v27 = vpop.f32.mrf.mxu0  ;;  %v1570_v29 = vpop.f32.mrf.mxu1 }
 0x1d6   : > { %2611 = vst [vmem:[%s4013_s12 + $0x300] sm:$0xff] %v2419_v24  ;;  %v2420_v28 = vadd.f32 %v4007_v13, %v1153_v27  ;;  %2613 = vst [vmem:[%s4013_s12 + $0x310] sm:$0xff] %v2421_v26 }
 0x1d7   : > { %v1157_v30 = vpop.f32.mrf.mxu0  ;;  %v1573_v32 = vpop.f32.mrf.mxu1 }
 0x1d8   : > { %2612 = vst [vmem:[%s4013_s12 + $0x308] sm:$0xff] %v2420_v28  ;;  %v2422_v31 = vadd.f32 %v4001_v9, %v1157_v30  ;;  %v2424_v33 = vadd.f32 %v4004_v11, %v1573_v32 }
 0x1d9   : > { %v1159_v34 = vpop.f32.mrf.mxu0  ;;  %v1575_v36 = vpop.f32.mrf.mxu1 }
 0x1da   : > { %2614 = vst [vmem:[%s4013_s12 + $0x318] sm:$0xff] %v2422_v31  ;;  %v2423_v35 = vadd.f32 %v4007_v13, %v1159_v34  ;;  %2616 = vst [vmem:[%s4013_s12 + $0x328] sm:$0xff] %v2424_v33 }
 0x1db   : > { %v1163_v37 = vpop.f32.mrf.mxu0  ;;  %v1578_v0 = vpop.f32.mrf.mxu1 }
 0x1dc   : > { %2615 = vst [vmem:[%s4013_s12 + $0x320] sm:$0xff] %v2423_v35  ;;  %v2425_v38 = vadd.f32 %v4001_v9, %v1163_v37  ;;  %v2427_v39 = vadd.f32 %v4004_v11, %v1578_v0 }
 0x1dd   : > { %v1165_v40 = vpop.f32.mrf.mxu0  ;;  %v1580_v42 = vpop.f32.mrf.mxu1 }
 0x1de   : > { %2617 = vst [vmem:[%s4013_s12 + $0x330] sm:$0xff] %v2425_v38  ;;  %v2426_v41 = vadd.f32 %v4007_v13, %v1165_v40  ;;  %2619 = vst [vmem:[%s4013_s12 + $0x340] sm:$0xff] %v2427_v39 }
 0x1df   : > { %v1169_v43 = vpop.f32.mrf.mxu0  ;;  %v1583_v45 = vpop.f32.mrf.mxu1 }
 0x1e0   : > { %2618 = vst [vmem:[%s4013_s12 + $0x338] sm:$0xff] %v2426_v41  ;;  %v2428_v44 = vadd.f32 %v4001_v9, %v1169_v43  ;;  %v2430_v46 = vadd.f32 %v4004_v11, %v1583_v45 }
 0x1e1   : > { %v1171_v47 = vpop.f32.mrf.mxu0  ;;  %v1585_v49 = vpop.f32.mrf.mxu1 }
 0x1e2   : > { %2620 = vst [vmem:[%s4013_s12 + $0x348] sm:$0xff] %v2428_v44  ;;  %v2429_v48 = vadd.f32 %v4007_v13, %v1171_v47  ;;  %2622 = vst [vmem:[%s4013_s12 + $0x358] sm:$0xff] %v2430_v46 }
 0x1e3   : > { %v1175_v50 = vpop.f32.mrf.mxu0  ;;  %v1588_v52 = vpop.f32.mrf.mxu1 }
 0x1e4   : > { %2621 = vst [vmem:[%s4013_s12 + $0x350] sm:$0xff] %v2429_v48  ;;  %v2431_v51 = vadd.f32 %v4001_v9, %v1175_v50  ;;  %v2433_v53 = vadd.f32 %v4004_v11, %v1588_v52 }
 0x1e5   : > { %v1177_v54 = vpop.f32.mrf.mxu0  ;;  %v1590_v56 = vpop.f32.mrf.mxu1 }
 0x1e6   : > { %2623 = vst [vmem:[%s4013_s12 + $0x360] sm:$0xff] %v2431_v51  ;;  %v2432_v55 = vadd.f32 %v4007_v13, %v1177_v54  ;;  %2625 = vst [vmem:[%s4013_s12 + $0x370] sm:$0xff] %v2433_v53 }
 0x1e7   : > { %v1181_v57 = vpop.f32.mrf.mxu0  ;;  %v1593_v59 = vpop.f32.mrf.mxu1 }
 0x1e8   : > { %2624 = vst [vmem:[%s4013_s12 + $0x368] sm:$0xff] %v2432_v55  ;;  %v2434_v58 = vadd.f32 %v4001_v9, %v1181_v57  ;;  %v2436_v60 = vadd.f32 %v4004_v11, %v1593_v59 }
 0x1e9   : > { %v1183_v61 = vpop.f32.mrf.mxu0  ;;  %v1595_v63 = vpop.f32.mrf.mxu1 }
 0x1ea   : > { %2626 = vst [vmem:[%s4013_s12 + $0x378] sm:$0xff] %v2434_v58  ;;  %v2435_v62 = vadd.f32 %v4007_v13, %v1183_v61  ;;  %2628 = vst [vmem:[%s4013_s12 + $0x388] sm:$0xff] %v2436_v60 }
 0x1eb   : > { %v1187_v1 = vpop.f32.mrf.mxu0  ;;  %v1598_v3 = vpop.f32.mrf.mxu1 }
 0x1ec   : > { %2627 = vst [vmem:[%s4013_s12 + $0x380] sm:$0xff] %v2435_v62  ;;  %v2437_v2 = vadd.f32 %v4001_v9, %v1187_v1  ;;  %v2439_v4 = vadd.f32 %v4004_v11, %v1598_v3 }
 0x1ed   : > { %v1189_v5 = vpop.f32.mrf.mxu0  ;;  %v1600_v7 = vpop.f32.mrf.mxu1 }
 0x1ee   : > { %2629 = vst [vmem:[%s4013_s12 + $0x390] sm:$0xff] %v2437_v2  ;;  %v2438_v6 = vadd.f32 %v4007_v13, %v1189_v5  ;;  %2631 = vst [vmem:[%s4013_s12 + $0x3a0] sm:$0xff] %v2439_v4 }
 0x1ef   : > { %v1193_v8 = vpop.f32.mrf.mxu0  ;;  %v1603_v12 = vpop.f32.mrf.mxu1 }
 0x1f0   : > { %2630 = vst [vmem:[%s4013_s12 + $0x398] sm:$0xff] %v2438_v6  ;;  %v2440_v10 = vadd.f32 %v4001_v9, %v1193_v8  ;;  %v2442_v14 = vadd.f32 %v4004_v11, %v1603_v12 }
 0x1f1   : > { %v1195_v15 = vpop.f32.mrf.mxu0  ;;  %v1605_v17 = vpop.f32.mrf.mxu1 }
 0x1f2   : > { %2632 = vst [vmem:[%s4013_s12 + $0x3a8] sm:$0xff] %v2440_v10  ;;  %v2441_v16 = vadd.f32 %v4007_v13, %v1195_v15  ;;  %2634 = vst [vmem:[%s4013_s12 + $0x3b8] sm:$0xff] %v2442_v14 }
 0x1f3   : > { %v1199_v18 = vpop.f32.mrf.mxu0  ;;  %v1608_v20 = vpop.f32.mrf.mxu1 }
 0x1f4   : > { %2633 = vst [vmem:[%s4013_s12 + $0x3b0] sm:$0xff] %v2441_v16  ;;  %v2443_v19 = vadd.f32 %v4001_v9, %v1199_v18  ;;  %v2445_v21 = vadd.f32 %v4004_v11, %v1608_v20 }
 0x1f5   : > { %v1201_v22 = vpop.f32.mrf.mxu0  ;;  %v1610_v24 = vpop.f32.mrf.mxu1 }
 0x1f6   : > { %2635 = vst [vmem:[%s4013_s12 + $0x3c0] sm:$0xff] %v2443_v19  ;;  %v2444_v23 = vadd.f32 %v4007_v13, %v1201_v22  ;;  %2637 = vst [vmem:[%s4013_s12 + $0x3d0] sm:$0xff] %v2445_v21 }
 0x1f7   : > { %v1205_v25 = vpop.f32.mrf.mxu0  ;;  %v1613_v27 = vpop.f32.mrf.mxu1 }
 0x1f8   : > { %2636 = vst [vmem:[%s4013_s12 + $0x3c8] sm:$0xff] %v2444_v23  ;;  %v2446_v26 = vadd.f32 %v4001_v9, %v1205_v25  ;;  %v2448_v28 = vadd.f32 %v4004_v11, %v1613_v27 }
 0x1f9   : > { %v1207_v29 = vpop.f32.mrf.mxu0  ;;  %v1615_v31 = vpop.f32.mrf.mxu1 }
 0x1fa   : > { %2638 = vst [vmem:[%s4013_s12 + $0x3d8] sm:$0xff] %v2446_v26  ;;  %v2447_v30 = vadd.f32 %v4007_v13, %v1207_v29  ;;  %2640 = vst [vmem:[%s4013_s12 + $0x3e8] sm:$0xff] %v2448_v28 }
 0x1fb   : > { %v1211_v32 = vpop.f32.mrf.mxu0  ;;  %v1618_v34 = vpop.f32.mrf.mxu1 }
 0x1fc   : > { %2639 = vst [vmem:[%s4013_s12 + $0x3e0] sm:$0xff] %v2447_v30  ;;  %v2449_v33 = vadd.f32 %v4001_v9, %v1211_v32  ;;  %v2451_v35 = vadd.f32 %v4004_v11, %v1618_v34 }
 0x1fd   : > { %v1213_v36 = vpop.f32.mrf.mxu0  ;;  %v1620_v38 = vpop.f32.mrf.mxu1 }
 0x1fe   : > { %2641 = vst [vmem:[%s4013_s12 + $0x3f0] sm:$0xff] %v2449_v33  ;;  %v2450_v37 = vadd.f32 %v4007_v13, %v1213_v36  ;;  %2643 = vst [vmem:[%s4013_s12 + $0x400] sm:$0xff] %v2451_v35 }
 0x1ff   : > { %v1217_v0 = vpop.f32.mrf.mxu0  ;;  %v1623_v40 = vpop.f32.mrf.mxu1 }
 0x200   : > { %2642 = vst [vmem:[%s4013_s12 + $0x3f8] sm:$0xff] %v2450_v37  ;;  %v2452_v39 = vadd.f32 %v4001_v9, %v1217_v0  ;;  %v2454_v41 = vadd.f32 %v4004_v11, %v1623_v40 }
 0x201   : > { %v1219_v42 = vpop.f32.mrf.mxu0  ;;  %v1625_v44 = vpop.f32.mrf.mxu1 }
 0x202   : > { %2644 = vst [vmem:[%s4013_s12 + $0x408] sm:$0xff] %v2452_v39  ;;  %v2453_v43 = vadd.f32 %v4007_v13, %v1219_v42  ;;  %2646 = vst [vmem:[%s4013_s12 + $0x418] sm:$0xff] %v2454_v41 }
 0x203   : > { %v1223_v45 = vpop.f32.mrf.mxu0  ;;  %v1628_v47 = vpop.f32.mrf.mxu1 }
 0x204   : > { %2645 = vst [vmem:[%s4013_s12 + $0x410] sm:$0xff] %v2453_v43  ;;  %v2455_v46 = vadd.f32 %v4001_v9, %v1223_v45  ;;  %v2457_v48 = vadd.f32 %v4004_v11, %v1628_v47 }
 0x205   : > { %v1225_v49 = vpop.f32.mrf.mxu0  ;;  %v1630_v51 = vpop.f32.mrf.mxu1 }
 0x206   : > { %2647 = vst [vmem:[%s4013_s12 + $0x420] sm:$0xff] %v2455_v46  ;;  %v2456_v50 = vadd.f32 %v4007_v13, %v1225_v49  ;;  %2649 = vst [vmem:[%s4013_s12 + $0x430] sm:$0xff] %v2457_v48 }
 0x207   : > { %v1229_v52 = vpop.f32.mrf.mxu0  ;;  %v1633_v54 = vpop.f32.mrf.mxu1 }
 0x208   : > { %2648 = vst [vmem:[%s4013_s12 + $0x428] sm:$0xff] %v2456_v50  ;;  %v2458_v53 = vadd.f32 %v4001_v9, %v1229_v52  ;;  %v2460_v55 = vadd.f32 %v4004_v11, %v1633_v54 }
 0x209   : > { %v1231_v56 = vpop.f32.mrf.mxu0  ;;  %v1635_v58 = vpop.f32.mrf.mxu1 }
 0x20a   : > { %2650 = vst [vmem:[%s4013_s12 + $0x438] sm:$0xff] %v2458_v53  ;;  %v2459_v57 = vadd.f32 %v4007_v13, %v1231_v56  ;;  %2652 = vst [vmem:[%s4013_s12 + $0x448] sm:$0xff] %v2460_v55 }
 0x20b   : > { %v1235_v59 = vpop.f32.mrf.mxu0  ;;  %v1638_v61 = vpop.f32.mrf.mxu1 }
 0x20c   : > { %2651 = vst [vmem:[%s4013_s12 + $0x440] sm:$0xff] %v2459_v57  ;;  %v2461_v60 = vadd.f32 %v4001_v9, %v1235_v59  ;;  %v2463_v62 = vadd.f32 %v4004_v11, %v1638_v61 }
 0x20d   : > { %v1237_v63 = vpop.f32.mrf.mxu0  ;;  %v1640_v2 = vpop.f32.mrf.mxu1 }
 0x20e   : > { %2653 = vst [vmem:[%s4013_s12 + $0x450] sm:$0xff] %v2461_v60  ;;  %v2462_v1 = vadd.f32 %v4007_v13, %v1237_v63  ;;  %2655 = vst [vmem:[%s4013_s12 + $0x460] sm:$0xff] %v2463_v62 }
 0x20f   : > { %v1241_v3 = vpop.f32.mrf.mxu0  ;;  %v1643_v5 = vpop.f32.mrf.mxu1 }
 0x210   : > { %2654 = vst [vmem:[%s4013_s12 + $0x458] sm:$0xff] %v2462_v1  ;;  %v2464_v4 = vadd.f32 %v4001_v9, %v1241_v3  ;;  %v2466_v6 = vadd.f32 %v4004_v11, %v1643_v5 }
 0x211   : > { %v1243_v7 = vpop.f32.mrf.mxu0  ;;  %v1645_v10 = vpop.f32.mrf.mxu1 }
 0x212   : > { %2656 = vst [vmem:[%s4013_s12 + $0x468] sm:$0xff] %v2464_v4  ;;  %v2465_v8 = vadd.f32 %v4007_v13, %v1243_v7  ;;  %2658 = vst [vmem:[%s4013_s12 + $0x478] sm:$0xff] %v2466_v6 }
 0x213   : > { %v1247_v12 = vpop.f32.mrf.mxu0  ;;  %v1648_v15 = vpop.f32.mrf.mxu1 }
 0x214   : > { %2657 = vst [vmem:[%s4013_s12 + $0x470] sm:$0xff] %v2465_v8  ;;  %v2467_v14 = vadd.f32 %v4001_v9, %v1247_v12  ;;  %v2469_v16 = vadd.f32 %v4004_v11, %v1648_v15 }
 0x215   : > { %v1249_v17 = vpop.f32.mrf.mxu0  ;;  %v1650_v19 = vpop.f32.mrf.mxu1 }
 0x216   : > { %2659 = vst [vmem:[%s4013_s12 + $0x480] sm:$0xff] %v2467_v14  ;;  %v2468_v18 = vadd.f32 %v4007_v13, %v1249_v17  ;;  %2661 = vst [vmem:[%s4013_s12 + $0x490] sm:$0xff] %v2469_v16 }
 0x217   : > { %v1253_v20 = vpop.f32.mrf.mxu0  ;;  %v1653_v22 = vpop.f32.mrf.mxu1 }
 0x218   : > { %2660 = vst [vmem:[%s4013_s12 + $0x488] sm:$0xff] %v2468_v18  ;;  %v2470_v21 = vadd.f32 %v4001_v9, %v1253_v20  ;;  %v2472_v23 = vadd.f32 %v4004_v11, %v1653_v22 }
 0x219   : > { %v1255_v24 = vpop.f32.mrf.mxu0  ;;  %v1655_v26 = vpop.f32.mrf.mxu1 }
 0x21a   : > { %2662 = vst [vmem:[%s4013_s12 + $0x498] sm:$0xff] %v2470_v21  ;;  %v2471_v25 = vadd.f32 %v4007_v13, %v1255_v24  ;;  %2664 = vst [vmem:[%s4013_s12 + $0x4a8] sm:$0xff] %v2472_v23 }
 0x21b   : > { %v1259_v27 = vpop.f32.mrf.mxu0  ;;  %v1658_v29 = vpop.f32.mrf.mxu1 }
 0x21c   : > { %2663 = vst [vmem:[%s4013_s12 + $0x4a0] sm:$0xff] %v2471_v25  ;;  %v2473_v28 = vadd.f32 %v4001_v9, %v1259_v27  ;;  %v2475_v30 = vadd.f32 %v4004_v11, %v1658_v29 }
 0x21d   : > { %v1261_v31 = vpop.f32.mrf.mxu0  ;;  %v1660_v33 = vpop.f32.mrf.mxu1 }
 0x21e   : > { %2665 = vst [vmem:[%s4013_s12 + $0x4b0] sm:$0xff] %v2473_v28  ;;  %v2474_v32 = vadd.f32 %v4007_v13, %v1261_v31  ;;  %2667 = vst [vmem:[%s4013_s12 + $0x4c0] sm:$0xff] %v2475_v30 }
 0x21f   : > { %v1265_v34 = vpop.f32.mrf.mxu0  ;;  %v1663_v36 = vpop.f32.mrf.mxu1 }
 0x220   : > { %2666 = vst [vmem:[%s4013_s12 + $0x4b8] sm:$0xff] %v2474_v32  ;;  %v2476_v35 = vadd.f32 %v4001_v9, %v1265_v34  ;;  %v2478_v37 = vadd.f32 %v4004_v11, %v1663_v36 }
 0x221   : > { %v1267_v38 = vpop.f32.mrf.mxu0  ;;  %v1665_v39 = vpop.f32.mrf.mxu1 }
 0x222   : > { %2668 = vst [vmem:[%s4013_s12 + $0x4c8] sm:$0xff] %v2476_v35  ;;  %v2477_v0 = vadd.f32 %v4007_v13, %v1267_v38  ;;  %2670 = vst [vmem:[%s4013_s12 + $0x4d8] sm:$0xff] %v2478_v37 }
 0x223   : > { %v1271_v40 = vpop.f32.mrf.mxu0  ;;  %v1668_v42 = vpop.f32.mrf.mxu1 }
 0x224   : > { %2669 = vst [vmem:[%s4013_s12 + $0x4d0] sm:$0xff] %v2477_v0  ;;  %v2479_v41 = vadd.f32 %v4001_v9, %v1271_v40  ;;  %v2481_v43 = vadd.f32 %v4004_v11, %v1668_v42 }
 0x225   : > { %v1273_v44 = vpop.f32.mrf.mxu0  ;;  %v1670_v46 = vpop.f32.mrf.mxu1 }
 0x226   : > { %2671 = vst [vmem:[%s4013_s12 + $0x4e0] sm:$0xff] %v2479_v41  ;;  %v2480_v45 = vadd.f32 %v4007_v13, %v1273_v44  ;;  %2673 = vst [vmem:[%s4013_s12 + $0x4f0] sm:$0xff] %v2481_v43 }
 0x227   : > { %v1277_v47 = vpop.f32.mrf.mxu0  ;;  %v1673_v49 = vpop.f32.mrf.mxu1 }
 0x228   : > { %2672 = vst [vmem:[%s4013_s12 + $0x4e8] sm:$0xff] %v2480_v45  ;;  %v2482_v48 = vadd.f32 %v4001_v9, %v1277_v47  ;;  %v2484_v50 = vadd.f32 %v4004_v11, %v1673_v49 }
 0x229   : > { %v1279_v51 = vpop.f32.mrf.mxu0  ;;  %v1675_v53 = vpop.f32.mrf.mxu1 }
 0x22a   : > { %2674 = vst [vmem:[%s4013_s12 + $0x4f8] sm:$0xff] %v2482_v48  ;;  %v2483_v52 = vadd.f32 %v4007_v13, %v1279_v51  ;;  %2676 = vst [vmem:[%s4013_s12 + $0x508] sm:$0xff] %v2484_v50 }
 0x22b   : > { %v1283_v54 = vpop.f32.mrf.mxu0  ;;  %v1678_v56 = vpop.f32.mrf.mxu1 }
 0x22c   : > { %2675 = vst [vmem:[%s4013_s12 + $0x500] sm:$0xff] %v2483_v52  ;;  %v2485_v55 = vadd.f32 %v4001_v9, %v1283_v54  ;;  %v2487_v57 = vadd.f32 %v4004_v11, %v1678_v56 }
 0x22d   : > { %v1285_v58 = vpop.f32.mrf.mxu0  ;;  %v1680_v60 = vpop.f32.mrf.mxu1 }
 0x22e   : > { %2677 = vst [vmem:[%s4013_s12 + $0x510] sm:$0xff] %v2485_v55  ;;  %v2486_v59 = vadd.f32 %v4007_v13, %v1285_v58  ;;  %2679 = vst [vmem:[%s4013_s12 + $0x520] sm:$0xff] %v2487_v57 }
 0x22f   : > { %v1289_v61 = vpop.f32.mrf.mxu0  ;;  %v1683_v63 = vpop.f32.mrf.mxu1 }
 0x230   : > { %2678 = vst [vmem:[%s4013_s12 + $0x518] sm:$0xff] %v2486_v59  ;;  %v2488_v62 = vadd.f32 %v4001_v9, %v1289_v61  ;;  %v2490_v1 = vadd.f32 %v4004_v11, %v1683_v63  ;;  %v2738_v63 = vld [vmem:[%s4013_s12 + $0x18] sm:$0xff] (%p3722_p13) }
 0x231   : > { %v1291_v2 = vpop.f32.mrf.mxu0  ;;  %v1685_v4 = vpop.f32.mrf.mxu1  ;;  %2739 = vst [vmem:[%s4443_s5 + $0x30] sm:$0xff] (%p3722_p13), %v2738_v63  ;;  %v2866_v63 = vld [vmem:[%s4013_s12 + $0x218] sm:$0xff] (%p3722_p13) }
 0x232   : > { %2680 = vst [vmem:[%s4013_s12 + $0x528] sm:$0xff] %v2488_v62  ;;  %v2489_v3 = vadd.f32 %v4007_v13, %v1291_v2  ;;  %2682 = vst [vmem:[%s4013_s12 + $0x538] sm:$0xff] %v2490_v1  ;;  %v2740_v1 = vld [vmem:[%s4013_s12 + $0x20] sm:$0xff] (%p3722_p13)  ;;  %v2742_v2 = vld [vmem:[%s4013_s12 + $0x28] sm:$0xff] (%p3722_p13) }
 0x233   : > { %v1295_v5 = vpop.f32.mrf.mxu0  ;;  %v1688_v7 = vpop.f32.mrf.mxu1  ;;  %v2746_v4 = vld [vmem:[%s4013_s12 + $0x38] sm:$0xff] (%p3722_p13)  ;;  %2741 = vst [vmem:[%s4443_s5 + $0x38] sm:$0xff] (%p3722_p13), %v2740_v1  ;;  %2743 = vst [vmem:[%s4443_s5 + $0x40] sm:$0xff] (%p3722_p13), %v2742_v2  ;;  %v2868_v1 = vld [vmem:[%s4013_s12 + $0x220] sm:$0xff] (%p3722_p13) }
 0x234   : > { %2681 = vst [vmem:[%s4013_s12 + $0x530] sm:$0xff] %v2489_v3  ;;  %v2491_v6 = vadd.f32 %v4001_v9, %v1295_v5  ;;  %v2493_v8 = vadd.f32 %v4004_v11, %v1688_v7  ;;  %v2744_v3 = vld [vmem:[%s4013_s12 + $0x30] sm:$0xff] (%p3722_p13)  ;;  %v2748_v5 = vld [vmem:[%s4013_s12 + $0x40] sm:$0xff] (%p3722_p13)  ;;  %2747 = vst [vmem:[%s4443_s5 + $0x68] sm:$0xff] (%p3722_p13), %v2746_v4 }
 0x235   : > { %v1297_v10 = vpop.f32.mrf.mxu0  ;;  %v1690_v14 = vpop.f32.mrf.mxu1  ;;  %v2752_v7 = vld [vmem:[%s4013_s12 + $0x50] sm:$0xff] (%p3722_p13)  ;;  %2745 = vst [vmem:[%s4443_s5 + $0x60] sm:$0xff] (%p3722_p13), %v2744_v3  ;;  %2749 = vst [vmem:[%s4443_s5 + $0x70] sm:$0xff] (%p3722_p13), %v2748_v5  ;;  %v2870_v2 = vld [vmem:[%s4013_s12 + $0x228] sm:$0xff] (%p3722_p13) }
 0x236   : > { %2683 = vst [vmem:[%s4013_s12 + $0x540] sm:$0xff] %v2491_v6  ;;  %v2492_v12 = vadd.f32 %v4007_v13, %v1297_v10  ;;  %2685 = vst [vmem:[%s4013_s12 + $0x550] sm:$0xff] %v2493_v8  ;;  %v2750_v6 = vld [vmem:[%s4013_s12 + $0x48] sm:$0xff] (%p3722_p13)  ;;  %v2754_v8 = vld [vmem:[%s4013_s12 + $0x58] sm:$0xff] (%p3722_p13) }
 0x237   : > { %v1301_v15 = vpop.f32.mrf.mxu0  ;;  %v1693_v17 = vpop.f32.mrf.mxu1  ;;  %v2756_v10 = vld [vmem:[%s4013_s12 + $0x60] sm:$0xff] (%p3722_p13)  ;;  %v2760_v14 = vld [vmem:[%s4013_s12 + $0x70] sm:$0xff] (%p3722_p13)  ;;  %2751 = vst [vmem:[%s4443_s5 + $0x90] sm:$0xff] (%p3722_p13), %v2750_v6  ;;  %2753 = vst [vmem:[%s4443_s5 + $0x98] sm:$0xff] (%p3722_p13), %v2752_v7 }
 0x238   : > { %2684 = vst [vmem:[%s4013_s12 + $0x548] sm:$0xff] %v2492_v12  ;;  %v2494_v16 = vadd.f32 %v4001_v9, %v1301_v15  ;;  %v2496_v18 = vadd.f32 %v4004_v11, %v1693_v17  ;;  %v2758_v12 = vld [vmem:[%s4013_s12 + $0x68] sm:$0xff] (%p3722_p13)  ;;  %2755 = vst [vmem:[%s4443_s5 + $0xa0] sm:$0xff] (%p3722_p13), %v2754_v8  ;;  %v2762_v15 = vld [vmem:[%s4013_s12 + $0x78] sm:$0xff] (%p3722_p13) }
 0x239   : > { %v1303_v19 = vpop.f32.mrf.mxu0  ;;  %v1695_v21 = vpop.f32.mrf.mxu1  ;;  %2757 = vst [vmem:[%s4443_s5 + $0xc0] sm:$0xff] (%p3722_p13), %v2756_v10  ;;  %2759 = vst [vmem:[%s4443_s5 + $0xc8] sm:$0xff] (%p3722_p13), %v2758_v12  ;;  %v2766_v17 = vld [vmem:[%s4013_s12 + $0x88] sm:$0xff] (%p3722_p13)  ;;  %v2872_v3 = vld [vmem:[%s4013_s12 + $0x230] sm:$0xff] (%p3722_p13) }
 0x23a   : > { %2686 = vst [vmem:[%s4013_s12 + $0x558] sm:$0xff] %v2494_v16  ;;  %v2495_v20 = vadd.f32 %v4007_v13, %v1303_v19  ;;  %2688 = vst [vmem:[%s4013_s12 + $0x568] sm:$0xff] %v2496_v18  ;;  %v2764_v16 = vld [vmem:[%s4013_s12 + $0x80] sm:$0xff] (%p3722_p13)  ;;  %v2768_v18 = vld [vmem:[%s4013_s12 + $0x90] sm:$0xff] (%p3722_p13) }
 0x23b   : > { %v1307_v22 = vpop.f32.mrf.mxu0  ;;  %v1698_v24 = vpop.f32.mrf.mxu1  ;;  %2761 = vst [vmem:[%s4443_s5 + $0xd0] sm:$0xff] (%p3722_p13), %v2760_v14  ;;  %2763 = vst [vmem:[%s4443_s5 + $0xf0] sm:$0xff] (%p3722_p13), %v2762_v15  ;;  %v2770_v19 = vld [vmem:[%s4013_s12 + $0x98] sm:$0xff] (%p3722_p13)  ;;  %v2774_v21 = vld [vmem:[%s4013_s12 + $0xa8] sm:$0xff] (%p3722_p13) }
 0x23c   : > { %2687 = vst [vmem:[%s4013_s12 + $0x560] sm:$0xff] %v2495_v20  ;;  %v2497_v23 = vadd.f32 %v4001_v9, %v1307_v22  ;;  %v2499_v25 = vadd.f32 %v4004_v11, %v1698_v24  ;;  %2765 = vst [vmem:[%s4443_s5 + $0xf8] sm:$0xff] (%p3722_p13), %v2764_v16  ;;  %v2772_v20 = vld [vmem:[%s4013_s12 + $0xa0] sm:$0xff] (%p3722_p13)  ;;  %v2776_v22 = vld [vmem:[%s4013_s12 + $0xb0] sm:$0xff] (%p3722_p13) }
 0x23d   : > { %v1309_v26 = vpop.f32.mrf.mxu0  ;;  %v1700_v28 = vpop.f32.mrf.mxu1  ;;  %2767 = vst [vmem:[%s4443_s5 + $0x100] sm:$0xff] (%p3722_p13), %v2766_v17  ;;  %2769 = vst [vmem:[%s4443_s5 + $0x120] sm:$0xff] (%p3722_p13), %v2768_v18  ;;  %v2780_v24 = vld [vmem:[%s4013_s12 + $0xc0] sm:$0xff] (%p3722_p13)  ;;  %v2874_v4 = vld [vmem:[%s4013_s12 + $0x238] sm:$0xff] (%p3722_p13) }
 0x23e   : > { %2689 = vst [vmem:[%s4013_s12 + $0x570] sm:$0xff] %v2497_v23  ;;  %v2498_v27 = vadd.f32 %v4007_v13, %v1309_v26  ;;  %2691 = vst [vmem:[%s4013_s12 + $0x580] sm:$0xff] %v2499_v25  ;;  %v2778_v23 = vld [vmem:[%s4013_s12 + $0xb8] sm:$0xff] (%p3722_p13)  ;;  %v2782_v25 = vld [vmem:[%s4013_s12 + $0xc8] sm:$0xff] (%p3722_p13) }
 0x23f   : > { %v1313_v29 = vpop.f32.mrf.mxu0  ;;  %v1703_v31 = vpop.f32.mrf.mxu1  ;;  %2771 = vst [vmem:[%s4443_s5 + $0x128] sm:$0xff] (%p3722_p13), %v2770_v19  ;;  %2773 = vst [vmem:[%s4443_s5 + $0x130] sm:$0xff] (%p3722_p13), %v2772_v20  ;;  %v2784_v26 = vld [vmem:[%s4013_s12 + $0xd0] sm:$0xff] (%p3722_p13)  ;;  %v2788_v28 = vld [vmem:[%s4013_s12 + $0xe0] sm:$0xff] (%p3722_p13) }
 0x240   : > { %2690 = vst [vmem:[%s4013_s12 + $0x578] sm:$0xff] %v2498_v27  ;;  %v2500_v30 = vadd.f32 %v4001_v9, %v1313_v29  ;;  %v2502_v32 = vadd.f32 %v4004_v11, %v1703_v31  ;;  %2775 = vst [vmem:[%s4443_s5 + $0x150] sm:$0xff] (%p3722_p13), %v2774_v21  ;;  %v2786_v27 = vld [vmem:[%s4013_s12 + $0xd8] sm:$0xff] (%p3722_p13)  ;;  %v2790_v29 = vld [vmem:[%s4013_s12 + $0xe8] sm:$0xff] (%p3722_p13) }
 0x241   : > { %v1315_v33 = vpop.f32.mrf.mxu0  ;;  %v1705_v35 = vpop.f32.mrf.mxu1  ;;  %2777 = vst [vmem:[%s4443_s5 + $0x158] sm:$0xff] (%p3722_p13), %v2776_v22  ;;  %2779 = vst [vmem:[%s4443_s5 + $0x160] sm:$0xff] (%p3722_p13), %v2778_v23  ;;  %v2794_v31 = vld [vmem:[%s4013_s12 + $0xf8] sm:$0xff] (%p3722_p13)  ;;  %v2876_v5 = vld [vmem:[%s4013_s12 + $0x240] sm:$0xff] (%p3722_p13) }
 0x242   : > { %2692 = vst [vmem:[%s4013_s12 + $0x588] sm:$0xff] %v2500_v30  ;;  %v2501_v34 = vadd.f32 %v4007_v13, %v1315_v33  ;;  %2694 = vst [vmem:[%s4013_s12 + $0x598] sm:$0xff] %v2502_v32  ;;  %v2792_v30 = vld [vmem:[%s4013_s12 + $0xf0] sm:$0xff] (%p3722_p13)  ;;  %v2796_v32 = vld [vmem:[%s4013_s12 + $0x100] sm:$0xff] (%p3722_p13) }
 0x243   : > { %v1319_v36 = vpop.f32.mrf.mxu0  ;;  %v1708_v38 = vpop.f32.mrf.mxu1  ;;  %2781 = vst [vmem:[%s4443_s5 + $0x180] sm:$0xff] (%p3722_p13), %v2780_v24  ;;  %2783 = vst [vmem:[%s4443_s5 + $0x188] sm:$0xff] (%p3722_p13), %v2782_v25  ;;  %v2798_v33 = vld [vmem:[%s4013_s12 + $0x108] sm:$0xff] (%p3722_p13)  ;;  %v2802_v35 = vld [vmem:[%s4013_s12 + $0x118] sm:$0xff] (%p3722_p13) }
 0x244   : > { %2693 = vst [vmem:[%s4013_s12 + $0x590] sm:$0xff] %v2501_v34  ;;  %v2503_v37 = vadd.f32 %v4001_v9, %v1319_v36  ;;  %v2505_v0 = vadd.f32 %v4004_v11, %v1708_v38  ;;  %2785 = vst [vmem:[%s4443_s5 + $0x190] sm:$0xff] (%p3722_p13), %v2784_v26  ;;  %v2800_v34 = vld [vmem:[%s4013_s12 + $0x110] sm:$0xff] (%p3722_p13)  ;;  %v2804_v36 = vld [vmem:[%s4013_s12 + $0x120] sm:$0xff] (%p3722_p13) }
 0x245   : > { %v1321_v39 = vpop.f32.mrf.mxu0  ;;  %v1710_v41 = vpop.f32.mrf.mxu1  ;;  %2787 = vst [vmem:[%s4443_s5 + $0x1b0] sm:$0xff] (%p3722_p13), %v2786_v27  ;;  %2789 = vst [vmem:[%s4443_s5 + $0x1b8] sm:$0xff] (%p3722_p13), %v2788_v28  ;;  %v2808_v38 = vld [vmem:[%s4013_s12 + $0x130] sm:$0xff] (%p3722_p13)  ;;  %v2878_v6 = vld [vmem:[%s4013_s12 + $0x248] sm:$0xff] (%p3722_p13) }
 0x246   : > { %2695 = vst [vmem:[%s4013_s12 + $0x5a0] sm:$0xff] %v2503_v37  ;;  %v2504_v40 = vadd.f32 %v4007_v13, %v1321_v39  ;;  %2697 = vst [vmem:[%s4013_s12 + $0x5b0] sm:$0xff] %v2505_v0  ;;  %v2806_v37 = vld [vmem:[%s4013_s12 + $0x128] sm:$0xff] (%p3722_p13)  ;;  %v2810_v0 = vld [vmem:[%s4013_s12 + $0x138] sm:$0xff] (%p3722_p13) }
 0x247   : > { %v1325_v42 = vpop.f32.mrf.mxu0  ;;  %v1713_v44 = vpop.f32.mrf.mxu1  ;;  %2791 = vst [vmem:[%s4443_s5 + $0x1c0] sm:$0xff] (%p3722_p13), %v2790_v29  ;;  %2793 = vst [vmem:[%s4443_s5 + $0x1e0] sm:$0xff] (%p3722_p13), %v2792_v30  ;;  %v2812_v39 = vld [vmem:[%s4013_s12 + $0x140] sm:$0xff] (%p3722_p13)  ;;  %v2816_v41 = vld [vmem:[%s4013_s12 + $0x150] sm:$0xff] (%p3722_p13) }
 0x248   : > { %2696 = vst [vmem:[%s4013_s12 + $0x5a8] sm:$0xff] %v2504_v40  ;;  %v2506_v43 = vadd.f32 %v4001_v9, %v1325_v42  ;;  %v2508_v45 = vadd.f32 %v4004_v11, %v1713_v44  ;;  %2795 = vst [vmem:[%s4443_s5 + $0x1e8] sm:$0xff] (%p3722_p13), %v2794_v31  ;;  %v2814_v40 = vld [vmem:[%s4013_s12 + $0x148] sm:$0xff] (%p3722_p13)  ;;  %v2818_v42 = vld [vmem:[%s4013_s12 + $0x158] sm:$0xff] (%p3722_p13) }
 0x249   : > { %v1327_v46 = vpop.f32.mrf.mxu0  ;;  %v1715_v48 = vpop.f32.mrf.mxu1  ;;  %2797 = vst [vmem:[%s4443_s5 + $0x1f0] sm:$0xff] (%p3722_p13), %v2796_v32  ;;  %2799 = vst [vmem:[%s4443_s5 + $0x210] sm:$0xff] (%p3722_p13), %v2798_v33  ;;  %v2822_v44 = vld [vmem:[%s4013_s12 + $0x168] sm:$0xff] (%p3722_p13)  ;;  %v2880_v7 = vld [vmem:[%s4013_s12 + $0x250] sm:$0xff] (%p3722_p13) }
 0x24a   : > { %2698 = vst [vmem:[%s4013_s12 + $0x5b8] sm:$0xff] %v2506_v43  ;;  %v2507_v47 = vadd.f32 %v4007_v13, %v1327_v46  ;;  %2700 = vst [vmem:[%s4013_s12 + $0x5c8] sm:$0xff] %v2508_v45  ;;  %v2820_v43 = vld [vmem:[%s4013_s12 + $0x160] sm:$0xff] (%p3722_p13)  ;;  %v2824_v45 = vld [vmem:[%s4013_s12 + $0x170] sm:$0xff] (%p3722_p13) }
 0x24b   : > { %v1331_v49 = vpop.f32.mrf.mxu0  ;;  %v1718_v51 = vpop.f32.mrf.mxu1  ;;  %2801 = vst [vmem:[%s4443_s5 + $0x218] sm:$0xff] (%p3722_p13), %v2800_v34  ;;  %2803 = vst [vmem:[%s4443_s5 + $0x220] sm:$0xff] (%p3722_p13), %v2802_v35  ;;  %v2826_v46 = vld [vmem:[%s4013_s12 + $0x178] sm:$0xff] (%p3722_p13)  ;;  %v2830_v48 = vld [vmem:[%s4013_s12 + $0x188] sm:$0xff] (%p3722_p13) }
 0x24c   : > { %2699 = vst [vmem:[%s4013_s12 + $0x5c0] sm:$0xff] %v2507_v47  ;;  %v2509_v50 = vadd.f32 %v4001_v9, %v1331_v49  ;;  %v2511_v52 = vadd.f32 %v4004_v11, %v1718_v51  ;;  %2805 = vst [vmem:[%s4443_s5 + $0x240] sm:$0xff] (%p3722_p13), %v2804_v36  ;;  %v2828_v47 = vld [vmem:[%s4013_s12 + $0x180] sm:$0xff] (%p3722_p13)  ;;  %v2832_v49 = vld [vmem:[%s4013_s12 + $0x190] sm:$0xff] (%p3722_p13) }
 0x24d   : > { %v1333_v53 = vpop.f32.mrf.mxu0  ;;  %v1720_v55 = vpop.f32.mrf.mxu1  ;;  %2807 = vst [vmem:[%s4443_s5 + $0x248] sm:$0xff] (%p3722_p13), %v2806_v37  ;;  %2809 = vst [vmem:[%s4443_s5 + $0x250] sm:$0xff] (%p3722_p13), %v2808_v38  ;;  %v2836_v51 = vld [vmem:[%s4013_s12 + $0x1a0] sm:$0xff] (%p3722_p13)  ;;  %v2882_v8 = vld [vmem:[%s4013_s12 + $0x258] sm:$0xff] (%p3722_p13) }
 0x24e   : > { %2701 = vst [vmem:[%s4013_s12 + $0x5d0] sm:$0xff] %v2509_v50  ;;  %v2510_v54 = vadd.f32 %v4007_v13, %v1333_v53  ;;  %2703 = vst [vmem:[%s4013_s12 + $0x5e0] sm:$0xff] %v2511_v52  ;;  %v2834_v50 = vld [vmem:[%s4013_s12 + $0x198] sm:$0xff] (%p3722_p13)  ;;  %v2838_v52 = vld [vmem:[%s4013_s12 + $0x1a8] sm:$0xff] (%p3722_p13) }
 0x24f   : > { %v1337_v56 = vpop.f32.mrf.mxu0  ;;  %v1723_v58 = vpop.f32.mrf.mxu1  ;;  %2811 = vst [vmem:[%s4443_s5 + $0x270] sm:$0xff] (%p3722_p13), %v2810_v0  ;;  %2813 = vst [vmem:[%s4443_s5 + $0x278] sm:$0xff] (%p3722_p13), %v2812_v39  ;;  %v2840_v53 = vld [vmem:[%s4013_s12 + $0x1b0] sm:$0xff] (%p3722_p13)  ;;  %v2844_v55 = vld [vmem:[%s4013_s12 + $0x1c0] sm:$0xff] (%p3722_p13) }
 0x250   : > { %2702 = vst [vmem:[%s4013_s12 + $0x5d8] sm:$0xff] %v2510_v54  ;;  %v2512_v57 = vadd.f32 %v4001_v9, %v1337_v56  ;;  %v2514_v59 = vadd.f32 %v4004_v11, %v1723_v58  ;;  %2713 = sbr.rel (!%p3722_p13) target bundleno = 671 (0x29f), region = 52  ;;  %v2732_v9 = vld [vmem:[%s4013_s12] sm:$0xff] (%p3722_p13)  ;;  %v2734_v11 = vld [vmem:[%s4013_s12 + $0x8] sm:$0xff] (%p3722_p13)  ;;  %2815 = vst [vmem:[%s4443_s5 + $0x280] sm:$0xff] (%p3722_p13), %v2814_v40 }
 0x251   : > { %v1339_v60 = vpop.f32.mrf.mxu0  ;;  %v1725_v62 = vpop.f32.mrf.mxu1  ;;  %2733 = vst [vmem:[%s4443_s5] sm:$0xff] (%p3722_p13), %v2732_v9  ;;  %2735 = vst [vmem:[%s4443_s5 + $0x8] sm:$0xff] (%p3722_p13), %v2734_v11  ;;  %v2842_v54 = vld [vmem:[%s4013_s12 + $0x1b8] sm:$0xff] (%p3722_p13)  ;;  %v2846_v56 = vld [vmem:[%s4013_s12 + $0x1c8] sm:$0xff] (%p3722_p13) }
 0x252   : > { %2704 = vst [vmem:[%s4013_s12 + $0x5e8] sm:$0xff] %v2512_v57  ;;  %v2513_v61 = vadd.f32 %v4007_v13, %v1339_v60  ;;  %2706 = vst [vmem:[%s4013_s12 + $0x5f8] sm:$0xff] %v2514_v59  ;;  %v2736_v13 = vld [vmem:[%s4013_s12 + $0x10] sm:$0xff] (%p3722_p13)  ;;  %v2850_v58 = vld [vmem:[%s4013_s12 + $0x1d8] sm:$0xff] (%p3722_p13) }
 0x253   : > { %2737 = vst [vmem:[%s4443_s5 + $0x10] sm:$0xff] (%p3722_p13), %v2736_v13  ;;  %2817 = vst [vmem:[%s4443_s5 + $0x2a0] sm:$0xff] (%p3722_p13), %v2816_v41  ;;  %v2848_v57 = vld [vmem:[%s4013_s12 + $0x1d0] sm:$0xff] (%p3722_p13)  ;;  %v2852_v59 = vld [vmem:[%s4013_s12 + $0x1e0] sm:$0xff] (%p3722_p13) }
 0x254   : > { %2705 = vst [vmem:[%s4013_s12 + $0x5f0] sm:$0xff] %v2513_v61  ;;  %2819 = vst [vmem:[%s4443_s5 + $0x2a8] sm:$0xff] (%p3722_p13), %v2818_v42  ;;  %v2854_v60 = vld [vmem:[%s4013_s12 + $0x1e8] sm:$0xff] (%p3722_p13)  ;;  %v2856_v61 = vld [vmem:[%s4013_s12 + $0x1f0] sm:$0xff] (%p3722_p13) }
 0x255   : > { %2821 = vst [vmem:[%s4443_s5 + $0x2b0] sm:$0xff] %v2820_v43  ;;  %2823 = vst [vmem:[%s4443_s5 + $0x2d0] sm:$0xff] %v2822_v44  ;;  %v2858_v62 = vld [vmem:[%s4013_s12 + $0x1f8] sm:$0xff]  ;;  %v2860_v9 = vld [vmem:[%s4013_s12 + $0x200] sm:$0xff] }
 0x256   : > { %2825 = vst [vmem:[%s4443_s5 + $0x2d8] sm:$0xff] %v2824_v45  ;;  %2827 = vst [vmem:[%s4443_s5 + $0x2e0] sm:$0xff] %v2826_v46  ;;  %v2862_v11 = vld [vmem:[%s4013_s12 + $0x208] sm:$0xff]  ;;  %v2864_v13 = vld [vmem:[%s4013_s12 + $0x210] sm:$0xff] }
 0x257   : > { %2829 = vst [vmem:[%s4443_s5 + $0x300] sm:$0xff] %v2828_v47  ;;  %2831 = vst [vmem:[%s4443_s5 + $0x308] sm:$0xff] %v2830_v48  ;;  %v2884_v10 = vld [vmem:[%s4013_s12 + $0x260] sm:$0xff]  ;;  %v2886_v12 = vld [vmem:[%s4013_s12 + $0x268] sm:$0xff] }
 0x258   : > { %2833 = vst [vmem:[%s4443_s5 + $0x310] sm:$0xff] %v2832_v49  ;;  %2835 = vst [vmem:[%s4443_s5 + $0x330] sm:$0xff] %v2834_v50  ;;  %v2888_v14 = vld [vmem:[%s4013_s12 + $0x270] sm:$0xff]  ;;  %v2890_v15 = vld [vmem:[%s4013_s12 + $0x278] sm:$0xff] }
 0x259   : > { %2837 = vst [vmem:[%s4443_s5 + $0x338] sm:$0xff] %v2836_v51  ;;  %2839 = vst [vmem:[%s4443_s5 + $0x340] sm:$0xff] %v2838_v52  ;;  %v2892_v16 = vld [vmem:[%s4013_s12 + $0x280] sm:$0xff]  ;;  %v2894_v17 = vld [vmem:[%s4013_s12 + $0x288] sm:$0xff] }
 0x25a   : > { %2841 = vst [vmem:[%s4443_s5 + $0x360] sm:$0xff] %v2840_v53  ;;  %2843 = vst [vmem:[%s4443_s5 + $0x368] sm:$0xff] %v2842_v54  ;;  %v2896_v18 = vld [vmem:[%s4013_s12 + $0x290] sm:$0xff]  ;;  %v2898_v19 = vld [vmem:[%s4013_s12 + $0x298] sm:$0xff] }
 0x25b   : > { %2845 = vst [vmem:[%s4443_s5 + $0x370] sm:$0xff] %v2844_v55  ;;  %2847 = vst [vmem:[%s4443_s5 + $0x390] sm:$0xff] %v2846_v56  ;;  %v2900_v20 = vld [vmem:[%s4013_s12 + $0x2a0] sm:$0xff]  ;;  %v2902_v21 = vld [vmem:[%s4013_s12 + $0x2a8] sm:$0xff] }
 0x25c   : > { %2849 = vst [vmem:[%s4443_s5 + $0x398] sm:$0xff] %v2848_v57  ;;  %2851 = vst [vmem:[%s4443_s5 + $0x3a0] sm:$0xff] %v2850_v58  ;;  %v2904_v22 = vld [vmem:[%s4013_s12 + $0x2b0] sm:$0xff]  ;;  %v2906_v23 = vld [vmem:[%s4013_s12 + $0x2b8] sm:$0xff] }
 0x25d   : > { %2853 = vst [vmem:[%s4443_s5 + $0x3c0] sm:$0xff] %v2852_v59  ;;  %2855 = vst [vmem:[%s4443_s5 + $0x3c8] sm:$0xff] %v2854_v60  ;;  %v2908_v24 = vld [vmem:[%s4013_s12 + $0x2c0] sm:$0xff]  ;;  %v2910_v25 = vld [vmem:[%s4013_s12 + $0x2c8] sm:$0xff] }
 0x25e   : > { %2857 = vst [vmem:[%s4443_s5 + $0x3d0] sm:$0xff] %v2856_v61  ;;  %2859 = vst [vmem:[%s4443_s5 + $0x3f0] sm:$0xff] %v2858_v62  ;;  %v2912_v26 = vld [vmem:[%s4013_s12 + $0x2d0] sm:$0xff]  ;;  %v2914_v27 = vld [vmem:[%s4013_s12 + $0x2d8] sm:$0xff] }
 0x25f   : > { %2861 = vst [vmem:[%s4443_s5 + $0x3f8] sm:$0xff] %v2860_v9  ;;  %2863 = vst [vmem:[%s4443_s5 + $0x400] sm:$0xff] %v2862_v11  ;;  %v2916_v28 = vld [vmem:[%s4013_s12 + $0x2e0] sm:$0xff]  ;;  %v2918_v29 = vld [vmem:[%s4013_s12 + $0x2e8] sm:$0xff] }
 0x260   : > { %2865 = vst [vmem:[%s4443_s5 + $0x420] sm:$0xff] %v2864_v13  ;;  %2867 = vst [vmem:[%s4443_s5 + $0x428] sm:$0xff] %v2866_v63  ;;  %v2920_v30 = vld [vmem:[%s4013_s12 + $0x2f0] sm:$0xff]  ;;  %v2922_v31 = vld [vmem:[%s4013_s12 + $0x2f8] sm:$0xff] }
 0x261   : > { %2869 = vst [vmem:[%s4443_s5 + $0x430] sm:$0xff] %v2868_v1  ;;  %2871 = vst [vmem:[%s4443_s5 + $0x450] sm:$0xff] %v2870_v2  ;;  %v2924_v32 = vld [vmem:[%s4013_s12 + $0x300] sm:$0xff]  ;;  %v2926_v33 = vld [vmem:[%s4013_s12 + $0x308] sm:$0xff] }
 0x262   : > { %2873 = vst [vmem:[%s4443_s5 + $0x458] sm:$0xff] %v2872_v3  ;;  %2875 = vst [vmem:[%s4443_s5 + $0x460] sm:$0xff] %v2874_v4  ;;  %v2928_v34 = vld [vmem:[%s4013_s12 + $0x310] sm:$0xff]  ;;  %v2930_v35 = vld [vmem:[%s4013_s12 + $0x318] sm:$0xff] }
 0x263   : > { %2877 = vst [vmem:[%s4443_s5 + $0x480] sm:$0xff] %v2876_v5  ;;  %2879 = vst [vmem:[%s4443_s5 + $0x488] sm:$0xff] %v2878_v6  ;;  %v2932_v36 = vld [vmem:[%s4013_s12 + $0x320] sm:$0xff]  ;;  %v2934_v37 = vld [vmem:[%s4013_s12 + $0x328] sm:$0xff] }
 0x264   : > { %2881 = vst [vmem:[%s4443_s5 + $0x490] sm:$0xff] %v2880_v7  ;;  %2883 = vst [vmem:[%s4443_s5 + $0x4b0] sm:$0xff] %v2882_v8  ;;  %v2936_v38 = vld [vmem:[%s4013_s12 + $0x330] sm:$0xff]  ;;  %v2938_v0 = vld [vmem:[%s4013_s12 + $0x338] sm:$0xff] }
 0x265   : > { %2885 = vst [vmem:[%s4443_s5 + $0x4b8] sm:$0xff] %v2884_v10  ;;  %2887 = vst [vmem:[%s4443_s5 + $0x4c0] sm:$0xff] %v2886_v12  ;;  %v2940_v39 = vld [vmem:[%s4013_s12 + $0x340] sm:$0xff]  ;;  %v2942_v40 = vld [vmem:[%s4013_s12 + $0x348] sm:$0xff] }
 0x266   : > { %2889 = vst [vmem:[%s4443_s5 + $0x4e0] sm:$0xff] %v2888_v14  ;;  %2891 = vst [vmem:[%s4443_s5 + $0x4e8] sm:$0xff] %v2890_v15  ;;  %v2944_v41 = vld [vmem:[%s4013_s12 + $0x350] sm:$0xff]  ;;  %v2946_v42 = vld [vmem:[%s4013_s12 + $0x358] sm:$0xff] }
 0x267   : > { %2893 = vst [vmem:[%s4443_s5 + $0x4f0] sm:$0xff] %v2892_v16  ;;  %2895 = vst [vmem:[%s4443_s5 + $0x510] sm:$0xff] %v2894_v17  ;;  %v2948_v43 = vld [vmem:[%s4013_s12 + $0x360] sm:$0xff]  ;;  %v2950_v44 = vld [vmem:[%s4013_s12 + $0x368] sm:$0xff] }
 0x268   : > { %2897 = vst [vmem:[%s4443_s5 + $0x518] sm:$0xff] %v2896_v18  ;;  %2899 = vst [vmem:[%s4443_s5 + $0x520] sm:$0xff] %v2898_v19  ;;  %v2952_v45 = vld [vmem:[%s4013_s12 + $0x370] sm:$0xff]  ;;  %v2954_v46 = vld [vmem:[%s4013_s12 + $0x378] sm:$0xff] }
 0x269   : > { %2901 = vst [vmem:[%s4443_s5 + $0x540] sm:$0xff] %v2900_v20  ;;  %2903 = vst [vmem:[%s4443_s5 + $0x548] sm:$0xff] %v2902_v21  ;;  %v2956_v47 = vld [vmem:[%s4013_s12 + $0x380] sm:$0xff]  ;;  %v2958_v48 = vld [vmem:[%s4013_s12 + $0x388] sm:$0xff] }
 0x26a   : > { %2905 = vst [vmem:[%s4443_s5 + $0x550] sm:$0xff] %v2904_v22  ;;  %2907 = vst [vmem:[%s4443_s5 + $0x570] sm:$0xff] %v2906_v23  ;;  %v2960_v49 = vld [vmem:[%s4013_s12 + $0x390] sm:$0xff]  ;;  %v2962_v50 = vld [vmem:[%s4013_s12 + $0x398] sm:$0xff] }
 0x26b   : > { %2909 = vst [vmem:[%s4443_s5 + $0x578] sm:$0xff] %v2908_v24  ;;  %2911 = vst [vmem:[%s4443_s5 + $0x580] sm:$0xff] %v2910_v25  ;;  %v2964_v51 = vld [vmem:[%s4013_s12 + $0x3a0] sm:$0xff]  ;;  %v2966_v52 = vld [vmem:[%s4013_s12 + $0x3a8] sm:$0xff] }
 0x26c   : > { %2913 = vst [vmem:[%s4443_s5 + $0x5a0] sm:$0xff] %v2912_v26  ;;  %2915 = vst [vmem:[%s4443_s5 + $0x5a8] sm:$0xff] %v2914_v27  ;;  %v2968_v53 = vld [vmem:[%s4013_s12 + $0x3b0] sm:$0xff]  ;;  %v2970_v54 = vld [vmem:[%s4013_s12 + $0x3b8] sm:$0xff] }
 0x26d   : > { %2917 = vst [vmem:[%s4443_s5 + $0x5b0] sm:$0xff] %v2916_v28  ;;  %2919 = vst [vmem:[%s4443_s5 + $0x5d0] sm:$0xff] %v2918_v29  ;;  %v2972_v55 = vld [vmem:[%s4013_s12 + $0x3c0] sm:$0xff]  ;;  %v2974_v56 = vld [vmem:[%s4013_s12 + $0x3c8] sm:$0xff] }
 0x26e   : > { %2921 = vst [vmem:[%s4443_s5 + $0x5d8] sm:$0xff] %v2920_v30  ;;  %2923 = vst [vmem:[%s4443_s5 + $0x5e0] sm:$0xff] %v2922_v31  ;;  %v2976_v57 = vld [vmem:[%s4013_s12 + $0x3d0] sm:$0xff]  ;;  %v2978_v58 = vld [vmem:[%s4013_s12 + $0x3d8] sm:$0xff] }
 0x26f   : > { %2925 = vst [vmem:[%s4443_s5 + $0x600] sm:$0xff] %v2924_v32  ;;  %2927 = vst [vmem:[%s4443_s5 + $0x608] sm:$0xff] %v2926_v33  ;;  %v2980_v59 = vld [vmem:[%s4013_s12 + $0x3e0] sm:$0xff]  ;;  %v2982_v60 = vld [vmem:[%s4013_s12 + $0x3e8] sm:$0xff] }
 0x270   : > { %2929 = vst [vmem:[%s4443_s5 + $0x610] sm:$0xff] %v2928_v34  ;;  %2931 = vst [vmem:[%s4443_s5 + $0x630] sm:$0xff] %v2930_v35  ;;  %v2984_v61 = vld [vmem:[%s4013_s12 + $0x3f0] sm:$0xff]  ;;  %v2986_v62 = vld [vmem:[%s4013_s12 + $0x3f8] sm:$0xff] }
 0x271   : > { %2933 = vst [vmem:[%s4443_s5 + $0x638] sm:$0xff] %v2932_v36  ;;  %2935 = vst [vmem:[%s4443_s5 + $0x640] sm:$0xff] %v2934_v37  ;;  %v2988_v9 = vld [vmem:[%s4013_s12 + $0x400] sm:$0xff]  ;;  %v2990_v11 = vld [vmem:[%s4013_s12 + $0x408] sm:$0xff] }
 0x272   : > { %2937 = vst [vmem:[%s4443_s5 + $0x660] sm:$0xff] %v2936_v38  ;;  %2939 = vst [vmem:[%s4443_s5 + $0x668] sm:$0xff] %v2938_v0  ;;  %v2992_v13 = vld [vmem:[%s4013_s12 + $0x410] sm:$0xff]  ;;  %v2994_v63 = vld [vmem:[%s4013_s12 + $0x418] sm:$0xff] }
 0x273   : > { %2941 = vst [vmem:[%s4443_s5 + $0x670] sm:$0xff] %v2940_v39  ;;  %2943 = vst [vmem:[%s4443_s5 + $0x690] sm:$0xff] %v2942_v40  ;;  %v2996_v1 = vld [vmem:[%s4013_s12 + $0x420] sm:$0xff]  ;;  %v2998_v2 = vld [vmem:[%s4013_s12 + $0x428] sm:$0xff] }
 0x274   : > { %2945 = vst [vmem:[%s4443_s5 + $0x698] sm:$0xff] %v2944_v41  ;;  %2947 = vst [vmem:[%s4443_s5 + $0x6a0] sm:$0xff] %v2946_v42  ;;  %v3000_v3 = vld [vmem:[%s4013_s12 + $0x430] sm:$0xff]  ;;  %v3002_v4 = vld [vmem:[%s4013_s12 + $0x438] sm:$0xff] }
 0x275   : > { %2949 = vst [vmem:[%s4443_s5 + $0x6c0] sm:$0xff] %v2948_v43  ;;  %2951 = vst [vmem:[%s4443_s5 + $0x6c8] sm:$0xff] %v2950_v44  ;;  %v3004_v5 = vld [vmem:[%s4013_s12 + $0x440] sm:$0xff]  ;;  %v3006_v6 = vld [vmem:[%s4013_s12 + $0x448] sm:$0xff] }
 0x276   : > { %2953 = vst [vmem:[%s4443_s5 + $0x6d0] sm:$0xff] %v2952_v45  ;;  %2955 = vst [vmem:[%s4443_s5 + $0x6f0] sm:$0xff] %v2954_v46  ;;  %v3008_v7 = vld [vmem:[%s4013_s12 + $0x450] sm:$0xff]  ;;  %v3010_v8 = vld [vmem:[%s4013_s12 + $0x458] sm:$0xff] }
 0x277   : > { %2957 = vst [vmem:[%s4443_s5 + $0x6f8] sm:$0xff] %v2956_v47  ;;  %2959 = vst [vmem:[%s4443_s5 + $0x700] sm:$0xff] %v2958_v48  ;;  %v3012_v10 = vld [vmem:[%s4013_s12 + $0x460] sm:$0xff]  ;;  %v3014_v12 = vld [vmem:[%s4013_s12 + $0x468] sm:$0xff] }
 0x278   : > { %2961 = vst [vmem:[%s4443_s5 + $0x720] sm:$0xff] %v2960_v49  ;;  %2963 = vst [vmem:[%s4443_s5 + $0x728] sm:$0xff] %v2962_v50  ;;  %v3016_v14 = vld [vmem:[%s4013_s12 + $0x470] sm:$0xff]  ;;  %v3018_v15 = vld [vmem:[%s4013_s12 + $0x478] sm:$0xff] }
 0x279   : > { %2965 = vst [vmem:[%s4443_s5 + $0x730] sm:$0xff] %v2964_v51  ;;  %2967 = vst [vmem:[%s4443_s5 + $0x750] sm:$0xff] %v2966_v52  ;;  %v3020_v16 = vld [vmem:[%s4013_s12 + $0x480] sm:$0xff]  ;;  %v3022_v17 = vld [vmem:[%s4013_s12 + $0x488] sm:$0xff] }
 0x27a   : > { %2969 = vst [vmem:[%s4443_s5 + $0x758] sm:$0xff] %v2968_v53  ;;  %2971 = vst [vmem:[%s4443_s5 + $0x760] sm:$0xff] %v2970_v54  ;;  %v3024_v18 = vld [vmem:[%s4013_s12 + $0x490] sm:$0xff]  ;;  %v3026_v19 = vld [vmem:[%s4013_s12 + $0x498] sm:$0xff] }
 0x27b   : > { %2973 = vst [vmem:[%s4443_s5 + $0x780] sm:$0xff] %v2972_v55  ;;  %2975 = vst [vmem:[%s4443_s5 + $0x788] sm:$0xff] %v2974_v56  ;;  %v3028_v20 = vld [vmem:[%s4013_s12 + $0x4a0] sm:$0xff]  ;;  %v3030_v21 = vld [vmem:[%s4013_s12 + $0x4a8] sm:$0xff] }
 0x27c   : > { %2977 = vst [vmem:[%s4443_s5 + $0x790] sm:$0xff] %v2976_v57  ;;  %2979 = vst [vmem:[%s4443_s5 + $0x7b0] sm:$0xff] %v2978_v58  ;;  %v3032_v22 = vld [vmem:[%s4013_s12 + $0x4b0] sm:$0xff]  ;;  %v3034_v23 = vld [vmem:[%s4013_s12 + $0x4b8] sm:$0xff] }
 0x27d   : > { %2981 = vst [vmem:[%s4443_s5 + $0x7b8] sm:$0xff] %v2980_v59  ;;  %2983 = vst [vmem:[%s4443_s5 + $0x7c0] sm:$0xff] %v2982_v60  ;;  %v3036_v24 = vld [vmem:[%s4013_s12 + $0x4c0] sm:$0xff]  ;;  %v3038_v25 = vld [vmem:[%s4013_s12 + $0x4c8] sm:$0xff] }
 0x27e   : > { %2985 = vst [vmem:[%s4443_s5 + $0x7e0] sm:$0xff] %v2984_v61  ;;  %2987 = vst [vmem:[%s4443_s5 + $0x7e8] sm:$0xff] %v2986_v62  ;;  %v3040_v26 = vld [vmem:[%s4013_s12 + $0x4d0] sm:$0xff]  ;;  %v3042_v27 = vld [vmem:[%s4013_s12 + $0x4d8] sm:$0xff] }
 0x27f   : > { %2989 = vst [vmem:[%s4443_s5 + $0x7f0] sm:$0xff] %v2988_v9  ;;  %2991 = vst [vmem:[%s4443_s5 + $0x810] sm:$0xff] %v2990_v11  ;;  %v3044_v28 = vld [vmem:[%s4013_s12 + $0x4e0] sm:$0xff]  ;;  %v3046_v29 = vld [vmem:[%s4013_s12 + $0x4e8] sm:$0xff] }
 0x280   : > { %2993 = vst [vmem:[%s4443_s5 + $0x818] sm:$0xff] %v2992_v13  ;;  %2995 = vst [vmem:[%s4443_s5 + $0x820] sm:$0xff] %v2994_v63  ;;  %v3048_v30 = vld [vmem:[%s4013_s12 + $0x4f0] sm:$0xff]  ;;  %v3050_v31 = vld [vmem:[%s4013_s12 + $0x4f8] sm:$0xff] }
 0x281   : > { %2997 = vst [vmem:[%s4443_s5 + $0x840] sm:$0xff] %v2996_v1  ;;  %2999 = vst [vmem:[%s4443_s5 + $0x848] sm:$0xff] %v2998_v2  ;;  %v3052_v32 = vld [vmem:[%s4013_s12 + $0x500] sm:$0xff]  ;;  %v3054_v33 = vld [vmem:[%s4013_s12 + $0x508] sm:$0xff] }
 0x282   : > { %3001 = vst [vmem:[%s4443_s5 + $0x850] sm:$0xff] %v3000_v3  ;;  %3003 = vst [vmem:[%s4443_s5 + $0x870] sm:$0xff] %v3002_v4  ;;  %v3056_v34 = vld [vmem:[%s4013_s12 + $0x510] sm:$0xff]  ;;  %v3058_v35 = vld [vmem:[%s4013_s12 + $0x518] sm:$0xff] }
 0x283   : > { %3005 = vst [vmem:[%s4443_s5 + $0x878] sm:$0xff] %v3004_v5  ;;  %3007 = vst [vmem:[%s4443_s5 + $0x880] sm:$0xff] %v3006_v6  ;;  %v3060_v36 = vld [vmem:[%s4013_s12 + $0x520] sm:$0xff]  ;;  %v3062_v37 = vld [vmem:[%s4013_s12 + $0x528] sm:$0xff] }
 0x284   : > { %3009 = vst [vmem:[%s4443_s5 + $0x8a0] sm:$0xff] %v3008_v7  ;;  %3011 = vst [vmem:[%s4443_s5 + $0x8a8] sm:$0xff] %v3010_v8  ;;  %v3064_v38 = vld [vmem:[%s4013_s12 + $0x530] sm:$0xff]  ;;  %v3066_v0 = vld [vmem:[%s4013_s12 + $0x538] sm:$0xff] }
 0x285   : > { %3013 = vst [vmem:[%s4443_s5 + $0x8b0] sm:$0xff] %v3012_v10  ;;  %3015 = vst [vmem:[%s4443_s5 + $0x8d0] sm:$0xff] %v3014_v12  ;;  %v3068_v39 = vld [vmem:[%s4013_s12 + $0x540] sm:$0xff]  ;;  %v3070_v40 = vld [vmem:[%s4013_s12 + $0x548] sm:$0xff] }
 0x286   : > { %3017 = vst [vmem:[%s4443_s5 + $0x8d8] sm:$0xff] %v3016_v14  ;;  %3019 = vst [vmem:[%s4443_s5 + $0x8e0] sm:$0xff] %v3018_v15  ;;  %v3072_v41 = vld [vmem:[%s4013_s12 + $0x550] sm:$0xff]  ;;  %v3074_v42 = vld [vmem:[%s4013_s12 + $0x558] sm:$0xff] }
 0x287   : > { %3021 = vst [vmem:[%s4443_s5 + $0x900] sm:$0xff] %v3020_v16  ;;  %3023 = vst [vmem:[%s4443_s5 + $0x908] sm:$0xff] %v3022_v17  ;;  %v3076_v43 = vld [vmem:[%s4013_s12 + $0x560] sm:$0xff]  ;;  %v3078_v44 = vld [vmem:[%s4013_s12 + $0x568] sm:$0xff] }
 0x288   : > { %3025 = vst [vmem:[%s4443_s5 + $0x910] sm:$0xff] %v3024_v18  ;;  %3027 = vst [vmem:[%s4443_s5 + $0x930] sm:$0xff] %v3026_v19  ;;  %v3080_v45 = vld [vmem:[%s4013_s12 + $0x570] sm:$0xff]  ;;  %v3082_v46 = vld [vmem:[%s4013_s12 + $0x578] sm:$0xff] }
 0x289   : > { %3029 = vst [vmem:[%s4443_s5 + $0x938] sm:$0xff] %v3028_v20  ;;  %3031 = vst [vmem:[%s4443_s5 + $0x940] sm:$0xff] %v3030_v21  ;;  %v3084_v47 = vld [vmem:[%s4013_s12 + $0x580] sm:$0xff]  ;;  %v3086_v48 = vld [vmem:[%s4013_s12 + $0x588] sm:$0xff] }
 0x28a   : > { %3033 = vst [vmem:[%s4443_s5 + $0x960] sm:$0xff] %v3032_v22  ;;  %3035 = vst [vmem:[%s4443_s5 + $0x968] sm:$0xff] %v3034_v23  ;;  %v3088_v49 = vld [vmem:[%s4013_s12 + $0x590] sm:$0xff]  ;;  %v3090_v50 = vld [vmem:[%s4013_s12 + $0x598] sm:$0xff] }
 0x28b   : > { %3037 = vst [vmem:[%s4443_s5 + $0x970] sm:$0xff] %v3036_v24  ;;  %3039 = vst [vmem:[%s4443_s5 + $0x990] sm:$0xff] %v3038_v25  ;;  %v3092_v51 = vld [vmem:[%s4013_s12 + $0x5a0] sm:$0xff]  ;;  %v3094_v52 = vld [vmem:[%s4013_s12 + $0x5a8] sm:$0xff] }
 0x28c   : > { %3041 = vst [vmem:[%s4443_s5 + $0x998] sm:$0xff] %v3040_v26  ;;  %3043 = vst [vmem:[%s4443_s5 + $0x9a0] sm:$0xff] %v3042_v27  ;;  %v3096_v53 = vld [vmem:[%s4013_s12 + $0x5b0] sm:$0xff]  ;;  %v3098_v54 = vld [vmem:[%s4013_s12 + $0x5b8] sm:$0xff] }
 0x28d   : > { %3045 = vst [vmem:[%s4443_s5 + $0x9c0] sm:$0xff] %v3044_v28  ;;  %3047 = vst [vmem:[%s4443_s5 + $0x9c8] sm:$0xff] %v3046_v29  ;;  %v3100_v55 = vld [vmem:[%s4013_s12 + $0x5c0] sm:$0xff]  ;;  %v3102_v56 = vld [vmem:[%s4013_s12 + $0x5c8] sm:$0xff] }
 0x28e   : > { %3049 = vst [vmem:[%s4443_s5 + $0x9d0] sm:$0xff] %v3048_v30  ;;  %3051 = vst [vmem:[%s4443_s5 + $0x9f0] sm:$0xff] %v3050_v31  ;;  %v3104_v57 = vld [vmem:[%s4013_s12 + $0x5d0] sm:$0xff]  ;;  %v3106_v58 = vld [vmem:[%s4013_s12 + $0x5d8] sm:$0xff] }
 0x28f   : > { %3053 = vst [vmem:[%s4443_s5 + $0x9f8] sm:$0xff] %v3052_v32  ;;  %3055 = vst [vmem:[%s4443_s5 + $0xa00] sm:$0xff] %v3054_v33  ;;  %v3108_v59 = vld [vmem:[%s4013_s12 + $0x5e0] sm:$0xff]  ;;  %v3110_v60 = vld [vmem:[%s4013_s12 + $0x5e8] sm:$0xff] }
 0x290   : > { %3057 = vst [vmem:[%s4443_s5 + $0xa20] sm:$0xff] %v3056_v34  ;;  %3059 = vst [vmem:[%s4443_s5 + $0xa28] sm:$0xff] %v3058_v35  ;;  %v3112_v61 = vld [vmem:[%s4013_s12 + $0x5f0] sm:$0xff]  ;;  %v3114_v62 = vld [vmem:[%s4013_s12 + $0x5f8] sm:$0xff] }
 0x291   : > { %3061 = vst [vmem:[%s4443_s5 + $0xa30] sm:$0xff] %v3060_v36  ;;  %3063 = vst [vmem:[%s4443_s5 + $0xa50] sm:$0xff] %v3062_v37 }
 0x292   : > { %3065 = vst [vmem:[%s4443_s5 + $0xa58] sm:$0xff] %v3064_v38  ;;  %3067 = vst [vmem:[%s4443_s5 + $0xa60] sm:$0xff] %v3066_v0 }
 0x293   : > { %3069 = vst [vmem:[%s4443_s5 + $0xa80] sm:$0xff] %v3068_v39  ;;  %3071 = vst [vmem:[%s4443_s5 + $0xa88] sm:$0xff] %v3070_v40 }
 0x294   : > { %3073 = vst [vmem:[%s4443_s5 + $0xa90] sm:$0xff] %v3072_v41  ;;  %3075 = vst [vmem:[%s4443_s5 + $0xab0] sm:$0xff] %v3074_v42 }
 0x295   : > { %3077 = vst [vmem:[%s4443_s5 + $0xab8] sm:$0xff] %v3076_v43  ;;  %3079 = vst [vmem:[%s4443_s5 + $0xac0] sm:$0xff] %v3078_v44 }
 0x296   : > { %3081 = vst [vmem:[%s4443_s5 + $0xae0] sm:$0xff] %v3080_v45  ;;  %3083 = vst [vmem:[%s4443_s5 + $0xae8] sm:$0xff] %v3082_v46 }
 0x297   : > { %3085 = vst [vmem:[%s4443_s5 + $0xaf0] sm:$0xff] %v3084_v47  ;;  %3087 = vst [vmem:[%s4443_s5 + $0xb10] sm:$0xff] %v3086_v48 }
 0x298   : > { %3089 = vst [vmem:[%s4443_s5 + $0xb18] sm:$0xff] %v3088_v49  ;;  %3091 = vst [vmem:[%s4443_s5 + $0xb20] sm:$0xff] %v3090_v50 }
 0x299   : > { %3093 = vst [vmem:[%s4443_s5 + $0xb40] sm:$0xff] %v3092_v51  ;;  %3095 = vst [vmem:[%s4443_s5 + $0xb48] sm:$0xff] %v3094_v52 }
 0x29a   : > { %3097 = vst [vmem:[%s4443_s5 + $0xb50] sm:$0xff] %v3096_v53  ;;  %3099 = vst [vmem:[%s4443_s5 + $0xb70] sm:$0xff] %v3098_v54 }
 0x29b   : > { %3101 = vst [vmem:[%s4443_s5 + $0xb78] sm:$0xff] %v3100_v55  ;;  %3103 = vst [vmem:[%s4443_s5 + $0xb80] sm:$0xff] %v3102_v56 }
 0x29c   : > { %3105 = vst [vmem:[%s4443_s5 + $0xba0] sm:$0xff] %v3104_v57  ;;  %3107 = vst [vmem:[%s4443_s5 + $0xba8] sm:$0xff] %v3106_v58 }
 0x29d   : > { %3109 = vst [vmem:[%s4443_s5 + $0xbb0] sm:$0xff] %v3108_v59  ;;  %3111 = vst [vmem:[%s4443_s5 + $0xbd0] sm:$0xff] %v3110_v60 }
 0x29e   : > { %3113 = vst [vmem:[%s4443_s5 + $0xbd8] sm:$0xff] %v3112_v61  ;;  %3115 = vst [vmem:[%s4443_s5 + $0xbe0] sm:$0xff] %v3114_v62 }
 0x29f PF: > { %s19_s24 = sadd.s32 1, %s3547_s24   ;;  %s4891_s29 = sld [smem:[#allocation13_spill]] }
 0x2a0   : > { %p4818_p11 = scmp.ge.s32.totalorder %s19_s24, 6   ;;  %s4892_s7 = sld [smem:[#allocation11_spill]] }
 0x2a1   : > { %s4893_s30 = sld [smem:[#allocation12_spill]]  ;;  %s4894_s12 = smov %s3503_s13 }
 0x2a2   : > { %s4895_s13 = smov %s3732_s26  ;;  %s4896_s14 = smov %s3511_s15 }
 0x2a3   : > { %s4897_s15 = smov %s3515_s16  ;;  %s4899_s17 = smov %s3523_s18 }
 0x2a4   : > { %s4900_s18 = smov %s3527_s19  ;;  %s4901_s19 = smov %s3729_s6 }
 0x2a5   : > { %s4898_s16 = smov %s4891_s29  ;;  %s4902_s20 = smov %s3539_s22 }
 0x2a6   : > { %s4903_s21 = smov %s3543_s23  ;;  %s4904_s22 = smov %s4892_s7 }
 0x2a7   : > { %s4905_s23 = smov %s4893_s30  ;;  %18 = sbr.rel (!%p4818_p11) target bundleno = 14 (0xe), region = 119 }
 0x2ac   :  { %3131 = vsyncpa [#allocation4], 1 }
 0x2ad   :  { %3133 = vsyncpa [#allocation4 + $0x1], 1 }
 0x2ae   :  { %3134 = vsyncpa [#allocation6], 1 }
 0x2af   :  { %3136 = vsyncpa [#allocation6 + $0x1], 1 }

// kernel: attention_forward.7
= control target key start
LH: loop header
LB: loop body
LE: loop exit
PB: predicated region body
PF: predicated region fallthrough
CT: control target
= control target key end

     0   :  { %8 = vsyncpa [#allocation4], 0  ;;  %s2908_s0 = inlined_call_operand.vmem [shape: f32[1024,256], index: 0, kind: input, shape index: {}]   ;;  %s2909_s1 = inlined_call_operand.vmem [shape: f32[256,256], index: 1, kind: input, shape index: {}]   ;;  %s2910_s2 = inlined_call_operand.vmem [shape: f32[1,256], index: 2, kind: input, shape index: {}]   ;;  %s2911_s3 = inlined_call_operand.hbm [shape: f32[1024,256], index: 3, kind: output, shape index: {}]  }
   0x1   :  { %10 = vsyncpa [#allocation4 + $0x1], 0  ;;  %s2203_s12 = smov 0   ;;  %s2205_s13 = smov 0  }
   0x2   :  { %s2207_s14 = smov 0   ;;  %s2209_s15 = smov 0  }
   0x3   :  { %s2211_s16 = smov 0   ;;  %s2213_s17 = smov 0  }
   0x4 LB: > { %s1961_s18 = sadd.s32 4294967295, %s2178_s17   ;;  %s1962_s19 = sadd.s32 4294967294, %s2178_s17   ;;  %s2178_s17 = sphi %s2213_s17, %s16_s17   ;;  %s2174_s16 = sphi %s2211_s16, %s2918_s16   ;;  %s2170_s15 = sphi %s2209_s15, %s2917_s15   ;;  %s2166_s14 = sphi %s2207_s14, %s2916_s14   ;;  %s2162_s13 = sphi %s2205_s13, %s2915_s13   ;;  %s2158_s12 = sphi %s2203_s12, %s2914_s12  }
   0x5   : > { %s35_s20 = sadd.s32 1, %s2174_s16  ;;  %s126_s21 = sadd.s32 1, %s2166_s14 }
   0x6   : > { %p37_p0 = scmp.ge.s32.totalorder %s35_s20, 2  ;;  %p136_p1 = scmp.ne.s32.totalorder %s2166_s14, %s2162_s13 }
   0x7   : > { %p137_p2 = scmp.eq.s32.totalorder %s1961_s18, 1  ;;  %p142_p3 = scmp.ne.s32.totalorder %s2162_s13, %s2158_s12 }
   0x8   : > { %s2920_s20 = smov (%p37_p0, %s35_s20), 0  ;;  %p143_p5 = scmp.eq.s32.totalorder %s1962_s19, 1 }
   0x9   : > { %p2243_p4 = por %p137_p2, %p136_p1  ;;  %s121_s23 = ssub.s32 %s2174_s16, %s2920_s20 }
   0xa   : > { %p1967_p6 = scmp.ge.s32.totalorder %s2178_s17, 1  ;;  %p124_p7 = scmp.eq.s32.totalorder %s121_s23, 0 }
   0xb   : > { %p2250_p8 = por %p143_p5, %p142_p3  ;;  %p199_p9 = scmp.lt.s32.totalorder %s2178_s17, 3 }
   0xc   : > { %s2256_s25 = scalar_select %p124_p7, %s2166_s14, %s126_s21  }
   0xd   : > { %p200_p10 = pnand %p1967_p6, %p199_p9 }
   0xe   : > { %s1969_s10 = sshll.u32 (!%p200_p10), %s2170_s15, 6  ;;  %s239_s21 = sand.u32 (!%p200_p10), 1, %s2162_s13  }
   0xf   : > { %203 = sbr.rel (%p200_p10) target bundleno = 421 (0x1a5), region = 32  ;;  %p244_p11 = scmp.lt.s32.totalorder (!%p200_p10), %s1969_s10, 127 }
  0x10   : > { %s1980_s29 = sshll.u32 (!%p200_p10), %s2170_s15, 14  ;;  %s2863_s15 = scalar_lea.sflag (!%p200_p10), [#allocation4], %s239_s21 }
  0x11   : > { %s2851_s6 = scalar_lea.hbm (!%p200_p10), %s2911_s3, %s1980_s29 }
  0x14   : > { %v692_v0 = vld [vmem:[%s2909_s1 + $0xf8] sm:$0xff]  ;;  %v691_v1 = vld [vmem:[%s2909_s1 + $0xf0] sm:$0xff]  ;;  %v690_v2 = vld [vmem:[%s2909_s1 + $0xe8] sm:$0xff]  ;;  %s2922_s10 = smov (!%p244_p11, %s1969_s10), 127 }
  0x15   : > { %725 = vmatprep.subr.mxu0 %v692_v0  ;;  %1981 = vmatprep.subr.mxu1 %v692_v0  ;;  %v689_v3 = vld [vmem:[%s2909_s1 + $0xe0] sm:$0xff]  ;;  %v688_v4 = vld [vmem:[%s2909_s1 + $0xd8] sm:$0xff]  ;;  %v687_v5 = vld [vmem:[%s2909_s1 + $0xd0] sm:$0xff]  ;;  %s1978_s27 = sshll.u32 %s2922_s10, 4  ;;  %s2180_s10 = smov [#allocation3]  }
  0x16   : > { %726 = vmatpush1.msra.mxu0 %v691_v1  ;;  %2013 = vmatpush1.msra.mxu1 %v691_v1  ;;  %v686_v6 = vld [vmem:[%s2909_s1 + $0xc8] sm:$0xff]  ;;  %v685_v7 = vld [vmem:[%s2909_s1 + $0xc0] sm:$0xff]  ;;  %v684_v8 = vld [vmem:[%s2909_s1 + $0xb8] sm:$0xff]  ;;  %s2448_s8 = scalar_lea.vmem %s2908_s0, %s1978_s27  ;;  %s1968_s27 = sshll.u32 %s239_s21, 10 }
  0x17   : > { %727 = vmatprep.subr.mxu0 %v690_v2  ;;  %1982 = vmatprep.subr.mxu1 %v690_v2  ;;  %v683_v9 = vld [vmem:[%s2909_s1 + $0xb0] sm:$0xff]  ;;  %v682_v10 = vld [vmem:[%s2909_s1 + $0xa8] sm:$0xff]  ;;  %v681_v11 = vld [vmem:[%s2909_s1 + $0xa0] sm:$0xff]  ;;  %s2596_s28 = scalar_lea.vmem [#allocation3], %s1968_s27 }
  0x18   : > { %728 = vmatpush1.msra.mxu0 %v689_v3  ;;  %2014 = vmatpush1.msra.mxu1 %v689_v3  ;;  %v680_v12 = vld [vmem:[%s2909_s1 + $0x98] sm:$0xff]  ;;  %v679_v13 = vld [vmem:[%s2909_s1 + $0x90] sm:$0xff]  ;;  %v678_v14 = vld [vmem:[%s2909_s1 + $0x88] sm:$0xff]  ;;  %s1846_s30 = sshll.u32 %s2596_s28, 4  ;;  %s2853_s30 = int_to_ptr.vmem [resolvable:$true] %s1846_s30 }
  0x19   : > { %729 = vmatprep.subr.mxu0 %v688_v4  ;;  %1983 = vmatprep.subr.mxu1 %v688_v4  ;;  %v677_v15 = vld [vmem:[%s2909_s1 + $0x80] sm:$0xff]  ;;  %v676_v16 = vld [vmem:[%s2909_s1 + $0x78] sm:$0xff]  ;;  %v675_v17 = vld [vmem:[%s2909_s1 + $0x70] sm:$0xff]  ;;  %s2102_s7 = scalar_lea.vmem %s2853_s30, 16384 }
  0x1a   : > { %730 = vmatpush1.msra.mxu0 %v687_v5  ;;  %2015 = vmatpush1.msra.mxu1 %v687_v5  ;;  %v674_v18 = vld [vmem:[%s2909_s1 + $0x68] sm:$0xff]  ;;  %v673_v19 = vld [vmem:[%s2909_s1 + $0x60] sm:$0xff]  ;;  %v672_v20 = vld [vmem:[%s2909_s1 + $0x58] sm:$0xff]  ;;  %p2103_p12 = scmp.ne.s32.totalorder %s2853_s30, %s2102_s7 }
  0x1b   : > { %731 = vmatprep.subr.mxu0 %v686_v6  ;;  %1984 = vmatprep.subr.mxu1 %v686_v6  ;;  %v671_v21 = vld [vmem:[%s2909_s1 + $0x50] sm:$0xff]  ;;  %v670_v22 = vld [vmem:[%s2909_s1 + $0x48] sm:$0xff]  ;;  %v669_v23 = vld [vmem:[%s2909_s1 + $0x40] sm:$0xff] }
  0x1c   : > { %732 = vmatpush1.msra.mxu0 %v685_v7  ;;  %2016 = vmatpush1.msra.mxu1 %v685_v7  ;;  %v668_v24 = vld [vmem:[%s2909_s1 + $0x38] sm:$0xff]  ;;  %v667_v25 = vld [vmem:[%s2909_s1 + $0x30] sm:$0xff]  ;;  %v666_v26 = vld [vmem:[%s2909_s1 + $0x28] sm:$0xff]  ;;  %p2104_p13 = pnand %p2103_p12, %p2243_p4 }
  0x1d   : > { %733 = vmatprep.subr.mxu0 %v684_v8  ;;  %1985 = vmatprep.subr.mxu1 %v684_v8  ;;  %v665_v27 = vld [vmem:[%s2909_s1 + $0x20] sm:$0xff]  ;;  %v664_v28 = vld [vmem:[%s2909_s1 + $0x18] sm:$0xff]  ;;  %v663_v29 = vld [vmem:[%s2909_s1 + $0x10] sm:$0xff] }
  0x1e   : > { %734 = vmatpush1.msra.mxu0 %v683_v9  ;;  %2017 = vmatpush1.msra.mxu1 %v683_v9  ;;  %v662_v30 = vld [vmem:[%s2909_s1 + $0x8] sm:$0xff]  ;;  %v661_v31 = vld [vmem:[%s2909_s1] sm:$0xff]  ;;  %v724_v32 = vld [vmem:[%s2909_s1 + $0x1f8] sm:$0xff]  ;;  %p2105_p0 = pneg %p2104_p13 }
  0x1f   : > { %735 = vmatprep.subr.mxu0 %v682_v10  ;;  %1986 = vmatprep.subr.mxu1 %v682_v10  ;;  %v723_v33 = vld [vmem:[%s2909_s1 + $0x1f0] sm:$0xff]  ;;  %v722_v34 = vld [vmem:[%s2909_s1 + $0x1e8] sm:$0xff]  ;;  %v721_v35 = vld [vmem:[%s2909_s1 + $0x1e0] sm:$0xff] }
  0x20   : > { %736 = vmatpush1.msra.mxu0 %v681_v11  ;;  %2018 = vmatpush1.msra.mxu1 %v681_v11  ;;  %v720_v36 = vld [vmem:[%s2909_s1 + $0x1d8] sm:$0xff]  ;;  %v719_v37 = vld [vmem:[%s2909_s1 + $0x1d0] sm:$0xff]  ;;  %v718_v38 = vld [vmem:[%s2909_s1 + $0x1c8] sm:$0xff] }
  0x21   : > { %737 = vmatprep.subr.mxu0 %v680_v12  ;;  %1987 = vmatprep.subr.mxu1 %v680_v12  ;;  %v717_v39 = vld [vmem:[%s2909_s1 + $0x1c0] sm:$0xff]  ;;  %v716_v40 = vld [vmem:[%s2909_s1 + $0x1b8] sm:$0xff]  ;;  %v715_v41 = vld [vmem:[%s2909_s1 + $0x1b0] sm:$0xff] }
  0x22   : > { %738 = vmatpush1.msra.mxu0 %v679_v13  ;;  %2019 = vmatpush1.msra.mxu1 %v679_v13  ;;  %v714_v42 = vld [vmem:[%s2909_s1 + $0x1a8] sm:$0xff]  ;;  %v713_v43 = vld [vmem:[%s2909_s1 + $0x1a0] sm:$0xff]  ;;  %v712_v44 = vld [vmem:[%s2909_s1 + $0x198] sm:$0xff] }
  0x23   : > { %739 = vmatprep.subr.mxu0 %v678_v14  ;;  %1988 = vmatprep.subr.mxu1 %v678_v14  ;;  %v711_v45 = vld [vmem:[%s2909_s1 + $0x190] sm:$0xff]  ;;  %v710_v46 = vld [vmem:[%s2909_s1 + $0x188] sm:$0xff]  ;;  %v709_v47 = vld [vmem:[%s2909_s1 + $0x180] sm:$0xff] }
  0x24   : > { %740 = vmatpush1.msra.mxu0 %v677_v15  ;;  %2020 = vmatpush1.msra.mxu1 %v677_v15  ;;  %v708_v48 = vld [vmem:[%s2909_s1 + $0x178] sm:$0xff]  ;;  %v707_v49 = vld [vmem:[%s2909_s1 + $0x170] sm:$0xff]  ;;  %v706_v50 = vld [vmem:[%s2909_s1 + $0x168] sm:$0xff] }
  0x25   : > { %741 = vmatprep.subr.mxu0 %v676_v16  ;;  %1989 = vmatprep.subr.mxu1 %v676_v16  ;;  %v705_v51 = vld [vmem:[%s2909_s1 + $0x160] sm:$0xff]  ;;  %v704_v52 = vld [vmem:[%s2909_s1 + $0x158] sm:$0xff]  ;;  %v703_v53 = vld [vmem:[%s2909_s1 + $0x150] sm:$0xff] }
  0x26   : > { %742 = vmatpush1.msra.mxu0 %v675_v17  ;;  %2021 = vmatpush1.msra.mxu1 %v675_v17  ;;  %v702_v54 = vld [vmem:[%s2909_s1 + $0x148] sm:$0xff]  ;;  %v701_v55 = vld [vmem:[%s2909_s1 + $0x140] sm:$0xff]  ;;  %v700_v56 = vld [vmem:[%s2909_s1 + $0x138] sm:$0xff] }
  0x27   : > { %743 = vmatprep.subr.mxu0 %v674_v18  ;;  %1990 = vmatprep.subr.mxu1 %v674_v18  ;;  %v699_v57 = vld [vmem:[%s2909_s1 + $0x130] sm:$0xff]  ;;  %v698_v58 = vld [vmem:[%s2909_s1 + $0x128] sm:$0xff]  ;;  %v697_v59 = vld [vmem:[%s2909_s1 + $0x120] sm:$0xff] }
  0x28   : > { %744 = vmatpush1.msra.mxu0 %v673_v19  ;;  %2022 = vmatpush1.msra.mxu1 %v673_v19  ;;  %v696_v60 = vld [vmem:[%s2909_s1 + $0x118] sm:$0xff]  ;;  %v695_v61 = vld [vmem:[%s2909_s1 + $0x110] sm:$0xff]  ;;  %v694_v62 = vld [vmem:[%s2909_s1 + $0x108] sm:$0xff] }
  0x29   : > { %745 = vmatprep.subr.mxu0 %v672_v20  ;;  %1991 = vmatprep.subr.mxu1 %v672_v20  ;;  %v693_v63 = vld [vmem:[%s2909_s1 + $0x100] sm:$0xff]  ;;  %v534_v0 = vld [vmem:[%s2448_s8 + $0x8] sm:$0xff]  ;;  %v536_v4 = vld [vmem:[%s2448_s8 + $0x18] sm:$0xff] }
  0x2a   : > { %746 = vmatpush1.msra.mxu0 %v671_v21  ;;  %2023 = vmatpush1.msra.mxu1 %v671_v21  ;;  %v598_v1 = vld [vmem:[%s2448_s8 + $0x208] sm:$0xff]  ;;  %v533_v2 = vld [vmem:[%s2448_s8] sm:$0xff]  ;;  %v600_v5 = vld [vmem:[%s2448_s8 + $0x218] sm:$0xff] }
  0x2b   : > { %747 = vmatprep.subr.mxu0 %v670_v22  ;;  %1992 = vmatprep.subr.mxu1 %v670_v22  ;;  %v597_v3 = vld [vmem:[%s2448_s8 + $0x200] sm:$0xff]  ;;  %v535_v6 = vld [vmem:[%s2448_s8 + $0x10] sm:$0xff]  ;;  %v538_v8 = vld [vmem:[%s2448_s8 + $0x28] sm:$0xff] }
  0x2c   : > { %748 = vmatpush1.msra.mxu0 %v669_v23  ;;  %2024 = vmatpush1.msra.mxu1 %v669_v23  ;;  %v599_v7 = vld [vmem:[%s2448_s8 + $0x210] sm:$0xff]  ;;  %v602_v9 = vld [vmem:[%s2448_s8 + $0x228] sm:$0xff]  ;;  %v537_v10 = vld [vmem:[%s2448_s8 + $0x20] sm:$0xff] }
  0x2d   : > { %749 = vmatprep.subr.mxu0 %v668_v24  ;;  %1993 = vmatprep.subr.mxu1 %v668_v24  ;;  %v601_v11 = vld [vmem:[%s2448_s8 + $0x220] sm:$0xff]  ;;  %v540_v12 = vld [vmem:[%s2448_s8 + $0x38] sm:$0xff]  ;;  %v539_v14 = vld [vmem:[%s2448_s8 + $0x30] sm:$0xff] }
  0x2e   : > { %750 = vmatpush1.msra.mxu0 %v667_v25  ;;  %2025 = vmatpush1.msra.mxu1 %v667_v25  ;;  %v604_v13 = vld [vmem:[%s2448_s8 + $0x238] sm:$0xff]  ;;  %v603_v15 = vld [vmem:[%s2448_s8 + $0x230] sm:$0xff]  ;;  %v542_v16 = vld [vmem:[%s2448_s8 + $0x48] sm:$0xff] }
  0x2f   : > { %751 = vmatprep.subr.mxu0 %v666_v26  ;;  %1994 = vmatprep.subr.mxu1 %v666_v26  ;;  %v606_v17 = vld [vmem:[%s2448_s8 + $0x248] sm:$0xff]  ;;  %v541_v18 = vld [vmem:[%s2448_s8 + $0x40] sm:$0xff]  ;;  %v544_v20 = vld [vmem:[%s2448_s8 + $0x58] sm:$0xff] }
  0x30   : > { %752 = vmatpush1.msra.mxu0 %v665_v27  ;;  %2026 = vmatpush1.msra.mxu1 %v665_v27  ;;  %v605_v19 = vld [vmem:[%s2448_s8 + $0x240] sm:$0xff]  ;;  %v608_v21 = vld [vmem:[%s2448_s8 + $0x258] sm:$0xff]  ;;  %v543_v22 = vld [vmem:[%s2448_s8 + $0x50] sm:$0xff] }
  0x31   : > { %753 = vmatprep.subr.mxu0 %v664_v28  ;;  %1995 = vmatprep.subr.mxu1 %v664_v28  ;;  %v607_v23 = vld [vmem:[%s2448_s8 + $0x250] sm:$0xff]  ;;  %v546_v24 = vld [vmem:[%s2448_s8 + $0x68] sm:$0xff]  ;;  %v545_v26 = vld [vmem:[%s2448_s8 + $0x60] sm:$0xff] }
  0x32   : > { %754 = vmatpush1.msra.mxu0 %v663_v29  ;;  %2027 = vmatpush1.msra.mxu1 %v663_v29  ;;  %v610_v25 = vld [vmem:[%s2448_s8 + $0x268] sm:$0xff]  ;;  %v609_v27 = vld [vmem:[%s2448_s8 + $0x260] sm:$0xff]  ;;  %v548_v28 = vld [vmem:[%s2448_s8 + $0x78] sm:$0xff] }
  0x33   : > { %755 = vmatprep.subr.mxu0 %v662_v30  ;;  %1996 = vmatprep.subr.mxu1 %v662_v30  ;;  %v612_v29 = vld [vmem:[%s2448_s8 + $0x278] sm:$0xff]  ;;  %v547_v30 = vld [vmem:[%s2448_s8 + $0x70] sm:$0xff] }
  0x34   : > { %756 = vmatpush1.msra.mxu0 %v661_v31  ;;  %2028 = vmatpush1.msra.mxu1 %v661_v31  ;;  %v611_v31 = vld [vmem:[%s2448_s8 + $0x270] sm:$0xff] }
  0x35   : > { %757 = vmatprep.subr.mxu0 %v724_v32  ;;  %1997 = vmatprep.subr.mxu1 %v724_v32  ;;  %v550_v32 = vld [vmem:[%s2448_s8 + $0x88] sm:$0xff] }
  0x36   : > { %758 = vmatpush2.msra.mxu0 %v723_v33  ;;  %2029 = vmatpush2.msra.mxu1 %v723_v33  ;;  %v614_v33 = vld [vmem:[%s2448_s8 + $0x288] sm:$0xff] }
  0x37   : > { %759 = vmatprep.subr.mxu0 %v722_v34  ;;  %1998 = vmatprep.subr.mxu1 %v722_v34  ;;  %v549_v34 = vld [vmem:[%s2448_s8 + $0x80] sm:$0xff] }
  0x38   : > { %760 = vmatpush2.msra.mxu0 %v721_v35  ;;  %2030 = vmatpush2.msra.mxu1 %v721_v35  ;;  %v613_v35 = vld [vmem:[%s2448_s8 + $0x280] sm:$0xff] }
  0x39   : > { %761 = vmatprep.subr.mxu0 %v720_v36  ;;  %1999 = vmatprep.subr.mxu1 %v720_v36  ;;  %v552_v36 = vld [vmem:[%s2448_s8 + $0x98] sm:$0xff] }
  0x3a   : > { %762 = vmatpush2.msra.mxu0 %v719_v37  ;;  %2031 = vmatpush2.msra.mxu1 %v719_v37  ;;  %v616_v37 = vld [vmem:[%s2448_s8 + $0x298] sm:$0xff] }
  0x3b   : > { %763 = vmatprep.subr.mxu0 %v718_v38  ;;  %2000 = vmatprep.subr.mxu1 %v718_v38  ;;  %v551_v38 = vld [vmem:[%s2448_s8 + $0x90] sm:$0xff] }
  0x3c   : > { %764 = vmatpush2.msra.mxu0 %v717_v39  ;;  %2032 = vmatpush2.msra.mxu1 %v717_v39  ;;  %v615_v39 = vld [vmem:[%s2448_s8 + $0x290] sm:$0xff] }
  0x3d   : > { %765 = vmatprep.subr.mxu0 %v716_v40  ;;  %2001 = vmatprep.subr.mxu1 %v716_v40  ;;  %v554_v40 = vld [vmem:[%s2448_s8 + $0xa8] sm:$0xff] }
  0x3e   : > { %766 = vmatpush2.msra.mxu0 %v715_v41  ;;  %2033 = vmatpush2.msra.mxu1 %v715_v41  ;;  %v618_v41 = vld [vmem:[%s2448_s8 + $0x2a8] sm:$0xff] }
  0x3f   : > { %767 = vmatprep.subr.mxu0 %v714_v42  ;;  %2002 = vmatprep.subr.mxu1 %v714_v42  ;;  %v553_v42 = vld [vmem:[%s2448_s8 + $0xa0] sm:$0xff] }
  0x40   : > { %768 = vmatpush2.msra.mxu0 %v713_v43  ;;  %2034 = vmatpush2.msra.mxu1 %v713_v43  ;;  %v617_v43 = vld [vmem:[%s2448_s8 + $0x2a0] sm:$0xff] }
  0x41   : > { %769 = vmatprep.subr.mxu0 %v712_v44  ;;  %2003 = vmatprep.subr.mxu1 %v712_v44  ;;  %v556_v44 = vld [vmem:[%s2448_s8 + $0xb8] sm:$0xff] }
  0x42   : > { %770 = vmatpush2.msra.mxu0 %v711_v45  ;;  %2035 = vmatpush2.msra.mxu1 %v711_v45  ;;  %v620_v45 = vld [vmem:[%s2448_s8 + $0x2b8] sm:$0xff] }
  0x43   : > { %771 = vmatprep.subr.mxu0 %v710_v46  ;;  %2004 = vmatprep.subr.mxu1 %v710_v46  ;;  %v555_v46 = vld [vmem:[%s2448_s8 + $0xb0] sm:$0xff] }
  0x44   : > { %772 = vmatpush2.msra.mxu0 %v709_v47  ;;  %2036 = vmatpush2.msra.mxu1 %v709_v47  ;;  %v619_v47 = vld [vmem:[%s2448_s8 + $0x2b0] sm:$0xff] }
  0x45   : > { %773 = vmatprep.subr.mxu0 %v708_v48  ;;  %2005 = vmatprep.subr.mxu1 %v708_v48  ;;  %v558_v48 = vld [vmem:[%s2448_s8 + $0xc8] sm:$0xff] }
  0x46   : > { %774 = vmatpush2.msra.mxu0 %v707_v49  ;;  %2037 = vmatpush2.msra.mxu1 %v707_v49  ;;  %v622_v49 = vld [vmem:[%s2448_s8 + $0x2c8] sm:$0xff] }
  0x47   : > { %775 = vmatprep.subr.mxu0 %v706_v50  ;;  %2006 = vmatprep.subr.mxu1 %v706_v50  ;;  %v557_v50 = vld [vmem:[%s2448_s8 + $0xc0] sm:$0xff] }
  0x48   : > { %776 = vmatpush2.msra.mxu0 %v705_v51  ;;  %2038 = vmatpush2.msra.mxu1 %v705_v51  ;;  %v621_v51 = vld [vmem:[%s2448_s8 + $0x2c0] sm:$0xff] }
  0x49   : > { %777 = vmatprep.subr.mxu0 %v704_v52  ;;  %2007 = vmatprep.subr.mxu1 %v704_v52  ;;  %v560_v52 = vld [vmem:[%s2448_s8 + $0xd8] sm:$0xff] }
  0x4a   : > { %778 = vmatpush2.msra.mxu0 %v703_v53  ;;  %2039 = vmatpush2.msra.mxu1 %v703_v53  ;;  %v624_v53 = vld [vmem:[%s2448_s8 + $0x2d8] sm:$0xff] }
  0x4b   : > { %779 = vmatprep.subr.mxu0 %v702_v54  ;;  %2008 = vmatprep.subr.mxu1 %v702_v54  ;;  %v559_v54 = vld [vmem:[%s2448_s8 + $0xd0] sm:$0xff] }
  0x4c   : > { %780 = vmatpush2.msra.mxu0 %v701_v55  ;;  %2040 = vmatpush2.msra.mxu1 %v701_v55  ;;  %v623_v55 = vld [vmem:[%s2448_s8 + $0x2d0] sm:$0xff] }
  0x4d   : > { %781 = vmatprep.subr.mxu0 %v700_v56  ;;  %2009 = vmatprep.subr.mxu1 %v700_v56  ;;  %v562_v56 = vld [vmem:[%s2448_s8 + $0xe8] sm:$0xff] }
  0x4e   : > { %782 = vmatpush2.msra.mxu0 %v699_v57  ;;  %2041 = vmatpush2.msra.mxu1 %v699_v57  ;;  %v626_v57 = vld [vmem:[%s2448_s8 + $0x2e8] sm:$0xff] }
  0x4f   : > { %783 = vmatprep.subr.mxu0 %v698_v58  ;;  %2010 = vmatprep.subr.mxu1 %v698_v58  ;;  %v561_v58 = vld [vmem:[%s2448_s8 + $0xe0] sm:$0xff] }
  0x50   : > { %784 = vmatpush2.msra.mxu0 %v697_v59  ;;  %2042 = vmatpush2.msra.mxu1 %v697_v59  ;;  %v625_v59 = vld [vmem:[%s2448_s8 + $0x2e0] sm:$0xff] }
  0x51   : > { %785 = vmatprep.subr.mxu0 %v696_v60  ;;  %2011 = vmatprep.subr.mxu1 %v696_v60  ;;  %v564_v60 = vld [vmem:[%s2448_s8 + $0xf8] sm:$0xff] }
  0x52   : > { %786 = vmatpush2.msra.mxu0 %v695_v61  ;;  %2043 = vmatpush2.msra.mxu1 %v695_v61  ;;  %v628_v61 = vld [vmem:[%s2448_s8 + $0x2f8] sm:$0xff] }
  0x53   : > { %787 = vmatprep.subr.mxu0 %v694_v62  ;;  %2012 = vmatprep.subr.mxu1 %v694_v62  ;;  %v563_v62 = vld [vmem:[%s2448_s8 + $0xf0] sm:$0xff] }
  0x54   : > { %788 = vmatpush2.msra.mxu0 %v693_v63  ;;  %2044 = vmatpush2.msra.mxu1 %v693_v63  ;;  %v627_v63 = vld [vmem:[%s2448_s8 + $0x2f0] sm:$0xff] }
  0x55   : > { %789 = vmatprep.mubr.f32.mxu0 %v534_v0  ;;  %981 = vmatprep.mubr.f32.mxu1 %v598_v1  ;;  %v566_v0 = vld [vmem:[%s2448_s8 + $0x108] sm:$0xff] }
  0x56   : > { %790 = vmatmul.mubr.f32.vlgmr.msra.gmra.mxu0 %v533_v2  ;;  %982 = vmatmul.mubr.f32.vlgmr.msra.gmra.mxu1 %v597_v3  ;;  %v630_v1 = vld [vmem:[%s2448_s8 + $0x308] sm:$0xff]  ;;  %v565_v2 = vld [vmem:[%s2448_s8 + $0x100] sm:$0xff] }
  0x57   : > { %795 = vmatprep.mubr.f32.mxu0 %v536_v4  ;;  %987 = vmatprep.mubr.f32.mxu1 %v600_v5  ;;  %v629_v3 = vld [vmem:[%s2448_s8 + $0x300] sm:$0xff]  ;;  %v568_v4 = vld [vmem:[%s2448_s8 + $0x118] sm:$0xff] }
  0x58   : > { %v632_v5 = vld [vmem:[%s2448_s8 + $0x318] sm:$0xff] }
  0x5a   : > { %796 = vmatmul.mubr.f32.gmra.mxu0 %v535_v6  ;;  %988 = vmatmul.mubr.f32.gmra.mxu1 %v599_v7  ;;  %v567_v6 = vld [vmem:[%s2448_s8 + $0x110] sm:$0xff] }
  0x5b   : > { %801 = vmatprep.mubr.f32.mxu0 %v538_v8  ;;  %993 = vmatprep.mubr.f32.mxu1 %v602_v9  ;;  %v631_v7 = vld [vmem:[%s2448_s8 + $0x310] sm:$0xff]  ;;  %v570_v8 = vld [vmem:[%s2448_s8 + $0x128] sm:$0xff] }
  0x5c   : > { %v634_v9 = vld [vmem:[%s2448_s8 + $0x328] sm:$0xff] }
  0x5e   : > { %802 = vmatmul.mubr.f32.gmra.mxu0 %v537_v10  ;;  %994 = vmatmul.mubr.f32.gmra.mxu1 %v601_v11  ;;  %v569_v10 = vld [vmem:[%s2448_s8 + $0x120] sm:$0xff] }
  0x5f   : > { %807 = vmatprep.mubr.f32.mxu0 %v540_v12  ;;  %999 = vmatprep.mubr.f32.mxu1 %v604_v13  ;;  %v633_v11 = vld [vmem:[%s2448_s8 + $0x320] sm:$0xff]  ;;  %v572_v12 = vld [vmem:[%s2448_s8 + $0x138] sm:$0xff] }
  0x60   : > { %v636_v13 = vld [vmem:[%s2448_s8 + $0x338] sm:$0xff] }
  0x62   : > { %808 = vmatmul.mubr.f32.gmra.mxu0 %v539_v14  ;;  %1000 = vmatmul.mubr.f32.gmra.mxu1 %v603_v15  ;;  %v571_v14 = vld [vmem:[%s2448_s8 + $0x130] sm:$0xff] }
  0x63   : > { %813 = vmatprep.mubr.f32.mxu0 %v542_v16  ;;  %1005 = vmatprep.mubr.f32.mxu1 %v606_v17  ;;  %v635_v15 = vld [vmem:[%s2448_s8 + $0x330] sm:$0xff]  ;;  %v574_v16 = vld [vmem:[%s2448_s8 + $0x148] sm:$0xff] }
  0x64   : > { %v638_v17 = vld [vmem:[%s2448_s8 + $0x348] sm:$0xff] }
  0x66   : > { %814 = vmatmul.mubr.f32.gmra.mxu0 %v541_v18  ;;  %1006 = vmatmul.mubr.f32.gmra.mxu1 %v605_v19  ;;  %v573_v18 = vld [vmem:[%s2448_s8 + $0x140] sm:$0xff] }
  0x67   : > { %819 = vmatprep.mubr.f32.mxu0 %v544_v20  ;;  %1011 = vmatprep.mubr.f32.mxu1 %v608_v21  ;;  %v637_v19 = vld [vmem:[%s2448_s8 + $0x340] sm:$0xff]  ;;  %v576_v20 = vld [vmem:[%s2448_s8 + $0x158] sm:$0xff] }
  0x68   : > { %v640_v21 = vld [vmem:[%s2448_s8 + $0x358] sm:$0xff] }
  0x6a   : > { %820 = vmatmul.mubr.f32.gmra.mxu0 %v543_v22  ;;  %1012 = vmatmul.mubr.f32.gmra.mxu1 %v607_v23  ;;  %v575_v22 = vld [vmem:[%s2448_s8 + $0x150] sm:$0xff] }
  0x6b   : > { %825 = vmatprep.mubr.f32.mxu0 %v546_v24  ;;  %1017 = vmatprep.mubr.f32.mxu1 %v610_v25  ;;  %v639_v23 = vld [vmem:[%s2448_s8 + $0x350] sm:$0xff]  ;;  %v578_v24 = vld [vmem:[%s2448_s8 + $0x168] sm:$0xff] }
  0x6c   : > { %v642_v25 = vld [vmem:[%s2448_s8 + $0x368] sm:$0xff] }
  0x6e   : > { %826 = vmatmul.mubr.f32.gmra.mxu0 %v545_v26  ;;  %1018 = vmatmul.mubr.f32.gmra.mxu1 %v609_v27  ;;  %v577_v26 = vld [vmem:[%s2448_s8 + $0x160] sm:$0xff] }
  0x6f   : > { %831 = vmatprep.mubr.f32.mxu0 %v548_v28  ;;  %1023 = vmatprep.mubr.f32.mxu1 %v612_v29  ;;  %v641_v27 = vld [vmem:[%s2448_s8 + $0x360] sm:$0xff]  ;;  %v580_v28 = vld [vmem:[%s2448_s8 + $0x178] sm:$0xff] }
  0x70   : > { %v644_v29 = vld [vmem:[%s2448_s8 + $0x378] sm:$0xff] }
  0x72   : > { %832 = vmatmul.mubr.f32.gmra.mxu0 %v547_v30  ;;  %1024 = vmatmul.mubr.f32.gmra.mxu1 %v611_v31  ;;  %v579_v30 = vld [vmem:[%s2448_s8 + $0x170] sm:$0xff] }
  0x73   : > { %837 = vmatprep.mubr.f32.mxu0 %v550_v32  ;;  %1029 = vmatprep.mubr.f32.mxu1 %v614_v33  ;;  %v643_v31 = vld [vmem:[%s2448_s8 + $0x370] sm:$0xff]  ;;  %v582_v32 = vld [vmem:[%s2448_s8 + $0x188] sm:$0xff] }
  0x74   : > { %v646_v33 = vld [vmem:[%s2448_s8 + $0x388] sm:$0xff] }
  0x76   : > { %838 = vmatmul.mubr.f32.gmra.mxu0 %v549_v34  ;;  %1030 = vmatmul.mubr.f32.gmra.mxu1 %v613_v35  ;;  %v581_v34 = vld [vmem:[%s2448_s8 + $0x180] sm:$0xff] }
  0x77   : > { %843 = vmatprep.mubr.f32.mxu0 %v552_v36  ;;  %1035 = vmatprep.mubr.f32.mxu1 %v616_v37  ;;  %v645_v35 = vld [vmem:[%s2448_s8 + $0x380] sm:$0xff]  ;;  %v584_v36 = vld [vmem:[%s2448_s8 + $0x198] sm:$0xff] }
  0x78   : > { %v648_v37 = vld [vmem:[%s2448_s8 + $0x398] sm:$0xff] }
  0x7a   : > { %844 = vmatmul.mubr.f32.gmra.mxu0 %v551_v38  ;;  %1036 = vmatmul.mubr.f32.gmra.mxu1 %v615_v39  ;;  %v583_v38 = vld [vmem:[%s2448_s8 + $0x190] sm:$0xff] }
  0x7b   : > { %849 = vmatprep.mubr.f32.mxu0 %v554_v40  ;;  %1041 = vmatprep.mubr.f32.mxu1 %v618_v41  ;;  %v647_v39 = vld [vmem:[%s2448_s8 + $0x390] sm:$0xff]  ;;  %v586_v40 = vld [vmem:[%s2448_s8 + $0x1a8] sm:$0xff] }
  0x7c   : > { %v650_v41 = vld [vmem:[%s2448_s8 + $0x3a8] sm:$0xff] }
  0x7e   : > { %850 = vmatmul.mubr.f32.gmra.mxu0 %v553_v42  ;;  %1042 = vmatmul.mubr.f32.gmra.mxu1 %v617_v43  ;;  %v585_v42 = vld [vmem:[%s2448_s8 + $0x1a0] sm:$0xff] }
  0x7f   : > { %855 = vmatprep.mubr.f32.mxu0 %v556_v44  ;;  %1047 = vmatprep.mubr.f32.mxu1 %v620_v45  ;;  %v649_v43 = vld [vmem:[%s2448_s8 + $0x3a0] sm:$0xff]  ;;  %v588_v44 = vld [vmem:[%s2448_s8 + $0x1b8] sm:$0xff] }
  0x80   : > { %v652_v45 = vld [vmem:[%s2448_s8 + $0x3b8] sm:$0xff] }
  0x82   : > { %856 = vmatmul.mubr.f32.gmra.mxu0 %v555_v46  ;;  %1048 = vmatmul.mubr.f32.gmra.mxu1 %v619_v47  ;;  %v587_v46 = vld [vmem:[%s2448_s8 + $0x1b0] sm:$0xff] }
  0x83   : > { %861 = vmatprep.mubr.f32.mxu0 %v558_v48  ;;  %1053 = vmatprep.mubr.f32.mxu1 %v622_v49  ;;  %v651_v47 = vld [vmem:[%s2448_s8 + $0x3b0] sm:$0xff]  ;;  %v590_v48 = vld [vmem:[%s2448_s8 + $0x1c8] sm:$0xff] }
  0x84   : > { %v654_v49 = vld [vmem:[%s2448_s8 + $0x3c8] sm:$0xff] }
  0x86   : > { %862 = vmatmul.mubr.f32.gmra.mxu0 %v557_v50  ;;  %1054 = vmatmul.mubr.f32.gmra.mxu1 %v621_v51  ;;  %v589_v50 = vld [vmem:[%s2448_s8 + $0x1c0] sm:$0xff] }
  0x87   : > { %867 = vmatprep.mubr.f32.mxu0 %v560_v52  ;;  %1059 = vmatprep.mubr.f32.mxu1 %v624_v53  ;;  %v653_v51 = vld [vmem:[%s2448_s8 + $0x3c0] sm:$0xff]  ;;  %v592_v52 = vld [vmem:[%s2448_s8 + $0x1d8] sm:$0xff] }
  0x88   : > { %v656_v53 = vld [vmem:[%s2448_s8 + $0x3d8] sm:$0xff] }
  0x8a   : > { %868 = vmatmul.mubr.f32.gmra.mxu0 %v559_v54  ;;  %1060 = vmatmul.mubr.f32.gmra.mxu1 %v623_v55  ;;  %v591_v54 = vld [vmem:[%s2448_s8 + $0x1d0] sm:$0xff] }
  0x8b   : > { %873 = vmatprep.mubr.f32.mxu0 %v562_v56  ;;  %1065 = vmatprep.mubr.f32.mxu1 %v626_v57  ;;  %v655_v55 = vld [vmem:[%s2448_s8 + $0x3d0] sm:$0xff]  ;;  %v594_v56 = vld [vmem:[%s2448_s8 + $0x1e8] sm:$0xff] }
  0x8c   : > { %v658_v57 = vld [vmem:[%s2448_s8 + $0x3e8] sm:$0xff] }
  0x8e   : > { %874 = vmatmul.mubr.f32.gmra.mxu0 %v561_v58  ;;  %1066 = vmatmul.mubr.f32.gmra.mxu1 %v625_v59  ;;  %v593_v58 = vld [vmem:[%s2448_s8 + $0x1e0] sm:$0xff] }
  0x8f   : > { %879 = vmatprep.mubr.f32.mxu0 %v564_v60  ;;  %1071 = vmatprep.mubr.f32.mxu1 %v628_v61  ;;  %v657_v59 = vld [vmem:[%s2448_s8 + $0x3e0] sm:$0xff]  ;;  %v596_v60 = vld [vmem:[%s2448_s8 + $0x1f8] sm:$0xff] }
  0x90   : > { %v660_v61 = vld [vmem:[%s2448_s8 + $0x3f8] sm:$0xff] }
  0x92   : > { %880 = vmatmul.mubr.f32.gmra.mxu0 %v563_v62  ;;  %1072 = vmatmul.mubr.f32.gmra.mxu1 %v627_v63  ;;  %v595_v62 = vld [vmem:[%s2448_s8 + $0x1f0] sm:$0xff] }
  0x93   : > { %885 = vmatprep.mubr.f32.mxu0 %v566_v0  ;;  %1077 = vmatprep.mubr.f32.mxu1 %v630_v1  ;;  %v659_v63 = vld [vmem:[%s2448_s8 + $0x3f0] sm:$0xff]  ;;  %v1563_v0 = vlaneseq  ;;  %s2106_s8 = sshll.u32 %s2180_s10, 4  ;;  %s2107_s8 = int_to_ptr.vmem [resolvable:$false] %s2106_s8 }
  0x94   : > { %s2108_s9 = scalar_lea.vmem %s2107_s8, 32768  ;;  %p2109_p1 = scmp.lt.s32.totalorder %s2853_s30, %s2107_s8 }
  0x95   : > { %v1564_v1 = vshrl.u32 %v1563_v0, 7  ;;  %p2110_p2 = scmp.lt.s32.totalorder %s2108_s9, %s2102_s7 }
  0x96   : > { %886 = vmatmul.mubr.f32.gmra.mxu0 %v565_v2  ;;  %1078 = vmatmul.mubr.f32.gmra.mxu1 %v629_v3  ;;  %v1561_v3 = vld [vmem:[%s2910_s2] sm:$0x3] }
  0x97   : > { %891 = vmatprep.mubr.f32.mxu0 %v568_v4  ;;  %1083 = vmatprep.mubr.f32.mxu1 %v632_v5  ;;  %v1565_v2 = vsub.s32 0, %v1564_v1  ;;  %v1569_v4 = vsub.s32 1, %v1564_v1  ;;  %p2111_p3 = por %p2110_p2, %p2109_p1 }
  0x99   : > { %v2590_v5 = vrot.slane %v1561_v3, %v1565_v2  ;;  %p2112_p5 = pnand %p2111_p3, %p2105_p0 }
  0x9a   : > { %892 = vmatmul.mubr.f32.gmra.mxu0 %v567_v6  ;;  %1084 = vmatmul.mubr.f32.gmra.mxu1 %v631_v7  ;;  %v2592_v6 = vrot.slane %v1561_v3, %v1569_v4 }
  0x9b   : > { %897 = vmatprep.mubr.f32.mxu0 %v570_v8  ;;  %1089 = vmatprep.mubr.f32.mxu1 %v634_v9 }
  0x9e   : > { %898 = vmatmul.mubr.f32.gmra.mxu0 %v569_v10  ;;  %1090 = vmatmul.mubr.f32.gmra.mxu1 %v633_v11 }
  0x9f   : > { %903 = vmatprep.mubr.f32.mxu0 %v572_v12  ;;  %1095 = vmatprep.mubr.f32.mxu1 %v636_v13 }
  0xa2   : > { %904 = vmatmul.mubr.f32.gmra.mxu0 %v571_v14  ;;  %1096 = vmatmul.mubr.f32.gmra.mxu1 %v635_v15 }
  0xa3   : > { %909 = vmatprep.mubr.f32.mxu0 %v574_v16  ;;  %1101 = vmatprep.mubr.f32.mxu1 %v638_v17 }
  0xa6   : > { %910 = vmatmul.mubr.f32.gmra.mxu0 %v573_v18  ;;  %1102 = vmatmul.mubr.f32.gmra.mxu1 %v637_v19 }
  0xa7   : > { %915 = vmatprep.mubr.f32.mxu0 %v576_v20  ;;  %1107 = vmatprep.mubr.f32.mxu1 %v640_v21 }
  0xaa   : > { %916 = vmatmul.mubr.f32.gmra.mxu0 %v575_v22  ;;  %1108 = vmatmul.mubr.f32.gmra.mxu1 %v639_v23 }
  0xab   : > { %921 = vmatprep.mubr.f32.mxu0 %v578_v24  ;;  %1113 = vmatprep.mubr.f32.mxu1 %v642_v25 }
  0xae   : > { %922 = vmatmul.mubr.f32.gmra.mxu0 %v577_v26  ;;  %1114 = vmatmul.mubr.f32.gmra.mxu1 %v641_v27 }
  0xaf   : > { %927 = vmatprep.mubr.f32.mxu0 %v580_v28  ;;  %1119 = vmatprep.mubr.f32.mxu1 %v644_v29 }
  0xb2   : > { %928 = vmatmul.mubr.f32.gmra.mxu0 %v579_v30  ;;  %1120 = vmatmul.mubr.f32.gmra.mxu1 %v643_v31 }
  0xb3   : > { %933 = vmatprep.mubr.f32.mxu0 %v582_v32  ;;  %1125 = vmatprep.mubr.f32.mxu1 %v646_v33 }
  0xb6   : > { %934 = vmatmul.mubr.f32.gmra.mxu0 %v581_v34  ;;  %1126 = vmatmul.mubr.f32.gmra.mxu1 %v645_v35 }
  0xb7   : > { %939 = vmatprep.mubr.f32.mxu0 %v584_v36  ;;  %1131 = vmatprep.mubr.f32.mxu1 %v648_v37 }
  0xba   : > { %940 = vmatmul.mubr.f32.gmra.mxu0 %v583_v38  ;;  %1132 = vmatmul.mubr.f32.gmra.mxu1 %v647_v39 }
  0xbb   : > { %945 = vmatprep.mubr.f32.mxu0 %v586_v40  ;;  %1137 = vmatprep.mubr.f32.mxu1 %v650_v41 }
  0xbe   : > { %946 = vmatmul.mubr.f32.gmra.mxu0 %v585_v42  ;;  %1138 = vmatmul.mubr.f32.gmra.mxu1 %v649_v43 }
  0xbf   : > { %951 = vmatprep.mubr.f32.mxu0 %v588_v44  ;;  %1143 = vmatprep.mubr.f32.mxu1 %v652_v45 }
  0xc2   : > { %952 = vmatmul.mubr.f32.gmra.mxu0 %v587_v46  ;;  %1144 = vmatmul.mubr.f32.gmra.mxu1 %v651_v47 }
  0xc3   : > { %957 = vmatprep.mubr.f32.mxu0 %v590_v48  ;;  %1149 = vmatprep.mubr.f32.mxu1 %v654_v49 }
  0xc6   : > { %958 = vmatmul.mubr.f32.gmra.mxu0 %v589_v50  ;;  %1150 = vmatmul.mubr.f32.gmra.mxu1 %v653_v51 }
  0xc7   : > { %963 = vmatprep.mubr.f32.mxu0 %v592_v52  ;;  %1155 = vmatprep.mubr.f32.mxu1 %v656_v53 }
  0xca   : > { %964 = vmatmul.mubr.f32.gmra.mxu0 %v591_v54  ;;  %1156 = vmatmul.mubr.f32.gmra.mxu1 %v655_v55 }
  0xcb   : > { %969 = vmatprep.mubr.f32.mxu0 %v594_v56  ;;  %1161 = vmatprep.mubr.f32.mxu1 %v658_v57 }
  0xce   : > { %970 = vmatmul.mubr.f32.gmra.mxu0 %v593_v58  ;;  %1162 = vmatmul.mubr.f32.gmra.mxu1 %v657_v59 }
  0xcf   : > { %975 = vmatprep.mubr.f32.mxu0 %v596_v60  ;;  %1167 = vmatprep.mubr.f32.mxu1 %v660_v61 }
  0xd2   : > { %976 = vmatmul.mubr.f32.gmra.mxu0 %v595_v62  ;;  %1168 = vmatmul.mubr.f32.gmra.mxu1 %v659_v63 }
 0x116   : > { %v791_v7 = vpop.f32.mrf.mxu0  ;;  %v983_v8 = vpop.f32.mrf.mxu1 }
 0x117   : > { %v1573_v9 = vadd.f32 %v2590_v5, %v791_v7  ;;  %v1637_v10 = vadd.f32 %v2590_v5, %v983_v8 }
 0x118   : > { %v793_v11 = vpop.f32.mrf.mxu0  ;;  %v985_v12 = vpop.f32.mrf.mxu1 }
 0x119   : > { %1701 = vst [vmem:[%s2596_s28] sm:$0xff] %v1573_v9  ;;  %1765 = vst [vmem:[%s2596_s28 + $0x200] sm:$0xff] %v1637_v10  ;;  %v1574_v13 = vadd.f32 %v2592_v6, %v793_v11  ;;  %v1638_v14 = vadd.f32 %v2592_v6, %v985_v12 }
 0x11a   : > { %v797_v15 = vpop.f32.mrf.mxu0  ;;  %v989_v16 = vpop.f32.mrf.mxu1 }
 0x11b   : > { %1702 = vst [vmem:[%s2596_s28 + $0x8] sm:$0xff] %v1574_v13  ;;  %1766 = vst [vmem:[%s2596_s28 + $0x208] sm:$0xff] %v1638_v14  ;;  %v1575_v17 = vadd.f32 %v2590_v5, %v797_v15  ;;  %v1639_v18 = vadd.f32 %v2590_v5, %v989_v16 }
 0x11c   : > { %v799_v19 = vpop.f32.mrf.mxu0  ;;  %v991_v20 = vpop.f32.mrf.mxu1 }
 0x11d   : > { %1703 = vst [vmem:[%s2596_s28 + $0x10] sm:$0xff] %v1575_v17  ;;  %1767 = vst [vmem:[%s2596_s28 + $0x210] sm:$0xff] %v1639_v18  ;;  %v1576_v21 = vadd.f32 %v2592_v6, %v799_v19  ;;  %v1640_v22 = vadd.f32 %v2592_v6, %v991_v20 }
 0x11e   : > { %v803_v23 = vpop.f32.mrf.mxu0  ;;  %v995_v24 = vpop.f32.mrf.mxu1 }
 0x11f   : > { %1704 = vst [vmem:[%s2596_s28 + $0x18] sm:$0xff] %v1576_v21  ;;  %1768 = vst [vmem:[%s2596_s28 + $0x218] sm:$0xff] %v1640_v22  ;;  %v1577_v25 = vadd.f32 %v2590_v5, %v803_v23  ;;  %v1641_v26 = vadd.f32 %v2590_v5, %v995_v24 }
 0x120   : > { %v805_v27 = vpop.f32.mrf.mxu0  ;;  %v997_v28 = vpop.f32.mrf.mxu1 }
 0x121   : > { %1705 = vst [vmem:[%s2596_s28 + $0x20] sm:$0xff] %v1577_v25  ;;  %1769 = vst [vmem:[%s2596_s28 + $0x220] sm:$0xff] %v1641_v26  ;;  %v1578_v29 = vadd.f32 %v2592_v6, %v805_v27  ;;  %v1642_v30 = vadd.f32 %v2592_v6, %v997_v28 }
 0x122   : > { %v809_v31 = vpop.f32.mrf.mxu0  ;;  %v1001_v32 = vpop.f32.mrf.mxu1 }
 0x123   : > { %1706 = vst [vmem:[%s2596_s28 + $0x28] sm:$0xff] %v1578_v29  ;;  %1770 = vst [vmem:[%s2596_s28 + $0x228] sm:$0xff] %v1642_v30  ;;  %v1579_v33 = vadd.f32 %v2590_v5, %v809_v31  ;;  %v1643_v34 = vadd.f32 %v2590_v5, %v1001_v32 }
 0x124   : > { %v811_v35 = vpop.f32.mrf.mxu0  ;;  %v1003_v36 = vpop.f32.mrf.mxu1 }
 0x125   : > { %1707 = vst [vmem:[%s2596_s28 + $0x30] sm:$0xff] %v1579_v33  ;;  %1771 = vst [vmem:[%s2596_s28 + $0x230] sm:$0xff] %v1643_v34  ;;  %v1580_v37 = vadd.f32 %v2592_v6, %v811_v35  ;;  %v1644_v38 = vadd.f32 %v2592_v6, %v1003_v36 }
 0x126   : > { %v815_v39 = vpop.f32.mrf.mxu0  ;;  %v1007_v40 = vpop.f32.mrf.mxu1 }
 0x127   : > { %1708 = vst [vmem:[%s2596_s28 + $0x38] sm:$0xff] %v1580_v37  ;;  %1772 = vst [vmem:[%s2596_s28 + $0x238] sm:$0xff] %v1644_v38  ;;  %v1581_v41 = vadd.f32 %v2590_v5, %v815_v39  ;;  %v1645_v42 = vadd.f32 %v2590_v5, %v1007_v40 }
 0x128   : > { %v817_v43 = vpop.f32.mrf.mxu0  ;;  %v1009_v44 = vpop.f32.mrf.mxu1 }
 0x129   : > { %1709 = vst [vmem:[%s2596_s28 + $0x40] sm:$0xff] %v1581_v41  ;;  %1773 = vst [vmem:[%s2596_s28 + $0x240] sm:$0xff] %v1645_v42  ;;  %v1582_v45 = vadd.f32 %v2592_v6, %v817_v43  ;;  %v1646_v46 = vadd.f32 %v2592_v6, %v1009_v44 }
 0x12a   : > { %v821_v47 = vpop.f32.mrf.mxu0  ;;  %v1013_v48 = vpop.f32.mrf.mxu1 }
 0x12b   : > { %1710 = vst [vmem:[%s2596_s28 + $0x48] sm:$0xff] %v1582_v45  ;;  %1774 = vst [vmem:[%s2596_s28 + $0x248] sm:$0xff] %v1646_v46  ;;  %v1583_v49 = vadd.f32 %v2590_v5, %v821_v47  ;;  %v1647_v50 = vadd.f32 %v2590_v5, %v1013_v48 }
 0x12c   : > { %v823_v51 = vpop.f32.mrf.mxu0  ;;  %v1015_v52 = vpop.f32.mrf.mxu1 }
 0x12d   : > { %1711 = vst [vmem:[%s2596_s28 + $0x50] sm:$0xff] %v1583_v49  ;;  %1775 = vst [vmem:[%s2596_s28 + $0x250] sm:$0xff] %v1647_v50  ;;  %v1584_v53 = vadd.f32 %v2592_v6, %v823_v51  ;;  %v1648_v54 = vadd.f32 %v2592_v6, %v1015_v52 }
 0x12e   : > { %v827_v55 = vpop.f32.mrf.mxu0  ;;  %v1019_v56 = vpop.f32.mrf.mxu1 }
 0x12f   : > { %1712 = vst [vmem:[%s2596_s28 + $0x58] sm:$0xff] %v1584_v53  ;;  %1776 = vst [vmem:[%s2596_s28 + $0x258] sm:$0xff] %v1648_v54  ;;  %v1585_v57 = vadd.f32 %v2590_v5, %v827_v55  ;;  %v1649_v58 = vadd.f32 %v2590_v5, %v1019_v56 }
 0x130   : > { %v829_v59 = vpop.f32.mrf.mxu0  ;;  %v1021_v60 = vpop.f32.mrf.mxu1 }
 0x131   : > { %1713 = vst [vmem:[%s2596_s28 + $0x60] sm:$0xff] %v1585_v57  ;;  %1777 = vst [vmem:[%s2596_s28 + $0x260] sm:$0xff] %v1649_v58  ;;  %v1586_v61 = vadd.f32 %v2592_v6, %v829_v59  ;;  %v1650_v62 = vadd.f32 %v2592_v6, %v1021_v60 }
 0x132   : > { %v833_v63 = vpop.f32.mrf.mxu0  ;;  %v1025_v0 = vpop.f32.mrf.mxu1 }
 0x133   : > { %1714 = vst [vmem:[%s2596_s28 + $0x68] sm:$0xff] %v1586_v61  ;;  %1778 = vst [vmem:[%s2596_s28 + $0x268] sm:$0xff] %v1650_v62  ;;  %v1587_v1 = vadd.f32 %v2590_v5, %v833_v63  ;;  %v1651_v2 = vadd.f32 %v2590_v5, %v1025_v0 }
 0x134   : > { %v835_v3 = vpop.f32.mrf.mxu0  ;;  %v1027_v4 = vpop.f32.mrf.mxu1 }
 0x135   : > { %1715 = vst [vmem:[%s2596_s28 + $0x70] sm:$0xff] %v1587_v1  ;;  %1779 = vst [vmem:[%s2596_s28 + $0x270] sm:$0xff] %v1651_v2  ;;  %v1588_v7 = vadd.f32 %v2592_v6, %v835_v3  ;;  %v1652_v8 = vadd.f32 %v2592_v6, %v1027_v4 }
 0x136   : > { %v839_v9 = vpop.f32.mrf.mxu0  ;;  %v1031_v10 = vpop.f32.mrf.mxu1 }
 0x137   : > { %1716 = vst [vmem:[%s2596_s28 + $0x78] sm:$0xff] %v1588_v7  ;;  %1780 = vst [vmem:[%s2596_s28 + $0x278] sm:$0xff] %v1652_v8  ;;  %v1589_v11 = vadd.f32 %v2590_v5, %v839_v9  ;;  %v1653_v12 = vadd.f32 %v2590_v5, %v1031_v10 }
 0x138   : > { %v841_v13 = vpop.f32.mrf.mxu0  ;;  %v1033_v14 = vpop.f32.mrf.mxu1 }
 0x139   : > { %1717 = vst [vmem:[%s2596_s28 + $0x80] sm:$0xff] %v1589_v11  ;;  %1781 = vst [vmem:[%s2596_s28 + $0x280] sm:$0xff] %v1653_v12  ;;  %v1590_v15 = vadd.f32 %v2592_v6, %v841_v13  ;;  %v1654_v16 = vadd.f32 %v2592_v6, %v1033_v14 }
 0x13a   : > { %v845_v17 = vpop.f32.mrf.mxu0  ;;  %v1037_v18 = vpop.f32.mrf.mxu1 }
 0x13b   : > { %1718 = vst [vmem:[%s2596_s28 + $0x88] sm:$0xff] %v1590_v15  ;;  %1782 = vst [vmem:[%s2596_s28 + $0x288] sm:$0xff] %v1654_v16  ;;  %v1591_v19 = vadd.f32 %v2590_v5, %v845_v17  ;;  %v1655_v20 = vadd.f32 %v2590_v5, %v1037_v18 }
 0x13c   : > { %v847_v21 = vpop.f32.mrf.mxu0  ;;  %v1039_v22 = vpop.f32.mrf.mxu1 }
 0x13d   : > { %1719 = vst [vmem:[%s2596_s28 + $0x90] sm:$0xff] %v1591_v19  ;;  %1783 = vst [vmem:[%s2596_s28 + $0x290] sm:$0xff] %v1655_v20  ;;  %v1592_v23 = vadd.f32 %v2592_v6, %v847_v21  ;;  %v1656_v24 = vadd.f32 %v2592_v6, %v1039_v22 }
 0x13e   : > { %v851_v25 = vpop.f32.mrf.mxu0  ;;  %v1043_v26 = vpop.f32.mrf.mxu1 }
 0x13f   : > { %1720 = vst [vmem:[%s2596_s28 + $0x98] sm:$0xff] %v1592_v23  ;;  %1784 = vst [vmem:[%s2596_s28 + $0x298] sm:$0xff] %v1656_v24  ;;  %v1593_v27 = vadd.f32 %v2590_v5, %v851_v25  ;;  %v1657_v28 = vadd.f32 %v2590_v5, %v1043_v26 }
 0x140   : > { %v853_v29 = vpop.f32.mrf.mxu0  ;;  %v1045_v30 = vpop.f32.mrf.mxu1 }
 0x141   : > { %1721 = vst [vmem:[%s2596_s28 + $0xa0] sm:$0xff] %v1593_v27  ;;  %1785 = vst [vmem:[%s2596_s28 + $0x2a0] sm:$0xff] %v1657_v28  ;;  %v1594_v31 = vadd.f32 %v2592_v6, %v853_v29  ;;  %v1658_v32 = vadd.f32 %v2592_v6, %v1045_v30 }
 0x142   : > { %v857_v33 = vpop.f32.mrf.mxu0  ;;  %v1049_v34 = vpop.f32.mrf.mxu1 }
 0x143   : > { %1722 = vst [vmem:[%s2596_s28 + $0xa8] sm:$0xff] %v1594_v31  ;;  %1786 = vst [vmem:[%s2596_s28 + $0x2a8] sm:$0xff] %v1658_v32  ;;  %v1595_v35 = vadd.f32 %v2590_v5, %v857_v33  ;;  %v1659_v36 = vadd.f32 %v2590_v5, %v1049_v34 }
 0x144   : > { %v859_v37 = vpop.f32.mrf.mxu0  ;;  %v1051_v38 = vpop.f32.mrf.mxu1 }
 0x145   : > { %1723 = vst [vmem:[%s2596_s28 + $0xb0] sm:$0xff] %v1595_v35  ;;  %1787 = vst [vmem:[%s2596_s28 + $0x2b0] sm:$0xff] %v1659_v36  ;;  %v1596_v39 = vadd.f32 %v2592_v6, %v859_v37  ;;  %v1660_v40 = vadd.f32 %v2592_v6, %v1051_v38 }
 0x146   : > { %v863_v41 = vpop.f32.mrf.mxu0  ;;  %v1055_v42 = vpop.f32.mrf.mxu1 }
 0x147   : > { %1724 = vst [vmem:[%s2596_s28 + $0xb8] sm:$0xff] %v1596_v39  ;;  %1788 = vst [vmem:[%s2596_s28 + $0x2b8] sm:$0xff] %v1660_v40  ;;  %v1597_v43 = vadd.f32 %v2590_v5, %v863_v41  ;;  %v1661_v44 = vadd.f32 %v2590_v5, %v1055_v42 }
 0x148   : > { %v865_v45 = vpop.f32.mrf.mxu0  ;;  %v1057_v46 = vpop.f32.mrf.mxu1 }
 0x149   : > { %1725 = vst [vmem:[%s2596_s28 + $0xc0] sm:$0xff] %v1597_v43  ;;  %1789 = vst [vmem:[%s2596_s28 + $0x2c0] sm:$0xff] %v1661_v44  ;;  %v1598_v47 = vadd.f32 %v2592_v6, %v865_v45  ;;  %v1662_v48 = vadd.f32 %v2592_v6, %v1057_v46 }
 0x14a   : > { %v869_v49 = vpop.f32.mrf.mxu0  ;;  %v1061_v50 = vpop.f32.mrf.mxu1 }
 0x14b   : > { %1726 = vst [vmem:[%s2596_s28 + $0xc8] sm:$0xff] %v1598_v47  ;;  %1790 = vst [vmem:[%s2596_s28 + $0x2c8] sm:$0xff] %v1662_v48  ;;  %v1599_v51 = vadd.f32 %v2590_v5, %v869_v49  ;;  %v1663_v52 = vadd.f32 %v2590_v5, %v1061_v50 }
 0x14c   : > { %v871_v53 = vpop.f32.mrf.mxu0  ;;  %v1063_v54 = vpop.f32.mrf.mxu1 }
 0x14d   : > { %1727 = vst [vmem:[%s2596_s28 + $0xd0] sm:$0xff] %v1599_v51  ;;  %1791 = vst [vmem:[%s2596_s28 + $0x2d0] sm:$0xff] %v1663_v52  ;;  %v1600_v55 = vadd.f32 %v2592_v6, %v871_v53  ;;  %v1664_v56 = vadd.f32 %v2592_v6, %v1063_v54 }
 0x14e   : > { %v875_v57 = vpop.f32.mrf.mxu0  ;;  %v1067_v58 = vpop.f32.mrf.mxu1 }
 0x14f   : > { %1728 = vst [vmem:[%s2596_s28 + $0xd8] sm:$0xff] %v1600_v55  ;;  %1792 = vst [vmem:[%s2596_s28 + $0x2d8] sm:$0xff] %v1664_v56  ;;  %v1601_v59 = vadd.f32 %v2590_v5, %v875_v57  ;;  %v1665_v60 = vadd.f32 %v2590_v5, %v1067_v58 }
 0x150   : > { %v877_v61 = vpop.f32.mrf.mxu0  ;;  %v1069_v62 = vpop.f32.mrf.mxu1 }
 0x151   : > { %1729 = vst [vmem:[%s2596_s28 + $0xe0] sm:$0xff] %v1601_v59  ;;  %1793 = vst [vmem:[%s2596_s28 + $0x2e0] sm:$0xff] %v1665_v60  ;;  %v1602_v63 = vadd.f32 %v2592_v6, %v877_v61  ;;  %v1666_v0 = vadd.f32 %v2592_v6, %v1069_v62 }
 0x152   : > { %v881_v1 = vpop.f32.mrf.mxu0  ;;  %v1073_v2 = vpop.f32.mrf.mxu1 }
 0x153   : > { %1730 = vst [vmem:[%s2596_s28 + $0xe8] sm:$0xff] %v1602_v63  ;;  %1794 = vst [vmem:[%s2596_s28 + $0x2e8] sm:$0xff] %v1666_v0  ;;  %v1603_v3 = vadd.f32 %v2590_v5, %v881_v1  ;;  %v1667_v4 = vadd.f32 %v2590_v5, %v1073_v2 }
 0x154   : > { %v883_v7 = vpop.f32.mrf.mxu0  ;;  %v1075_v8 = vpop.f32.mrf.mxu1 }
 0x155   : > { %1731 = vst [vmem:[%s2596_s28 + $0xf0] sm:$0xff] %v1603_v3  ;;  %1795 = vst [vmem:[%s2596_s28 + $0x2f0] sm:$0xff] %v1667_v4  ;;  %v1604_v9 = vadd.f32 %v2592_v6, %v883_v7  ;;  %v1668_v10 = vadd.f32 %v2592_v6, %v1075_v8 }
 0x156   : > { %v887_v11 = vpop.f32.mrf.mxu0  ;;  %v1079_v12 = vpop.f32.mrf.mxu1 }
 0x157   : > { %1732 = vst [vmem:[%s2596_s28 + $0xf8] sm:$0xff] %v1604_v9  ;;  %1796 = vst [vmem:[%s2596_s28 + $0x2f8] sm:$0xff] %v1668_v10  ;;  %v1605_v13 = vadd.f32 %v2590_v5, %v887_v11  ;;  %v1669_v14 = vadd.f32 %v2590_v5, %v1079_v12 }
 0x158   : > { %v889_v15 = vpop.f32.mrf.mxu0  ;;  %v1081_v16 = vpop.f32.mrf.mxu1 }
 0x159   : > { %1733 = vst [vmem:[%s2596_s28 + $0x100] sm:$0xff] %v1605_v13  ;;  %1797 = vst [vmem:[%s2596_s28 + $0x300] sm:$0xff] %v1669_v14  ;;  %v1606_v17 = vadd.f32 %v2592_v6, %v889_v15  ;;  %v1670_v18 = vadd.f32 %v2592_v6, %v1081_v16 }
 0x15a   : > { %v893_v19 = vpop.f32.mrf.mxu0  ;;  %v1085_v20 = vpop.f32.mrf.mxu1 }
 0x15b   : > { %1734 = vst [vmem:[%s2596_s28 + $0x108] sm:$0xff] %v1606_v17  ;;  %1798 = vst [vmem:[%s2596_s28 + $0x308] sm:$0xff] %v1670_v18  ;;  %v1607_v21 = vadd.f32 %v2590_v5, %v893_v19  ;;  %v1671_v22 = vadd.f32 %v2590_v5, %v1085_v20 }
 0x15c   : > { %v895_v23 = vpop.f32.mrf.mxu0  ;;  %v1087_v24 = vpop.f32.mrf.mxu1 }
 0x15d   : > { %1735 = vst [vmem:[%s2596_s28 + $0x110] sm:$0xff] %v1607_v21  ;;  %1799 = vst [vmem:[%s2596_s28 + $0x310] sm:$0xff] %v1671_v22  ;;  %v1608_v25 = vadd.f32 %v2592_v6, %v895_v23  ;;  %v1672_v26 = vadd.f32 %v2592_v6, %v1087_v24 }
 0x15e   : > { %v899_v27 = vpop.f32.mrf.mxu0  ;;  %v1091_v28 = vpop.f32.mrf.mxu1 }
 0x15f   : > { %1736 = vst [vmem:[%s2596_s28 + $0x118] sm:$0xff] %v1608_v25  ;;  %1800 = vst [vmem:[%s2596_s28 + $0x318] sm:$0xff] %v1672_v26  ;;  %v1609_v29 = vadd.f32 %v2590_v5, %v899_v27  ;;  %v1673_v30 = vadd.f32 %v2590_v5, %v1091_v28 }
 0x160   : > { %v901_v31 = vpop.f32.mrf.mxu0  ;;  %v1093_v32 = vpop.f32.mrf.mxu1 }
 0x161   : > { %1737 = vst [vmem:[%s2596_s28 + $0x120] sm:$0xff] %v1609_v29  ;;  %1801 = vst [vmem:[%s2596_s28 + $0x320] sm:$0xff] %v1673_v30  ;;  %v1610_v33 = vadd.f32 %v2592_v6, %v901_v31  ;;  %v1674_v34 = vadd.f32 %v2592_v6, %v1093_v32 }
 0x162   : > { %v905_v35 = vpop.f32.mrf.mxu0  ;;  %v1097_v36 = vpop.f32.mrf.mxu1 }
 0x163   : > { %1738 = vst [vmem:[%s2596_s28 + $0x128] sm:$0xff] %v1610_v33  ;;  %1802 = vst [vmem:[%s2596_s28 + $0x328] sm:$0xff] %v1674_v34  ;;  %v1611_v37 = vadd.f32 %v2590_v5, %v905_v35  ;;  %v1675_v38 = vadd.f32 %v2590_v5, %v1097_v36 }
 0x164   : > { %v907_v39 = vpop.f32.mrf.mxu0  ;;  %v1099_v40 = vpop.f32.mrf.mxu1 }
 0x165   : > { %1739 = vst [vmem:[%s2596_s28 + $0x130] sm:$0xff] %v1611_v37  ;;  %1803 = vst [vmem:[%s2596_s28 + $0x330] sm:$0xff] %v1675_v38  ;;  %v1612_v41 = vadd.f32 %v2592_v6, %v907_v39  ;;  %v1676_v42 = vadd.f32 %v2592_v6, %v1099_v40 }
 0x166   : > { %v911_v43 = vpop.f32.mrf.mxu0  ;;  %v1103_v44 = vpop.f32.mrf.mxu1 }
 0x167   : > { %1740 = vst [vmem:[%s2596_s28 + $0x138] sm:$0xff] %v1612_v41  ;;  %1804 = vst [vmem:[%s2596_s28 + $0x338] sm:$0xff] %v1676_v42  ;;  %v1613_v45 = vadd.f32 %v2590_v5, %v911_v43  ;;  %v1677_v46 = vadd.f32 %v2590_v5, %v1103_v44 }
 0x168   : > { %v913_v47 = vpop.f32.mrf.mxu0  ;;  %v1105_v48 = vpop.f32.mrf.mxu1 }
 0x169   : > { %1741 = vst [vmem:[%s2596_s28 + $0x140] sm:$0xff] %v1613_v45  ;;  %1805 = vst [vmem:[%s2596_s28 + $0x340] sm:$0xff] %v1677_v46  ;;  %v1614_v49 = vadd.f32 %v2592_v6, %v913_v47  ;;  %v1678_v50 = vadd.f32 %v2592_v6, %v1105_v48 }
 0x16a   : > { %v917_v51 = vpop.f32.mrf.mxu0  ;;  %v1109_v52 = vpop.f32.mrf.mxu1 }
 0x16b   : > { %1742 = vst [vmem:[%s2596_s28 + $0x148] sm:$0xff] %v1614_v49  ;;  %1806 = vst [vmem:[%s2596_s28 + $0x348] sm:$0xff] %v1678_v50  ;;  %v1615_v53 = vadd.f32 %v2590_v5, %v917_v51  ;;  %v1679_v54 = vadd.f32 %v2590_v5, %v1109_v52 }
 0x16c   : > { %v919_v55 = vpop.f32.mrf.mxu0  ;;  %v1111_v56 = vpop.f32.mrf.mxu1 }
 0x16d   : > { %1743 = vst [vmem:[%s2596_s28 + $0x150] sm:$0xff] %v1615_v53  ;;  %1807 = vst [vmem:[%s2596_s28 + $0x350] sm:$0xff] %v1679_v54  ;;  %v1616_v57 = vadd.f32 %v2592_v6, %v919_v55  ;;  %v1680_v58 = vadd.f32 %v2592_v6, %v1111_v56 }
 0x16e   : > { %v923_v59 = vpop.f32.mrf.mxu0  ;;  %v1115_v60 = vpop.f32.mrf.mxu1 }
 0x16f   : > { %1744 = vst [vmem:[%s2596_s28 + $0x158] sm:$0xff] %v1616_v57  ;;  %1808 = vst [vmem:[%s2596_s28 + $0x358] sm:$0xff] %v1680_v58  ;;  %v1617_v61 = vadd.f32 %v2590_v5, %v923_v59  ;;  %v1681_v62 = vadd.f32 %v2590_v5, %v1115_v60 }
 0x170   : > { %v925_v63 = vpop.f32.mrf.mxu0  ;;  %v1117_v0 = vpop.f32.mrf.mxu1 }
 0x171   : > { %1745 = vst [vmem:[%s2596_s28 + $0x160] sm:$0xff] %v1617_v61  ;;  %1809 = vst [vmem:[%s2596_s28 + $0x360] sm:$0xff] %v1681_v62  ;;  %v1618_v1 = vadd.f32 %v2592_v6, %v925_v63  ;;  %v1682_v2 = vadd.f32 %v2592_v6, %v1117_v0 }
 0x172   : > { %v929_v3 = vpop.f32.mrf.mxu0  ;;  %v1121_v4 = vpop.f32.mrf.mxu1 }
 0x173   : > { %1746 = vst [vmem:[%s2596_s28 + $0x168] sm:$0xff] %v1618_v1  ;;  %1810 = vst [vmem:[%s2596_s28 + $0x368] sm:$0xff] %v1682_v2  ;;  %v1619_v7 = vadd.f32 %v2590_v5, %v929_v3  ;;  %v1683_v8 = vadd.f32 %v2590_v5, %v1121_v4 }
 0x174   : > { %v931_v9 = vpop.f32.mrf.mxu0  ;;  %v1123_v10 = vpop.f32.mrf.mxu1 }
 0x175   : > { %1747 = vst [vmem:[%s2596_s28 + $0x170] sm:$0xff] %v1619_v7  ;;  %1811 = vst [vmem:[%s2596_s28 + $0x370] sm:$0xff] %v1683_v8  ;;  %v1620_v11 = vadd.f32 %v2592_v6, %v931_v9  ;;  %v1684_v12 = vadd.f32 %v2592_v6, %v1123_v10 }
 0x176   : > { %v935_v13 = vpop.f32.mrf.mxu0  ;;  %v1127_v14 = vpop.f32.mrf.mxu1 }
 0x177   : > { %1748 = vst [vmem:[%s2596_s28 + $0x178] sm:$0xff] %v1620_v11  ;;  %1812 = vst [vmem:[%s2596_s28 + $0x378] sm:$0xff] %v1684_v12  ;;  %v1621_v15 = vadd.f32 %v2590_v5, %v935_v13  ;;  %v1685_v16 = vadd.f32 %v2590_v5, %v1127_v14 }
 0x178   : > { %v937_v17 = vpop.f32.mrf.mxu0  ;;  %v1129_v18 = vpop.f32.mrf.mxu1 }
 0x179   : > { %1749 = vst [vmem:[%s2596_s28 + $0x180] sm:$0xff] %v1621_v15  ;;  %1813 = vst [vmem:[%s2596_s28 + $0x380] sm:$0xff] %v1685_v16  ;;  %v1622_v19 = vadd.f32 %v2592_v6, %v937_v17  ;;  %v1686_v20 = vadd.f32 %v2592_v6, %v1129_v18 }
 0x17a   : > { %v941_v21 = vpop.f32.mrf.mxu0  ;;  %v1133_v22 = vpop.f32.mrf.mxu1 }
 0x17b   : > { %1750 = vst [vmem:[%s2596_s28 + $0x188] sm:$0xff] %v1622_v19  ;;  %1814 = vst [vmem:[%s2596_s28 + $0x388] sm:$0xff] %v1686_v20  ;;  %v1623_v23 = vadd.f32 %v2590_v5, %v941_v21  ;;  %v1687_v24 = vadd.f32 %v2590_v5, %v1133_v22 }
 0x17c   : > { %v943_v25 = vpop.f32.mrf.mxu0  ;;  %v1135_v26 = vpop.f32.mrf.mxu1 }
 0x17d   : > { %1751 = vst [vmem:[%s2596_s28 + $0x190] sm:$0xff] %v1623_v23  ;;  %1815 = vst [vmem:[%s2596_s28 + $0x390] sm:$0xff] %v1687_v24  ;;  %v1624_v27 = vadd.f32 %v2592_v6, %v943_v25  ;;  %v1688_v28 = vadd.f32 %v2592_v6, %v1135_v26 }
 0x17e   : > { %v947_v29 = vpop.f32.mrf.mxu0  ;;  %v1139_v30 = vpop.f32.mrf.mxu1 }
 0x17f   : > { %1752 = vst [vmem:[%s2596_s28 + $0x198] sm:$0xff] %v1624_v27  ;;  %1816 = vst [vmem:[%s2596_s28 + $0x398] sm:$0xff] %v1688_v28  ;;  %v1625_v31 = vadd.f32 %v2590_v5, %v947_v29  ;;  %v1689_v32 = vadd.f32 %v2590_v5, %v1139_v30 }
 0x180   : > { %v949_v33 = vpop.f32.mrf.mxu0  ;;  %v1141_v34 = vpop.f32.mrf.mxu1 }
 0x181   : > { %1753 = vst [vmem:[%s2596_s28 + $0x1a0] sm:$0xff] %v1625_v31  ;;  %1817 = vst [vmem:[%s2596_s28 + $0x3a0] sm:$0xff] %v1689_v32  ;;  %v1626_v35 = vadd.f32 %v2592_v6, %v949_v33  ;;  %v1690_v36 = vadd.f32 %v2592_v6, %v1141_v34 }
 0x182   : > { %v953_v37 = vpop.f32.mrf.mxu0  ;;  %v1145_v38 = vpop.f32.mrf.mxu1 }
 0x183   : > { %1754 = vst [vmem:[%s2596_s28 + $0x1a8] sm:$0xff] %v1626_v35  ;;  %1818 = vst [vmem:[%s2596_s28 + $0x3a8] sm:$0xff] %v1690_v36  ;;  %v1627_v39 = vadd.f32 %v2590_v5, %v953_v37  ;;  %v1691_v40 = vadd.f32 %v2590_v5, %v1145_v38 }
 0x184   : > { %v955_v41 = vpop.f32.mrf.mxu0  ;;  %v1147_v42 = vpop.f32.mrf.mxu1 }
 0x185   : > { %1755 = vst [vmem:[%s2596_s28 + $0x1b0] sm:$0xff] %v1627_v39  ;;  %1819 = vst [vmem:[%s2596_s28 + $0x3b0] sm:$0xff] %v1691_v40  ;;  %v1628_v43 = vadd.f32 %v2592_v6, %v955_v41  ;;  %v1692_v44 = vadd.f32 %v2592_v6, %v1147_v42 }
 0x186   : > { %v959_v45 = vpop.f32.mrf.mxu0  ;;  %v1151_v46 = vpop.f32.mrf.mxu1 }
 0x187   : > { %1756 = vst [vmem:[%s2596_s28 + $0x1b8] sm:$0xff] %v1628_v43  ;;  %1820 = vst [vmem:[%s2596_s28 + $0x3b8] sm:$0xff] %v1692_v44  ;;  %v1629_v47 = vadd.f32 %v2590_v5, %v959_v45  ;;  %v1693_v48 = vadd.f32 %v2590_v5, %v1151_v46 }
 0x188   : > { %v961_v49 = vpop.f32.mrf.mxu0  ;;  %v1153_v50 = vpop.f32.mrf.mxu1 }
 0x189   : > { %1757 = vst [vmem:[%s2596_s28 + $0x1c0] sm:$0xff] %v1629_v47  ;;  %1821 = vst [vmem:[%s2596_s28 + $0x3c0] sm:$0xff] %v1693_v48  ;;  %v1630_v51 = vadd.f32 %v2592_v6, %v961_v49  ;;  %v1694_v52 = vadd.f32 %v2592_v6, %v1153_v50 }
 0x18a   : > { %v965_v53 = vpop.f32.mrf.mxu0  ;;  %v1157_v54 = vpop.f32.mrf.mxu1 }
 0x18b   : > { %1758 = vst [vmem:[%s2596_s28 + $0x1c8] sm:$0xff] %v1630_v51  ;;  %1822 = vst [vmem:[%s2596_s28 + $0x3c8] sm:$0xff] %v1694_v52  ;;  %v1631_v55 = vadd.f32 %v2590_v5, %v965_v53  ;;  %v1695_v56 = vadd.f32 %v2590_v5, %v1157_v54 }
 0x18c   : > { %v967_v57 = vpop.f32.mrf.mxu0  ;;  %v1159_v58 = vpop.f32.mrf.mxu1 }
 0x18d   : > { %1759 = vst [vmem:[%s2596_s28 + $0x1d0] sm:$0xff] %v1631_v55  ;;  %1823 = vst [vmem:[%s2596_s28 + $0x3d0] sm:$0xff] %v1695_v56  ;;  %v1632_v59 = vadd.f32 %v2592_v6, %v967_v57  ;;  %v1696_v60 = vadd.f32 %v2592_v6, %v1159_v58 }
 0x18e   : > { %v971_v61 = vpop.f32.mrf.mxu0  ;;  %v1163_v62 = vpop.f32.mrf.mxu1 }
 0x18f   : > { %1760 = vst [vmem:[%s2596_s28 + $0x1d8] sm:$0xff] %v1632_v59  ;;  %1824 = vst [vmem:[%s2596_s28 + $0x3d8] sm:$0xff] %v1696_v60  ;;  %v1633_v63 = vadd.f32 %v2590_v5, %v971_v61  ;;  %v1697_v0 = vadd.f32 %v2590_v5, %v1163_v62 }
 0x190   : > { %v973_v1 = vpop.f32.mrf.mxu0  ;;  %v1165_v2 = vpop.f32.mrf.mxu1 }
 0x191   : > { %1761 = vst [vmem:[%s2596_s28 + $0x1e0] sm:$0xff] %v1633_v63  ;;  %1825 = vst [vmem:[%s2596_s28 + $0x3e0] sm:$0xff] %v1697_v0  ;;  %v1634_v3 = vadd.f32 %v2592_v6, %v973_v1  ;;  %v1698_v4 = vadd.f32 %v2592_v6, %v1165_v2 }
 0x192   : > { %v977_v7 = vpop.f32.mrf.mxu0  ;;  %v1169_v8 = vpop.f32.mrf.mxu1 }
 0x193   : > { %1762 = vst [vmem:[%s2596_s28 + $0x1e8] sm:$0xff] %v1634_v3  ;;  %1826 = vst [vmem:[%s2596_s28 + $0x3e8] sm:$0xff] %v1698_v4  ;;  %v1635_v9 = vadd.f32 %v2590_v5, %v977_v7  ;;  %v1699_v10 = vadd.f32 %v2590_v5, %v1169_v8 }
 0x194   : > { %v979_v11 = vpop.f32.mrf.mxu0  ;;  %v1171_v12 = vpop.f32.mrf.mxu1 }
 0x195   : > { %1763 = vst [vmem:[%s2596_s28 + $0x1f0] sm:$0xff] %v1635_v9  ;;  %1827 = vst [vmem:[%s2596_s28 + $0x3f0] sm:$0xff] %v1699_v10  ;;  %v1636_v13 = vadd.f32 %v2592_v6, %v979_v11  ;;  %v1700_v14 = vadd.f32 %v2592_v6, %v1171_v12 }
 0x197   : > { %1764 = vst [vmem:[%s2596_s28 + $0x1f8] sm:$0xff] %v1636_v13  ;;  %1828 = vst [vmem:[%s2596_s28 + $0x3f8] sm:$0xff] %v1700_v14 }
 0x198   : > { %2115 = shalt.err (!%p2112_p5)
}
 0x199   : > { %s2116_s11 = scalar_lea.hbm %s2851_s6, 16384  ;;  %s2120_s21 = scalar_lea.hbm %s2911_s3, 32768 }
 0x19a   : > { %p2117_p6 = scmp.ne.s32.totalorder %s2851_s6, %s2116_s11  ;;  %p2121_p10 = scmp.lt.s32.totalorder %s2851_s6, %s2911_s3 }
 0x19b   : > { %p2122_p11 = scmp.lt.s32.totalorder %s2120_s21, %s2116_s11 }
 0x19c   : > { %p2118_p7 = pnand %p2117_p6, %p2243_p4 }
 0x19d   : > { %p2123_p12 = por %p2122_p11, %p2121_p10 }
 0x19e   : > { %p2119_p9 = pneg %p2118_p7 }
 0x1a0   : > { %p2124_p13 = pnand %p2123_p12, %p2119_p9 }
 0x1a2   : > { %2127 = shalt.err (!%p2124_p13)
}
 0x1a3   : > { %s2181_s27 = smov 256   ;;  %s2182_s28 = smov 16  }
 0x1a4   : > { %2045 = dma.vmem_to_hbm [thread:$0]  (%p2243_p4), %s2853_s30, 16384, %s2851_s6, %s2863_s15, %s2181_s27, %s2181_s27, %s2182_s28  }
 0x1a5 PF: > { %p2051_p0 = scmp.ge.s32.totalorder %s2178_s17, 2  ;;  %s1861_s29 = sand.u32 1, %s2158_s12  }
 0x1a6   : > { %s1862_s4 = scalar_lea.sflag [#allocation4], %s1861_s29 }
 0x1a7   : > { %p2048_p1 = pnand %p2051_p0, %p2250_p8 }
 0x1a9   : > { %p2049_p2 = pneg %p2048_p1 }
 0x1ab   : > { %2153 = dma.done.wait (%p2049_p2), %s1862_s4, 16384  }
 0x1ac   : > { %2155 = vsyncadd (%p2049_p2), %s1862_s4, 4294950912  ;;  %s16_s17 = sadd.s32 1, %s2178_s17   ;;  %s2914_s12 = smov %s2162_s13 }
 0x1ad   : > { %p13_p3 = scmp.ge.s32.totalorder %s16_s17, 4   ;;  %s2915_s13 = smov %s2166_s14 }
 0x1ae   : > { %s2916_s14 = smov %s2256_s25  ;;  %s2917_s15 = smov %s2174_s16 }
 0x1af   : > { %s2918_s16 = smov %s2920_s20  ;;  %15 = sbr.rel (!%p13_p3) target bundleno = 4 (0x4), region = 81 }
 0x1b4   :  { %1867 = vsyncpa [#allocation4], 1 }
 0x1b5   :  { %1869 = vsyncpa [#allocation4 + $0x1], 1 }

</bundles_post_ra>
